<compile_context>
chip_gen: v6e
topology: v6e:2x2x1
jax: 0.10.0
libtpu: 0.0.40
codegen_flags: <defaults>
</compile_context>

<pallas_src>
import jax
import jax.numpy as jnp
from jax.experimental import pallas as pl
from jax.experimental.pallas import tpu as pltpu


# ----------------------------------------------------------------------------
# Static LeNet dimensions (fixed by the PyTorch module).
# ----------------------------------------------------------------------------
C1, H1, W1 = 3, 32, 32            # conv1 input (CIFAR-10)
K = 5                             # conv kernel size (both convs)
OC1, OH1 = 6, H1 - K + 1          # conv1: 6 channels, 28x28
C2, H2 = OC1, OH1 // 2            # conv2 input: 6 channels, 14x14
OC2, OH2 = 16, H2 - K + 1         # conv2: 16 channels, 10x10
PH2 = OH2 // 2                    # pooled conv2 spatial: 5x5
FC1, FC2, NCLS = 120, 84, 10
BLOCK_B = 8                       # images per grid step (multiple of 4 => B*32 % 128 == 0)


# ----------------------------------------------------------------------------
# Fused LeNet kernel: one grid step == BLOCK_B images, everything stays in VMEM.
# Column coordinate c in [0, B*32): image b = c // 32, within-image w = c % 32.
# Used columns never read across an image's 32-lane block (bounds checked in the
# derivation), so the seam columns may hold garbage and are simply ignored.
# ----------------------------------------------------------------------------
def _lenet_kernel(x_ref, w1_ref, b1_ref, w2_ref, b2_ref, w1fc_ref, bfc1_ref,
                  sel_ref, w2fc_ref, bfc2_ref, w3fc_ref, bfc3_ref, out_ref):
    f32 = jnp.float32
    bw = x_ref.shape[1]                          # BLOCK_B * 32 lanes
    l1, l2, l3 = bw - 4, bw - 13, bw - 31

    xb = x_ref[...]                              # (96, bw) bf16, rows=(c,h), cols=(b,w)

    # ---- conv1 + bias + ReLU: kh folded into banded weights, kw = lane-offset slice
    acc = jnp.dot(w1_ref[0], xb[:, 0:l1], preferred_element_type=f32)
    for kw in range(1, K):
        acc = acc + jnp.dot(w1_ref[kw], xb[:, kw:kw + l1], preferred_element_type=f32)
    a1 = jnp.maximum(acc + b1_ref[...], 0.0)                     # (168, l1)

    # ---- avg-pool1 along w: adjacent-column pre-sum (h-pool is folded into w2) ----
    s1 = (a1[:, 0:l1 - 1] + a1[:, 1:l1]).astype(jnp.bfloat16)    # (168, l1-1)

    # ---- conv2 + bias + ReLU: stride-2 lane offsets (pool1 w-downsample deferred) --
    acc = jnp.dot(w2_ref[0], s1[:, 0:l2], preferred_element_type=f32)
    for kw in range(1, K):
        acc = acc + jnp.dot(w2_ref[kw], s1[:, 2 * kw:2 * kw + l2],
                            preferred_element_type=f32)
    a2 = jnp.maximum(acc + b2_ref[...], 0.0)                     # (160, l2)

    # ---- avg-pool2 along w: columns 2 apart (valid conv2 outputs sit on even lanes)
    s2 = a2[:, 0:l2 - 2] + a2[:, 2:l2]                           # (160, l2-2) f32

    # ---- fc1: PyTorch flatten + pool2-h folded into 5 per-w weight slabs (f32) -----
    h = jnp.dot(w1fc_ref[0], s2[:, 0:l3], preferred_element_type=f32)
    for pw in range(1, PH2):
        h = h + jnp.dot(w1fc_ref[pw], s2[:, 4 * pw:4 * pw + l3],
                        preferred_element_type=f32)              # (120, l3)
    # Compact: one valid column per image (lane b*32) -> (120, B); then bias + ReLU.
    hc = jnp.maximum(jnp.dot(h, sel_ref[...], preferred_element_type=f32)
                     + bfc1_ref[...], 0.0)                       # (120, B)

    # ---- fc2 + ReLU, fc3 (f32, batched over the B lane columns) --------------------
    h2 = jnp.maximum(jnp.dot(w2fc_ref[...], hc, preferred_element_type=f32)
                     + bfc2_ref[...], 0.0)                       # (84, B)
    z = jnp.dot(w3fc_ref[...], h2, preferred_element_type=f32) + bfc3_ref[...]  # (10, B)
    out_ref[0] = z


# ----------------------------------------------------------------------------
# One-time weight preparation (hoisted out of the hot path).
# ----------------------------------------------------------------------------
def _banded_conv_matrix(w, in_h):
    """w: (OC,C,K,K) -> (K, OC*OH, C*in_h) with M[kw][(oc,oh),(c,h)] = w[oc,c,h-oh,kw]."""
    oc, c, ksz, _ = w.shape
    oh = in_h - ksz + 1
    d = jnp.arange(in_h)[None, :] - jnp.arange(oh)[:, None]          # (OH, in_h)
    valid = ((d >= 0) & (d < ksz)).astype(w.dtype)
    wg = jnp.take(w, jnp.clip(d, 0, ksz - 1), axis=2)                # (OC,C,OH,in_h,K)
    wg = wg * valid[None, None, :, :, None]
    return jnp.transpose(wg, (4, 0, 2, 1, 3)).reshape(ksz, oc * oh, c * in_h)


def prepare_lenet_constants(params, block_b=BLOCK_B):
    f32, bf16 = jnp.float32, jnp.bfloat16
    # conv1: banded over h, one (168, 96) slab per kw.
    m1 = _banded_conv_matrix(params["conv1_w"].astype(f32), H1).astype(bf16)   # (5,168,96)
    b1 = jnp.repeat(params["conv1_b"].astype(f32), OH1).reshape(OC1 * OH1, 1)
    # conv2: banded over the pooled h, with pool1's h-average (x0.25) folded in.
    m2h = _banded_conv_matrix(params["conv2_w"].astype(f32), H2)               # (5,160,84)
    hpool = (jnp.arange(OH1)[None, :] // 2
             == jnp.arange(H2)[:, None]).astype(f32)                           # (14,28)
    p_oh = 0.25 * jnp.kron(jnp.eye(C2, dtype=f32), hpool)                      # (84,168)
    m2 = jnp.matmul(m2h, p_oh).astype(bf16)                                    # (5,160,168)
    b2 = jnp.repeat(params["conv2_b"].astype(f32), OH2).reshape(OC2 * OH2, 1)
    # fc1: (c,h,w) flatten + pool2's h-average folded into 5 per-w-column slabs.
    wr = params["fc1_w"].astype(f32).reshape(FC1, OC2, PH2, PH2)               # (j,c,hp,wp)
    wg = jnp.take(wr, jnp.repeat(jnp.arange(PH2), 2), axis=2)                  # (j,c,10,wp)
    w1fc = 0.25 * jnp.transpose(wg, (3, 0, 1, 2)).reshape(PH2, FC1, OC2 * OH2)  # (5,120,160)
    bfc1 = params["fc1_b"].astype(f32).reshape(FC1, 1)
    # Per-block compaction matrix: pick lane b*32 of the fc1 accumulator for image b.
    l3 = 32 * block_b - 31
    sel = (jnp.arange(l3)[:, None] == 32 * jnp.arange(block_b)[None, :]).astype(f32)
    w2fc = params["fc2_w"].astype(f32)                                         # (84,120)
    bfc2 = params["fc2_b"].astype(f32).reshape(FC2, 1)
    w3fc = params["fc3_w"].astype(f32)                                         # (10,84)
    bfc3 = params["fc3_b"].astype(f32).reshape(NCLS, 1)
    return (m1, b1, m2, b2, w1fc, bfc1, sel, w2fc, bfc2, w3fc, bfc3)


# ----------------------------------------------------------------------------
# Forward pass: one fused pallas_call, grid over blocks of BLOCK_B images.
# ----------------------------------------------------------------------------
def lenet_forward(consts, x, block_b=BLOCK_B):
    assert block_b % 4 == 0, "block_b*32 must be a multiple of 128 lanes"
    n = x.shape[0]
    nb = -(-n // block_b)
    n_pad = nb * block_b
    xb = x.astype(jnp.bfloat16)                               # halve the input DMA
    if n_pad != n:
        xb = jnp.pad(xb, ((0, n_pad - n), (0, 0), (0, 0), (0, 0)))
    # (N,C,H,W) -> (C,H,N,W) -> (C*H, N*W): one 32-lane column block per image.
    x2 = jnp.transpose(xb, (1, 2, 0, 3)).reshape(C1 * H1, n_pad * W1)

    def const_spec(arr):
        rank = arr.ndim
        return pl.BlockSpec(arr.shape, lambda i, rank=rank: (0,) * rank)

    in_specs = [pl.BlockSpec((C1 * H1, block_b * W1), lambda i: (0, i))]
    in_specs += [const_spec(a) for a in consts]

    out = pl.pallas_call(
        _lenet_kernel,
        grid=(nb,),
        in_specs=in_specs,
        out_specs=pl.BlockSpec((1, NCLS, block_b), lambda i: (i, 0, 0)),
        out_shape=jax.ShapeDtypeStruct((nb, NCLS, block_b), jnp.float32),
        compiler_params=pltpu.CompilerParams(
            dimension_semantics=("parallel",)),               # megacore-shard the blocks
    )(x2, *consts)
    # (nb, 10, B) -> (N, 10): one cheap XLA transpose on 10*N floats.
    return jnp.transpose(out, (0, 2, 1)).reshape(n_pad, NCLS)[:n]


# ----------------------------------------------------------------------------
# Parameters (deterministic synthetic init) and a pure-JAX reference.
# ----------------------------------------------------------------------------
def init_lenet_params(key):
    ks = jax.random.split(key, 10)

    def uinit(k, shape, fan_in):
        bound = 1.0 / jnp.sqrt(float(fan_in))
        return jax.random.uniform(k, shape, jnp.float32, -bound, bound)

    return {
        "conv1_w": uinit(ks[0], (6, 3, 5, 5), 3 * 5 * 5),
        "conv1_b": uinit(ks[1], (6,), 3 * 5 * 5),
        "conv2_w": uinit(ks[2], (16, 6, 5, 5), 6 * 5 * 5),
        "conv2_b": uinit(ks[3], (16,), 6 * 5 * 5),
        "fc1_w": uinit(ks[4], (120, 16 * 5 * 5), 16 * 5 * 5),
        "fc1_b": uinit(ks[5], (120,), 16 * 5 * 5),
        "fc2_w": uinit(ks[6], (84, 120), 120),
        "fc2_b": uinit(ks[7], (84,), 120),
        "fc3_w": uinit(ks[8], (10, 84), 84),
        "fc3_b": uinit(ks[9], (10,), 84),
    }


def lenet_reference(params, x):
    hp = jax.lax.Precision.HIGHEST

    def conv(z, w, b):
        y = jax.lax.conv_general_dilated(
            z, w, window_strides=(1, 1), padding="VALID",
            dimension_numbers=("NCHW", "OIHW", "NCHW"), precision=hp)
        return jnp.maximum(y + b[None, :, None, None], 0.0)

    def pool(z):
        n_, c_, h_, w_ = z.shape
        return z.reshape(n_, c_, h_ // 2, 2, w_ // 2, 2).mean(axis=(3, 5))

    out = pool(conv(x, params["conv1_w"], params["conv1_b"]))
    out = pool(conv(out, params["conv2_w"], params["conv2_b"]))
    out = out.reshape(out.shape[0], -1)
    out = jnp.maximum(jnp.dot(out, params["fc1_w"].T, precision=hp) + params["fc1_b"], 0.0)
    out = jnp.maximum(jnp.dot(out, params["fc2_w"].T, precision=hp) + params["fc2_b"], 0.0)
    return jnp.dot(out, params["fc3_w"].T, precision=hp) + params["fc3_b"]


if __name__ == "__main__":
    key = jax.random.PRNGKey(0)
    pkey, xkey = jax.random.split(key)
    params = init_lenet_params(pkey)
    # LeNet's fc1 (16*5*5 inputs) implies a 3x32x32 (CIFAR-10) input.
    # batch=12: exercises both the batch-block padding path and a >1 grid.
    x = jax.random.normal(xkey, (12, 3, 32, 32), jnp.float32)

    consts = prepare_lenet_constants(params)          # one-time weight preparation
    logits = jax.jit(lenet_forward)(consts, x)
    jax.block_until_ready(logits)

    assert logits.shape == (12, 10), logits.shape
    ref = lenet_reference(params, x)
    assert jnp.allclose(logits, ref, atol=5e-3, rtol=3e-2), (
        float(jnp.max(jnp.abs(logits - ref))))
    print("KERNEL_OK")
</pallas_src>

<mosaic_0001>
module attributes {stable_mosaic.version = 11 : i64} {
  func.func @_lenet_kernel(%arg0: i32, %arg1: memref<96x256xbf16, #tpu.memory_space<vmem>>, %arg2: memref<5x168x96xbf16, #tpu.memory_space<vmem>>, %arg3: memref<168x1xf32, #tpu.memory_space<vmem>>, %arg4: memref<5x160x168xbf16, #tpu.memory_space<vmem>>, %arg5: memref<160x1xf32, #tpu.memory_space<vmem>>, %arg6: memref<5x120x160xf32, #tpu.memory_space<vmem>>, %arg7: memref<120x1xf32, #tpu.memory_space<vmem>>, %arg8: memref<225x8xf32, #tpu.memory_space<vmem>>, %arg9: memref<84x120xf32, #tpu.memory_space<vmem>>, %arg10: memref<84x1xf32, #tpu.memory_space<vmem>>, %arg11: memref<10x84xf32, #tpu.memory_space<vmem>>, %arg12: memref<10x1xf32, #tpu.memory_space<vmem>>, %arg13: memref<1x10x8xf32, #tpu.memory_space<vmem>>) attributes {dimension_semantics = [#tpu.dimension_semantics<parallel>], iteration_bounds = array<i64: 2>, scalar_prefetch = 0 : i64, scratch_operands = 0 : i64, tpu.core_type = #tpu.core_type<tc>, window_params = [{transform_indices = @transform_0, window_bounds = array<i64: 96, 256>}, {pipeline_mode = #tpu.pipeline_mode<synchronous>, transform_indices = @transform_1, window_bounds = array<i64: 5, 168, 96>}, {pipeline_mode = #tpu.pipeline_mode<synchronous>, transform_indices = @transform_2, window_bounds = array<i64: 168, 1>}, {pipeline_mode = #tpu.pipeline_mode<synchronous>, transform_indices = @transform_3, window_bounds = array<i64: 5, 160, 168>}, {pipeline_mode = #tpu.pipeline_mode<synchronous>, transform_indices = @transform_4, window_bounds = array<i64: 160, 1>}, {pipeline_mode = #tpu.pipeline_mode<synchronous>, transform_indices = @transform_5, window_bounds = array<i64: 5, 120, 160>}, {pipeline_mode = #tpu.pipeline_mode<synchronous>, transform_indices = @transform_6, window_bounds = array<i64: 120, 1>}, {pipeline_mode = #tpu.pipeline_mode<synchronous>, transform_indices = @transform_7, window_bounds = array<i64: 225, 8>}, {pipeline_mode = #tpu.pipeline_mode<synchronous>, transform_indices = @transform_8, window_bounds = array<i64: 84, 120>}, {pipeline_mode = #tpu.pipeline_mode<synchronous>, transform_indices = @transform_9, window_bounds = array<i64: 84, 1>}, {pipeline_mode = #tpu.pipeline_mode<synchronous>, transform_indices = @transform_10, window_bounds = array<i64: 10, 84>}, {pipeline_mode = #tpu.pipeline_mode<synchronous>, transform_indices = @transform_11, window_bounds = array<i64: 10, 1>}, {transform_indices = @transform_12, window_bounds = array<i64: 1, 10, 8>}]} {
    %c0 = arith.constant 0 : index
    %c0_0 = arith.constant 0 : index
    %0 = vector.load %arg1[%c0, %c0_0] : memref<96x256xbf16, #tpu.memory_space<vmem>>, vector<96x256xbf16>
    %c0_1 = arith.constant 0 : index
    %c0_2 = arith.constant 0 : index
    %c0_3 = arith.constant 0 : index
    %1 = vector.load %arg2[%c0_1, %c0_2, %c0_3] : memref<5x168x96xbf16, #tpu.memory_space<vmem>>, vector<1x168x96xbf16>
    %2 = vector.shape_cast %1 : vector<1x168x96xbf16> to vector<168x96xbf16>
    %3 = vector.extract_strided_slice %0 {offsets = [0, 0], sizes = [96, 252], strides = [1, 1]} : vector<96x256xbf16> to vector<96x252xbf16>
    %cst = arith.constant dense<0.000000e+00> : vector<168x252xf32>
    %4 = tpu.matmul %2, %3, %cst {dimension_numbers = #tpu.dot_dimension_numbers<[1], [0], [0], [1], [0, 0, 1, 1], [], []>} : vector<168x96xbf16>, vector<96x252xbf16>, vector<168x252xf32> -> vector<168x252xf32>
    %c1 = arith.constant 1 : index
    %c0_4 = arith.constant 0 : index
    %c0_5 = arith.constant 0 : index
    %5 = vector.load %arg2[%c1, %c0_4, %c0_5] : memref<5x168x96xbf16, #tpu.memory_space<vmem>>, vector<1x168x96xbf16>
    %6 = vector.shape_cast %5 : vector<1x168x96xbf16> to vector<168x96xbf16>
    %7 = vector.extract_strided_slice %0 {offsets = [0, 1], sizes = [96, 252], strides = [1, 1]} : vector<96x256xbf16> to vector<96x252xbf16>
    %cst_6 = arith.constant dense<0.000000e+00> : vector<168x252xf32>
    %8 = tpu.matmul %6, %7, %cst_6 {dimension_numbers = #tpu.dot_dimension_numbers<[1], [0], [0], [1], [0, 0, 1, 1], [], []>} : vector<168x96xbf16>, vector<96x252xbf16>, vector<168x252xf32> -> vector<168x252xf32>
    %9 = arith.addf %4, %8 : vector<168x252xf32>
    %c2 = arith.constant 2 : index
    %c0_7 = arith.constant 0 : index
    %c0_8 = arith.constant 0 : index
    %10 = vector.load %arg2[%c2, %c0_7, %c0_8] : memref<5x168x96xbf16, #tpu.memory_space<vmem>>, vector<1x168x96xbf16>
    %11 = vector.shape_cast %10 : vector<1x168x96xbf16> to vector<168x96xbf16>
    %12 = vector.extract_strided_slice %0 {offsets = [0, 2], sizes = [96, 252], strides = [1, 1]} : vector<96x256xbf16> to vector<96x252xbf16>
    %cst_9 = arith.constant dense<0.000000e+00> : vector<168x252xf32>
    %13 = tpu.matmul %11, %12, %cst_9 {dimension_numbers = #tpu.dot_dimension_numbers<[1], [0], [0], [1], [0, 0, 1, 1], [], []>} : vector<168x96xbf16>, vector<96x252xbf16>, vector<168x252xf32> -> vector<168x252xf32>
    %14 = arith.addf %9, %13 : vector<168x252xf32>
    %c3 = arith.constant 3 : index
    %c0_10 = arith.constant 0 : index
    %c0_11 = arith.constant 0 : index
    %15 = vector.load %arg2[%c3, %c0_10, %c0_11] : memref<5x168x96xbf16, #tpu.memory_space<vmem>>, vector<1x168x96xbf16>
    %16 = vector.shape_cast %15 : vector<1x168x96xbf16> to vector<168x96xbf16>
    %17 = vector.extract_strided_slice %0 {offsets = [0, 3], sizes = [96, 252], strides = [1, 1]} : vector<96x256xbf16> to vector<96x252xbf16>
    %cst_12 = arith.constant dense<0.000000e+00> : vector<168x252xf32>
    %18 = tpu.matmul %16, %17, %cst_12 {dimension_numbers = #tpu.dot_dimension_numbers<[1], [0], [0], [1], [0, 0, 1, 1], [], []>} : vector<168x96xbf16>, vector<96x252xbf16>, vector<168x252xf32> -> vector<168x252xf32>
    %19 = arith.addf %14, %18 : vector<168x252xf32>
    %c4 = arith.constant 4 : index
    %c0_13 = arith.constant 0 : index
    %c0_14 = arith.constant 0 : index
    %20 = vector.load %arg2[%c4, %c0_13, %c0_14] : memref<5x168x96xbf16, #tpu.memory_space<vmem>>, vector<1x168x96xbf16>
    %21 = vector.shape_cast %20 : vector<1x168x96xbf16> to vector<168x96xbf16>
    %22 = vector.extract_strided_slice %0 {offsets = [0, 4], sizes = [96, 252], strides = [1, 1]} : vector<96x256xbf16> to vector<96x252xbf16>
    %cst_15 = arith.constant dense<0.000000e+00> : vector<168x252xf32>
    %23 = tpu.matmul %21, %22, %cst_15 {dimension_numbers = #tpu.dot_dimension_numbers<[1], [0], [0], [1], [0, 0, 1, 1], [], []>} : vector<168x96xbf16>, vector<96x252xbf16>, vector<168x252xf32> -> vector<168x252xf32>
    %24 = arith.addf %19, %23 : vector<168x252xf32>
    %c0_16 = arith.constant 0 : index
    %c0_17 = arith.constant 0 : index
    %25 = vector.load %arg3[%c0_16, %c0_17] : memref<168x1xf32, #tpu.memory_space<vmem>>, vector<168x1xf32>
    %26 = vector.broadcast %25 : vector<168x1xf32> to vector<168x252xf32>
    %27 = arith.addf %24, %26 : vector<168x252xf32>
    %cst_18 = arith.constant 0.000000e+00 : f32
    %28 = vector.broadcast %cst_18 : f32 to vector<168x252xf32>
    %29 = arith.maximumf %27, %28 : vector<168x252xf32>
    %30 = vector.extract_strided_slice %29 {offsets = [0, 0], sizes = [168, 251], strides = [1, 1]} : vector<168x252xf32> to vector<168x251xf32>
    %31 = vector.extract_strided_slice %29 {offsets = [0, 1], sizes = [168, 251], strides = [1, 1]} : vector<168x252xf32> to vector<168x251xf32>
    %32 = arith.addf %30, %31 : vector<168x251xf32>
    %33 = arith.truncf %32 : vector<168x251xf32> to vector<168x251xbf16>
    %c0_19 = arith.constant 0 : index
    %c0_20 = arith.constant 0 : index
    %c0_21 = arith.constant 0 : index
    %34 = vector.load %arg4[%c0_19, %c0_20, %c0_21] : memref<5x160x168xbf16, #tpu.memory_space<vmem>>, vector<1x160x168xbf16>
    %35 = vector.shape_cast %34 : vector<1x160x168xbf16> to vector<160x168xbf16>
    %36 = vector.extract_strided_slice %33 {offsets = [0, 0], sizes = [168, 243], strides = [1, 1]} : vector<168x251xbf16> to vector<168x243xbf16>
    %cst_22 = arith.constant dense<0.000000e+00> : vector<160x243xf32>
    %37 = tpu.matmul %35, %36, %cst_22 {dimension_numbers = #tpu.dot_dimension_numbers<[1], [0], [0], [1], [0, 0, 1, 1], [], []>} : vector<160x168xbf16>, vector<168x243xbf16>, vector<160x243xf32> -> vector<160x243xf32>
    %c1_23 = arith.constant 1 : index
    %c0_24 = arith.constant 0 : index
    %c0_25 = arith.constant 0 : index
    %38 = vector.load %arg4[%c1_23, %c0_24, %c0_25] : memref<5x160x168xbf16, #tpu.memory_space<vmem>>, vector<1x160x168xbf16>
    %39 = vector.shape_cast %38 : vector<1x160x168xbf16> to vector<160x168xbf16>
    %40 = vector.extract_strided_slice %33 {offsets = [0, 2], sizes = [168, 243], strides = [1, 1]} : vector<168x251xbf16> to vector<168x243xbf16>
    %cst_26 = arith.constant dense<0.000000e+00> : vector<160x243xf32>
    %41 = tpu.matmul %39, %40, %cst_26 {dimension_numbers = #tpu.dot_dimension_numbers<[1], [0], [0], [1], [0, 0, 1, 1], [], []>} : vector<160x168xbf16>, vector<168x243xbf16>, vector<160x243xf32> -> vector<160x243xf32>
    %42 = arith.addf %37, %41 : vector<160x243xf32>
    %c2_27 = arith.constant 2 : index
    %c0_28 = arith.constant 0 : index
    %c0_29 = arith.constant 0 : index
    %43 = vector.load %arg4[%c2_27, %c0_28, %c0_29] : memref<5x160x168xbf16, #tpu.memory_space<vmem>>, vector<1x160x168xbf16>
    %44 = vector.shape_cast %43 : vector<1x160x168xbf16> to vector<160x168xbf16>
    %45 = vector.extract_strided_slice %33 {offsets = [0, 4], sizes = [168, 243], strides = [1, 1]} : vector<168x251xbf16> to vector<168x243xbf16>
    %cst_30 = arith.constant dense<0.000000e+00> : vector<160x243xf32>
    %46 = tpu.matmul %44, %45, %cst_30 {dimension_numbers = #tpu.dot_dimension_numbers<[1], [0], [0], [1], [0, 0, 1, 1], [], []>} : vector<160x168xbf16>, vector<168x243xbf16>, vector<160x243xf32> -> vector<160x243xf32>
    %47 = arith.addf %42, %46 : vector<160x243xf32>
    %c3_31 = arith.constant 3 : index
    %c0_32 = arith.constant 0 : index
    %c0_33 = arith.constant 0 : index
    %48 = vector.load %arg4[%c3_31, %c0_32, %c0_33] : memref<5x160x168xbf16, #tpu.memory_space<vmem>>, vector<1x160x168xbf16>
    %49 = vector.shape_cast %48 : vector<1x160x168xbf16> to vector<160x168xbf16>
    %50 = vector.extract_strided_slice %33 {offsets = [0, 6], sizes = [168, 243], strides = [1, 1]} : vector<168x251xbf16> to vector<168x243xbf16>
    %cst_34 = arith.constant dense<0.000000e+00> : vector<160x243xf32>
    %51 = tpu.matmul %49, %50, %cst_34 {dimension_numbers = #tpu.dot_dimension_numbers<[1], [0], [0], [1], [0, 0, 1, 1], [], []>} : vector<160x168xbf16>, vector<168x243xbf16>, vector<160x243xf32> -> vector<160x243xf32>
    %52 = arith.addf %47, %51 : vector<160x243xf32>
    %c4_35 = arith.constant 4 : index
    %c0_36 = arith.constant 0 : index
    %c0_37 = arith.constant 0 : index
    %53 = vector.load %arg4[%c4_35, %c0_36, %c0_37] : memref<5x160x168xbf16, #tpu.memory_space<vmem>>, vector<1x160x168xbf16>
    %54 = vector.shape_cast %53 : vector<1x160x168xbf16> to vector<160x168xbf16>
    %55 = vector.extract_strided_slice %33 {offsets = [0, 8], sizes = [168, 243], strides = [1, 1]} : vector<168x251xbf16> to vector<168x243xbf16>
    %cst_38 = arith.constant dense<0.000000e+00> : vector<160x243xf32>
    %56 = tpu.matmul %54, %55, %cst_38 {dimension_numbers = #tpu.dot_dimension_numbers<[1], [0], [0], [1], [0, 0, 1, 1], [], []>} : vector<160x168xbf16>, vector<168x243xbf16>, vector<160x243xf32> -> vector<160x243xf32>
    %57 = arith.addf %52, %56 : vector<160x243xf32>
    %c0_39 = arith.constant 0 : index
    %c0_40 = arith.constant 0 : index
    %58 = vector.load %arg5[%c0_39, %c0_40] : memref<160x1xf32, #tpu.memory_space<vmem>>, vector<160x1xf32>
    %59 = vector.broadcast %58 : vector<160x1xf32> to vector<160x243xf32>
    %60 = arith.addf %57, %59 : vector<160x243xf32>
    %cst_41 = arith.constant 0.000000e+00 : f32
    %61 = vector.broadcast %cst_41 : f32 to vector<160x243xf32>
    %62 = arith.maximumf %60, %61 : vector<160x243xf32>
    %63 = vector.extract_strided_slice %62 {offsets = [0, 0], sizes = [160, 241], strides = [1, 1]} : vector<160x243xf32> to vector<160x241xf32>
    %64 = vector.extract_strided_slice %62 {offsets = [0, 2], sizes = [160, 241], strides = [1, 1]} : vector<160x243xf32> to vector<160x241xf32>
    %65 = arith.addf %63, %64 : vector<160x241xf32>
    %c0_42 = arith.constant 0 : index
    %c0_43 = arith.constant 0 : index
    %c0_44 = arith.constant 0 : index
    %66 = vector.load %arg6[%c0_42, %c0_43, %c0_44] : memref<5x120x160xf32, #tpu.memory_space<vmem>>, vector<1x120x160xf32>
    %67 = vector.shape_cast %66 : vector<1x120x160xf32> to vector<120x160xf32>
    %68 = vector.extract_strided_slice %65 {offsets = [0, 0], sizes = [160, 225], strides = [1, 1]} : vector<160x241xf32> to vector<160x225xf32>
    %cst_45 = arith.constant dense<0.000000e+00> : vector<120x225xf32>
    %69 = tpu.matmul %67, %68, %cst_45 {dimension_numbers = #tpu.dot_dimension_numbers<[1], [0], [0], [1], [0, 0, 1, 1], [], []>} : vector<120x160xf32>, vector<160x225xf32>, vector<120x225xf32> -> vector<120x225xf32>
    %c1_46 = arith.constant 1 : index
    %c0_47 = arith.constant 0 : index
    %c0_48 = arith.constant 0 : index
    %70 = vector.load %arg6[%c1_46, %c0_47, %c0_48] : memref<5x120x160xf32, #tpu.memory_space<vmem>>, vector<1x120x160xf32>
    %71 = vector.shape_cast %70 : vector<1x120x160xf32> to vector<120x160xf32>
    %72 = vector.extract_strided_slice %65 {offsets = [0, 4], sizes = [160, 225], strides = [1, 1]} : vector<160x241xf32> to vector<160x225xf32>
    %cst_49 = arith.constant dense<0.000000e+00> : vector<120x225xf32>
    %73 = tpu.matmul %71, %72, %cst_49 {dimension_numbers = #tpu.dot_dimension_numbers<[1], [0], [0], [1], [0, 0, 1, 1], [], []>} : vector<120x160xf32>, vector<160x225xf32>, vector<120x225xf32> -> vector<120x225xf32>
    %74 = arith.addf %69, %73 : vector<120x225xf32>
    %c2_50 = arith.constant 2 : index
    %c0_51 = arith.constant 0 : index
    %c0_52 = arith.constant 0 : index
    %75 = vector.load %arg6[%c2_50, %c0_51, %c0_52] : memref<5x120x160xf32, #tpu.memory_space<vmem>>, vector<1x120x160xf32>
    %76 = vector.shape_cast %75 : vector<1x120x160xf32> to vector<120x160xf32>
    %77 = vector.extract_strided_slice %65 {offsets = [0, 8], sizes = [160, 225], strides = [1, 1]} : vector<160x241xf32> to vector<160x225xf32>
    %cst_53 = arith.constant dense<0.000000e+00> : vector<120x225xf32>
    %78 = tpu.matmul %76, %77, %cst_53 {dimension_numbers = #tpu.dot_dimension_numbers<[1], [0], [0], [1], [0, 0, 1, 1], [], []>} : vector<120x160xf32>, vector<160x225xf32>, vector<120x225xf32> -> vector<120x225xf32>
    %79 = arith.addf %74, %78 : vector<120x225xf32>
    %c3_54 = arith.constant 3 : index
    %c0_55 = arith.constant 0 : index
    %c0_56 = arith.constant 0 : index
    %80 = vector.load %arg6[%c3_54, %c0_55, %c0_56] : memref<5x120x160xf32, #tpu.memory_space<vmem>>, vector<1x120x160xf32>
    %81 = vector.shape_cast %80 : vector<1x120x160xf32> to vector<120x160xf32>
    %82 = vector.extract_strided_slice %65 {offsets = [0, 12], sizes = [160, 225], strides = [1, 1]} : vector<160x241xf32> to vector<160x225xf32>
    %cst_57 = arith.constant dense<0.000000e+00> : vector<120x225xf32>
    %83 = tpu.matmul %81, %82, %cst_57 {dimension_numbers = #tpu.dot_dimension_numbers<[1], [0], [0], [1], [0, 0, 1, 1], [], []>} : vector<120x160xf32>, vector<160x225xf32>, vector<120x225xf32> -> vector<120x225xf32>
    %84 = arith.addf %79, %83 : vector<120x225xf32>
    %c4_58 = arith.constant 4 : index
    %c0_59 = arith.constant 0 : index
    %c0_60 = arith.constant 0 : index
    %85 = vector.load %arg6[%c4_58, %c0_59, %c0_60] : memref<5x120x160xf32, #tpu.memory_space<vmem>>, vector<1x120x160xf32>
    %86 = vector.shape_cast %85 : vector<1x120x160xf32> to vector<120x160xf32>
    %87 = vector.extract_strided_slice %65 {offsets = [0, 16], sizes = [160, 225], strides = [1, 1]} : vector<160x241xf32> to vector<160x225xf32>
    %cst_61 = arith.constant dense<0.000000e+00> : vector<120x225xf32>
    %88 = tpu.matmul %86, %87, %cst_61 {dimension_numbers = #tpu.dot_dimension_numbers<[1], [0], [0], [1], [0, 0, 1, 1], [], []>} : vector<120x160xf32>, vector<160x225xf32>, vector<120x225xf32> -> vector<120x225xf32>
    %89 = arith.addf %84, %88 : vector<120x225xf32>
    %c0_62 = arith.constant 0 : index
    %c0_63 = arith.constant 0 : index
    %90 = vector.load %arg8[%c0_62, %c0_63] : memref<225x8xf32, #tpu.memory_space<vmem>>, vector<225x8xf32>
    %cst_64 = arith.constant dense<0.000000e+00> : vector<120x8xf32>
    %91 = tpu.matmul %89, %90, %cst_64 {dimension_numbers = #tpu.dot_dimension_numbers<[1], [0], [0], [1], [0, 0, 1, 1], [], []>} : vector<120x225xf32>, vector<225x8xf32>, vector<120x8xf32> -> vector<120x8xf32>
    %c0_65 = arith.constant 0 : index
    %c0_66 = arith.constant 0 : index
    %92 = vector.load %arg7[%c0_65, %c0_66] : memref<120x1xf32, #tpu.memory_space<vmem>>, vector<120x1xf32>
    %93 = vector.broadcast %92 : vector<120x1xf32> to vector<120x8xf32>
    %94 = arith.addf %91, %93 : vector<120x8xf32>
    %cst_67 = arith.constant 0.000000e+00 : f32
    %95 = vector.broadcast %cst_67 : f32 to vector<120x8xf32>
    %96 = arith.maximumf %94, %95 : vector<120x8xf32>
    %c0_68 = arith.constant 0 : index
    %c0_69 = arith.constant 0 : index
    %97 = vector.load %arg9[%c0_68, %c0_69] : memref<84x120xf32, #tpu.memory_space<vmem>>, vector<84x120xf32>
    %cst_70 = arith.constant dense<0.000000e+00> : vector<84x8xf32>
    %98 = tpu.matmul %97, %96, %cst_70 {dimension_numbers = #tpu.dot_dimension_numbers<[1], [0], [0], [1], [0, 0, 1, 1], [], []>} : vector<84x120xf32>, vector<120x8xf32>, vector<84x8xf32> -> vector<84x8xf32>
    %c0_71 = arith.constant 0 : index
    %c0_72 = arith.constant 0 : index
    %99 = vector.load %arg10[%c0_71, %c0_72] : memref<84x1xf32, #tpu.memory_space<vmem>>, vector<84x1xf32>
    %100 = vector.broadcast %99 : vector<84x1xf32> to vector<84x8xf32>
    %101 = arith.addf %98, %100 : vector<84x8xf32>
    %cst_73 = arith.constant 0.000000e+00 : f32
    %102 = vector.broadcast %cst_73 : f32 to vector<84x8xf32>
    %103 = arith.maximumf %101, %102 : vector<84x8xf32>
    %c0_74 = arith.constant 0 : index
    %c0_75 = arith.constant 0 : index
    %104 = vector.load %arg11[%c0_74, %c0_75] : memref<10x84xf32, #tpu.memory_space<vmem>>, vector<10x84xf32>
    %cst_76 = arith.constant dense<0.000000e+00> : vector<10x8xf32>
    %105 = tpu.matmul %104, %103, %cst_76 {dimension_numbers = #tpu.dot_dimension_numbers<[1], [0], [0], [1], [0, 0, 1, 1], [], []>} : vector<10x84xf32>, vector<84x8xf32>, vector<10x8xf32> -> vector<10x8xf32>
    %c0_77 = arith.constant 0 : index
    %c0_78 = arith.constant 0 : index
    %106 = vector.load %arg12[%c0_77, %c0_78] : memref<10x1xf32, #tpu.memory_space<vmem>>, vector<10x1xf32>
    %107 = vector.broadcast %106 : vector<10x1xf32> to vector<10x8xf32>
    %108 = arith.addf %105, %107 : vector<10x8xf32>
    %c0_79 = arith.constant 0 : index
    %c0_80 = arith.constant 0 : index
    %c0_81 = arith.constant 0 : index
    %109 = vector.load %arg13[%c0_79, %c0_80, %c0_81] : memref<1x10x8xf32, #tpu.memory_space<vmem>>, vector<1x10x8xf32>
    %110 = vector.shape_cast %109 : vector<1x10x8xf32> to vector<10x8xf32>
    %111 = vector.shape_cast %108 : vector<10x8xf32> to vector<1x10x8xf32>
    tpu.vector_store %arg13[%c0_79, %c0_80, %c0_81], %111 {strides = array<i32>} : memref<1x10x8xf32, #tpu.memory_space<vmem>>, vector<1x10x8xf32>,
    return
  }
  func.func @transform_0(%arg0: i32) -> (i32, i32) {
    %c0_i32 = arith.constant 0 : i32
    %c0_i32_0 = arith.constant 0 : i32
    return %c0_i32, %arg0 : i32, i32
  }
  func.func @transform_1(%arg0: i32) -> (i32, i32, i32) {
    %c0_i32 = arith.constant 0 : i32
    %c0_i32_0 = arith.constant 0 : i32
    %c0_i32_1 = arith.constant 0 : i32
    %c0_i32_2 = arith.constant 0 : i32
    return %c0_i32, %c0_i32_0, %c0_i32_1 : i32, i32, i32
  }
  func.func @transform_2(%arg0: i32) -> (i32, i32) {
    %c0_i32 = arith.constant 0 : i32
    %c0_i32_0 = arith.constant 0 : i32
    %c0_i32_1 = arith.constant 0 : i32
    return %c0_i32, %c0_i32_0 : i32, i32
  }
  func.func @transform_3(%arg0: i32) -> (i32, i32, i32) {
    %c0_i32 = arith.constant 0 : i32
    %c0_i32_0 = arith.constant 0 : i32
    %c0_i32_1 = arith.constant 0 : i32
    %c0_i32_2 = arith.constant 0 : i32
    return %c0_i32, %c0_i32_0, %c0_i32_1 : i32, i32, i32
  }
  func.func @transform_4(%arg0: i32) -> (i32, i32) {
    %c0_i32 = arith.constant 0 : i32
    %c0_i32_0 = arith.constant 0 : i32
    %c0_i32_1 = arith.constant 0 : i32
    return %c0_i32, %c0_i32_0 : i32, i32
  }
  func.func @transform_5(%arg0: i32) -> (i32, i32, i32) {
    %c0_i32 = arith.constant 0 : i32
    %c0_i32_0 = arith.constant 0 : i32
    %c0_i32_1 = arith.constant 0 : i32
    %c0_i32_2 = arith.constant 0 : i32
    return %c0_i32, %c0_i32_0, %c0_i32_1 : i32, i32, i32
  }
  func.func @transform_6(%arg0: i32) -> (i32, i32) {
    %c0_i32 = arith.constant 0 : i32
    %c0_i32_0 = arith.constant 0 : i32
    %c0_i32_1 = arith.constant 0 : i32
    return %c0_i32, %c0_i32_0 : i32, i32
  }
  func.func @transform_7(%arg0: i32) -> (i32, i32) {
    %c0_i32 = arith.constant 0 : i32
    %c0_i32_0 = arith.constant 0 : i32
    %c0_i32_1 = arith.constant 0 : i32
    return %c0_i32, %c0_i32_0 : i32, i32
  }
  func.func @transform_8(%arg0: i32) -> (i32, i32) {
    %c0_i32 = arith.constant 0 : i32
    %c0_i32_0 = arith.constant 0 : i32
    %c0_i32_1 = arith.constant 0 : i32
    return %c0_i32, %c0_i32_0 : i32, i32
  }
  func.func @transform_9(%arg0: i32) -> (i32, i32) {
    %c0_i32 = arith.constant 0 : i32
    %c0_i32_0 = arith.constant 0 : i32
    %c0_i32_1 = arith.constant 0 : i32
    return %c0_i32, %c0_i32_0 : i32, i32
  }
  func.func @transform_10(%arg0: i32) -> (i32, i32) {
    %c0_i32 = arith.constant 0 : i32
    %c0_i32_0 = arith.constant 0 : i32
    %c0_i32_1 = arith.constant 0 : i32
    return %c0_i32, %c0_i32_0 : i32, i32
  }
  func.func @transform_11(%arg0: i32) -> (i32, i32) {
    %c0_i32 = arith.constant 0 : i32
    %c0_i32_0 = arith.constant 0 : i32
    %c0_i32_1 = arith.constant 0 : i32
    return %c0_i32, %c0_i32_0 : i32, i32
  }
  func.func @transform_12(%arg0: i32) -> (i32, i32, i32) {
    %c0_i32 = arith.constant 0 : i32
    %c0_i32_0 = arith.constant 0 : i32
    %c0_i32_1 = arith.constant 0 : i32
    return %arg0, %c0_i32, %c0_i32_0 : i32, i32, i32
  }
}

</mosaic_0001>

<bundles_post_ra>
// kernel: lenet_forward.1
= control target key start
LH: loop header
LB: loop body
LE: loop exit
PB: predicated region body
PF: predicated region fallthrough
CT: control target
= control target key end

     0   :  { %s8587_s21 = smov 0   ;;  %s8589_s22 = smov 0   ;;  %s13547_s0 = inlined_call_operand.vmem [shape: bf16[96,512], index: 0, kind: input, shape index: {}]   ;;  %s13548_s1 = inlined_call_operand.vmem [shape: bf16[5,168,96], index: 1, kind: input, shape index: {}]   ;;  %s13549_s2 = inlined_call_operand.vmem [shape: f32[168,1], index: 2, kind: input, shape index: {}]   ;;  %s13550_s3 = inlined_call_operand.vmem [shape: bf16[5,160,168], index: 3, kind: input, shape index: {}]   ;;  %s13551_s4 = inlined_call_operand.vmem [shape: f32[160,1], index: 4, kind: input, shape index: {}]   ;;  %s13552_s5 = inlined_call_operand.vmem [shape: f32[5,120,160], index: 5, kind: input, shape index: {}]   ;;  %s13553_s6 = inlined_call_operand.vmem [shape: f32[120,1], index: 6, kind: input, shape index: {}]   ;;  %s13554_s7 = inlined_call_operand.vmem [shape: f32[225,8], index: 7, kind: input, shape index: {}]   ;;  %s13555_s8 = inlined_call_operand.vmem [shape: f32[84,120], index: 8, kind: input, shape index: {}]   ;;  %s13556_s9 = inlined_call_operand.vmem [shape: f32[84,1], index: 9, kind: input, shape index: {}]   ;;  %s13557_s10 = inlined_call_operand.vmem [shape: f32[10,84], index: 10, kind: input, shape index: {}]   ;;  %s13558_s11 = inlined_call_operand.vmem [shape: f32[10,1], index: 11, kind: input, shape index: {}]   ;;  %s13559_s12 = inlined_call_operand.vmem [shape: f32[2,10,8], index: 12, kind: output, shape index: {}]  }
   0x1   :  { %s8591_s23 = smov 0  }
   0x2 LB: > { %s7419_s24 = sadd.s32 4294967295, %s8509_s23   ;;  %s8604_s25 = sadd.s32 1, %s8509_s23   ;;  %s8509_s23 = sphi %s8591_s23, %s14173_s23   ;;  %s8505_s22 = sphi %s8589_s22, %s14172_s22   ;;  %s8501_s21 = sphi %s8587_s21, %s14171_s21  }
   0x3   : > { %s26_s26 = ssub.s32 %s8509_s23, %s8604_s25  ;;  %s29_s27 = sadd.s32 1, %s8505_s22 }
   0x4   : > { %p27_p0 = scmp.eq.s32.totalorder %s26_s26, 0  ;;  %p36_p1 = scmp.ne.s32.totalorder %s8505_s22, %s8501_s21 }
   0x5   : > { %p37_p2 = scmp.eq.s32.totalorder %s8509_s23, 0  ;;  %p7422_p4 = scmp.ge.s32.totalorder %s8509_s23, 2 }
   0x6   : > { %s8613_s28 = scalar_select %p27_p0, %s8505_s22, %s29_s27  }
   0x7   : > { %p38_p3 = por %p37_p2, %p36_p1  ;;  %352 = sbr.rel (%p7422_p4) target bundleno = 22 (0x16), region = 60 }
   0xc   : > { %355 = sbr.rel (!%p38_p3) target bundleno = 22 (0x16), region = 64  ;;  %s357_s29 = sand.u32 (%p38_p3), 1, %s8505_s22  }
   0xd   : > { %s8096_s30 = sshll.u32 (%p38_p3), %s8509_s23, 3  ;;  %s8225_s13 = smul.u32 (%p38_p3), 96, %s357_s29 }
   0xe   : > { %s362_s16 = scalar_lea.vmem (%p38_p3), %s13547_s0, %s8096_s30 }
   0xf   : > { %v413_v0 = vld [vmem:[%s362_s16] sm:$0xff] (%p38_p3)  ;;  %v415_v1 = vld [vmem:[%s362_s16 + $0x10] sm:$0xff] (%p38_p3)  ;;  %s359_s17 = scalar_lea.vmem (%p38_p3), [#allocation2], %s8225_s13 }
  0x10   : > { %v417_v2 = vld [vmem:[%s362_s16 + $0x20] sm:$0xff] (%p38_p3)  ;;  %v419_v3 = vld [vmem:[%s362_s16 + $0x30] sm:$0xff] (%p38_p3)  ;;  %414 = vst [vmem:[%s359_s17] sm:$0xff] (%p38_p3), %v413_v0  ;;  %416 = vst [vmem:[%s359_s17 + $0x8] sm:$0xff] (%p38_p3), %v415_v1 }
  0x11   : > { %v421_v4 = vld [vmem:[%s362_s16 + $0x40] sm:$0xff]  ;;  %v423_v5 = vld [vmem:[%s362_s16 + $0x50] sm:$0xff]  ;;  %418 = vst [vmem:[%s359_s17 + $0x10] sm:$0xff] %v417_v2  ;;  %420 = vst [vmem:[%s359_s17 + $0x18] sm:$0xff] %v419_v3 }
  0x12   : > { %422 = vst [vmem:[%s359_s17 + $0x20] sm:$0xff] %v421_v4  ;;  %424 = vst [vmem:[%s359_s17 + $0x28] sm:$0xff] %v423_v5  ;;  %v425_v6 = vld [vmem:[%s362_s16 + $0x60] sm:$0xff]  ;;  %v427_v7 = vld [vmem:[%s362_s16 + $0x70] sm:$0xff] }
  0x13   : > { %v429_v8 = vld [vmem:[%s362_s16 + $0x80] sm:$0xff]  ;;  %426 = vst [vmem:[%s359_s17 + $0x30] sm:$0xff] %v425_v6  ;;  %428 = vst [vmem:[%s359_s17 + $0x38] sm:$0xff] %v427_v7  ;;  %v431_v9 = vld [vmem:[%s362_s16 + $0x90] sm:$0xff] }
  0x14   : > { %430 = vst [vmem:[%s359_s17 + $0x40] sm:$0xff] %v429_v8  ;;  %v433_v10 = vld [vmem:[%s362_s16 + $0xa0] sm:$0xff]  ;;  %v435_v11 = vld [vmem:[%s362_s16 + $0xb0] sm:$0xff]  ;;  %432 = vst [vmem:[%s359_s17 + $0x48] sm:$0xff] %v431_v9 }
  0x15   : > { %434 = vst [vmem:[%s359_s17 + $0x50] sm:$0xff] %v433_v10  ;;  %436 = vst [vmem:[%s359_s17 + $0x58] sm:$0xff] %v435_v11 }
  0x16 PF: > { %p7425_p5 = scmp.ge.s32.totalorder %s8509_s23, 1  ;;  %p441_p6 = scmp.lt.s32.totalorder %s8509_s23, 3 }
  0x18   : > { %p442_p7 = pnand %p7425_p5, %p441_p6 }
  0x1a   : > { %445 = sbr.rel (%p442_p7) target bundleno = 2750 (0xabe), region = 102 }
  0x1f   : > { %s448_s18 = sand.u32 1, %s8501_s21   ;;  %s8511_s26 = smov 127   ;;  %v8512_v22 = vmov 0   ;;  %vm695_vm0 = vcmask 785408   ;;  %v8283_v25 = vld [vmem:[%s13548_s1] sm:$0xff]   ;;  %v8285_v26 = vld [vmem:[%s13548_s1 + $0x8] sm:$0xff]  }
  0x20   : > { %s8226_s19 = smul.u32 96, %s448_s18  ;;  %761 = vmatprep.mubr.bf16.mxu0 %v8512_v22  ;;  %1000 = vmatprep.mubr.bf16.mxu1 %v8512_v22  ;;  %s8513_s29 = smov 126   ;;  %v8287_v27 = vld [vmem:[%s13548_s1 + $0x10] sm:$0xff]   ;;  %v8289_v28 = vld [vmem:[%s13548_s1 + $0x18] sm:$0xff]   ;;  %v8291_v29 = vld [vmem:[%s13548_s1 + $0x20] sm:$0xff]   ;;  %vm676_vm1 = vcmask 1039360  }
  0x21   : > { %8263 = vset.pattern.permute.xlu1 %v8512_v22  ;;  %8262 = vset.pattern.permute.xlu0 %v8512_v22  ;;  %s8514_s18 = smov 125   ;;  %v8293_v30 = vld [vmem:[%s13548_s1 + $0x28] sm:$0xff]   ;;  %v8295_v31 = vld [vmem:[%s13548_s1 + $0x30] sm:$0xff]   ;;  %v8297_v32 = vld [vmem:[%s13548_s1 + $0x38] sm:$0xff]   ;;  %vm1208_vm2 = vcmask 1031168   ;;  %vm1542_vm3 = vcmask 1022976  }
  0x22   : > { %s8624_s20 = scalar_lea.vmem [#allocation2], %s8226_s19  ;;  %s8515_s19 = smov 124   ;;  %v8299_v33 = vld [vmem:[%s13548_s1 + $0x40] sm:$0xff]   ;;  %v8301_v34 = vld [vmem:[%s13548_s1 + $0x48] sm:$0xff]   ;;  %v8303_v35 = vld [vmem:[%s13548_s1 + $0x50] ss:$0 sps:$4 sm:$0xff]  }
  0x23   : > { %v8627_v12 = vld [vmem:[%s8624_s20 + $0x50] ss:$8 sps:$4 sm:$0xff]   ;;  %v8630_v13 = vld [vmem:[%s8624_s20 + $0x40] ss:$8 sps:$4 sm:$0xff]   ;;  %v8635_v14 = vld [vmem:[%s8624_s20 + $0x54] ss:$8 sps:$4 sm:$0xff]  }
  0x24   : > { %672 = vrot.lane.b32.xlu0 %v8627_v12, %s8511_s26  ;;  %668 = vrot.lane.b32.xlu1 %v8630_v13, %s8511_s26  ;;  %v8640_v15 = vld [vmem:[%s8624_s20 + $0x44] ss:$8 sps:$4 sm:$0xff]   ;;  %v8647_v16 = vld [vmem:[%s8624_s20 + $0x30] ss:$8 sps:$4 sm:$0xff]   ;;  %vm1876_vm4 = vcmask 1014784   ;;  %vm2803_vm5 = vcmask 326656  }
  0x25   : > { %972 = vmatprep.subr.bf16.mxu1 %v8635_v14  ;;  %v8653_v17 = vld [vmem:[%s8624_s20 + $0x34] ss:$8 sps:$4 sm:$0xff]   ;;  %v8656_v18 = vld [vmem:[%s8624_s20 + $0x20] ss:$8 sps:$4 sm:$0xff]   ;;  %v8659_v19 = vld [vmem:[%s8624_s20 + $0x24] ss:$8 sps:$4 sm:$0xff]  }
  0x26   : > { %973 = vmatpush1.bf16.msra.mxu1 %v8627_v12  ;;  %v8668_v20 = vld [vmem:[%s8624_s20 + $0x14] ss:$8 sps:$4 sm:$0xff]   ;;  %v8674_v21 = vld [vmem:[%s8624_s20 + $0x10] ss:$8 sps:$4 sm:$0xff]   ;;  %v8683_v23 = vld [vmem:[%s8624_s20 + $0x4] ss:$8 sps:$4 sm:$0xff]  }
  0x27   : > { %974 = vmatprep.subr.bf16.mxu1 %v8640_v15  ;;  %v8690_v24 = vld [vmem:[%s8624_s20] ss:$8 sps:$4 sm:$0xff]   ;;  %v8282_v55 = vld [vmem:[%s13548_s1 + $0x54] sm:$0xff]   ;;  %s8516_s16 = smov 122   ;;  %s8517_s17 = smov 120   ;;  %vm2834_vm6 = vcmask 1043456  }
  0x28   : > { %674 = vrot.lane.b32.xlu0 %v8635_v14, %s8511_s26  ;;  %670 = vrot.lane.b32.xlu1 %v8640_v15, %s8511_s26  ;;  %v8284_v62 = vld [vmem:[%s13548_s1 + $0x5c] sm:$0xff]   ;;  %v8286_v5 = vld [vmem:[%s13548_s1 + $0x64] sm:$0xff]   ;;  %vm4179_vm7 = vcmask 982016   ;;  %vm3783_vm8 = vcmask 998400   ;;  %s8519_s13 = smov 112   ;;  %vm5083_vm9 = vcmask 261120  }
  0x29   : > { %vm5997_vm10 = vcmask 949248   ;;  %vm6399_vm11 = vcmask 916480   ;;  %vm6855_vm12 = vcmask 1040384   ;;  %vm6809_vm13 = vcmask 793600   ;;  %p490_p8 = scmp.lt.s32.totalorder %s7419_s24, 1 }
  0x2a   : > { %975 = vmatpush1.bf16.msra.mxu1 %v8630_v13  ;;  %vm8521_vm14 = vmmov 0   ;;  %vm7269_vm15 = vcmask 687104  }
  0x2b   : > { %976 = vmatprep.subr.bf16.mxu1 %v8653_v17  ;;  %s14175_s24 = smov (!%p490_p8, %s7419_s24), 1 }
  0x2c   : > { %664 = vrot.lane.b32.xlu0 %v8647_v16, %s8511_s26  ;;  %666 = vrot.lane.b32.xlu1 %v8653_v17, %s8511_s26  ;;  %s8097_s20 = sshll.u32 %s14175_s24, 4 }
  0x2e   : > { %977 = vmatpush1.bf16.msra.mxu1 %v8647_v16 }
  0x2f   : > { %978 = vmatprep.subr.bf16.mxu1 %v8659_v19 }
  0x30   : > { %660 = vrot.lane.b32.xlu0 %v8656_v18, %s8511_s26  ;;  %662 = vrot.lane.b32.xlu1 %v8659_v19, %s8511_s26 }
  0x32   : > { %979 = vmatpush1.bf16.msra.mxu1 %v8656_v18 }
  0x33   : > { %980 = vmatprep.subr.bf16.mxu1 %v8668_v20 }
  0x34   : > { %656 = vrot.lane.b32.xlu0 %v8674_v21, %s8511_s26  ;;  %658 = vrot.lane.b32.xlu1 %v8668_v20, %s8511_s26 }
  0x36   : > { %981 = vmatpush1.bf16.msra.mxu1 %v8674_v21 }
  0x37   : > { %982 = vmatprep.subr.bf16.mxu1 %v8683_v23 }
  0x38   : > { %652 = vrot.lane.b32.xlu0 %v8690_v24, %s8511_s26  ;;  %654 = vrot.lane.b32.xlu1 %v8683_v23, %s8511_s26 }
  0x3a   : > { %983 = vmatpush1.bf16.msra.mxu1 %v8690_v24 }
  0x3c   : > { %1204 = vrot.lane.b32.xlu0 %v8627_v12, %s8513_s29  ;;  %1206 = vrot.lane.b32.xlu1 %v8635_v14, %s8513_s29 }
  0x3d   : > { %7494 = vmatmul.mubr.msk.bf16.vlgmr.msra.gmra.mxu1 %vm695_vm0, %v8283_v25  ;;  %v8292_v25 = vld [vmem:[%s13548_s1 + $0x7c] sm:$0xff]  }
  0x3e   : > { %1010 = vmatprep.mubr.bf16.mxu1 %v8512_v22 }
  0x40   : > { %1200 = vrot.lane.b32.xlu0 %v8630_v13, %s8513_s29  ;;  %1202 = vrot.lane.b32.xlu1 %v8640_v15, %s8513_s29 }
  0x44   : > { %1196 = vrot.lane.b32.xlu0 %v8647_v16, %s8513_s29  ;;  %1198 = vrot.lane.b32.xlu1 %v8653_v17, %s8513_s29 }
  0x45   : > { %7495 = vmatmul.mubr.msk.bf16.gmra.mxu1 %vm695_vm0, %v8285_v26 }
  0x46   : > { %1020 = vmatprep.mubr.bf16.mxu1 %v8512_v22 }
  0x48   : > { %1192 = vrot.lane.b32.xlu0 %v8656_v18, %s8513_s29  ;;  %1194 = vrot.lane.b32.xlu1 %v8659_v19, %s8513_s29 }
  0x4c   : > { %1188 = vrot.lane.b32.xlu0 %v8674_v21, %s8513_s29  ;;  %1190 = vrot.lane.b32.xlu1 %v8668_v20, %s8513_s29 }
  0x4d   : > { %7496 = vmatmul.mubr.msk.bf16.gmra.mxu1 %vm695_vm0, %v8287_v27 }
  0x4e   : > { %1030 = vmatprep.mubr.bf16.mxu1 %v8512_v22 }
  0x50   : > { %1184 = vrot.lane.b32.xlu0 %v8690_v24, %s8513_s29  ;;  %1186 = vrot.lane.b32.xlu1 %v8683_v23, %s8513_s29 }
  0x54   : > { %1538 = vrot.lane.b32.xlu0 %v8627_v12, %s8514_s18  ;;  %1540 = vrot.lane.b32.xlu1 %v8635_v14, %s8514_s18 }
  0x55   : > { %7497 = vmatmul.mubr.msk.bf16.gmra.mxu1 %vm695_vm0, %v8289_v28 }
  0x56   : > { %1040 = vmatprep.mubr.bf16.mxu1 %v8512_v22 }
  0x58   : > { %1872 = vrot.lane.b32.xlu0 %v8627_v12, %s8515_s19  ;;  %1874 = vrot.lane.b32.xlu1 %v8635_v14, %s8515_s19  ;;  %v8288_v12 = vld [vmem:[%s13548_s1 + $0x6c] sm:$0xff]  }
  0x5c   : > { %1534 = vrot.lane.b32.xlu0 %v8630_v13, %s8514_s18  ;;  %1536 = vrot.lane.b32.xlu1 %v8640_v15, %s8514_s18 }
  0x5d   : > { %7498 = vmatmul.mubr.msk.bf16.gmra.mxu1 %vm695_vm0, %v8291_v29 }
  0x5e   : > { %1050 = vmatprep.mubr.bf16.mxu1 %v8512_v22 }
  0x60   : > { %1868 = vrot.lane.b32.xlu0 %v8630_v13, %s8515_s19  ;;  %1870 = vrot.lane.b32.xlu1 %v8640_v15, %s8515_s19 }
  0x64   : > { %1530 = vrot.lane.b32.xlu0 %v8647_v16, %s8514_s18  ;;  %1532 = vrot.lane.b32.xlu1 %v8653_v17, %s8514_s18 }
  0x65   : > { %7499 = vmatmul.mubr.msk.bf16.gmra.mxu1 %vm695_vm0, %v8293_v30 }
  0x66   : > { %1060 = vmatprep.mubr.bf16.mxu1 %v8512_v22 }
  0x68   : > { %1864 = vrot.lane.b32.xlu0 %v8647_v16, %s8515_s19  ;;  %1866 = vrot.lane.b32.xlu1 %v8653_v17, %s8515_s19 }
  0x6c   : > { %1526 = vrot.lane.b32.xlu0 %v8656_v18, %s8514_s18  ;;  %1528 = vrot.lane.b32.xlu1 %v8659_v19, %s8514_s18 }
  0x6d   : > { %7500 = vmatmul.mubr.msk.bf16.gmra.mxu1 %vm695_vm0, %v8295_v31  ;;  %v8294_v31 = vld [vmem:[%s13548_s1 + $0x84] sm:$0xff]  }
  0x6e   : > { %1070 = vmatprep.mubr.bf16.mxu1 %v8512_v22 }
  0x70   : > { %1860 = vrot.lane.b32.xlu0 %v8656_v18, %s8515_s19  ;;  %1862 = vrot.lane.b32.xlu1 %v8659_v19, %s8515_s19  ;;  %v8290_v18 = vld [vmem:[%s13548_s1 + $0x74] sm:$0xff]  }
  0x74   : > { %1522 = vrot.lane.b32.xlu0 %v8674_v21, %s8514_s18  ;;  %1524 = vrot.lane.b32.xlu1 %v8668_v20, %s8514_s18 }
  0x75   : > { %7501 = vmatmul.mubr.msk.bf16.gmra.mxu1 %vm695_vm0, %v8297_v32 }
  0x76   : > { %1080 = vmatprep.mubr.bf16.mxu1 %v8512_v22 }
  0x78   : > { %1856 = vrot.lane.b32.xlu0 %v8674_v21, %s8515_s19  ;;  %1858 = vrot.lane.b32.xlu1 %v8668_v20, %s8515_s19 }
  0x7c   : > { %1518 = vrot.lane.b32.xlu0 %v8690_v24, %s8514_s18  ;;  %1520 = vrot.lane.b32.xlu1 %v8683_v23, %s8514_s18 }
  0x7d   : > { %7502 = vmatmul.mubr.msk.bf16.gmra.mxu1 %vm695_vm0, %v8299_v33 }
  0x7e   : > { %1090 = vmatprep.mubr.bf16.mxu1 %v8512_v22 }
  0x80   : > { %1852 = vrot.lane.b32.xlu0 %v8690_v24, %s8515_s19  ;;  %1854 = vrot.lane.b32.xlu1 %v8683_v23, %s8515_s19 }
  0x85   : > { %7503 = vmatmul.mubr.msk.bf16.gmra.mxu1 %vm695_vm0, %v8301_v34 }
  0x86   : > { %1100 = vmatprep.mubr.bf16.mxu1 %v8512_v22 }
  0x8d   : > { %7504 = vmatmul.mubr.msk.bf16.gmra.mxu1 %vm695_vm0, %v8303_v35 }
  0x8e   : > { %1626 = vmatprep.mubr.bf16.mxu1 %v8512_v22 }
  0x96   : > { %v673_v36 = vpop.permute.xlu0 %672  ;;  %v669_v37 = vpop.permute.xlu1 %668 }
  0x9a   : > { %v675_v38 = vpop.permute.xlu0 %674  ;;  %v671_v39 = vpop.permute.xlu1 %670 }
  0x9b   : > { %733 = vmatprep.subr.bf16.mxu0 %v675_v38  ;;  %v682_v40 = vsel %vm676_vm1, %v673_v36, %v675_v38  ;;  %v681_v42 = vsel %vm676_vm1, %v669_v37, %v671_v39  ;;  %v8296_v37 = vld [vmem:[%s13548_s1 + $0x8c] sm:$0xff]  }
  0x9c   : > { %734 = vmatpush1.bf16.msra.mxu0 %v682_v40 }
  0x9d   : > { %735 = vmatprep.subr.bf16.mxu0 %v671_v39 }
  0x9e   : > { %v665_v41 = vpop.permute.xlu0 %664  ;;  %v667_v43 = vpop.permute.xlu1 %666 }
  0x9f   : > { %v680_v44 = vsel %vm676_vm1, %v665_v41, %v667_v43 }
  0xa0   : > { %736 = vmatpush1.bf16.msra.mxu0 %v681_v42 }
  0xa1   : > { %737 = vmatprep.subr.bf16.mxu0 %v667_v43  ;;  %v8298_v43 = vld [vmem:[%s13548_s1 + $0x94] sm:$0xff]  }
  0xa2   : > { %v661_v45 = vpop.permute.xlu0 %660  ;;  %v663_v46 = vpop.permute.xlu1 %662 }
  0xa3   : > { %v679_v47 = vsel %vm676_vm1, %v661_v45, %v663_v46 }
  0xa4   : > { %738 = vmatpush1.bf16.msra.mxu0 %v680_v44 }
  0xa5   : > { %739 = vmatprep.subr.bf16.mxu0 %v663_v46  ;;  %v8305_v46 = vld [vmem:[%s13548_s1 + $0xfc] sm:$0xff]  }
  0xa6   : > { %v657_v48 = vpop.permute.xlu0 %656  ;;  %v659_v49 = vpop.permute.xlu1 %658 }
  0xa7   : > { %v678_v50 = vsel %vm676_vm1, %v657_v48, %v659_v49  ;;  %v8307_v48 = vld [vmem:[%s13548_s1 + $0x104] sm:$0xff]  }
  0xa8   : > { %740 = vmatpush1.bf16.msra.mxu0 %v679_v47  ;;  %v8300_v47 = vld [vmem:[%s13548_s1 + $0x9c] sm:$0xff]  }
  0xa9   : > { %741 = vmatprep.subr.bf16.mxu0 %v659_v49 }
  0xaa   : > { %v653_v51 = vpop.permute.xlu0 %652  ;;  %v655_v52 = vpop.permute.xlu1 %654 }
  0xab   : > { %v677_v53 = vsel %vm676_vm1, %v653_v51, %v655_v52  ;;  %v8309_v51 = vld [vmem:[%s13548_s1 + $0x10c] sm:$0xff]  }
  0xac   : > { %742 = vmatpush1.bf16.msra.mxu0 %v678_v50  ;;  %v8302_v50 = vld [vmem:[%s13548_s1 + $0xa4] ss:$0 sps:$4 sm:$0xff]  }
  0xad   : > { %743 = vmatprep.subr.bf16.mxu0 %v655_v52 }
  0xae   : > { %v1205_v54 = vpop.permute.xlu0 %1204  ;;  %v1207_v56 = vpop.permute.xlu1 %1206 }
  0xaf   : > { %v1214_v57 = vsel %vm1208_vm2, %v1205_v54, %v1207_v56 }
  0xb0   : > { %744 = vmatpush1.bf16.msra.mxu0 %v677_v53 }
  0xb1   : > { %1264 = vmatprep.subr.bf16.mxu0 %v1207_v56 }
  0xb2   : > { %v1201_v58 = vpop.permute.xlu0 %1200  ;;  %v1203_v59 = vpop.permute.xlu1 %1202 }
  0xb3   : > { %7472 = vmatmul.mubr.msk.bf16.vlgmr.msra.gmra.mxu0 %vm695_vm0, %v8282_v55  ;;  %v1213_v60 = vsel %vm1208_vm2, %v1201_v58, %v1203_v59  ;;  %v2126_v55 = vld [vmem:[%s13549_s2 + $0x78] sm:$0xff] }
  0xb4   : > { %771 = vmatprep.mubr.bf16.mxu0 %v8512_v22  ;;  %1265 = vmatpush1.bf16.msra.mxu0 %v1214_v57  ;;  %v8304_v57 = vld [vmem:[%s13548_s1 + $0xa8] sm:$0xff]   ;;  %v8311_v58 = vld [vmem:[%s13548_s1 + $0x114] sm:$0xff]  }
  0xb5   : > { %1266 = vmatprep.subr.bf16.mxu0 %v1203_v59  ;;  %2209 = vperm.xlu1 %8263, %v2126_v55   ;;  %v8321_v55 = vld [vmem:[%s13548_s1 + $0x13c] sm:$0xff]  }
  0xb6   : > { %v1197_v61 = vpop.permute.xlu0 %1196  ;;  %v1199_v63 = vpop.permute.xlu1 %1198 }
  0xb7   : > { %v1212_v0 = vsel %vm1208_vm2, %v1197_v61, %v1199_v63 }
  0xb8   : > { %1267 = vmatpush1.bf16.msra.mxu0 %v1213_v60  ;;  %v2123_v60 = vld [vmem:[%s13549_s2 + $0x60] sm:$0xff] }
  0xb9   : > { %1268 = vmatprep.subr.bf16.mxu0 %v1199_v63  ;;  %2194 = vperm.xlu1 %8263, %v2123_v60  }
  0xba   : > { %v1193_v1 = vpop.permute.xlu0 %1192  ;;  %v1195_v2 = vpop.permute.xlu1 %1194 }
  0xbb   : > { %7473 = vmatmul.mubr.msk.bf16.gmra.mxu0 %vm695_vm0, %v8284_v62  ;;  %v1211_v3 = vsel %vm1208_vm2, %v1193_v1, %v1195_v2 }
  0xbc   : > { %781 = vmatprep.mubr.bf16.mxu0 %v8512_v22  ;;  %1269 = vmatpush1.bf16.msra.mxu0 %v1212_v0  ;;  %v2121_v0 = vld [vmem:[%s13549_s2 + $0x50] sm:$0xff] }
  0xbd   : > { %1270 = vmatprep.subr.bf16.mxu0 %v1195_v2  ;;  %2184 = vperm.xlu1 %8263, %v2121_v0  }
  0xbe   : > { %v1189_v4 = vpop.permute.xlu0 %1188  ;;  %v1191_v6 = vpop.permute.xlu1 %1190 }
  0xbf   : > { %v1210_v7 = vsel %vm1208_vm2, %v1189_v4, %v1191_v6  ;;  %v8313_v4 = vld [vmem:[%s13548_s1 + $0x11c] sm:$0xff]  }
  0xc0   : > { %1271 = vmatpush1.bf16.msra.mxu0 %v1211_v3  ;;  %v8306_v3 = vld [vmem:[%s13548_s1 + $0xb0] sm:$0xff]  }
  0xc1   : > { %1272 = vmatprep.subr.bf16.mxu0 %v1191_v6  ;;  %v2119_v6 = vld [vmem:[%s13549_s2 + $0x40] sm:$0xff] }
  0xc2   : > { %v1185_v8 = vpop.permute.xlu0 %1184  ;;  %v1187_v9 = vpop.permute.xlu1 %1186  ;;  %2174 = vperm.xlu1 %8263, %v2119_v6   ;;  %v2127_v6 = vld [vmem:[%s13549_s2 + $0x80] sm:$0xff] }
  0xc3   : > { %7474 = vmatmul.mubr.msk.bf16.gmra.mxu0 %vm695_vm0, %v8286_v5  ;;  %v1209_v10 = vsel %vm1208_vm2, %v1185_v8, %v1187_v9 }
  0xc4   : > { %791 = vmatprep.mubr.bf16.mxu0 %v8512_v22  ;;  %1273 = vmatpush1.bf16.msra.mxu0 %v1210_v7 }
  0xc5   : > { %1274 = vmatprep.subr.bf16.mxu0 %v1187_v9  ;;  %v2125_v9 = vld [vmem:[%s13549_s2 + $0x70] sm:$0xff] }
  0xc6   : > { %v1539_v11 = vpop.permute.xlu0 %1538  ;;  %v1541_v13 = vpop.permute.xlu1 %1540  ;;  %2204 = vperm.xlu0 %8262, %v2125_v9  }
  0xc7   : > { %v1548_v14 = vsel %vm1542_vm3, %v1539_v11, %v1541_v13  ;;  %1598 = vmatprep.subr.bf16.mxu1 %v1541_v13  ;;  %v2117_v11 = vld [vmem:[%s13549_s2 + $0x30] sm:$0xff] }
  0xc8   : > { %1275 = vmatpush1.bf16.msra.mxu0 %v1209_v10  ;;  %1599 = vmatpush1.bf16.msra.mxu1 %v1548_v14  ;;  %v2124_v14 = vld [vmem:[%s13549_s2 + $0x68] sm:$0xff] }
  0xc9   : > { %2164 = vperm.xlu1 %8263, %v2117_v11  }
  0xca   : > { %v8860_v15 = vpop.permute.xlu0 %1872  ;;  %v8863_v16 = vpop.permute.xlu1 %1874  ;;  %2199 = vperm.xlu0 %8262, %v2124_v14   ;;  %v8325_v14 = vld [vmem:[%s13548_s1 + $0x14c] ss:$0 sps:$4 sm:$0xff]  }
  0xcb   : > { %7475 = vmatmul.mubr.msk.bf16.gmra.mxu0 %vm695_vm0, %v8288_v12  ;;  %1932 = vmatprep.subr.bf16.mxu0 %v8863_v16  ;;  %v1882_v61 = vsel %vm1876_vm4, %v8860_v15, %v8863_v16  ;;  %v8308_v15 = vld [vmem:[%s13548_s1 + $0xb8] sm:$0xff]   ;;  %v8315_v16 = vld [vmem:[%s13548_s1 + $0x124] sm:$0xff]  }
  0xcc   : > { %801 = vmatprep.mubr.bf16.mxu0 %v8512_v22 }
  0xce   : > { %v1535_v17 = vpop.permute.xlu0 %1534  ;;  %v1537_v19 = vpop.permute.xlu1 %1536 }
  0xcf   : > { %v1547_v20 = vsel %vm1542_vm3, %v1535_v17, %v1537_v19  ;;  %1600 = vmatprep.subr.bf16.mxu1 %v1537_v19 }
  0xd0   : > { %1601 = vmatpush1.bf16.msra.mxu1 %v1547_v20 }
  0xd2   : > { %v8871_v21 = vpop.permute.xlu0 %1868  ;;  %v8874_v23 = vpop.permute.xlu1 %1870 }
  0xd3   : > { %7476 = vmatmul.mubr.msk.bf16.gmra.mxu0 %vm695_vm0, %v8290_v18  ;;  %v1881_v1 = vsel %vm1876_vm4, %v8871_v21, %v8874_v23  ;;  %v2115_v18 = vld [vmem:[%s13549_s2 + $0x20] sm:$0xff]  ;;  %v2122_v21 = vld [vmem:[%s13549_s2 + $0x58] sm:$0xff] }
  0xd4   : > { %811 = vmatprep.mubr.bf16.mxu0 %v8512_v22  ;;  %2154 = vperm.xlu1 %8263, %v2115_v18  }
  0xd5   : > { %2189 = vperm.xlu0 %8262, %v2122_v21   ;;  %v8320_v21 = vld [vmem:[%s13548_s1 + $0xe8] sm:$0xff]  }
  0xd6   : > { %v1531_v24 = vpop.permute.xlu0 %1530  ;;  %v1533_v26 = vpop.permute.xlu1 %1532 }
  0xd7   : > { %v1546_v27 = vsel %vm1542_vm3, %v1531_v24, %v1533_v26  ;;  %1602 = vmatprep.subr.bf16.mxu1 %v1533_v26  ;;  %v2113_v26 = vld [vmem:[%s13549_s2 + $0x10] sm:$0xff] }
  0xd8   : > { %1603 = vmatpush1.bf16.msra.mxu1 %v1546_v27  ;;  %2144 = vperm.xlu1 %8263, %v2113_v26  }
  0xda   : > { %v8881_v28 = vpop.permute.xlu0 %1864  ;;  %v8884_v29 = vpop.permute.xlu1 %1866 }
  0xdb   : > { %7477 = vmatmul.mubr.msk.bf16.gmra.mxu0 %vm695_vm0, %v8292_v25  ;;  %v1880_v7 = vsel %vm1876_vm4, %v8881_v28, %v8884_v29 }
  0xdc   : > { %821 = vmatprep.mubr.bf16.mxu0 %v8512_v22 }
  0xde   : > { %v1527_v30 = vpop.permute.xlu0 %1526  ;;  %v1529_v32 = vpop.permute.xlu1 %1528 }
  0xdf   : > { %v1545_v33 = vsel %vm1542_vm3, %v1527_v30, %v1529_v32  ;;  %1604 = vmatprep.subr.bf16.mxu1 %v1529_v32  ;;  %v8310_v30 = vld [vmem:[%s13548_s1 + $0xc0] sm:$0xff]  }
  0xe0   : > { %1605 = vmatpush1.bf16.msra.mxu1 %v1545_v33  ;;  %v2111_v33 = vld [vmem:[%s13549_s2] sm:$0xff] }
  0xe1   : > { %2134 = vperm.xlu1 %8263, %v2111_v33  }
  0xe2   : > { %v8891_v34 = vpop.permute.xlu0 %1860  ;;  %v8894_v35 = vpop.permute.xlu1 %1862 }
  0xe3   : > { %7478 = vmatmul.mubr.msk.bf16.gmra.mxu0 %vm695_vm0, %v8294_v31  ;;  %v1879_v12 = vsel %vm1876_vm4, %v8891_v34, %v8894_v35  ;;  %v8317_v31 = vld [vmem:[%s13548_s1 + $0x12c] sm:$0xff]  }
  0xe4   : > { %831 = vmatprep.mubr.bf16.mxu0 %v8512_v22 }
  0xe6   : > { %v1523_v36 = vpop.permute.xlu0 %1522  ;;  %v1525_v38 = vpop.permute.xlu1 %1524 }
  0xe7   : > { %v1544_v39 = vsel %vm1542_vm3, %v1523_v36, %v1525_v38  ;;  %1606 = vmatprep.subr.bf16.mxu1 %v1525_v38 }
  0xe8   : > { %1607 = vmatpush1.bf16.msra.mxu1 %v1544_v39  ;;  %v2116_v39 = vld [vmem:[%s13549_s2 + $0x28] sm:$0xff] }
  0xea   : > { %v8901_v40 = vpop.permute.xlu0 %1856  ;;  %v8904_v41 = vpop.permute.xlu1 %1858 }
  0xeb   : > { %7479 = vmatmul.mubr.msk.bf16.gmra.mxu0 %vm695_vm0, %v8296_v37  ;;  %v1878_v19 = vsel %vm1876_vm4, %v8901_v40, %v8904_v41  ;;  %v2131_v37 = vld [vmem:[%s13549_s2 + $0xa0] sm:$0xff]  ;;  %v8312_v40 = vld [vmem:[%s13548_s1 + $0xc8] sm:$0xff]  }
  0xec   : > { %841 = vmatprep.mubr.bf16.mxu0 %v8512_v22  ;;  %2234 = vperm.xlu1 %8263, %v2131_v37   ;;  %v8326_v37 = vld [vmem:[%s13548_s1 + $0x150] sm:$0xff]  }
  0xee   : > { %v1519_v42 = vpop.permute.xlu0 %1518  ;;  %v1521_v44 = vpop.permute.xlu1 %1520 }
  0xef   : > { %v1543_v45 = vsel %vm1542_vm3, %v1519_v42, %v1521_v44  ;;  %1608 = vmatprep.subr.bf16.mxu1 %v1521_v44 }
  0xf0   : > { %1609 = vmatpush1.bf16.msra.mxu1 %v1543_v45  ;;  %v2114_v45 = vld [vmem:[%s13549_s2 + $0x18] sm:$0xff] }
  0xf2   : > { %v1853_v24 = vpop.permute.xlu0 %1852 }
  0xf3   : > { %7480 = vmatmul.mubr.msk.bf16.gmra.mxu0 %vm695_vm0, %v8298_v43  ;;  %7580 = vmatmul.mubr.msk.bf16.vlgmr.msra.gmra.mxu1 %vm695_vm0, %v8305_v46  ;;  %v2130_v43 = vld [vmem:[%s13549_s2 + $0x98] sm:$0xff] }
  0xf4   : > { %851 = vmatprep.mubr.bf16.mxu0 %v8512_v22  ;;  %1636 = vmatprep.mubr.bf16.mxu1 %v8512_v22 }
  0xf5   : > { %2229 = vperm.xlu1 %8263, %v2130_v43  }
  0xfb   : > { %7481 = vmatmul.mubr.msk.bf16.gmra.mxu0 %vm695_vm0, %v8300_v47  ;;  %7581 = vmatmul.mubr.msk.bf16.gmra.mxu1 %vm695_vm0, %v8307_v48  ;;  %v2128_v47 = vld [vmem:[%s13549_s2 + $0x88] sm:$0xff] }
  0xfc   : > { %861 = vmatprep.mubr.bf16.mxu0 %v8512_v22  ;;  %1646 = vmatprep.mubr.bf16.mxu1 %v8512_v22 }
  0xfd   : > { %v8928_v49 = vpop.f32.mrf.mxu1  ;;  %2219 = vperm.xlu1 %8263, %v2128_v47   ;;  %v8329_v47 = vld [vmem:[%s13548_s1 + $0x168] sm:$0xff]  }
  0xff   : > { %v8936_v52 = vpop.f32.mrf.mxu1 }
 0x101   : > { %v8938_v53 = vpop.f32.mrf.mxu1 }
 0x103   : > { %7482 = vmatmul.mubr.msk.bf16.gmra.mxu0 %vm695_vm0, %v8302_v50  ;;  %7582 = vmatmul.mubr.msk.bf16.gmra.mxu1 %vm695_vm0, %v8309_v51  ;;  %v8943_v54 = vpop.f32.mrf.mxu1  ;;  %v2112_v50 = vld [vmem:[%s13549_s2 + $0x8] sm:$0xff]  ;;  %v8314_v51 = vld [vmem:[%s13548_s1 + $0xd0] sm:$0xff]  }
 0x104   : > { %1292 = vmatprep.mubr.bf16.mxu0 %v8512_v22  ;;  %13680 = vst [vmem:[#allocation3_spill] sm:$0xff] %v8943_v54  ;;  %1656 = vmatprep.mubr.bf16.mxu1 %v8512_v22 }
 0x105   : > { %v8949_v56 = vpop.f32.mrf.mxu1 }
 0x107   : > { %v8957_v59 = vpop.f32.mrf.mxu1 }
 0x109   : > { %v8965_v62 = vpop.f32.mrf.mxu1 }
 0x10b   : > { %7537 = vmatmul.mubr.msk.bf16.vlgmr.msra.gmra.mxu0 %vm695_vm0, %v8304_v57  ;;  %7583 = vmatmul.mubr.msk.bf16.gmra.mxu1 %vm695_vm0, %v8311_v58  ;;  %v8970_v63 = vpop.f32.mrf.mxu1 }
 0x10c   : > { %1302 = vmatprep.mubr.bf16.mxu0 %v8512_v22  ;;  %13681 = vst [vmem:[#allocation4_spill] sm:$0xff] %v8970_v63  ;;  %1666 = vmatprep.mubr.bf16.mxu1 %v8512_v22 }
 0x10d   : > { %1933 = vmatpush1.bf16.msra.mxu0 %v1882_v61  ;;  %v8980_v2 = vpop.f32.mrf.mxu1  ;;  %v2129_v61 = vld [vmem:[%s13549_s2 + $0x90] sm:$0xff] }
 0x10e   : > { %1934 = vmatprep.subr.bf16.mxu0 %v8874_v23  ;;  %v1855_v23 = vpop.permute.xlu1 %1854 }
 0x10f   : > { %v8988_v5 = vpop.f32.mrf.mxu1  ;;  %v1877_v27 = vsel %vm1876_vm4, %v1853_v24, %v1855_v23 }
 0x111   : > { %1935 = vmatpush1.bf16.msra.mxu0 %v1881_v1  ;;  %v8997_v8 = vpop.f32.mrf.mxu1  ;;  %v8316_v1 = vld [vmem:[%s13548_s1 + $0xd8] sm:$0xff]  }
 0x112   : > { %1936 = vmatprep.subr.bf16.mxu0 %v8884_v29  ;;  %v2120_v29 = vld [vmem:[%s13549_s2 + $0x48] sm:$0xff] }
 0x113   : > { %7538 = vmatmul.mubr.msk.bf16.gmra.mxu0 %vm695_vm0, %v8306_v3  ;;  %7584 = vmatmul.mubr.msk.bf16.gmra.mxu1 %vm695_vm0, %v8313_v4  ;;  %v9005_v10 = vpop.f32.mrf.mxu1  ;;  %v8323_v3 = vld [vmem:[%s13548_s1 + $0x144] sm:$0xff]  }
 0x114   : > { %1312 = vmatprep.mubr.bf16.mxu0 %v8512_v22  ;;  %13682 = vst [vmem:[#allocation5_spill] sm:$0xff] %v9005_v10  ;;  %1676 = vmatprep.mubr.bf16.mxu1 %v8512_v22  ;;  %v8335_v10 = vld [vmem:[%s13548_s1 + $0x198] sm:$0xff]  }
 0x115   : > { %1937 = vmatpush1.bf16.msra.mxu0 %v1880_v7  ;;  %v9015_v13 = vpop.f32.mrf.mxu1  ;;  %2179 = vperm.xlu0 %8262, %v2120_v29   ;;  %v8322_v29 = vld [vmem:[%s13548_s1 + $0xf0] sm:$0xff]  }
 0x116   : > { %1938 = vmatprep.subr.bf16.mxu0 %v8894_v35  ;;  %v2118_v35 = vld [vmem:[%s13549_s2 + $0x38] sm:$0xff] }
 0x117   : > { %v9026_v17 = vpop.f32.mrf.mxu1 }
 0x119   : > { %1939 = vmatpush1.bf16.msra.mxu0 %v1879_v12  ;;  %v9035_v20 = vpop.f32.mrf.mxu1  ;;  %2169 = vperm.xlu0 %8262, %v2118_v35   ;;  %v8318_v12 = vld [vmem:[%s13548_s1 + $0xe0] sm:$0xff]   ;;  %v8324_v35 = vld [vmem:[%s13548_s1 + $0xf8] ss:$0 sps:$4 sm:$0xff]  }
 0x11a   : > { %1940 = vmatprep.subr.bf16.mxu0 %v8904_v41  ;;  %v8319_v41 = vld [vmem:[%s13548_s1 + $0x134] sm:$0xff]  }
 0x11b   : > { %7539 = vmatmul.mubr.msk.bf16.gmra.mxu0 %vm695_vm0, %v8308_v15  ;;  %7585 = vmatmul.mubr.msk.bf16.gmra.mxu1 %vm695_vm0, %v8315_v16  ;;  %v9043_v25 = vpop.f32.mrf.mxu1 }
 0x11c   : > { %1322 = vmatprep.mubr.bf16.mxu0 %v8512_v22  ;;  %13683 = vst [vmem:[#allocation6_spill] sm:$0xff] %v9043_v25  ;;  %1686 = vmatprep.mubr.bf16.mxu1 %v8512_v22 }
 0x11d   : > { %1941 = vmatpush1.bf16.msra.mxu0 %v1878_v19  ;;  %v9050_v28 = vpop.f32.mrf.mxu1  ;;  %2159 = vperm.xlu0 %8262, %v2116_v39   ;;  %v8327_v39 = vld [vmem:[%s13548_s1 + $0x158] sm:$0xff]  }
 0x11e   : > { %1942 = vmatprep.subr.bf16.mxu0 %v1855_v23 }
 0x11f   : > { %v9061_v32 = vpop.f32.mrf.mxu1 }
 0x121   : > { %1943 = vmatpush1.bf16.msra.mxu0 %v1877_v27  ;;  %v9066_v34 = vpop.f32.mrf.mxu1  ;;  %2149 = vperm.xlu0 %8262, %v2114_v45  }
 0x123   : > { %7540 = vmatmul.mubr.msk.bf16.gmra.mxu0 %vm695_vm0, %v8310_v30  ;;  %7586 = vmatmul.mubr.msk.bf16.gmra.mxu1 %vm695_vm0, %v8317_v31  ;;  %v9074_v36 = vpop.f32.mrf.mxu1 }
 0x124   : > { %1332 = vmatprep.mubr.bf16.mxu0 %v8512_v22  ;;  %13684 = vst [vmem:[#allocation7_spill] sm:$0xff] %v9074_v36  ;;  %1696 = vmatprep.mubr.bf16.mxu1 %v8512_v22 }
 0x125   : > { %v9080_v38 = vpop.f32.mrf.mxu1  ;;  %2139 = vperm.xlu0 %8262, %v2112_v50  }
 0x127   : > { %v9091_v42 = vpop.f32.mrf.mxu1 }
 0x129   : > { %v9096_v44 = vpop.f32.mrf.mxu1  ;;  %2224 = vperm.xlu0 %8262, %v2129_v61  }
 0x12b   : > { %7541 = vmatmul.mubr.msk.bf16.gmra.mxu0 %vm695_vm0, %v8312_v40  ;;  %7587 = vmatmul.mubr.msk.bf16.gmra.mxu1 %vm695_vm0, %v8319_v41  ;;  %v9104_v46 = vpop.f32.mrf.mxu1  ;;  %v8328_v40 = vld [vmem:[%s13548_s1 + $0x160] sm:$0xff]  }
 0x12c   : > { %1342 = vmatprep.mubr.bf16.mxu0 %v8512_v22  ;;  %13685 = vst [vmem:[#allocation8_spill] sm:$0xff] %v9104_v46  ;;  %1706 = vmatprep.mubr.bf16.mxu1 %v8512_v22 }
 0x12d   : > { %v9110_v48 = vpop.f32.mrf.mxu1  ;;  %2214 = vperm.xlu0 %8262, %v2127_v6  }
 0x12f   : > { %v9121_v57 = vpop.f32.mrf.mxu1 }
 0x131   : > { %v9123_v58 = vpop.f32.mrf.mxu1 }
 0x132   : > { %13686 = vst [vmem:[#allocation9_spill] sm:$0xff] %v9123_v58 }
 0x133   : > { %7542 = vmatmul.mubr.msk.bf16.gmra.mxu0 %vm695_vm0, %v8314_v51  ;;  %7588 = vmatmul.mubr.msk.bf16.gmra.mxu1 %vm695_vm0, %v8321_v55  ;;  %v9128_v60 = vpop.f32.mrf.mxu1 }
 0x134   : > { %1352 = vmatprep.mubr.bf16.mxu0 %v8512_v22  ;;  %13687 = vst [vmem:[#allocation10_spill] sm:$0xff] %v9128_v60  ;;  %1716 = vmatprep.mubr.bf16.mxu1 %v8512_v22 }
 0x135   : > { %v9134_v0 = vpop.f32.mrf.mxu1 }
 0x136   : > { %13688 = vst [vmem:[#allocation11_spill] sm:$0xff] %v9134_v0 }
 0x137   : > { %v9142_v4 = vpop.f32.mrf.mxu1 }
 0x138   : > { %13689 = vst [vmem:[#allocation12_spill] sm:$0xff] %v9142_v4 }
 0x139   : > { %v9147_v7 = vpop.f32.mrf.mxu1 }
 0x13a   : > { %13690 = vst [vmem:[#allocation13_spill] sm:$0xff] %v9147_v7 }
 0x13b   : > { %7543 = vmatmul.mubr.msk.bf16.gmra.mxu0 %vm695_vm0, %v8316_v1  ;;  %7589 = vmatmul.mubr.msk.bf16.gmra.mxu1 %vm695_vm0, %v8323_v3  ;;  %v9152_v9 = vpop.f32.mrf.mxu1  ;;  %v8330_v1 = vld [vmem:[%s13548_s1 + $0x170] sm:$0xff]  }
 0x13c   : > { %1362 = vmatprep.mubr.bf16.mxu0 %v8512_v22  ;;  %13691 = vst [vmem:[#allocation14_spill] sm:$0xff] %v9152_v9  ;;  %1726 = vmatprep.mubr.bf16.mxu1 %v8512_v22 }
 0x13d   : > { %v9155_v11 = vpop.f32.mrf.mxu1 }
 0x13e   : > { %13692 = vst [vmem:[#allocation15_spill] sm:$0xff] %v9155_v11 }
 0x13f   : > { %v9163_v15 = vpop.f32.mrf.mxu1 }
 0x140   : > { %13693 = vst [vmem:[#allocation16_spill] sm:$0xff] %v9163_v15 }
 0x141   : > { %v9165_v16 = vpop.f32.mrf.mxu1 }
 0x142   : > { %13694 = vst [vmem:[#allocation17_spill] sm:$0xff] %v9165_v16 }
 0x143   : > { %7544 = vmatmul.mubr.msk.bf16.gmra.mxu0 %vm695_vm0, %v8318_v12  ;;  %7590 = vmatmul.mubr.msk.bf16.gmra.mxu1 %vm695_vm0, %v8325_v14  ;;  %v9170_v18 = vpop.f32.mrf.mxu1 }
 0x144   : > { %1372 = vmatprep.mubr.bf16.mxu0 %v8512_v22  ;;  %13695 = vst [vmem:[#allocation18_spill] sm:$0xff] %v9170_v18 }
 0x145   : > { %v9172_v19 = vpop.f32.mrf.mxu1 }
 0x146   : > { %13696 = vst [vmem:[#allocation19_spill] sm:$0xff] %v9172_v19 }
 0x147   : > { %v9177_v23 = vpop.f32.mrf.mxu1 }
 0x148   : > { %13697 = vst [vmem:[#allocation20_spill] sm:$0xff] %v9177_v23 }
 0x149   : > { %v9179_v24 = vpop.f32.mrf.mxu1 }
 0x14a   : > { %13698 = vst [vmem:[#allocation21_spill] sm:$0xff] %v9179_v24 }
 0x14b   : > { %7545 = vmatmul.mubr.msk.bf16.gmra.mxu0 %vm695_vm0, %v8320_v21  ;;  %v9183_v26 = vpop.f32.mrf.mxu1  ;;  %v8331_v21 = vld [vmem:[%s13548_s1 + $0x178] sm:$0xff]  }
 0x14c   : > { %1382 = vmatprep.mubr.bf16.mxu0 %v8512_v22  ;;  %13699 = vst [vmem:[#allocation22_spill] sm:$0xff] %v9183_v26 }
 0x14d   : > { %v9185_v27 = vpop.f32.mrf.mxu1 }
 0x14e   : > { %13700 = vst [vmem:[#allocation23_spill] sm:$0xff] %v9185_v27 }
 0x14f   : > { %v9190_v30 = vpop.f32.mrf.mxu1 }
 0x150   : > { %13701 = vst [vmem:[#allocation24_spill] sm:$0xff] %v9190_v30 }
 0x151   : > { %v1106_v31 = vpop.f32.mrf.mxu1 }
 0x153   : > { %7546 = vmatmul.mubr.msk.bf16.gmra.mxu0 %vm695_vm0, %v8322_v29  ;;  %v1107_v33 = vpop.f32.mrf.mxu1 }
 0x154   : > { %1392 = vmatprep.mubr.bf16.mxu0 %v8512_v22 }
 0x15b   : > { %7547 = vmatmul.mubr.msk.bf16.gmra.mxu0 %vm695_vm0, %v8324_v35 }
 0x15c   : > { %1960 = vmatprep.mubr.bf16.mxu0 %v8512_v22 }
 0x163   : > { %7623 = vmatmul.mubr.msk.bf16.vlgmr.msra.gmra.mxu0 %vm695_vm0, %v8326_v37  ;;  %v8332_v37 = vld [vmem:[%s13548_s1 + $0x180] sm:$0xff]  }
 0x164   : > { %1970 = vmatprep.mubr.bf16.mxu0 %v8512_v22 }
 0x16b   : > { %7624 = vmatmul.mubr.msk.bf16.gmra.mxu0 %vm695_vm0, %v8327_v39 }
 0x16c   : > { %1980 = vmatprep.mubr.bf16.mxu0 %v8512_v22 }
 0x173   : > { %v9212_v41 = vpop.f32.mrf.mxu0  ;;  %7625 = vmatmul.mubr.msk.bf16.gmra.mxu0 %vm695_vm0, %v8328_v40 }
 0x174   : > { %1990 = vmatprep.mubr.bf16.mxu0 %v8512_v22 }
 0x175   : > { %v9216_v43 = vpop.f32.mrf.mxu0 }
 0x177   : > { %v9218_v45 = vpop.f32.mrf.mxu0 }
 0x179   : > { %v9223_v50 = vpop.f32.mrf.mxu0 }
 0x17a   : > { %13702 = vst [vmem:[#allocation25_spill] sm:$0xff] %v9223_v50  ;;  %v8334_v50 = vld [vmem:[%s13548_s1 + $0x190] sm:$0xff]  }
 0x17b   : > { %v9225_v51 = vpop.f32.mrf.mxu0  ;;  %7626 = vmatmul.mubr.msk.bf16.gmra.mxu0 %vm695_vm0, %v8329_v47 }
 0x17c   : > { %2000 = vmatprep.mubr.bf16.mxu0 %v8512_v22 }
 0x17d   : > { %v9229_v55 = vpop.f32.mrf.mxu0 }
 0x17f   : > { %v9231_v61 = vpop.f32.mrf.mxu0 }
 0x181   : > { %v9236_v3 = vpop.f32.mrf.mxu0 }
 0x182   : > { %13703 = vst [vmem:[#allocation26_spill] sm:$0xff] %v9236_v3 }
 0x183   : > { %v9238_v6 = vpop.f32.mrf.mxu0  ;;  %7627 = vmatmul.mubr.msk.bf16.gmra.mxu0 %vm695_vm0, %v8330_v1 }
 0x184   : > { %2010 = vmatprep.mubr.bf16.mxu0 %v8512_v22 }
 0x185   : > { %v9242_v12 = vpop.f32.mrf.mxu0 }
 0x187   : > { %v9244_v14 = vpop.f32.mrf.mxu0 }
 0x189   : > { %v9249_v29 = vpop.f32.mrf.mxu0 }
 0x18a   : > { %13704 = vst [vmem:[#allocation27_spill] sm:$0xff] %v9249_v29 }
 0x18b   : > { %v9251_v31 = vpop.f32.mrf.mxu0  ;;  %7628 = vmatmul.mubr.msk.bf16.gmra.mxu0 %vm695_vm0, %v8331_v21  ;;  %v8333_v21 = vld [vmem:[%s13548_s1 + $0x188] sm:$0xff]  }
 0x18c   : > { %2020 = vmatprep.mubr.bf16.mxu0 %v8512_v22 }
 0x18d   : > { %v9255_v33 = vpop.f32.mrf.mxu0 }
 0x18f   : > { %v9257_v35 = vpop.f32.mrf.mxu0 }
 0x191   : > { %v9262_v39 = vpop.f32.mrf.mxu0 }
 0x192   : > { %13705 = vst [vmem:[#allocation28_spill] sm:$0xff] %v9262_v39 }
 0x193   : > { %v9264_v40 = vpop.f32.mrf.mxu0  ;;  %7629 = vmatmul.mubr.msk.bf16.gmra.mxu0 %vm695_vm0, %v8332_v37 }
 0x194   : > { %2030 = vmatprep.mubr.bf16.mxu0 %v8512_v22 }
 0x195   : > { %v9268_v47 = vpop.f32.mrf.mxu0 }
 0x197   : > { %v9270_v1 = vpop.f32.mrf.mxu0 }
 0x199   : > { %v9275_v18 = vpop.f32.mrf.mxu0 }
 0x19a   : > { %13706 = vst [vmem:[#allocation29_spill] sm:$0xff] %v9275_v18 }
 0x19b   : > { %v9277_v26 = vpop.f32.mrf.mxu0  ;;  %7630 = vmatmul.mubr.msk.bf16.gmra.mxu0 %vm695_vm0, %v8333_v21 }
 0x19c   : > { %2040 = vmatprep.mubr.bf16.mxu0 %v8512_v22 }
 0x19d   : > { %v9281_v54 = vpop.f32.mrf.mxu0 }
 0x19f   : > { %v9283_v37 = vpop.f32.mrf.mxu0 }
 0x1a1   : > { %v9288_v63 = vpop.f32.mrf.mxu0 }
 0x1a2   : > { %13707 = vst [vmem:[#allocation30_spill] sm:$0xff] %v9288_v63  ;;  %v8336_v63 = vld [vmem:[%s13548_s1 + $0x1a0] ss:$0 sps:$4 sm:$0xff]  }
 0x1a3   : > { %v9290_v3 = vpop.f32.mrf.mxu0  ;;  %7631 = vmatmul.mubr.msk.bf16.gmra.mxu0 %vm695_vm0, %v8334_v50 }
 0x1a4   : > { %2050 = vmatprep.mubr.bf16.mxu0 %v8512_v22 }
 0x1a5   : > { %v9294_v9 = vpop.f32.mrf.mxu0 }
 0x1a7   : > { %v9296_v21 = vpop.f32.mrf.mxu0 }
 0x1a9   : > { %v9301_v29 = vpop.f32.mrf.mxu0 }
 0x1aa   : > { %13708 = vst [vmem:[#allocation31_spill] sm:$0xff] %v9301_v29 }
 0x1ab   : > { %v9303_v60 = vpop.f32.mrf.mxu0  ;;  %7632 = vmatmul.mubr.msk.bf16.gmra.mxu0 %vm695_vm0, %v8335_v10 }
 0x1ac   : > { %13709 = vst [vmem:[#allocation32_spill] sm:$0xff] %v9303_v60  ;;  %2060 = vmatprep.mubr.bf16.mxu0 %v8512_v22 }
 0x1ad   : > { %v9307_v46 = vpop.f32.mrf.mxu0 }
 0x1ae   : > { %13710 = vst [vmem:[#allocation33_spill] sm:$0xff] %v9307_v46 }
 0x1af   : > { %v9309_v50 = vpop.f32.mrf.mxu0 }
 0x1b0   : > { %13711 = vst [vmem:[#allocation34_spill] sm:$0xff] %v9309_v50 }
 0x1b1   : > { %v9314_v36 = vpop.f32.mrf.mxu0 }
 0x1b2   : > { %13712 = vst [vmem:[#allocation35_spill] sm:$0xff] %v9314_v36 }
 0x1b3   : > { %v9316_v18 = vpop.f32.mrf.mxu0  ;;  %7633 = vmatmul.mubr.msk.bf16.gmra.mxu0 %vm695_vm0, %v8336_v63  ;;  %v1628_v29 = vpop.f32.mrf.mxu1  ;;  %vm7356_vm0 = vcmask 58368  }
 0x1b4   : > { %13713 = vst [vmem:[#allocation36_spill] sm:$0xff] %v9316_v18 }
 0x1b5   : > { %v9319_v25 = vpop.f32.mrf.mxu0  ;;  %v1630_v10 = vpop.f32.mrf.mxu1 }
 0x1b6   : > { %13714 = vst [vmem:[#allocation37_spill] sm:$0xff] %v9319_v25 }
 0x1b7   : > { %v9321_v39 = vpop.f32.mrf.mxu0  ;;  %v1632_v22 = vpop.f32.mrf.mxu1 }
 0x1b8   : > { %13715 = vst [vmem:[#allocation38_spill] sm:$0xff] %v9321_v39 }
 0x1b9   : > { %v9323_v30 = vpop.f32.mrf.mxu0  ;;  %v9325_v27 = vpop.f32.mrf.mxu1 }
 0x1ba   : > { %13716 = vst [vmem:[#allocation39_spill] sm:$0xff] %v9323_v30  ;;  %13717 = vst [vmem:[#allocation40_spill] sm:$0xff] %v9325_v27 }
 0x1bb   : > { %v9327_v24 = vpop.f32.mrf.mxu0  ;;  %v1638_v23 = vpop.f32.mrf.mxu1 }
 0x1bc   : > { %13718 = vst [vmem:[#allocation41_spill] sm:$0xff] %v9327_v24 }
 0x1bd   : > { %v9329_v19 = vpop.f32.mrf.mxu0  ;;  %v1640_v36 = vpop.f32.mrf.mxu1 }
 0x1be   : > { %13719 = vst [vmem:[#allocation42_spill] sm:$0xff] %v9329_v19  ;;  %v1003_v19 = vadd.f32 %v8928_v49, %v9212_v41 }
 0x1bf   : > { %v9331_v16 = vpop.f32.mrf.mxu0  ;;  %v1642_v63 = vpop.f32.mrf.mxu1 }
 0x1c0   : > { %13720 = vst [vmem:[#allocation43_spill] sm:$0xff] %v9331_v16 }
 0x1c1   : > { %v9333_v15 = vpop.f32.mrf.mxu0  ;;  %v9335_v25 = vpop.f32.mrf.mxu1 }
 0x1c2   : > { %13721 = vst [vmem:[#allocation44_spill] sm:$0xff] %v9333_v15  ;;  %13722 = vst [vmem:[#allocation45_spill] sm:$0xff] %v9335_v25  ;;  %v1005_v15 = vadd.f32 %v8936_v52, %v9216_v43  ;;  %v1013_v52 = vadd.f32 %v8949_v56, %v9225_v51 }
 0x1c3   : > { %v9337_v11 = vpop.f32.mrf.mxu0  ;;  %v1648_v39 = vpop.f32.mrf.mxu1 }
 0x1c4   : > { %13723 = vst [vmem:[#allocation46_spill] sm:$0xff] %v9337_v11  ;;  %v1007_v11 = vadd.f32 %v8938_v53, %v9218_v45  ;;  %v1015_v53 = vadd.f32 %v8957_v59, %v9229_v55  ;;  %v1023_v59 = vadd.f32 %v8980_v2, %v9238_v6 }
 0x1c5   : > { %v9339_v18 = vpop.f32.mrf.mxu0  ;;  %v1650_v30 = vpop.f32.mrf.mxu1 }
 0x1c6   : > { %13724 = vst [vmem:[#allocation47_spill] sm:$0xff] %v9339_v18 }
 0x1c7   : > { %v867_v27 = vpop.f32.mrf.mxu0  ;;  %v1652_v7 = vpop.f32.mrf.mxu1 }
 0x1c9   : > { %v868_v24 = vpop.f32.mrf.mxu0  ;;  %v9343_v50 = vpop.f32.mrf.mxu1 }
 0x1cb   : > { %v1294_v16 = vpop.f32.mrf.mxu0  ;;  %v1658_v25 = vpop.f32.mrf.mxu1 }
 0x1cc   : > { %v1401_v4 = vadd.f32 %v1294_v16, %v1003_v19 }
 0x1cd   : > { %v1296_v46 = vpop.f32.mrf.mxu0  ;;  %v1660_v27 = vpop.f32.mrf.mxu1 }
 0x1ce   : > { %v1402_v18 = vadd.f32 %v1296_v46, %v1005_v15  ;;  %v9349_v0 = vadd.f32 %v1628_v29, %v1401_v4 }
 0x1cf   : > { %v1298_v24 = vpop.f32.mrf.mxu0  ;;  %v1662_v49 = vpop.f32.mrf.mxu1 }
 0x1d0   : > { %v1403_v60 = vadd.f32 %v1298_v24, %v1007_v11  ;;  %v9351_v58 = vadd.f32 %v1630_v10, %v1402_v18  ;;  %v1017_v11 = vadd.f32 %v8965_v62, %v9231_v61  ;;  %v1025_v62 = vadd.f32 %v8988_v5, %v9242_v12 }
 0x1d1   : > { %v9353_v41 = vpop.f32.mrf.mxu0  ;;  %v9359_v19 = vpop.f32.mrf.mxu1  ;;  %v1033_v5 = vadd.f32 %v9015_v13, %v9251_v31 }
 0x1d2   : > { %13725 = vst [vmem:[#allocation48_spill] sm:$0xff] %v9353_v41  ;;  %v9357_v16 = vadd.f32 %v1632_v22, %v1403_v60  ;;  %v13739_v41 = vld [vmem:[#allocation37_spill] sm:$0xff] }
 0x1d3   : > { %v1304_v43 = vpop.f32.mrf.mxu0  ;;  %v1668_v4 = vpop.f32.mrf.mxu1 }
 0x1d4   : > { %v1405_v46 = vadd.f32 %v1304_v43, %v1013_v52 }
 0x1d5   : > { %v1306_v15 = vpop.f32.mrf.mxu0  ;;  %v1670_v29 = vpop.f32.mrf.mxu1 }
 0x1d6   : > { %v1406_v18 = vadd.f32 %v1306_v15, %v1015_v53  ;;  %v9365_v45 = vadd.f32 %v1638_v23, %v1405_v46 }
 0x1d7   : > { %v1308_v10 = vpop.f32.mrf.mxu0  ;;  %v1672_v51 = vpop.f32.mrf.mxu1 }
 0x1d8   : > { %v1407_v56 = vadd.f32 %v1308_v10, %v1017_v11  ;;  %v9367_v60 = vadd.f32 %v1640_v36, %v1406_v18  ;;  %v1027_v36 = vadd.f32 %v8997_v8, %v9244_v14  ;;  %v1035_v8 = vadd.f32 %v9026_v17, %v9255_v33 }
 0x1d9   : > { %v9369_v22 = vpop.f32.mrf.mxu0  ;;  %v9375_v24 = vpop.f32.mrf.mxu1  ;;  %v1043_v17 = vadd.f32 %v9050_v28, %v9264_v40 }
 0x1da   : > { %13726 = vst [vmem:[#allocation49_spill] sm:$0xff] %v9367_v60  ;;  %v9373_v55 = vadd.f32 %v1642_v63, %v1407_v56 }
 0x1db   : > { %v1314_v52 = vpop.f32.mrf.mxu0  ;;  %v1678_v61 = vpop.f32.mrf.mxu1 }
 0x1dc   : > { %13727 = vst [vmem:[#allocation50_spill] sm:$0xff] %v9373_v55  ;;  %v1409_v23 = vadd.f32 %v1314_v52, %v1023_v59 }
 0x1dd   : > { %v1316_v43 = vpop.f32.mrf.mxu0  ;;  %v1680_v15 = vpop.f32.mrf.mxu1 }
 0x1de   : > { %v1410_v53 = vadd.f32 %v1316_v43, %v1025_v62  ;;  %v9381_v46 = vadd.f32 %v1648_v39, %v1409_v23 }
 0x1df   : > { %v1318_v11 = vpop.f32.mrf.mxu0  ;;  %v1682_v63 = vpop.f32.mrf.mxu1 }
 0x1e0   : > { %v1411_v2 = vadd.f32 %v1318_v11, %v1027_v36  ;;  %v9383_v6 = vadd.f32 %v1650_v30, %v1410_v53  ;;  %v1037_v30 = vadd.f32 %v9035_v20, %v9257_v35  ;;  %v1045_v20 = vadd.f32 %v9061_v32, %v9268_v47 }
 0x1e1   : > { %v9385_v18 = vpop.f32.mrf.mxu0  ;;  %v9391_v10 = vpop.f32.mrf.mxu1  ;;  %v1053_v32 = vadd.f32 %v9080_v38, %v9277_v26 }
 0x1e2   : > { %v9389_v12 = vadd.f32 %v1652_v7, %v1411_v2 }
 0x1e3   : > { %v1324_v56 = vpop.f32.mrf.mxu0  ;;  %v1688_v39 = vpop.f32.mrf.mxu1 }
 0x1e4   : > { %v1413_v14 = vadd.f32 %v1324_v56, %v1033_v5 }
 0x1e5   : > { %v1326_v59 = vpop.f32.mrf.mxu0  ;;  %v1690_v23 = vpop.f32.mrf.mxu1 }
 0x1e6   : > { %v1414_v52 = vadd.f32 %v1326_v59, %v1035_v8  ;;  %v9397_v62 = vadd.f32 %v1658_v25, %v1413_v14 }
 0x1e7   : > { %v1328_v43 = vpop.f32.mrf.mxu0  ;;  %v1692_v31 = vpop.f32.mrf.mxu1 }
 0x1e8   : > { %v1415_v13 = vadd.f32 %v1328_v43, %v1037_v30  ;;  %v9399_v7 = vadd.f32 %v1660_v27, %v1414_v52  ;;  %v1047_v27 = vadd.f32 %v9066_v34, %v9270_v1  ;;  %v1055_v34 = vadd.f32 %v9091_v42, %v9281_v54 }
 0x1e9   : > { %v9401_v36 = vpop.f32.mrf.mxu0  ;;  %v9407_v53 = vpop.f32.mrf.mxu1  ;;  %v1063_v54 = vadd.f32 %v9110_v48, %v9290_v3 }
 0x1ea   : > { %v9405_v33 = vadd.f32 %v1662_v49, %v1415_v13 }
 0x1eb   : > { %v1334_v11 = vpop.f32.mrf.mxu0  ;;  %v1698_v35 = vpop.f32.mrf.mxu1 }
 0x1ec   : > { %v1417_v25 = vadd.f32 %v1334_v11, %v1043_v17 }
 0x1ed   : > { %v1336_v2 = vpop.f32.mrf.mxu0  ;;  %v1700_v8 = vpop.f32.mrf.mxu1 }
 0x1ee   : > { %v1418_v5 = vadd.f32 %v1336_v2, %v1045_v20  ;;  %v9413_v56 = vadd.f32 %v1668_v4, %v1417_v25 }
 0x1ef   : > { %v1338_v14 = vpop.f32.mrf.mxu0  ;;  %v1702_v49 = vpop.f32.mrf.mxu1 }
 0x1f0   : > { %v1419_v28 = vadd.f32 %v1338_v14, %v1047_v27  ;;  %v9415_v40 = vadd.f32 %v1670_v29, %v1418_v5  ;;  %v1057_v29 = vadd.f32 %v9096_v44, %v9283_v37  ;;  %v1065_v44 = vadd.f32 %v9121_v57, %v9294_v9 }
 0x1f1   : > { %v9417_v59 = vpop.f32.mrf.mxu0  ;;  %v9423_v30 = vpop.f32.mrf.mxu1 }
 0x1f2   : > { %v9421_v47 = vadd.f32 %v1672_v51, %v1419_v28 }
 0x1f3   : > { %v1344_v52 = vpop.f32.mrf.mxu0  ;;  %v1708_v4 = vpop.f32.mrf.mxu1 }
 0x1f4   : > { %v1421_v1 = vadd.f32 %v1344_v52, %v1053_v32 }
 0x1f5   : > { %v1346_v43 = vpop.f32.mrf.mxu0  ;;  %v1710_v11 = vpop.f32.mrf.mxu1 }
 0x1f6   : > { %v1422_v13 = vadd.f32 %v1346_v43, %v1055_v34  ;;  %v9429_v17 = vadd.f32 %v1678_v61, %v1421_v1  ;;  %v13730_v43 = vld [vmem:[#allocation32_spill] sm:$0xff] }
 0x1f7   : > { %v1348_v20 = vpop.f32.mrf.mxu0  ;;  %v1712_v51 = vpop.f32.mrf.mxu1 }
 0x1f8   : > { %v1423_v38 = vadd.f32 %v1348_v20, %v1057_v29  ;;  %v9431_v26 = vadd.f32 %v1680_v15, %v1422_v13  ;;  %v13729_v15 = vld [vmem:[#allocation9_spill] sm:$0xff]  ;;  %v13731_v29 = vld [vmem:[#allocation11_spill] sm:$0xff] }
 0x1f9   : > { %v9433_v25 = vpop.f32.mrf.mxu0  ;;  %v9439_v2 = vpop.f32.mrf.mxu1  ;;  %v1067_v14 = vadd.f32 %v13729_v15, %v9296_v21  ;;  %v1073_v57 = vadd.f32 %v13731_v29, %v13730_v43  ;;  %v13733_v21 = vld [vmem:[#allocation33_spill] sm:$0xff] }
 0x1fa   : > { %v9437_v42 = vadd.f32 %v1682_v63, %v1423_v38  ;;  %13728 = vst [vmem:[#allocation51_spill] sm:$0xff] %v9439_v2  ;;  %v13734_v38 = vld [vmem:[#allocation12_spill] sm:$0xff] }
 0x1fb   : > { %v1354_v27 = vpop.f32.mrf.mxu0  ;;  %v1718_v61 = vpop.f32.mrf.mxu1  ;;  %v13737_v2 = vld [vmem:[#allocation36_spill] sm:$0xff] }
 0x1fc   : > { %v1425_v37 = vadd.f32 %v1354_v27, %v1063_v54 }
 0x1fd   : > { %v1356_v5 = vpop.f32.mrf.mxu0  ;;  %v1720_v52 = vpop.f32.mrf.mxu1 }
 0x1fe   : > { %v1426_v28 = vadd.f32 %v1356_v5, %v1065_v44  ;;  %v9445_v32 = vadd.f32 %v1688_v39, %v1425_v37  ;;  %v1075_v39 = vadd.f32 %v13734_v38, %v13733_v21  ;;  %v13735_v37 = vld [vmem:[#allocation34_spill] sm:$0xff] }
 0x1ff   : > { %v1358_v34 = vpop.f32.mrf.mxu0  ;;  %v1722_v63 = vpop.f32.mrf.mxu1 }
 0x200   : > { %v1427_v48 = vadd.f32 %v1358_v34, %v1067_v14  ;;  %v9447_v3 = vadd.f32 %v1690_v23, %v1426_v28  ;;  %v13736_v23 = vld [vmem:[#allocation13_spill] sm:$0xff] }
 0x201   : > { %v9449_v1 = vpop.f32.mrf.mxu0  ;;  %v9455_v13 = vpop.f32.mrf.mxu1  ;;  %v1077_v5 = vadd.f32 %v13736_v23, %v13735_v37  ;;  %v13740_v37 = vld [vmem:[#allocation16_spill] sm:$0xff]  ;;  %v13742_v23 = vld [vmem:[#allocation17_spill] sm:$0xff] }
 0x202   : > { %v9453_v9 = vadd.f32 %v1692_v31, %v1427_v48  ;;  %13732 = vst [vmem:[#allocation9_spill] sm:$0xff] %v9455_v13  ;;  %v13738_v13 = vld [vmem:[#allocation15_spill] sm:$0xff] }
 0x203   : > { %v1364_v20 = vpop.f32.mrf.mxu0  ;;  %v1728_v27 = vpop.f32.mrf.mxu1  ;;  %v1083_v21 = vadd.f32 %v13738_v13, %v13737_v2  ;;  %v13747_v13 = vld [vmem:[#allocation19_spill] sm:$0xff] }
 0x204   : > { %v1429_v54 = vadd.f32 %v1364_v20, %v1073_v57 }
 0x205   : > { %v1366_v44 = vpop.f32.mrf.mxu0  ;;  %v1730_v28 = vpop.f32.mrf.mxu1 }
 0x206   : > { %v1430_v15 = vadd.f32 %v1366_v44, %v1075_v39  ;;  %v9461_v14 = vadd.f32 %v1698_v35, %v1429_v54  ;;  %v1085_v39 = vadd.f32 %v13740_v37, %v13739_v41  ;;  %v13741_v44 = vld [vmem:[#allocation38_spill] sm:$0xff] }
 0x207   : > { %v1368_v34 = vpop.f32.mrf.mxu0  ;;  %v1732_v48 = vpop.f32.mrf.mxu1 }
 0x208   : > { %v1431_v43 = vadd.f32 %v1368_v34, %v1077_v5  ;;  %v9463_v31 = vadd.f32 %v1700_v8, %v1430_v15  ;;  %v1087_v5 = vadd.f32 %v13742_v23, %v13741_v44 }
 0x209   : > { %v9465_v29 = vpop.f32.mrf.mxu0  ;;  %v1733_v20 = vpop.f32.mrf.mxu1 }
 0x20a   : > { %v9469_v57 = vadd.f32 %v1702_v49, %v1431_v43  ;;  %v13746_v49 = vld [vmem:[#allocation41_spill] sm:$0xff] }
 0x20b   : > { %v1374_v38 = vpop.f32.mrf.mxu0  ;;  %v1093_v43 = vadd.f32 %v13747_v13, %v13746_v49  ;;  %v13756_v49 = vld [vmem:[#allocation23_spill] sm:$0xff] }
 0x20c   : > { %v1433_v35 = vadd.f32 %v1374_v38, %v1083_v21  ;;  %v13749_v21 = vld [vmem:[#allocation42_spill] sm:$0xff]  ;;  %v13750_v38 = vld [vmem:[#allocation20_spill] sm:$0xff] }
 0x20d   : > { %v1376_v54 = vpop.f32.mrf.mxu0  ;;  %v1095_v37 = vadd.f32 %v13750_v38, %v13749_v21  ;;  %v13759_v38 = vld [vmem:[#allocation24_spill] sm:$0xff] }
 0x20e   : > { %v1434_v8 = vadd.f32 %v1376_v54, %v1085_v39  ;;  %v9475_v15 = vadd.f32 %v1708_v4, %v1433_v35  ;;  %v13751_v39 = vld [vmem:[#allocation43_spill] sm:$0xff]  ;;  %v13752_v4 = vld [vmem:[#allocation21_spill] sm:$0xff]  ;;  %v9489_v54 = vpop.permute.xlu1 %2209 }
 0x20f   : > { %v1378_v34 = vpop.f32.mrf.mxu0  ;;  %v1097_v35 = vadd.f32 %v13752_v4, %v13751_v39 }
 0x210   : > { %13743 = vst [vmem:[#allocation32_spill] sm:$0xff] %v9475_v15  ;;  %v1435_v48 = vadd.f32 %v1378_v34, %v1087_v5  ;;  %v9477_v55 = vadd.f32 %v1710_v11, %v1434_v8 }
 0x211   : > { %v9479_v2 = vpop.f32.mrf.mxu0 }
 0x212   : > { %13744 = vst [vmem:[#allocation11_spill] sm:$0xff] %v9477_v55  ;;  %13745 = vst [vmem:[#allocation33_spill] sm:$0xff] %v9479_v2  ;;  %v9483_v20 = vadd.f32 %v1712_v51, %v1435_v48  ;;  %v13755_v48 = vld [vmem:[#allocation46_spill] sm:$0xff]  ;;  %v9503_v4 = vpop.permute.xlu1 %2194 }
 0x213   : > { %v1384_v41 = vpop.f32.mrf.mxu0  ;;  %v1103_v13 = vadd.f32 %v13756_v49, %v13755_v48 }
 0x214   : > { %13748 = vst [vmem:[#allocation12_spill] sm:$0xff] %v9483_v20  ;;  %v1437_v60 = vadd.f32 %v1384_v41, %v1093_v43  ;;  %v13758_v41 = vld [vmem:[#allocation47_spill] sm:$0xff] }
 0x215   : > { %v1386_v44 = vpop.f32.mrf.mxu0  ;;  %v1105_v39 = vadd.f32 %v13759_v38, %v13758_v41 }
 0x216   : > { %v1438_v11 = vadd.f32 %v1386_v44, %v1095_v37  ;;  %v9491_v23 = vadd.f32 %v1718_v61, %v1437_v60 }
 0x217   : > { %v1388_v5 = vpop.f32.mrf.mxu0 }
 0x218   : > { %v1439_v8 = vadd.f32 %v1388_v5, %v1097_v35  ;;  %v9493_v34 = vadd.f32 %v1720_v52, %v1438_v11  ;;  %v9509_v5 = vpop.permute.xlu1 %2184 }
 0x219   : > { %v9495_v51 = vpop.f32.mrf.mxu0 }
 0x21a   : > { %13753 = vst [vmem:[#allocation34_spill] sm:$0xff] %v9493_v34  ;;  %13754 = vst [vmem:[#allocation13_spill] sm:$0xff] %v9495_v51  ;;  %v9499_v21 = vadd.f32 %v1722_v63, %v1439_v8  ;;  %v13767_v34 = vld [vmem:[#allocation7_spill] sm:$0xff] }
 0x21b   : > { %v1394_v43 = vpop.f32.mrf.mxu0 }
 0x21c   : > { %13757 = vst [vmem:[#allocation36_spill] sm:$0xff] %v9499_v21  ;;  %v1441_v37 = vadd.f32 %v1394_v43, %v1103_v13  ;;  %v2175_v13 = vpop.permute.xlu1 %2174  ;;  %v13764_v21 = vld [vmem:[#allocation28_spill] sm:$0xff] }
 0x21d   : > { %v1396_v60 = vpop.f32.mrf.mxu0 }
 0x21e   : > { %v1442_v61 = vadd.f32 %v1396_v60, %v1105_v39  ;;  %v9505_v44 = vadd.f32 %v1728_v27, %v1441_v37  ;;  %v9520_v27 = vpop.permute.xlu0 %2204 }
 0x21f   : > { %v1398_v52 = vpop.f32.mrf.mxu0 }
 0x220   : > { %13760 = vst [vmem:[#allocation15_spill] sm:$0xff] %v9505_v44  ;;  %v9507_v35 = vadd.f32 %v1730_v28, %v1442_v61  ;;  %v2165_v37 = vpop.permute.xlu1 %2164 }
 0x221   : > { %v1399_v11 = vpop.f32.mrf.mxu0 }
 0x222   : > { %13761 = vst [vmem:[#allocation37_spill] sm:$0xff] %v9507_v35  ;;  %v13765_v35 = vld [vmem:[#allocation6_spill] sm:$0xff] }
 0x223   : > { %v1962_v48 = vpop.f32.mrf.mxu0  ;;  %v1039_v44 = vadd.f32 %v13765_v35, %v13764_v21 }
 0x224   : > { %v9512_v63 = vadd.f32 %v1962_v48, %v9349_v0  ;;  %v9528_v0 = vpop.permute.xlu0 %2199  ;;  %v2155_v52 = vpop.permute.xlu1 %2154 }
 0x225   : > { %v1964_v8 = vpop.f32.mrf.mxu0 }
 0x226   : > { %v9515_v49 = vadd.f32 %v1964_v8, %v9351_v58 }
 0x227   : > { %v1966_v41 = vpop.f32.mrf.mxu0 }
 0x228   : > { %v9518_v43 = vadd.f32 %v1966_v41, %v9357_v16  ;;  %v9535_v11 = vpop.permute.xlu0 %2189 }
 0x229   : > { %v9522_v28 = vpop.f32.mrf.mxu0 }
 0x22b   : > { %v9524_v38 = vpop.f32.mrf.mxu0 }
 0x22d   : > { %v9526_v39 = vpop.f32.mrf.mxu0 }
 0x22f   : > { %v9530_v60 = vpop.f32.mrf.mxu0 }
 0x231   : > { %v9532_v58 = vpop.f32.mrf.mxu0 }
 0x233   : > { %v1982_v61 = vpop.f32.mrf.mxu0 }
 0x234   : > { %v2077_v16 = vadd.f32 %v1982_v61, %v9381_v46  ;;  %v2180_v61 = vpop.permute.xlu0 %2179 }
 0x235   : > { %v1984_v48 = vpop.f32.mrf.mxu0 }
 0x236   : > { %v9537_v8 = vadd.f32 %v2155_v52, %v2077_v16  ;;  %v2078_v41 = vadd.f32 %v1984_v48, %v9383_v6  ;;  %v1416_v6 = vadd.f32 %v9401_v36, %v1039_v44 }
 0x237   : > { %v9540_v20 = vpop.f32.mrf.mxu0 }
 0x238   : > { %13762 = vst [vmem:[#allocation16_spill] sm:$0xff] %v9537_v8  ;;  %v13560_v55 = vmax.f32 %v9537_v8, 0.0  ;;  %v9543_v15 = vadd.f32 %v2155_v52, %v2078_v41  ;;  %v1750_v51 = vadd.f32 %v9359_v19, %v1416_v6  ;;  %v2170_v44 = vpop.permute.xlu0 %2169 }
 0x239   : > { %v9545_v2 = vpop.f32.mrf.mxu0 }
 0x23a   : > { %13763 = vst [vmem:[#allocation38_spill] sm:$0xff] %v9543_v15  ;;  %v13563_v46 = vmax.f32 %v9543_v15, 0.0  ;;  %2379 = vrot.lane.b32.xlu0 %v13560_v55, %s8511_s26 }
 0x23b   : > { %v1992_v16 = vpop.f32.mrf.mxu0 }
 0x23c   : > { %v2081_v48 = vadd.f32 %v1992_v16, %v9397_v62  ;;  %2381 = vrot.lane.b32.xlu1 %v13563_v46, %s8511_s26  ;;  %v13766_v16 = vld [vmem:[#allocation29_spill] sm:$0xff] }
 0x23d   : > { %v1994_v52 = vpop.f32.mrf.mxu0  ;;  %v1049_v15 = vadd.f32 %v13767_v34, %v13766_v16  ;;  %v13769_v16 = vld [vmem:[#allocation8_spill] sm:$0xff] }
 0x23e   : > { %v9558_v41 = vadd.f32 %v2165_v37, %v2081_v48  ;;  %v2082_v21 = vadd.f32 %v1994_v52, %v9399_v7 }
 0x23f   : > { %v1996_v35 = vpop.f32.mrf.mxu0 }
 0x240   : > { %v13564_v55 = vmax.f32 %v9558_v41, 0.0  ;;  %v9563_v8 = vadd.f32 %v2165_v37, %v2082_v21  ;;  %v2083_v36 = vadd.f32 %v1996_v35, %v9405_v33  ;;  %v1420_v37 = vadd.f32 %v9417_v59, %v1049_v15 }
 0x241   : > { %v1998_v62 = vpop.f32.mrf.mxu0 }
 0x242   : > { %v9568_v46 = vadd.f32 %v2170_v44, %v2083_v36  ;;  %v2084_v48 = vadd.f32 %v1998_v62, %v1750_v51  ;;  %2387 = vrot.lane.b32.xlu0 %v13564_v55, %s8511_s26  ;;  %v13565_v19 = vmax.f32 %v9563_v8, 0.0  ;;  %v1754_v35 = vadd.f32 %v9375_v24, %v1420_v37  ;;  %v13768_v62 = vld [vmem:[#allocation30_spill] sm:$0xff] }
 0x243   : > { %v2002_v7 = vpop.f32.mrf.mxu0 }
 0x244   : > { %v13566_v6 = vmax.f32 %v9568_v46, 0.0  ;;  %v9576_v33 = vadd.f32 %v2170_v44, %v2084_v48  ;;  %v2085_v52 = vadd.f32 %v2002_v7, %v9413_v56  ;;  %2389 = vrot.lane.b32.xlu1 %v13565_v19, %s8511_s26  ;;  %v1059_v48 = vadd.f32 %v13769_v16, %v13768_v62 }
 0x245   : > { %v2004_v34 = vpop.f32.mrf.mxu0 }
 0x246   : > { %v9582_v51 = vadd.f32 %v2175_v13, %v2085_v52  ;;  %v2086_v21 = vadd.f32 %v2004_v34, %v9415_v40  ;;  %2391 = vrot.lane.b32.xlu0 %v13566_v6, %s8511_s26  ;;  %v13567_v59 = vmax.f32 %v9576_v33, 0.0 }
 0x247   : > { %v2006_v15 = vpop.f32.mrf.mxu0 }
 0x248   : > { %v13568_v56 = vmax.f32 %v9582_v51, 0.0  ;;  %v9591_v36 = vadd.f32 %v2175_v13, %v2086_v21  ;;  %v2087_v44 = vadd.f32 %v2006_v15, %v9421_v47  ;;  %2393 = vrot.lane.b32.xlu1 %v13567_v59, %s8511_s26  ;;  %v1424_v47 = vadd.f32 %v9433_v25, %v1059_v48  ;;  %v13770_v48 = vld [vmem:[#allocation31_spill] sm:$0xff] }
 0x249   : > { %v2008_v40 = vpop.f32.mrf.mxu0 }
 0x24a   : > { %v9599_v7 = vadd.f32 %v2180_v61, %v2087_v44  ;;  %v2088_v52 = vadd.f32 %v2008_v40, %v1754_v35  ;;  %2395 = vrot.lane.b32.xlu0 %v13568_v56, %s8511_s26  ;;  %v13569_v24 = vmax.f32 %v9591_v36, 0.0  ;;  %v1758_v40 = vadd.f32 %v9391_v10, %v1424_v47 }
 0x24b   : > { %v2012_v13 = vpop.f32.mrf.mxu0 }
 0x24c   : > { %v13575_v37 = vmax.f32 %v9599_v7, 0.0  ;;  %v9607_v34 = vadd.f32 %v2180_v61, %v2088_v52  ;;  %v2089_v21 = vadd.f32 %v2012_v13, %v9429_v17  ;;  %2397 = vrot.lane.b32.xlu1 %v13569_v24, %s8511_s26  ;;  %v13771_v52 = vld [vmem:[#allocation10_spill] sm:$0xff] }
 0x24d   : > { %v2014_v15 = vpop.f32.mrf.mxu0  ;;  %v1069_v13 = vadd.f32 %v13771_v52, %v13770_v48 }
 0x24e   : > { %v9614_v35 = vadd.f32 %v9509_v5, %v2089_v21  ;;  %v2090_v44 = vadd.f32 %v2014_v15, %v9431_v26  ;;  %2399 = vrot.lane.b32.xlu0 %v13575_v37, %s8511_s26  ;;  %v13576_v25 = vmax.f32 %v9607_v34, 0.0 }
 0x24f   : > { %v2016_v61 = vpop.f32.mrf.mxu0 }
 0x250   : > { %v13577_v17 = vmax.f32 %v9614_v35, 0.0  ;;  %v9624_v62 = vadd.f32 %v9509_v5, %v2090_v44  ;;  %v2091_v16 = vadd.f32 %v2016_v61, %v9437_v42  ;;  %2401 = vrot.lane.b32.xlu1 %v13576_v25, %s8511_s26  ;;  %v1428_v42 = vadd.f32 %v9449_v1, %v1069_v13  ;;  %v13789_v25 = vld [vmem:[#allocation34_spill] sm:$0xff] }
 0x251   : > { %v2018_v26 = vpop.f32.mrf.mxu0 }
 0x252   : > { %v9633_v21 = vadd.f32 %v9535_v11, %v2091_v16  ;;  %v2092_v15 = vadd.f32 %v2018_v26, %v1758_v40  ;;  %2403 = vrot.lane.b32.xlu0 %v13577_v17, %s8511_s26  ;;  %v13578_v10 = vmax.f32 %v9624_v62, 0.0  ;;  %v1762_v48 = vadd.f32 %v9407_v53, %v1428_v42 }
 0x253   : > { %v2022_v5 = vpop.f32.mrf.mxu0 }
 0x254   : > { %v13580_v47 = vmax.f32 %v9633_v21, 0.0  ;;  %v9642_v44 = vadd.f32 %v9535_v11, %v2092_v15  ;;  %v2093_v61 = vadd.f32 %v2022_v5, %v9445_v32  ;;  %2405 = vrot.lane.b32.xlu1 %v13578_v10, %s8511_s26  ;;  %v13773_v15 = vld [vmem:[#allocation5_spill] sm:$0xff] }
 0x255   : > { %v2024_v40 = vpop.f32.mrf.mxu0 }
 0x256   : > { %v9649_v16 = vadd.f32 %v9503_v4, %v2093_v61  ;;  %v2094_v26 = vadd.f32 %v2024_v40, %v9447_v3  ;;  %2407 = vrot.lane.b32.xlu0 %v13580_v47, %s8511_s26  ;;  %v13581_v1 = vmax.f32 %v9642_v44, 0.0  ;;  %v13772_v3 = vld [vmem:[#allocation27_spill] sm:$0xff]  ;;  %v13775_v40 = vld [vmem:[#allocation14_spill] sm:$0xff] }
 0x257   : > { %v2026_v11 = vpop.f32.mrf.mxu0  ;;  %v1029_v5 = vadd.f32 %v13773_v15, %v13772_v3  ;;  %v13774_v61 = vld [vmem:[#allocation35_spill] sm:$0xff] }
 0x258   : > { %v13596_v32 = vmax.f32 %v9649_v16, 0.0  ;;  %v9659_v52 = vadd.f32 %v9503_v4, %v2094_v26  ;;  %v2095_v13 = vadd.f32 %v2026_v11, %v9453_v9  ;;  %2409 = vrot.lane.b32.xlu1 %v13581_v1, %s8511_s26  ;;  %v1079_v55 = vadd.f32 %v13775_v40, %v13774_v61  ;;  %v13792_v1 = vld [vmem:[#allocation15_spill] sm:$0xff] }
 0x259   : > { %v2028_v19 = vpop.f32.mrf.mxu0  ;;  %v1412_v4 = vadd.f32 %v9385_v18, %v1029_v5  ;;  %v2079_v5 = vadd.f32 %v9540_v20, %v9389_v12 }
 0x25a   : > { %v9670_v53 = vadd.f32 %v9528_v0, %v2095_v13  ;;  %v2096_v42 = vadd.f32 %v2028_v19, %v1762_v48  ;;  %2411 = vrot.lane.b32.xlu0 %v13596_v32, %s8511_s26  ;;  %v13597_v9 = vmax.f32 %v9659_v52, 0.0  ;;  %v1432_v26 = vadd.f32 %v9465_v29, %v1079_v55 }
 0x25b   : > { %v2032_v11 = vpop.f32.mrf.mxu0  ;;  %v1746_v29 = vadd.f32 %v9343_v50, %v1412_v4 }
 0x25c   : > { %v13598_v3 = vmax.f32 %v9670_v53, 0.0  ;;  %v9680_v15 = vadd.f32 %v9528_v0, %v2096_v42  ;;  %v2097_v13 = vadd.f32 %v2032_v11, %v9461_v14  ;;  %2413 = vrot.lane.b32.xlu1 %v13597_v9, %s8511_s26  ;;  %v1766_v14 = vadd.f32 %v9423_v30, %v1432_v26  ;;  %v13776_v42 = vld [vmem:[#allocation26_spill] sm:$0xff]  ;;  %v13777_v11 = vld [vmem:[#allocation4_spill] sm:$0xff] }
 0x25d   : > { %v2034_v19 = vpop.f32.mrf.mxu0  ;;  %v1019_v50 = vadd.f32 %v13777_v11, %v13776_v42  ;;  %v2080_v30 = vadd.f32 %v9545_v2, %v1746_v29 }
 0x25e   : > { %v9687_v48 = vadd.f32 %v9520_v27, %v2097_v13  ;;  %v2098_v18 = vadd.f32 %v2034_v19, %v9463_v31  ;;  %2415 = vrot.lane.b32.xlu0 %v13598_v3, %s8511_s26  ;;  %v13599_v55 = vmax.f32 %v9680_v15, 0.0  ;;  %v2073_v19 = vadd.f32 %v9524_v38, %v9365_v45  ;;  %v2145_v38 = vpop.permute.xlu1 %2144 }
 0x25f   : > { %v2036_v0 = vpop.f32.mrf.mxu0  ;;  %v1408_v20 = vadd.f32 %v9369_v22, %v1019_v50  ;;  %v13778_v22 = vld [vmem:[#allocation49_spill] sm:$0xff]  ;;  %v13780_v50 = vld [vmem:[#allocation50_spill] sm:$0xff] }
 0x260   : > { %v13601_v61 = vmax.f32 %v9687_v48, 0.0  ;;  %v9700_v40 = vadd.f32 %v9520_v27, %v2098_v18  ;;  %v2099_v31 = vadd.f32 %v2036_v0, %v9469_v57  ;;  %2417 = vrot.lane.b32.xlu1 %v13599_v55, %s8511_s26  ;;  %v2160_v27 = vpop.permute.xlu0 %2159  ;;  %v2074_v0 = vadd.f32 %v9526_v39, %v13778_v22 }
 0x261   : > { %v2038_v4 = vpop.f32.mrf.mxu0  ;;  %v9721_v18 = vadd.f32 %v2160_v27, %v2079_v5  ;;  %v13779_v5 = vld [vmem:[#allocation45_spill] sm:$0xff]  ;;  %v9743_v11 = vadd.f32 %v2145_v38, %v2073_v19 }
 0x262   : > { %v9710_v26 = vadd.f32 %v9489_v54, %v2099_v31  ;;  %v2100_v12 = vadd.f32 %v2038_v4, %v1766_v14  ;;  %2419 = vrot.lane.b32.xlu0 %v13601_v61, %s8511_s26  ;;  %v13603_v57 = vmax.f32 %v9700_v40, 0.0  ;;  %v9734_v31 = vadd.f32 %v2160_v27, %v2080_v30  ;;  %v13782_v27 = vld [vmem:[#allocation3_spill] sm:$0xff] }
 0x263   : > { %v9717_v13 = vpop.f32.mrf.mxu0  ;;  %v1742_v42 = vadd.f32 %v13779_v5, %v1408_v20  ;;  %v2075_v4 = vadd.f32 %v9530_v60, %v13780_v50  ;;  %v13570_v39 = vmax.f32 %v9721_v18, 0.0  ;;  %v9755_v6 = vadd.f32 %v2145_v38, %v2074_v0  ;;  %v13783_v50 = vld [vmem:[#allocation48_spill] sm:$0xff] }
 0x264   : > { %v13600_v2 = vmax.f32 %v9710_v26, 0.0  ;;  %v9725_v29 = vadd.f32 %v9489_v54, %v2100_v12  ;;  %2421 = vrot.lane.b32.xlu1 %v13603_v57, %s8511_s26  ;;  %v13781_v12 = vld [vmem:[#allocation25_spill] sm:$0xff]  ;;  %v13572_v60 = vmax.f32 %v9734_v31, 0.0  ;;  %v2150_v19 = vpop.permute.xlu0 %2149  ;;  %v13571_v56 = vmax.f32 %v9743_v11, 0.0 }
 0x265   : > { %v9730_v14 = vpop.f32.mrf.mxu0  ;;  %v1009_v22 = vadd.f32 %v13782_v27, %v13781_v12  ;;  %v2076_v20 = vadd.f32 %v9532_v58, %v1742_v42  ;;  %v9764_v24 = vadd.f32 %v2150_v19, %v2075_v4  ;;  %v13573_v58 = vmax.f32 %v9755_v6, 0.0  ;;  %v2135_v42 = vpop.permute.xlu1 %2134  ;;  %v13784_v27 = vld [vmem:[#allocation40_spill] sm:$0xff] }
 0x266   : > { %2423 = vrot.lane.b32.xlu0 %v13600_v2, %s8511_s26  ;;  %v13602_v45 = vmax.f32 %v9725_v29, 0.0  ;;  %v9777_v4 = vadd.f32 %v2135_v42, %v9512_v63 }
 0x267   : > { %v9740_v54 = vpop.f32.mrf.mxu0  ;;  %v1404_v59 = vadd.f32 %v13783_v50, %v1009_v22  ;;  %v9770_v38 = vadd.f32 %v2150_v19, %v2076_v20  ;;  %v13574_v50 = vmax.f32 %v9764_v24, 0.0  ;;  %v9784_v19 = vadd.f32 %v2135_v42, %v9515_v49  ;;  %v13788_v42 = vld [vmem:[#allocation22_spill] sm:$0xff] }
 0x268   : > { %2425 = vrot.lane.b32.xlu1 %v13602_v45, %s8511_s26  ;;  %13785 = vst [vmem:[#allocation17_spill] sm:$0xff] %v9777_v4 }
 0x269   : > { %v9751_v30 = vpop.f32.mrf.mxu0  ;;  %v1738_v22 = vadd.f32 %v13784_v27, %v1404_v59  ;;  %13786 = vst [vmem:[#allocation41_spill] sm:$0xff] %v9784_v19  ;;  %v13579_v63 = vmax.f32 %v9770_v38, 0.0  ;;  %v13582_v27 = vmax.f32 %v9777_v4, 0.0  ;;  %v13816_v4 = vmax.f32 %v9680_v15, 0.0 }
 0x26a   : > { %2383 = vrot.lane.b32.xlu0 %v13570_v39, %s8511_s26  ;;  %v2140_v39 = vpop.permute.xlu0 %2139 }
 0x26b   : > { %v2052_v5 = vpop.f32.mrf.mxu0 }
 0x26c   : > { %2385 = vrot.lane.b32.xlu1 %v13572_v60, %s8511_s26  ;;  %v9793_v60 = vadd.f32 %v2140_v39, %v9518_v43 }
 0x26d   : > { %v2054_v0 = vpop.f32.mrf.mxu0 }
 0x26e   : > { %2371 = vrot.lane.b32.xlu0 %v13571_v56, %s8511_s26  ;;  %v2072_v56 = vadd.f32 %v9522_v28, %v1738_v22  ;;  %v13787_v28 = vld [vmem:[#allocation44_spill] sm:$0xff]  ;;  %v2106_v17 = vadd.f32 %v2054_v0, %v13789_v25  ;;  %v2225_v43 = vpop.permute.xlu0 %2224 }
 0x26f   : > { %v2056_v12 = vpop.f32.mrf.mxu0  ;;  %v1099_v22 = vadd.f32 %v13788_v42, %v13787_v28  ;;  %v13794_v42 = vld [vmem:[#allocation37_spill] sm:$0xff] }
 0x270   : > { %2373 = vrot.lane.b32.xlu1 %v13573_v58, %s8511_s26  ;;  %v2105_v58 = vadd.f32 %v2052_v5, %v9491_v23  ;;  %v9802_v37 = vadd.f32 %v2140_v39, %v2072_v56  ;;  %v13790_v5 = vld [vmem:[#allocation13_spill] sm:$0xff]  ;;  %v2235_v56 = vpop.permute.xlu1 %2234  ;;  %v9817_v0 = vadd.f32 %v2225_v43, %v2106_v17  ;;  %v13798_v17 = vld [vmem:[#allocation39_spill] sm:$0xff] }
 0x271   : > { %v2058_v20 = vpop.f32.mrf.mxu0  ;;  %v1440_v10 = vadd.f32 %v13790_v5, %v1099_v22 }
 0x272   : > { %2375 = vrot.lane.b32.xlu0 %v13574_v50, %s8511_s26  ;;  %v13583_v50 = vmax.f32 %v9784_v19, 0.0  ;;  %v9810_v47 = vadd.f32 %v2225_v43, %v2105_v58  ;;  %v13585_v39 = vmax.f32 %v9802_v37, 0.0  ;;  %13793 = vst [vmem:[#allocation42_spill] sm:$0xff] %v9817_v0  ;;  %v13795_v58 = vld [vmem:[#allocation9_spill] sm:$0xff]  ;;  %v13799_v43 = vld [vmem:[#allocation18_spill] sm:$0xff] }
 0x273   : > { %v2062_v59 = vpop.f32.mrf.mxu0  ;;  %v1774_v22 = vadd.f32 %v13795_v58, %v1440_v10  ;;  %v13802_v58 = vld [vmem:[#allocation32_spill] sm:$0xff] }
 0x274   : > { %2377 = vrot.lane.b32.xlu1 %v13579_v63, %s8511_s26  ;;  %v13584_v63 = vmax.f32 %v9793_v60, 0.0  ;;  %13791 = vst [vmem:[#allocation19_spill] sm:$0xff] %v9810_v47  ;;  %v2109_v28 = vadd.f32 %v2062_v59, %v13792_v1  ;;  %v13588_v1 = vmax.f32 %v9810_v47, 0.0  ;;  %v13796_v59 = vld [vmem:[#allocation36_spill] sm:$0xff]  ;;  %v2230_v10 = vpop.permute.xlu1 %2229 }
 0x275   : > { %v2064_v49 = vpop.f32.mrf.mxu0  ;;  %v2107_v5 = vadd.f32 %v2056_v12, %v13796_v59  ;;  %v13801_v12 = vld [vmem:[#allocation33_spill] sm:$0xff]  ;;  %v2101_v59 = vadd.f32 %v9717_v13, %v13802_v58  ;;  %v2215_v13 = vpop.permute.xlu0 %2214 }
 0x276   : > { %2363 = vrot.lane.b32.xlu0 %v13582_v27, %s8511_s26  ;;  %v9826_v27 = vadd.f32 %v2235_v56, %v2109_v28 }
 0x277   : > { %v2066_v23 = vpop.f32.mrf.mxu0 }
 0x278   : > { %2365 = vrot.lane.b32.xlu1 %v13583_v50, %s8511_s26  ;;  %v2110_v23 = vadd.f32 %v2064_v49, %v13794_v42  ;;  %13797 = vst [vmem:[#allocation20_spill] sm:$0xff] %v9826_v27  ;;  %v13589_v49 = vmax.f32 %v9817_v0, 0.0  ;;  %v2108_v42 = vadd.f32 %v2058_v20, %v1774_v22  ;;  %v13804_v20 = vld [vmem:[#allocation11_spill] sm:$0xff]  ;;  %v13814_v0 = vmax.f32 %v9687_v48, 0.0 }
 0x279   : > { %v2067_v25 = vpop.f32.mrf.mxu0 }
 0x27a   : > { %2367 = vrot.lane.b32.xlu0 %v13584_v63, %s8511_s26  ;;  %v1089_v25 = vadd.f32 %v13799_v43, %v13798_v17  ;;  %v9834_v50 = vadd.f32 %v2235_v56, %v2110_v23  ;;  %v9842_v63 = vadd.f32 %v2230_v10, %v2107_v5  ;;  %v2102_v56 = vadd.f32 %v9730_v14, %v13804_v20  ;;  %v13806_v5 = vld [vmem:[#allocation51_spill] sm:$0xff] }
 0x27b   : > { %v9850_v23 = vadd.f32 %v2230_v10, %v2108_v42  ;;  %v9857_v43 = vadd.f32 %v2215_v13, %v2101_v59 }
 0x27c   : > { %2369 = vrot.lane.b32.xlu1 %v13585_v39, %s8511_s26  ;;  %13800 = vst [vmem:[#allocation43_spill] sm:$0xff] %v9834_v50  ;;  %v1436_v28 = vadd.f32 %v13801_v12, %v1089_v25  ;;  %13803 = vst [vmem:[#allocation21_spill] sm:$0xff] %v9842_v63  ;;  %v13593_v39 = vmax.f32 %v9826_v27, 0.0  ;;  %v13595_v22 = vmax.f32 %v9834_v50, 0.0  ;;  %v13808_v25 = vld [vmem:[#allocation12_spill] sm:$0xff]  ;;  %v13591_v58 = vmax.f32 %v9842_v63, 0.0 }
 0x27d   : > { %13805 = vst [vmem:[#allocation46_spill] sm:$0xff] %v9850_v23  ;;  %13807 = vst [vmem:[#allocation23_spill] sm:$0xff] %v9857_v43  ;;  %v2103_v12 = vadd.f32 %v9740_v54, %v13808_v25  ;;  %v9865_v14 = vadd.f32 %v2215_v13, %v2102_v56  ;;  %v13592_v10 = vmax.f32 %v9850_v23, 0.0  ;;  %v13586_v59 = vmax.f32 %v9857_v43, 0.0 }
 0x27e   : > { %2435 = vrot.lane.b32.xlu0 %v13588_v1, %s8511_s26  ;;  %v1770_v17 = vadd.f32 %v13806_v5, %v1436_v28  ;;  %v2220_v28 = vpop.permute.xlu1 %2219  ;;  %v13815_v23 = vmax.f32 %v9710_v26, 0.0 }
 0x27f   : > { %13809 = vst [vmem:[#allocation47_spill] sm:$0xff] %v9865_v14  ;;  %v9873_v54 = vadd.f32 %v2220_v28, %v2103_v12  ;;  %v13587_v20 = vmax.f32 %v9865_v14, 0.0  ;;  %v13813_v14 = vmax.f32 %v9725_v29, 0.0 }
 0x280   : > { %2437 = vrot.lane.b32.xlu1 %v13589_v49, %s8511_s26  ;;  %v2104_v42 = vadd.f32 %v9751_v30, %v1770_v17 }
 0x281   : > { %13810 = vst [vmem:[#allocation24_spill] sm:$0xff] %v9873_v54  ;;  %v13590_v30 = vmax.f32 %v9873_v54, 0.0  ;;  %v13812_v54 = vmax.f32 %v9700_v40, 0.0 }
 0x282   : > { %2443 = vrot.lane.b32.xlu0 %v13593_v39, %s8511_s26  ;;  %v9879_v56 = vadd.f32 %v2220_v28, %v2104_v42 }
 0x284   : > { %2445 = vrot.lane.b32.xlu1 %v13595_v22, %s8511_s26  ;;  %13811 = vst [vmem:[#allocation28_spill] sm:$0xff] %v9879_v56  ;;  %v13594_v13 = vmax.f32 %v9879_v56, 0.0 }
 0x286   : > { %2439 = vrot.lane.b32.xlu0 %v13591_v58, %s8511_s26 }
 0x288   : > { %2441 = vrot.lane.b32.xlu1 %v13592_v10, %s8511_s26 }
 0x28a   : > { %2427 = vrot.lane.b32.xlu0 %v13586_v59, %s8511_s26 }
 0x28c   : > { %2429 = vrot.lane.b32.xlu1 %v13587_v20, %s8511_s26 }
 0x28e   : > { %2431 = vrot.lane.b32.xlu0 %v13590_v30, %s8511_s26 }
 0x290   : > { %2433 = vrot.lane.b32.xlu1 %v13594_v13, %s8511_s26 }
 0x2ac   : > { %v9895_v5 = vpop.permute.xlu0 %2379 }
 0x2ae   : > { %v9897_v17 = vpop.permute.xlu1 %2381 }
 0x2b4   : > { %v9899_v25 = vpop.permute.xlu0 %2387 }
 0x2b6   : > { %v9901_v12 = vpop.permute.xlu1 %2389 }
 0x2b8   : > { %v2392_v42 = vpop.permute.xlu0 %2391 }
 0x2ba   : > { %v9903_v28 = vpop.permute.xlu1 %2393 }
 0x2bc   : > { %v2396_v59 = vpop.permute.xlu0 %2395 }
 0x2be   : > { %v2398_v20 = vpop.permute.xlu1 %2397 }
 0x2c0   : > { %v2400_v1 = vpop.permute.xlu0 %2399 }
 0x2c2   : > { %v2402_v49 = vpop.permute.xlu1 %2401 }
 0x2c4   : > { %v2404_v30 = vpop.permute.xlu0 %2403 }
 0x2c6   : > { %v2406_v58 = vpop.permute.xlu1 %2405 }
 0x2c8   : > { %v2408_v10 = vpop.permute.xlu0 %2407 }
 0x2ca   : > { %v2410_v39 = vpop.permute.xlu1 %2409 }
 0x2cb   : > { %v2459_v48 = vsel %vm676_vm1, %v2408_v10, %v2410_v39 }
 0x2cc   : > { %v2412_v13 = vpop.permute.xlu0 %2411 }
 0x2ce   : > { %v2414_v22 = vpop.permute.xlu1 %2413 }
 0x2d0   : > { %v2416_v32 = vpop.permute.xlu0 %2415 }
 0x2d2   : > { %v2418_v9 = vpop.permute.xlu1 %2417 }
 0x2d3   : > { %v2461_v57 = vsel %vm676_vm1, %v2416_v32, %v2418_v9  ;;  %v2538_v32 = vadd.f32 %v2418_v9, %v13816_v4 }
 0x2d4   : > { %v2420_v3 = vpop.permute.xlu0 %2419 }
 0x2d6   : > { %v2422_v55 = vpop.permute.xlu1 %2421 }
 0x2d7   : > { %v2462_v61 = vsel %vm676_vm1, %v2420_v3, %v2422_v55  ;;  %v2540_v43 = vadd.f32 %v2422_v55, %v13812_v54  ;;  %v2460_v3 = vsel %vm676_vm1, %v2412_v13, %v2414_v22  ;;  %v13817_v55 = vmax.f32 %v9670_v53, 0.0 }
 0x2d8   : > { %v2424_v2 = vpop.permute.xlu0 %2423  ;;  %v2539_v63 = vadd.f32 %v2462_v61, %v13814_v0  ;;  %v13818_v61 = vmax.f32 %v9659_v52, 0.0  ;;  %v13820_v53 = vmax.f32 %v9642_v44, 0.0  ;;  %v13821_v52 = vmax.f32 %v9633_v21, 0.0 }
 0x2d9   : > { %v2537_v40 = vadd.f32 %v2461_v57, %v13817_v55  ;;  %v2456_v21 = vsel %vm676_vm1, %v2396_v59, %v2398_v20  ;;  %v2454_v59 = vsel %vm676_vm1, %v9899_v25, %v9901_v12 }
 0x2da   : > { %v2426_v45 = vpop.permute.xlu1 %2425  ;;  %v2536_v26 = vadd.f32 %v2414_v22, %v13818_v61  ;;  %v2534_v57 = vadd.f32 %v2410_v39, %v13820_v53 }
 0x2db   : > { %v2463_v56 = vsel %vm676_vm1, %v2424_v2, %v2426_v45  ;;  %v2542_v47 = vadd.f32 %v2426_v45, %v13813_v14  ;;  %v13819_v45 = vmax.f32 %v9649_v16, 0.0  ;;  %v2457_v16 = vsel %vm676_vm1, %v2400_v1, %v2402_v49 }
 0x2dc   : > { %v2541_v27 = vadd.f32 %v2463_v56, %v13815_v23  ;;  %v2384_v50 = vpop.permute.xlu0 %2383  ;;  %v9937_v4 = vpack.c.bf16 %v2538_v32, %v2536_v26  ;;  %v13822_v23 = vmax.f32 %v9624_v62, 0.0  ;;  %v13824_v14 = vmax.f32 %v9607_v34, 0.0 }
 0x2dd   : > { %v9919_v19 = vpack.c.bf16 %v2542_v47, %v2540_v43  ;;  %v2535_v15 = vadd.f32 %v2460_v3, %v13819_v45  ;;  %v2458_v47 = vsel %vm676_vm1, %v2404_v30, %v2406_v58  ;;  %v13823_v43 = vmax.f32 %v9614_v35, 0.0 }
 0x2de   : > { %v9923_v2 = vpack.c.bf16 %v2541_v27, %v2539_v63  ;;  %v2386_v29 = vpop.permute.xlu1 %2385  ;;  %v2533_v63 = vadd.f32 %v2459_v48, %v13821_v52  ;;  %v2532_v22 = vadd.f32 %v2406_v58, %v13822_v23  ;;  %v2530_v10 = vadd.f32 %v2402_v49, %v13824_v14 }
 0x2df   : > { %2758 = vrot.lane.b32.xlu1 %v9919_v19, %s8513_s29  ;;  %v9941_v27 = vpack.c.bf16 %v2537_v40, %v2535_v15  ;;  %v2531_v44 = vadd.f32 %v2458_v47, %v13823_v43  ;;  %v13825_v62 = vmax.f32 %v9599_v7, 0.0  ;;  %v2455_v35 = vsel %vm676_vm1, %v2392_v42, %v9903_v28  ;;  %v13834_v47 = vld [vmem:[#allocation38_spill] sm:$0xff] }
 0x2e0   : > { %v2372_v9 = vpop.permute.xlu0 %2371  ;;  %2756 = vrot.lane.b32.xlu0 %v9923_v2, %s8513_s29  ;;  %v9955_v54 = vpack.c.bf16 %v2534_v57, %v2532_v22  ;;  %v13826_v30 = vmax.f32 %v9591_v36, 0.0  ;;  %v13827_v34 = vmax.f32 %v9582_v51, 0.0  ;;  %v13828_v3 = vmax.f32 %v9576_v33, 0.0 }
 0x2e1   : > { %v2529_v1 = vadd.f32 %v2457_v16, %v13825_v62  ;;  %v9959_v58 = vpack.c.bf16 %v2533_v63, %v2531_v44  ;;  %v13830_v40 = vmax.f32 %v9563_v8, 0.0  ;;  %v2453_v61 = vsel %vm676_vm1, %v2384_v50, %v2386_v29 }
 0x2e2   : > { %v2374_v0 = vpop.permute.xlu1 %2373  ;;  %v2528_v13 = vadd.f32 %v2398_v20, %v13826_v30  ;;  %v2527_v49 = vadd.f32 %v2456_v21, %v13827_v34  ;;  %v2526_v42 = vadd.f32 %v9903_v28, %v13828_v3  ;;  %v13829_v20 = vmax.f32 %v9568_v46, 0.0  ;;  %v13844_v34 = vld [vmem:[#allocation41_spill] sm:$0xff] }
 0x2e3   : > { %2754 = vrot.lane.b32.xlu1 %v9937_v4, %s8513_s29  ;;  %v2524_v48 = vadd.f32 %v9901_v12, %v13830_v40  ;;  %v13831_v33 = vmax.f32 %v9558_v41, 0.0  ;;  %v2452_v28 = vsel %vm676_vm1, %v9895_v5, %v9897_v17  ;;  %v13832_v8 = vmax.f32 %v9734_v31, 0.0  ;;  %v13836_v5 = vld [vmem:[#allocation16_spill] sm:$0xff]  ;;  %v13846_v3 = vld [vmem:[#allocation17_spill] sm:$0xff] }
 0x2e4   : > { %v2376_v39 = vpop.permute.xlu0 %2375  ;;  %2752 = vrot.lane.b32.xlu0 %v9941_v27, %s8513_s29  ;;  %v9977_v36 = vpack.c.bf16 %v2530_v10, %v2528_v13  ;;  %v2525_v32 = vadd.f32 %v2455_v35, %v13829_v20  ;;  %v9981_v55 = vpack.c.bf16 %v2529_v1, %v2527_v49  ;;  %v13833_v45 = vmax.f32 %v9721_v18, 0.0 }
 0x2e5   : > { %v2523_v25 = vadd.f32 %v2454_v59, %v13831_v33  ;;  %v9996_v26 = vpack.c.bf16 %v2526_v42, %v2524_v48  ;;  %v2522_v12 = vadd.f32 %v2386_v29, %v13832_v8  ;;  %v13835_v53 = vmax.f32 %v13834_v47, 0.0 }
 0x2e6   : > { %v2378_v56 = vpop.permute.xlu1 %2377  ;;  %v2521_v15 = vadd.f32 %v2453_v61, %v13833_v45  ;;  %v13837_v63 = vmax.f32 %v13836_v5, 0.0  ;;  %v2450_v18 = vsel %vm676_vm1, %v2372_v9, %v2374_v0  ;;  %v13838_v23 = vmax.f32 %v9770_v38, 0.0  ;;  %v13852_v45 = vld [vmem:[#allocation46_spill] sm:$0xff] }
 0x2e7   : > { %2750 = vrot.lane.b32.xlu1 %v9955_v54, %s8513_s29  ;;  %v10000_v50 = vpack.c.bf16 %v2525_v32, %v2523_v25  ;;  %v2520_v57 = vadd.f32 %v9897_v17, %v13835_v53  ;;  %v2451_v52 = vsel %vm676_vm1, %v2376_v39, %v2378_v56  ;;  %v13839_v43 = vmax.f32 %v9764_v24, 0.0  ;;  %v13854_v53 = vld [vmem:[#allocation21_spill] sm:$0xff] }
 0x2e8   : > { %2748 = vrot.lane.b32.xlu0 %v9959_v58, %s8513_s29  ;;  %v2364_v7 = vpop.permute.xlu0 %2363  ;;  %v2519_v16 = vadd.f32 %v2452_v28, %v13837_v63  ;;  %v2518_v22 = vadd.f32 %v2378_v56, %v13838_v23  ;;  %v13840_v21 = vmax.f32 %v9755_v6, 0.0  ;;  %v13841_v62 = vmax.f32 %v9743_v11, 0.0  ;;  %v8339_v63 = vld [vmem:[%s13550_s3 + $0xa4] ss:$8 sps:$4 sm:$0xff]  }
 0x2e9   : > { %v10014_v29 = vpack.c.bf16 %v2522_v12, %v2520_v57  ;;  %v2517_v44 = vadd.f32 %v2451_v52, %v13839_v43  ;;  %v13842_v56 = vmax.f32 %v9802_v37, 0.0  ;;  %v13843_v35 = vmax.f32 %v9793_v60, 0.0  ;;  %v13848_v60 = vld [vmem:[#allocation43_spill] sm:$0xff]  ;;  %7675 = vmatprep.mubr.msk.bf16.mxu1 %vm2803_vm5, %v8339_v63 }
 0x2ea   : > { %v2366_v51 = vpop.permute.xlu1 %2365  ;;  %v10019_v17 = vpack.c.bf16 %v2521_v15, %v2519_v16  ;;  %v2516_v14 = vadd.f32 %v2374_v0, %v13840_v21  ;;  %v2515_v9 = vadd.f32 %v2450_v18, %v13841_v62  ;;  %v13845_v11 = vmax.f32 %v13844_v34, 0.0  ;;  %v13856_v16 = vld [vmem:[#allocation42_spill] sm:$0xff]  ;;  %v13860_v62 = vld [vmem:[#allocation47_spill] sm:$0xff] }
 0x2eb   : > { %2746 = vrot.lane.b32.xlu1 %v9977_v36, %s8513_s29  ;;  %v2448_v24 = vsel %vm676_vm1, %v2364_v7, %v2366_v51  ;;  %v13847_v42 = vmax.f32 %v13846_v3, 0.0  ;;  %v13849_v32 = vmax.f32 %v13848_v60, 0.0  ;;  %v13853_v15 = vmax.f32 %v13852_v45, 0.0 }
 0x2ec   : > { %2744 = vrot.lane.b32.xlu0 %v9981_v55, %s8513_s29  ;;  %v2368_v46 = vpop.permute.xlu0 %2367  ;;  %v10032_v1 = vpack.c.bf16 %v2518_v22, %v2516_v14  ;;  %v10037_v0 = vpack.c.bf16 %v2517_v44, %v2515_v9  ;;  %v2512_v49 = vadd.f32 %v2366_v51, %v13845_v11  ;;  %v13850_v51 = vld [vmem:[#allocation20_spill] sm:$0xff]  ;;  %v13855_v57 = vmax.f32 %v13854_v53, 0.0 }
 0x2ed   : > { %v2511_v7 = vadd.f32 %v2448_v24, %v13847_v42  ;;  %v13851_v61 = vmax.f32 %v13850_v51, 0.0  ;;  %v13857_v18 = vmax.f32 %v13856_v16, 0.0  ;;  %v13861_v9 = vmax.f32 %v13860_v62, 0.0  ;;  %v13866_v11 = vld [vmem:[#allocation24_spill] sm:$0xff] }
 0x2ee   : > { %v2370_v41 = vpop.permute.xlu1 %2369 }
 0x2ef   : > { %2742 = vrot.lane.b32.xlu1 %v9996_v26, %s8513_s29  ;;  %v2449_v10 = vsel %vm676_vm1, %v2368_v46, %v2370_v41  ;;  %v2514_v6 = vadd.f32 %v2370_v41, %v13842_v56  ;;  %v13862_v56 = vld [vmem:[#allocation28_spill] sm:$0xff] }
 0x2f0   : > { %2740 = vrot.lane.b32.xlu0 %v10000_v50, %s8513_s29  ;;  %v2436_v31 = vpop.permute.xlu0 %2435  ;;  %v2513_v30 = vadd.f32 %v2449_v10, %v13843_v35 }
 0x2f1   : > { %v10050_v20 = vpack.c.bf16 %v2514_v6, %v2512_v49  ;;  %v13863_v6 = vmax.f32 %v13862_v56, 0.0  ;;  %v13867_v49 = vmax.f32 %v13866_v11, 0.0  ;;  %v8340_v11 = vld [vmem:[%s13550_s3 + $0xb4] ss:$8 sps:$4 sm:$0xff]  }
 0x2f2   : > { %v2438_v39 = vpop.permute.xlu1 %2437  ;;  %v10054_v48 = vpack.c.bf16 %v2513_v30, %v2511_v7  ;;  %v13864_v30 = vld [vmem:[#allocation23_spill] sm:$0xff] }
 0x2f3   : > { %2738 = vrot.lane.b32.xlu1 %v10014_v29, %s8513_s29  ;;  %v2466_v8 = vsel %vm676_vm1, %v2436_v31, %v2438_v39  ;;  %v2548_v23 = vadd.f32 %v2438_v39, %v13857_v18  ;;  %v13858_v31 = vld [vmem:[#allocation19_spill] sm:$0xff] }
 0x2f4   : > { %2736 = vrot.lane.b32.xlu0 %v10019_v17, %s8513_s29  ;;  %v2444_v38 = vpop.permute.xlu0 %2443  ;;  %v13859_v22 = vmax.f32 %v13858_v31, 0.0  ;;  %v8359_v7 = vld [vmem:[%s13550_s3 + $0x144] ss:$8 sps:$4 sm:$0xff]  }
 0x2f5   : > { %7757 = vmatprep.mubr.msk.bf16.mxu0 %vm2803_vm5, %v8359_v7  ;;  %v8342_v7 = vld [vmem:[%s13550_s3 + $0xb0] ss:$8 sps:$4 sm:$0xff]  }
 0x2f6   : > { %v2446_v13 = vpop.permute.xlu1 %2445  ;;  %v2547_v43 = vadd.f32 %v2466_v8, %v13859_v22 }
 0x2f7   : > { %v2468_v59 = vsel %vm676_vm1, %v2444_v38, %v2446_v13  ;;  %2734 = vrot.lane.b32.xlu1 %v10032_v1, %s8513_s29  ;;  %v2552_v40 = vadd.f32 %v2446_v13, %v13849_v32  ;;  %v13865_v13 = vmax.f32 %v13864_v30, 0.0 }
 0x2f8   : > { %2732 = vrot.lane.b32.xlu0 %v10037_v0, %s8513_s29  ;;  %v2440_v37 = vpop.permute.xlu0 %2439  ;;  %v2551_v33 = vadd.f32 %v2468_v59, %v13851_v61 }
 0x2f9   : > { %v10064_v12 = vpack.c.bf16 %v2552_v40, %v2552_v40 }
 0x2fa   : > { %v2442_v25 = vpop.permute.xlu1 %2441  ;;  %v10068_v47 = vpack.c.bf16 %v2551_v33, %v2551_v33 }
 0x2fb   : > { %v2467_v46 = vsel %vm676_vm1, %v2440_v37, %v2442_v25  ;;  %2730 = vrot.lane.b32.xlu1 %v10050_v20, %s8513_s29  ;;  %v2550_v41 = vadd.f32 %v2442_v25, %v13853_v15 }
 0x2fc   : > { %2728 = vrot.lane.b32.xlu0 %v10054_v48, %s8513_s29  ;;  %v2428_v28 = vpop.permute.xlu0 %2427  ;;  %v2549_v52 = vadd.f32 %v2467_v46, %v13855_v57 }
 0x2fd   : > { %v10084_v44 = vpack.c.bf16 %v2550_v41, %v2548_v23 }
 0x2fe   : > { %v2430_v5 = vpop.permute.xlu1 %2429  ;;  %v10087_v14 = vpack.c.bf16 %v2549_v52, %v2547_v43 }
 0x2ff   : > { %2770 = vrot.lane.b32.xlu1 %v10064_v12, %s8513_s29  ;;  %v2464_v21 = vsel %vm676_vm1, %v2428_v28, %v2430_v5  ;;  %v2544_v38 = vadd.f32 %v2430_v5, %v13861_v9 }
 0x300   : > { %2768 = vrot.lane.b32.xlu0 %v10068_v47, %s8513_s29  ;;  %v2432_v10 = vpop.permute.xlu0 %2431  ;;  %v2543_v34 = vadd.f32 %v2464_v21, %v13865_v13 }
 0x302   : > { %v2434_v39 = vpop.permute.xlu1 %2433 }
 0x303   : > { %v2465_v24 = vsel %vm676_vm1, %v2432_v10, %v2434_v39  ;;  %v2546_v35 = vadd.f32 %v2434_v39, %v13863_v6  ;;  %2766 = vrot.lane.b32.xlu1 %v10084_v44, %s8513_s29  ;;  %vm7354_vm1 = vcmask 64512  }
 0x304   : > { %v2545_v59 = vadd.f32 %v2465_v24, %v13867_v49  ;;  %2764 = vrot.lane.b32.xlu0 %v10087_v14, %s8513_s29 }
 0x305   : > { %v10102_v3 = vpack.c.bf16 %v2546_v35, %v2544_v38  ;;  %v8337_v35 = vld [vmem:[%s13550_s3 + $0xa0] ss:$8 sps:$4 sm:$0xff]  }
 0x306   : > { %v10104_v42 = vpack.c.bf16 %v2545_v59, %v2543_v34 }
 0x307   : > { %2762 = vrot.lane.b32.xlu1 %v10102_v3, %s8513_s29 }
 0x308   : > { %2760 = vrot.lane.b32.xlu0 %v10104_v42, %s8513_s29 }
 0x30b   : > { %3374 = vrot.lane.b32.xlu1 %v9919_v19, %s8515_s19 }
 0x30c   : > { %3372 = vrot.lane.b32.xlu0 %v9923_v2, %s8515_s19 }
 0x30f   : > { %3370 = vrot.lane.b32.xlu1 %v9937_v4, %s8515_s19 }
 0x310   : > { %3368 = vrot.lane.b32.xlu0 %v9941_v27, %s8515_s19 }
 0x313   : > { %3366 = vrot.lane.b32.xlu1 %v9955_v54, %s8515_s19 }
 0x314   : > { %3364 = vrot.lane.b32.xlu0 %v9959_v58, %s8515_s19 }
 0x317   : > { %3362 = vrot.lane.b32.xlu1 %v9977_v36, %s8515_s19 }
 0x318   : > { %3360 = vrot.lane.b32.xlu0 %v9981_v55, %s8515_s19 }
 0x31b   : > { %3358 = vrot.lane.b32.xlu1 %v9996_v26, %s8515_s19 }
 0x31c   : > { %3356 = vrot.lane.b32.xlu0 %v10000_v50, %s8515_s19 }
 0x31f   : > { %3354 = vrot.lane.b32.xlu1 %v10014_v29, %s8515_s19 }
 0x320   : > { %3352 = vrot.lane.b32.xlu0 %v10019_v17, %s8515_s19 }
 0x323   : > { %3350 = vrot.lane.b32.xlu1 %v10032_v1, %s8515_s19 }
 0x324   : > { %3348 = vrot.lane.b32.xlu0 %v10037_v0, %s8515_s19 }
 0x327   : > { %3346 = vrot.lane.b32.xlu1 %v10050_v20, %s8515_s19 }
 0x328   : > { %3344 = vrot.lane.b32.xlu0 %v10054_v48, %s8515_s19 }
 0x32b   : > { %3386 = vrot.lane.b32.xlu1 %v10064_v12, %s8515_s19 }
 0x32c   : > { %3380 = vrot.lane.b32.xlu0 %v10087_v14, %s8515_s19 }
 0x32f   : > { %3382 = vrot.lane.b32.xlu1 %v10084_v44, %s8515_s19 }
 0x330   : > { %3384 = vrot.lane.b32.xlu0 %v10068_v47, %s8515_s19 }
 0x333   : > { %3378 = vrot.lane.b32.xlu1 %v10102_v3, %s8515_s19 }
 0x334   : > { %3376 = vrot.lane.b32.xlu0 %v10104_v42, %s8515_s19 }
 0x337   : > { %3769 = vrot.lane.b32.xlu1 %v9919_v19, %s8516_s16 }
 0x338   : > { %3767 = vrot.lane.b32.xlu0 %v9923_v2, %s8516_s16 }
 0x33b   : > { %4165 = vrot.lane.b32.xlu1 %v9919_v19, %s8517_s17 }
 0x33c   : > { %4163 = vrot.lane.b32.xlu0 %v9923_v2, %s8517_s17 }
 0x33f   : > { %3765 = vrot.lane.b32.xlu1 %v9937_v4, %s8516_s16 }
 0x340   : > { %3763 = vrot.lane.b32.xlu0 %v9941_v27, %s8516_s16 }
 0x343   : > { %4161 = vrot.lane.b32.xlu1 %v9937_v4, %s8517_s17 }
 0x344   : > { %4159 = vrot.lane.b32.xlu0 %v9941_v27, %s8517_s17 }
 0x347   : > { %3761 = vrot.lane.b32.xlu1 %v9955_v54, %s8516_s16 }
 0x348   : > { %3759 = vrot.lane.b32.xlu0 %v9959_v58, %s8516_s16 }
 0x34b   : > { %4157 = vrot.lane.b32.xlu1 %v9955_v54, %s8517_s17 }
 0x34c   : > { %4155 = vrot.lane.b32.xlu0 %v9959_v58, %s8517_s17 }
 0x34f   : > { %3757 = vrot.lane.b32.xlu1 %v9977_v36, %s8516_s16 }
 0x350   : > { %3755 = vrot.lane.b32.xlu0 %v9981_v55, %s8516_s16 }
 0x351   : > { %v2759_v37 = vpop.permute.xlu1 %2758 }
 0x352   : > { %2841 = vmatprep.subr.bf16.mxu1 %v2759_v37  ;;  %v2757_v60 = vpop.permute.xlu0 %2756 }
 0x353   : > { %v2779_v32 = vsel %vm1208_vm2, %v2757_v60, %v2759_v37  ;;  %4153 = vrot.lane.b32.xlu1 %v9977_v36, %s8517_s17  ;;  %v8343_v60 = vld [vmem:[%s13550_s3 + $0xc4] ss:$8 sps:$4 sm:$0xff]  }
 0x354   : > { %4151 = vrot.lane.b32.xlu0 %v9981_v55, %s8517_s17  ;;  %2842 = vmatpush1.bf16.msra.mxu1 %v2779_v32 }
 0x355   : > { %v2755_v40 = vpop.permute.xlu1 %2754 }
 0x356   : > { %2843 = vmatprep.subr.bf16.mxu1 %v2755_v40  ;;  %v2753_v51 = vpop.permute.xlu0 %2752 }
 0x357   : > { %v2778_v61 = vsel %vm1208_vm2, %v2753_v51, %v2755_v40  ;;  %3753 = vrot.lane.b32.xlu1 %v9996_v26, %s8516_s16  ;;  %v4434_v40 = vld [vmem:[%s13551_s4 + $0x70] sm:$0xff]  ;;  %v4435_v51 = vld [vmem:[%s13551_s4 + $0x78] sm:$0xff] }
 0x358   : > { %3751 = vrot.lane.b32.xlu0 %v10000_v50, %s8516_s16  ;;  %2844 = vmatpush1.bf16.msra.mxu1 %v2778_v61 }
 0x359   : > { %v2751_v33 = vpop.permute.xlu1 %2750 }
 0x35a   : > { %2845 = vmatprep.subr.bf16.mxu1 %v2751_v33  ;;  %v2749_v25 = vpop.permute.xlu0 %2748 }
 0x35b   : > { %v2777_v46 = vsel %vm1208_vm2, %v2749_v25, %v2751_v33  ;;  %4149 = vrot.lane.b32.xlu1 %v9996_v26, %s8517_s17  ;;  %v8346_v25 = vld [vmem:[%s13550_s3 + $0xd4] ss:$8 sps:$4 sm:$0xff]  }
 0x35c   : > { %4147 = vrot.lane.b32.xlu0 %v10000_v50, %s8517_s17  ;;  %2846 = vmatpush1.bf16.msra.mxu1 %v2777_v46 }
 0x35d   : > { %v2747_v28 = vpop.permute.xlu1 %2746 }
 0x35e   : > { %2847 = vmatprep.subr.bf16.mxu1 %v2747_v28  ;;  %v2745_v8 = vpop.permute.xlu0 %2744 }
 0x35f   : > { %v2776_v45 = vsel %vm1208_vm2, %v2745_v8, %v2747_v28  ;;  %3749 = vrot.lane.b32.xlu1 %v10014_v29, %s8516_s16 }
 0x360   : > { %3747 = vrot.lane.b32.xlu0 %v10019_v17, %s8516_s16  ;;  %2848 = vmatpush1.bf16.msra.mxu1 %v2776_v45  ;;  %v4430_v45 = vld [vmem:[%s13551_s4 + $0x50] sm:$0xff] }
 0x361   : > { %v2743_v15 = vpop.permute.xlu1 %2742 }
 0x362   : > { %2849 = vmatprep.subr.bf16.mxu1 %v2743_v15  ;;  %v2741_v41 = vpop.permute.xlu0 %2740 }
 0x363   : > { %v2775_v53 = vsel %vm1208_vm2, %v2741_v41, %v2743_v15  ;;  %4145 = vrot.lane.b32.xlu1 %v10014_v29, %s8517_s17 }
 0x364   : > { %4143 = vrot.lane.b32.xlu0 %v10019_v17, %s8517_s17  ;;  %2850 = vmatpush1.bf16.msra.mxu1 %v2775_v53 }
 0x365   : > { %v2739_v57 = vpop.permute.xlu1 %2738 }
 0x366   : > { %2851 = vmatprep.subr.bf16.mxu1 %v2739_v57  ;;  %v2737_v52 = vpop.permute.xlu0 %2736 }
 0x367   : > { %v2774_v5 = vsel %vm1208_vm2, %v2737_v52, %v2739_v57  ;;  %3745 = vrot.lane.b32.xlu1 %v10032_v1, %s8516_s16  ;;  %v8349_v57 = vld [vmem:[%s13550_s3 + $0xe4] ss:$8 sps:$4 sm:$0xff]  }
 0x368   : > { %3743 = vrot.lane.b32.xlu0 %v10037_v0, %s8516_s16  ;;  %2852 = vmatpush1.bf16.msra.mxu1 %v2774_v5 }
 0x369   : > { %v2735_v63 = vpop.permute.xlu1 %2734 }
 0x36a   : > { %2853 = vmatprep.subr.bf16.mxu1 %v2735_v63  ;;  %v2733_v16 = vpop.permute.xlu0 %2732 }
 0x36b   : > { %v2773_v18 = vsel %vm1208_vm2, %v2733_v16, %v2735_v63  ;;  %4141 = vrot.lane.b32.xlu1 %v10032_v1, %s8517_s17  ;;  %v4426_v16 = vld [vmem:[%s13551_s4 + $0x30] sm:$0xff] }
 0x36c   : > { %4139 = vrot.lane.b32.xlu0 %v10037_v0, %s8517_s17  ;;  %2854 = vmatpush1.bf16.msra.mxu1 %v2773_v18 }
 0x36d   : > { %v2731_v23 = vpop.permute.xlu1 %2730 }
 0x36e   : > { %2855 = vmatprep.subr.bf16.mxu1 %v2731_v23  ;;  %v2729_v31 = vpop.permute.xlu0 %2728 }
 0x36f   : > { %v2772_v22 = vsel %vm1208_vm2, %v2729_v31, %v2731_v23  ;;  %3741 = vrot.lane.b32.xlu1 %v10050_v20, %s8516_s16  ;;  %v8352_v23 = vld [vmem:[%s13550_s3 + $0xf4] ss:$8 sps:$4 sm:$0xff]  }
 0x370   : > { %3739 = vrot.lane.b32.xlu0 %v10054_v48, %s8516_s16  ;;  %2856 = vmatpush1.bf16.msra.mxu1 %v2772_v22  ;;  %v4424_v22 = vld [vmem:[%s13551_s4 + $0x20] sm:$0xff] }
 0x371   : > { %v2771_v43 = vpop.permute.xlu1 %2770 }
 0x372   : > { %7674 = vmatprep.subr.msk.bf16.mxu1 %vm2834_vm6, %v2771_v43  ;;  %v2769_v21 = vpop.permute.xlu0 %2768 }
 0x373   : > { %v2782_v10 = vsel %vm1208_vm2, %v2769_v21, %v2771_v43  ;;  %4137 = vrot.lane.b32.xlu1 %v10050_v20, %s8517_s17  ;;  %v4425_v21 = vld [vmem:[%s13551_s4 + $0x28] sm:$0xff] }
 0x374   : > { %v2836_v39 = vsel %vm2834_vm6, %v2782_v10, 0  ;;  %4135 = vrot.lane.b32.xlu0 %v10054_v48, %s8517_s17 }
 0x375   : > { %v2767_v62 = vpop.permute.xlu1 %2766  ;;  %2868 = vmatpush2.bf16.msra.mxu1 %v2836_v39  ;;  %v4422_v39 = vld [vmem:[%s13551_s4 + $0x10] sm:$0xff] }
 0x376   : > { %2869 = vmatprep.subr.bf16.mxu1 %v2767_v62  ;;  %v2765_v9 = vpop.permute.xlu0 %2764 }
 0x377   : > { %v2781_v38 = vsel %vm1208_vm2, %v2765_v9, %v2767_v62  ;;  %3781 = vrot.lane.b32.xlu1 %v10064_v12, %s8516_s16  ;;  %v8354_v62 = vld [vmem:[%s13550_s3 + $0xf0] ss:$8 sps:$4 sm:$0xff]  }
 0x378   : > { %3775 = vrot.lane.b32.xlu0 %v10087_v14, %s8516_s16 }
 0x379   : > { %v2763_v24 = vpop.permute.xlu1 %2762  ;;  %2870 = vmatpush2.bf16.msra.mxu1 %v2781_v38 }
 0x37a   : > { %2871 = vmatprep.subr.bf16.mxu1 %v2763_v24  ;;  %v2761_v56 = vpop.permute.xlu0 %2760 }
 0x37b   : > { %v2780_v6 = vsel %vm1208_vm2, %v2761_v56, %v2763_v24  ;;  %4177 = vrot.lane.b32.xlu1 %v10064_v12, %s8517_s17  ;;  %v8355_v24 = vld [vmem:[%s13550_s3 + $0x104] ss:$8 sps:$4 sm:$0xff]  }
 0x37c   : > { %3779 = vrot.lane.b32.xlu0 %v10068_v47, %s8516_s16 }
 0x37d   : > { %v3375_v30 = vpop.permute.xlu1 %3374  ;;  %2872 = vmatpush2.bf16.msra.mxu1 %v2780_v6 }
 0x37e   : > { %3100 = vmatprep.subr.bf16.mxu1 %v9919_v19  ;;  %3455 = vmatprep.subr.bf16.mxu0 %v3375_v30  ;;  %v3373_v13 = vpop.permute.xlu0 %3372 }
 0x37f   : > { %v3395_v34 = vsel %vm1876_vm4, %v3373_v13, %v3375_v30  ;;  %3777 = vrot.lane.b32.xlu1 %v10084_v44, %s8516_s16  ;;  %v8360_v13 = vld [vmem:[%s13550_s3 + $0x100] ss:$8 sps:$4 sm:$0xff]  }
 0x380   : > { %4175 = vrot.lane.b32.xlu0 %v10068_v47, %s8517_s17  ;;  %2874 = vmatmul.mubr.bf16.vlgmr.msra.gmra.mxu1 %v8337_v35 }
 0x381   : > { %3456 = vmatpush1.bf16.msra.mxu0 %v3395_v34  ;;  %v3371_v49 = vpop.permute.xlu1 %3370  ;;  %3101 = vmatpush1.bf16.msra.mxu1 %v9923_v2 }
 0x382   : > { %3102 = vmatprep.subr.bf16.mxu1 %v9937_v4  ;;  %3457 = vmatprep.subr.bf16.mxu0 %v3371_v49  ;;  %v3369_v19 = vpop.permute.xlu0 %3368 }
 0x383   : > { %v3394_v59 = vsel %vm1876_vm4, %v3369_v19, %v3371_v49  ;;  %4173 = vrot.lane.b32.xlu1 %v10084_v44, %s8517_s17  ;;  %7676 = vmatprep.mubr.msk.bf16.mxu1 %vm2803_vm5, %v8340_v11  ;;  %v8357_v11 = vld [vmem:[%s13550_s3 + $0x140] ss:$8 sps:$4 sm:$0xff]   ;;  %v4439_v49 = vld [vmem:[%s13551_s4 + $0x98] sm:$0xff] }
 0x384   : > { %4171 = vrot.lane.b32.xlu0 %v10087_v14, %s8517_s17  ;;  %v8361_v19 = vld [vmem:[%s13550_s3 + $0x114] ss:$8 sps:$4 sm:$0xff]  }
 0x385   : > { %3458 = vmatpush1.bf16.msra.mxu0 %v3394_v59  ;;  %v3367_v2 = vpop.permute.xlu1 %3366  ;;  %3103 = vmatpush1.bf16.msra.mxu1 %v9941_v27 }
 0x386   : > { %3104 = vmatprep.subr.bf16.mxu1 %v9955_v54  ;;  %3459 = vmatprep.subr.bf16.mxu0 %v3367_v2  ;;  %v3365_v4 = vpop.permute.xlu0 %3364 }
 0x387   : > { %v3393_v37 = vsel %vm1876_vm4, %v3365_v4, %v3367_v2  ;;  %3773 = vrot.lane.b32.xlu1 %v10102_v3, %s8516_s16  ;;  %v4436_v4 = vld [vmem:[%s13551_s4 + $0x80] sm:$0xff] }
 0x388   : > { %3771 = vrot.lane.b32.xlu0 %v10104_v42, %s8516_s16  ;;  %2884 = vmatmul.mubr.bf16.gmra.mxu1 %v8342_v7  ;;  %v8376_v7 = vld [vmem:[%s13550_s3 + $0x154] ss:$8 sps:$4 sm:$0xff]  }
 0x389   : > { %3460 = vmatpush1.bf16.msra.mxu0 %v3393_v37  ;;  %v3363_v32 = vpop.permute.xlu1 %3362  ;;  %3105 = vmatpush1.bf16.msra.mxu1 %v9959_v58  ;;  %v8345_v58 = vld [vmem:[%s13550_s3 + $0xc0] ss:$8 sps:$4 sm:$0xff]  }
 0x38a   : > { %3106 = vmatprep.subr.bf16.mxu1 %v9977_v36  ;;  %3461 = vmatprep.subr.bf16.mxu0 %v3363_v32  ;;  %v3361_v27 = vpop.permute.xlu0 %3360 }
 0x38b   : > { %v3392_v54 = vsel %vm1876_vm4, %v3361_v27, %v3363_v32  ;;  %4169 = vrot.lane.b32.xlu1 %v10102_v3, %s8517_s17  ;;  %7677 = vmatprep.mubr.msk.bf16.mxu1 %vm2803_vm5, %v8343_v60  ;;  %v4437_v60 = vld [vmem:[%s13551_s4 + $0x88] sm:$0xff]  ;;  %v8363_v27 = vld [vmem:[%s13550_s3 + $0x110] ss:$8 sps:$4 sm:$0xff]  }
 0x38c   : > { %4167 = vrot.lane.b32.xlu0 %v10104_v42, %s8517_s17 }
 0x38d   : > { %3462 = vmatpush1.bf16.msra.mxu0 %v3392_v54  ;;  %v3359_v36 = vpop.permute.xlu1 %3358  ;;  %3107 = vmatpush1.bf16.msra.mxu1 %v9981_v55  ;;  %v4432_v55 = vld [vmem:[%s13551_s4 + $0x60] sm:$0xff] }
 0x38e   : > { %3108 = vmatprep.subr.bf16.mxu1 %v9996_v26  ;;  %3463 = vmatprep.subr.bf16.mxu0 %v3359_v36  ;;  %v3357_v61 = vpop.permute.xlu0 %3356  ;;  %v4433_v26 = vld [vmem:[%s13551_s4 + $0x68] sm:$0xff] }
 0x38f   : > { %v3391_v33 = vsel %vm1876_vm4, %v3357_v61, %v3359_v36  ;;  %4512 = vperm.xlu1 %8263, %v4434_v40   ;;  %v8364_v40 = vld [vmem:[%s13550_s3 + $0x124] ss:$8 sps:$4 sm:$0xff]  }
 0x390   : > { %4517 = vperm.xlu0 %8262, %v4435_v51   ;;  %2894 = vmatmul.mubr.bf16.gmra.mxu1 %v8345_v58  ;;  %v8378_v58 = vld [vmem:[%s13550_s3 + $0x150] ss:$8 sps:$4 sm:$0xff]   ;;  %v8382_v51 = vld [vmem:[%s13550_s3 + $0x164] ss:$8 sps:$4 sm:$0xff]  }
 0x391   : > { %3464 = vmatpush1.bf16.msra.mxu0 %v3391_v33  ;;  %v3355_v46 = vpop.permute.xlu1 %3354  ;;  %3109 = vmatpush1.bf16.msra.mxu1 %v10000_v50  ;;  %v8348_v50 = vld [vmem:[%s13550_s3 + $0xd0] ss:$8 sps:$4 sm:$0xff]  }
 0x392   : > { %3110 = vmatprep.subr.bf16.mxu1 %v10014_v29  ;;  %3465 = vmatprep.subr.bf16.mxu0 %v3355_v46  ;;  %v3353_v28 = vpop.permute.xlu0 %3352  ;;  %v4431_v29 = vld [vmem:[%s13551_s4 + $0x58] sm:$0xff] }
 0x393   : > { %v3390_v8 = vsel %vm1876_vm4, %v3353_v28, %v3355_v46  ;;  %4502 = vperm.xlu1 %8263, %v4432_v55   ;;  %7678 = vmatprep.mubr.msk.bf16.mxu1 %vm2803_vm5, %v8346_v25  ;;  %v8366_v55 = vld [vmem:[%s13550_s3 + $0x120] ss:$8 sps:$4 sm:$0xff]  }
 0x394   : > { %4507 = vperm.xlu0 %8262, %v4433_v26   ;;  %v8367_v26 = vld [vmem:[%s13550_s3 + $0x134] ss:$8 sps:$4 sm:$0xff]   ;;  %v8384_v28 = vld [vmem:[%s13550_s3 + $0x160] ss:$8 sps:$4 sm:$0xff]  }
 0x395   : > { %3466 = vmatpush1.bf16.msra.mxu0 %v3390_v8  ;;  %v3351_v15 = vpop.permute.xlu1 %3350  ;;  %3111 = vmatpush1.bf16.msra.mxu1 %v10019_v17  ;;  %v4428_v17 = vld [vmem:[%s13551_s4 + $0x40] sm:$0xff] }
 0x396   : > { %3112 = vmatprep.subr.bf16.mxu1 %v10032_v1  ;;  %3467 = vmatprep.subr.bf16.mxu0 %v3351_v15  ;;  %v3349_v41 = vpop.permute.xlu0 %3348  ;;  %v4429_v1 = vld [vmem:[%s13551_s4 + $0x48] sm:$0xff] }
 0x397   : > { %v3389_v53 = vsel %vm1876_vm4, %v3349_v41, %v3351_v15  ;;  %4492 = vperm.xlu1 %8263, %v4430_v45   ;;  %v8388_v45 = vld [vmem:[%s13550_s3 + $0x174] ss:$8 sps:$4 sm:$0xff]   ;;  %v8369_v41 = vld [vmem:[%s13550_s3 + $0x130] ss:$8 sps:$4 sm:$0xff]  }
 0x398   : > { %4497 = vperm.xlu0 %8262, %v4431_v29   ;;  %2904 = vmatmul.mubr.bf16.gmra.mxu1 %v8348_v50 }
 0x399   : > { %3468 = vmatpush1.bf16.msra.mxu0 %v3389_v53  ;;  %v3347_v52 = vpop.permute.xlu1 %3346  ;;  %3113 = vmatpush1.bf16.msra.mxu1 %v10037_v0  ;;  %v8351_v0 = vld [vmem:[%s13550_s3 + $0xe0] ss:$8 sps:$4 sm:$0xff]  }
 0x39a   : > { %3114 = vmatprep.subr.bf16.mxu1 %v10050_v20  ;;  %3469 = vmatprep.subr.bf16.mxu0 %v3347_v52  ;;  %v3345_v5 = vpop.permute.xlu0 %3344  ;;  %v4427_v20 = vld [vmem:[%s13551_s4 + $0x38] sm:$0xff] }
 0x39b   : > { %v3388_v63 = vsel %vm1876_vm4, %v3345_v5, %v3347_v52  ;;  %4482 = vperm.xlu1 %8263, %v4428_v17   ;;  %7679 = vmatprep.mubr.msk.bf16.mxu1 %vm2803_vm5, %v8349_v57  ;;  %v8372_v57 = vld [vmem:[%s13550_s3 + $0x4] ss:$8 sps:$4 sm:$0xff]   ;;  %v8390_v17 = vld [vmem:[%s13550_s3 + $0x170] ss:$8 sps:$4 sm:$0xff]  }
 0x39c   : > { %4487 = vperm.xlu0 %8262, %v4429_v1   ;;  %v8394_v1 = vld [vmem:[%s13550_s3 + $0x184] ss:$8 sps:$4 sm:$0xff]  }
 0x39d   : > { %3470 = vmatpush1.bf16.msra.mxu0 %v3388_v63  ;;  %v3387_v18 = vpop.permute.xlu1 %3386  ;;  %3115 = vmatpush1.bf16.msra.mxu1 %v10054_v48  ;;  %v3095_v48 = vsel %vm2834_vm6, %v10068_v47, 0 }
 0x39e   : > { %7705 = vmatprep.subr.msk.bf16.mxu1 %vm2834_vm6, %v10064_v12  ;;  %7756 = vmatprep.subr.msk.bf16.mxu0 %vm2834_vm6, %v3387_v18  ;;  %v3381_v31 = vpop.permute.xlu0 %3380 }
 0x39f   : > { %4472 = vperm.xlu1 %8263, %v4426_v16  }
 0x3a0   : > { %4477 = vperm.xlu0 %8262, %v4427_v20   ;;  %2914 = vmatmul.mubr.bf16.gmra.mxu1 %v8351_v0  ;;  %v8370_v0 = vld [vmem:[%s13550_s3] ss:$8 sps:$4 sm:$0xff]   ;;  %v8373_v20 = vld [vmem:[%s13550_s3 + $0x14] ss:$8 sps:$4 sm:$0xff]  }
 0x3a1   : > { %v3383_v43 = vpop.permute.xlu1 %3382  ;;  %3127 = vmatpush2.bf16.msra.mxu1 %v3095_v48  ;;  %7680 = vmatprep.mubr.msk.bf16.mxu1 %vm2803_vm5, %v8352_v23 }
 0x3a2   : > { %3128 = vmatprep.subr.bf16.mxu1 %v10084_v44  ;;  %v3385_v12 = vpop.permute.xlu0 %3384  ;;  %v4423_v44 = vld [vmem:[%s13551_s4 + $0x18] sm:$0xff]  ;;  %v3397_v56 = vsel %vm1876_vm4, %v3381_v31, %v3383_v43  ;;  %v8396_v31 = vld [vmem:[%s13550_s3 + $0x180] ss:$8 sps:$4 sm:$0xff]  }
 0x3a3   : > { %v3398_v10 = vsel %vm1876_vm4, %v3385_v12, %v3387_v18  ;;  %4462 = vperm.xlu1 %8263, %v4424_v22   ;;  %v8400_v22 = vld [vmem:[%s13550_s3 + $0x194] ss:$8 sps:$4 sm:$0xff]  }
 0x3a4   : > { %v3450_v47 = vsel %vm2834_vm6, %v3398_v10, 0  ;;  %4467 = vperm.xlu0 %8262, %v4425_v21  }
 0x3a5   : > { %v3379_v9 = vpop.permute.xlu1 %3378  ;;  %3129 = vmatpush2.bf16.msra.mxu1 %v10087_v14  ;;  %3482 = vmatpush2.bf16.msra.mxu0 %v3450_v47  ;;  %v4420_v14 = vld [vmem:[%s13551_s4] sm:$0xff]  ;;  %v8375_v47 = vld [vmem:[%s13550_s3 + $0x10] ss:$8 sps:$4 sm:$0xff]  }
 0x3a6   : > { %3130 = vmatprep.subr.bf16.mxu1 %v10102_v3  ;;  %3483 = vmatprep.subr.bf16.mxu0 %v3383_v43  ;;  %v3377_v38 = vpop.permute.xlu0 %3376  ;;  %v4421_v3 = vld [vmem:[%s13551_s4 + $0x8] sm:$0xff] }
 0x3a7   : > { %4452 = vperm.xlu1 %8263, %v4422_v39   ;;  %v3396_v30 = vsel %vm1876_vm4, %v3377_v38, %v3379_v9 }
 0x3a8   : > { %4457 = vperm.xlu0 %8262, %v4423_v44   ;;  %2924 = vmatmul.mubr.bf16.gmra.mxu1 %v8354_v62  ;;  %v8379_v62 = vld [vmem:[%s13550_s3 + $0x24] ss:$8 sps:$4 sm:$0xff]   ;;  %v8402_v44 = vld [vmem:[%s13550_s3 + $0x190] ss:$8 sps:$4 sm:$0xff]  }
 0x3a9   : > { %v10380_v6 = vpop.permute.xlu1 %3769  ;;  %3131 = vmatpush2.bf16.msra.mxu1 %v10104_v42  ;;  %3484 = vmatpush2.bf16.msra.mxu0 %v3397_v56  ;;  %v4438_v42 = vld [vmem:[%s13551_s4 + $0x90] sm:$0xff] }
 0x3aa   : > { %3485 = vmatprep.subr.bf16.mxu0 %v3379_v9  ;;  %3851 = vmatprep.subr.bf16.mxu1 %v10380_v6  ;;  %v10387_v35 = vpop.permute.xlu0 %3767 }
 0x3ab   : > { %4442 = vperm.xlu1 %8263, %v4420_v14   ;;  %7681 = vmatprep.mubr.msk.bf16.mxu1 %vm2803_vm5, %v8355_v24  ;;  %v3791_v43 = vsel %vm3783_vm8, %v10387_v35, %v10380_v6  ;;  %v8406_v24 = vld [vmem:[%s13550_s3 + $0x1a4] ss:$8 sps:$4 sm:$0xff]   ;;  %v8381_v35 = vld [vmem:[%s13550_s3 + $0x20] ss:$8 sps:$4 sm:$0xff]  }
 0x3ac   : > { %4447 = vperm.xlu0 %8262, %v4421_v3  }
 0x3ad   : > { %v4166_v34 = vpop.permute.xlu1 %4165  ;;  %3486 = vmatpush2.bf16.msra.mxu0 %v3396_v30 }
 0x3ae   : > { %4247 = vmatprep.subr.bf16.mxu0 %v4166_v34  ;;  %v4164_v59 = vpop.permute.xlu0 %4163 }
 0x3af   : > { %v4187_v2 = vsel %vm4179_vm7, %v4164_v59, %v4166_v34  ;;  %4532 = vperm.xlu1 %8263, %v4438_v42   ;;  %v8385_v42 = vld [vmem:[%s13550_s3 + $0x34] ss:$8 sps:$4 sm:$0xff]   ;;  %v8408_v34 = vld [vmem:[%s13550_s3 + $0x1a0] ss:$8 sps:$4 sm:$0xff]  }
 0x3b0   : > { %4537 = vperm.xlu0 %8262, %v4439_v49   ;;  %2934 = vmatmul.mubr.bf16.gmra.mxu1 %v8360_v13  ;;  %v8412_v49 = vld [vmem:[%s13550_s3 + $0x1b4] ss:$8 sps:$4 sm:$0xff]  }
 0x3b1   : > { %v10413_v37 = vpop.permute.xlu1 %3765  ;;  %3488 = vmatmul.mubr.bf16.vlgmr.msra.gmra.mxu0 %v8357_v11  ;;  %7682 = vmatprep.mubr.msk.bf16.mxu1 %vm2803_vm5, %v8361_v19 }
 0x3b2   : > { %4248 = vmatpush1.bf16.msra.mxu0 %v4187_v2  ;;  %v10419_v32 = vpop.permute.xlu0 %3763  ;;  %7758 = vmatprep.mubr.msk.bf16.mxu0 %vm2803_vm5, %v8376_v7 }
 0x3b3   : > { %4522 = vperm.xlu1 %8263, %v4436_v4   ;;  %v3790_v10 = vsel %vm3783_vm8, %v10419_v32, %v10413_v37  ;;  %v8387_v4 = vld [vmem:[%s13550_s3 + $0x30] ss:$8 sps:$4 sm:$0xff]  }
 0x3b4   : > { %4527 = vperm.xlu0 %8262, %v4437_v60   ;;  %v8391_v60 = vld [vmem:[%s13550_s3 + $0x44] ss:$8 sps:$4 sm:$0xff]  }
 0x3b5   : > { %v4162_v54 = vpop.permute.xlu1 %4161 }
 0x3b6   : > { %4249 = vmatprep.subr.bf16.mxu0 %v4162_v54  ;;  %v4160_v36 = vpop.permute.xlu0 %4159 }
 0x3b7   : > { %v4186_v61 = vsel %vm4179_vm7, %v4160_v36, %v4162_v54 }
 0x3b8   : > { %2944 = vmatmul.mubr.bf16.gmra.mxu1 %v8363_v27  ;;  %4250 = vmatpush1.bf16.msra.mxu0 %v4186_v61  ;;  %v8414_v27 = vld [vmem:[%s13550_s3 + $0x1b0] ss:$8 sps:$4 sm:$0xff]  }
 0x3b9   : > { %v10435_v33 = vpop.permute.xlu1 %3761  ;;  %7683 = vmatprep.mubr.msk.bf16.mxu1 %vm2803_vm5, %v8364_v40  ;;  %3498 = vmatmul.mubr.bf16.gmra.mxu0 %v8378_v58  ;;  %v8418_v40 = vld [vmem:[%s13550_s3 + $0x1c4] ss:$8 sps:$4 sm:$0xff]  }
 0x3ba   : > { %v10438_v25 = vpop.permute.xlu0 %3759  ;;  %7759 = vmatprep.mubr.msk.bf16.mxu0 %vm2803_vm5, %v8382_v51 }
 0x3bb   : > { %v3789_v56 = vsel %vm3783_vm8, %v10438_v25, %v10435_v33 }
 0x3bd   : > { %v4158_v46 = vpop.permute.xlu1 %4157 }
 0x3be   : > { %4251 = vmatprep.subr.bf16.mxu0 %v4158_v46  ;;  %v4156_v8 = vpop.permute.xlu0 %4155 }
 0x3bf   : > { %v4185_v50 = vsel %vm4179_vm7, %v4156_v8, %v4158_v46  ;;  %v8424_v8 = vld [vmem:[%s13550_s3 + $0x1d4] ss:$8 sps:$4 sm:$0xff]  }
 0x3c0   : > { %2954 = vmatmul.mubr.bf16.gmra.mxu1 %v8366_v55  ;;  %4252 = vmatpush1.bf16.msra.mxu0 %v4185_v50  ;;  %v8397_v55 = vld [vmem:[%s13550_s3 + $0x54] ss:$8 sps:$4 sm:$0xff]  }
 0x3c1   : > { %v3758_v15 = vpop.permute.xlu1 %3757  ;;  %7684 = vmatprep.mubr.msk.bf16.mxu1 %vm2803_vm5, %v8367_v26  ;;  %3508 = vmatmul.mubr.bf16.gmra.mxu0 %v8384_v28  ;;  %v8420_v26 = vld [vmem:[%s13550_s3 + $0x1c0] ss:$8 sps:$4 sm:$0xff]  }
 0x3c2   : > { %v3756_v29 = vpop.permute.xlu0 %3755  ;;  %7760 = vmatprep.mubr.msk.bf16.mxu0 %vm2803_vm5, %v8388_v45 }
 0x3c3   : > { %v3788_v3 = vsel %vm3783_vm8, %v3756_v29, %v3758_v15 }
 0x3c5   : > { %v4154_v53 = vpop.permute.xlu1 %4153 }
 0x3c6   : > { %4253 = vmatprep.subr.bf16.mxu0 %v4154_v53  ;;  %v4152_v52 = vpop.permute.xlu0 %4151 }
 0x3c7   : > { %v4184_v5 = vsel %vm4179_vm7, %v4152_v52, %v4154_v53  ;;  %v8403_v52 = vld [vmem:[%s13550_s3 + $0x64] ss:$8 sps:$4 sm:$0xff]  }
 0x3c8   : > { %2964 = vmatmul.mubr.bf16.gmra.mxu1 %v8369_v41  ;;  %4254 = vmatpush1.bf16.msra.mxu0 %v4184_v5  ;;  %v8426_v5 = vld [vmem:[%s13550_s3 + $0x1d0] ss:$8 sps:$4 sm:$0xff]  }
 0x3c9   : > { %v3754_v63 = vpop.permute.xlu1 %3753  ;;  %7706 = vmatprep.mubr.msk.bf16.mxu1 %vm2803_vm5, %v8372_v57  ;;  %3518 = vmatmul.mubr.bf16.gmra.mxu0 %v8390_v17  ;;  %v8399_v57 = vld [vmem:[%s13550_s3 + $0x50] ss:$8 sps:$4 sm:$0xff]  }
 0x3ca   : > { %v3752_v16 = vpop.permute.xlu0 %3751  ;;  %7761 = vmatprep.mubr.msk.bf16.mxu0 %vm2803_vm5, %v8394_v1 }
 0x3cb   : > { %v3787_v19 = vsel %vm3783_vm8, %v3752_v16, %v3754_v63  ;;  %v8432_v16 = vld [vmem:[%s13550_s3 + $0x284] ss:$8 sps:$4 sm:$0xff]  }
 0x3cd   : > { %v4150_v18 = vpop.permute.xlu1 %4149 }
 0x3ce   : > { %4255 = vmatprep.subr.bf16.mxu0 %v4150_v18  ;;  %v4148_v23 = vpop.permute.xlu0 %4147 }
 0x3cf   : > { %v4183_v48 = vsel %vm4179_vm7, %v4148_v23, %v4150_v18  ;;  %v8405_v23 = vld [vmem:[%s13550_s3 + $0x60] ss:$8 sps:$4 sm:$0xff]  }
 0x3d0   : > { %3133 = vmatmul.mubr.bf16.vlgmr.msra.gmra.mxu1 %v8370_v0  ;;  %4256 = vmatpush1.bf16.msra.mxu0 %v4183_v48  ;;  %v8409_v48 = vld [vmem:[%s13550_s3 + $0x74] ss:$8 sps:$4 sm:$0xff]  }
 0x3d1   : > { %3852 = vmatpush1.bf16.msra.mxu1 %v3791_v43  ;;  %v3750_v21 = vpop.permute.xlu1 %3749  ;;  %7707 = vmatprep.mubr.msk.bf16.mxu1 %vm2803_vm5, %v8373_v20 }
 0x3d2   : > { %3853 = vmatprep.subr.bf16.mxu1 %v10413_v37  ;;  %v3748_v12 = vpop.permute.xlu0 %3747  ;;  %3528 = vmatmul.mubr.bf16.gmra.mxu0 %v8396_v31 }
 0x3d3   : > { %7762 = vmatprep.mubr.msk.bf16.mxu0 %vm2803_vm5, %v8400_v22  ;;  %v3786_v2 = vsel %vm3783_vm8, %v3748_v12, %v3750_v21  ;;  %v8436_v12 = vld [vmem:[%s13550_s3 + $0x294] ss:$8 sps:$4 sm:$0xff]  }
 0x3d5   : > { %3854 = vmatpush1.bf16.msra.mxu1 %v3790_v10  ;;  %v4146_v39 = vpop.permute.xlu1 %4145  ;;  %v8411_v10 = vld [vmem:[%s13550_s3 + $0x70] ss:$8 sps:$4 sm:$0xff]  }
 0x3d6   : > { %3855 = vmatprep.subr.bf16.mxu1 %v10435_v33  ;;  %4257 = vmatprep.subr.bf16.mxu0 %v4146_v39  ;;  %v4144_v9 = vpop.permute.xlu0 %4143  ;;  %v8393_v33 = vld [vmem:[%s13550_s3 + $0x40] ss:$8 sps:$4 sm:$0xff]  }
 0x3d7   : > { %v4182_v38 = vsel %vm4179_vm7, %v4144_v9, %v4146_v39  ;;  %v8438_v39 = vld [vmem:[%s13550_s3 + $0x290] ss:$8 sps:$4 sm:$0xff]   ;;  %v8417_v9 = vld [vmem:[%s13550_s3 + $0x80] ss:$8 sps:$4 sm:$0xff]  }
 0x3d8   : > { %3143 = vmatmul.mubr.bf16.gmra.mxu1 %v8375_v47  ;;  %4258 = vmatpush1.bf16.msra.mxu0 %v4182_v38  ;;  %v8415_v47 = vld [vmem:[%s13550_s3 + $0x84] ss:$8 sps:$4 sm:$0xff]   ;;  %v8444_v38 = vld [vmem:[%s13550_s3 + $0x2a0] ss:$8 sps:$4 sm:$0xff]  }
 0x3d9   : > { %3856 = vmatpush1.bf16.msra.mxu1 %v3789_v56  ;;  %v3746_v14 = vpop.permute.xlu1 %3745  ;;  %7708 = vmatprep.mubr.msk.bf16.mxu1 %vm2803_vm5, %v8379_v62  ;;  %v8442_v62 = vld [vmem:[%s13550_s3 + $0x2a4] ss:$8 sps:$4 sm:$0xff]   ;;  %v8423_v56 = vld [vmem:[%s13550_s3 + $0x90] ss:$8 sps:$4 sm:$0xff]  }
 0x3da   : > { %3857 = vmatprep.subr.bf16.mxu1 %v3758_v15  ;;  %v3744_v6 = vpop.permute.xlu0 %3743  ;;  %3538 = vmatmul.mubr.bf16.gmra.mxu0 %v8402_v44  ;;  %v8421_v44 = vld [vmem:[%s13550_s3 + $0x94] ss:$8 sps:$4 sm:$0xff]  }
 0x3db   : > { %7763 = vmatprep.mubr.msk.bf16.mxu0 %vm2803_vm5, %v8406_v24  ;;  %v3785_v58 = vsel %vm3783_vm8, %v3744_v6, %v3746_v14  ;;  %v8448_v24 = vld [vmem:[%s13550_s3 + $0x2b4] ss:$8 sps:$4 sm:$0xff]   ;;  %v8450_v6 = vld [vmem:[%s13550_s3 + $0x2b0] ss:$8 sps:$4 sm:$0xff]  }
 0x3dd   : > { %3858 = vmatpush1.bf16.msra.mxu1 %v3788_v3  ;;  %v4142_v30 = vpop.permute.xlu1 %4141  ;;  %v8454_v3 = vld [vmem:[%s13550_s3 + $0x2c4] ss:$8 sps:$4 sm:$0xff]  }
 0x3de   : > { %3859 = vmatprep.subr.bf16.mxu1 %v3754_v63  ;;  %4259 = vmatprep.subr.bf16.mxu0 %v4142_v30  ;;  %v4140_v13 = vpop.permute.xlu0 %4139 }
 0x3df   : > { %v4181_v11 = vsel %vm4179_vm7, %v4140_v13, %v4142_v30  ;;  %v8433_v30 = vld [vmem:[%s13550_s3 + $0x1f4] ss:$8 sps:$4 sm:$0xff]  }
 0x3e0   : > { %3153 = vmatmul.mubr.bf16.gmra.mxu1 %v8381_v35  ;;  %4260 = vmatpush1.bf16.msra.mxu0 %v4181_v11  ;;  %v8427_v35 = vld [vmem:[%s13550_s3 + $0x1e0] ss:$8 sps:$4 sm:$0xff]   ;;  %v8460_v13 = vld [vmem:[%s13550_s3 + $0x2d4] ss:$8 sps:$4 sm:$0xff]   ;;  %v8439_v11 = vld [vmem:[%s13550_s3 + $0x204] ss:$8 sps:$4 sm:$0xff]  }
 0x3e1   : > { %3860 = vmatpush1.bf16.msra.mxu1 %v3787_v19  ;;  %v3742_v59 = vpop.permute.xlu1 %3741  ;;  %7709 = vmatprep.mubr.msk.bf16.mxu1 %vm2803_vm5, %v8385_v42  ;;  %v8456_v42 = vld [vmem:[%s13550_s3 + $0x2c0] ss:$8 sps:$4 sm:$0xff]   ;;  %v8466_v19 = vld [vmem:[%s13550_s3 + $0x2e4] ss:$8 sps:$4 sm:$0xff]  }
 0x3e2   : > { %3861 = vmatprep.subr.bf16.mxu1 %v3750_v21  ;;  %v3740_v7 = vpop.permute.xlu0 %3739  ;;  %3548 = vmatmul.mubr.bf16.gmra.mxu0 %v8408_v34  ;;  %v8430_v21 = vld [vmem:[%s13550_s3 + $0x280] ss:$8 sps:$4 sm:$0xff]   ;;  %v8435_v34 = vld [vmem:[%s13550_s3 + $0x1f0] ss:$8 sps:$4 sm:$0xff]  }
 0x3e3   : > { %7764 = vmatprep.mubr.msk.bf16.mxu0 %vm2803_vm5, %v8412_v49  ;;  %v3784_v61 = vsel %vm3783_vm8, %v3740_v7, %v3742_v59  ;;  %v8462_v49 = vld [vmem:[%s13550_s3 + $0x2d0] ss:$8 sps:$4 sm:$0xff]   ;;  %v8445_v7 = vld [vmem:[%s13550_s3 + $0x214] ss:$8 sps:$4 sm:$0xff]  }
 0x3e5   : > { %3862 = vmatpush1.bf16.msra.mxu1 %v3786_v2  ;;  %v4138_v37 = vpop.permute.xlu1 %4137  ;;  %v8468_v2 = vld [vmem:[%s13550_s3 + $0x2e0] ss:$8 sps:$4 sm:$0xff]  }
 0x3e6   : > { %3863 = vmatprep.subr.bf16.mxu1 %v3746_v14  ;;  %4261 = vmatprep.subr.bf16.mxu0 %v4138_v37  ;;  %v4136_v32 = vpop.permute.xlu0 %4135  ;;  %v8429_v14 = vld [vmem:[%s13550_s3 + $0x1e4] ss:$8 sps:$4 sm:$0xff]  }
 0x3e7   : > { %v4180_v54 = vsel %vm4179_vm7, %v4136_v32, %v4138_v37  ;;  %v8447_v37 = vld [vmem:[%s13550_s3 + $0x210] ss:$8 sps:$4 sm:$0xff]  }
 0x3e8   : > { %3163 = vmatmul.mubr.bf16.gmra.mxu1 %v8387_v4  ;;  %4262 = vmatpush1.bf16.msra.mxu0 %v4180_v54  ;;  %v8472_v4 = vld [vmem:[%s13550_s3 + $0x2f4] ss:$8 sps:$4 sm:$0xff]   ;;  %v8474_v32 = vld [vmem:[%s13550_s3 + $0x2f0] ss:$8 sps:$4 sm:$0xff]   ;;  %v8453_v54 = vld [vmem:[%s13550_s3 + $0x220] ss:$8 sps:$4 sm:$0xff]  }
 0x3e9   : > { %3864 = vmatpush1.bf16.msra.mxu1 %v3785_v58  ;;  %v3782_v36 = vpop.permute.xlu1 %3781  ;;  %7710 = vmatprep.mubr.msk.bf16.mxu1 %vm2803_vm5, %v8391_v60  ;;  %v8451_v60 = vld [vmem:[%s13550_s3 + $0x224] ss:$8 sps:$4 sm:$0xff]   ;;  %v8480_v58 = vld [vmem:[%s13550_s3 + $0x300] ss:$8 sps:$4 sm:$0xff]  }
 0x3ea   : > { %3865 = vmatprep.subr.bf16.mxu1 %v3742_v59  ;;  %v3776_v51 = vpop.permute.xlu0 %3775  ;;  %3558 = vmatmul.mubr.bf16.gmra.mxu0 %v8414_v27  ;;  %v8441_v59 = vld [vmem:[%s13550_s3 + $0x200] ss:$8 sps:$4 sm:$0xff]   ;;  %v8478_v27 = vld [vmem:[%s13550_s3 + $0x304] ss:$8 sps:$4 sm:$0xff]  }
 0x3eb   : > { %7765 = vmatprep.mubr.msk.bf16.mxu0 %vm2803_vm5, %v8418_v40  ;;  %v8457_v40 = vld [vmem:[%s13550_s3 + $0x234] ss:$8 sps:$4 sm:$0xff]  }
 0x3ed   : > { %3866 = vmatpush1.bf16.msra.mxu1 %v3784_v61  ;;  %v4178_v25 = vpop.permute.xlu1 %4177 }
 0x3ee   : > { %7807 = vmatprep.subr.msk.bf16.mxu1 %vm2834_vm6, %v3782_v36  ;;  %7858 = vmatprep.subr.msk.bf16.mxu0 %vm2834_vm6, %v4178_v25  ;;  %v3780_v46 = vpop.permute.xlu0 %3779 }
 0x3ef   : > { %v3794_v28 = vsel %vm3783_vm8, %v3780_v46, %v3782_v36 }
 0x3f0   : > { %v3846_v45 = vsel %vm2834_vm6, %v3794_v28, 0  ;;  %3173 = vmatmul.mubr.bf16.gmra.mxu1 %v8393_v33 }
 0x3f1   : > { %v3778_v50 = vpop.permute.xlu1 %3777  ;;  %3878 = vmatpush2.bf16.msra.mxu1 %v3846_v45  ;;  %7711 = vmatprep.mubr.msk.bf16.mxu1 %vm2803_vm5, %v8397_v55  ;;  %v8463_v55 = vld [vmem:[%s13550_s3 + $0x244] ss:$8 sps:$4 sm:$0xff]  }
 0x3f2   : > { %3879 = vmatprep.subr.bf16.mxu1 %v3778_v50  ;;  %v4176_v15 = vpop.permute.xlu0 %4175  ;;  %3568 = vmatmul.mubr.bf16.gmra.mxu0 %v8420_v26  ;;  %v3793_v53 = vsel %vm3783_vm8, %v3776_v51, %v3778_v50  ;;  %v8484_v51 = vld [vmem:[%s13550_s3 + $0x314] ss:$8 sps:$4 sm:$0xff]   ;;  %v8486_v26 = vld [vmem:[%s13550_s3 + $0x310] ss:$8 sps:$4 sm:$0xff]   ;;  %v8465_v50 = vld [vmem:[%s13550_s3 + $0x240] ss:$8 sps:$4 sm:$0xff]  }
 0x3f3   : > { %v4190_v29 = vsel %vm4179_vm7, %v4176_v15, %v4178_v25  ;;  %7766 = vmatprep.mubr.msk.bf16.mxu0 %vm2803_vm5, %v8424_v8  ;;  %v8459_v25 = vld [vmem:[%s13550_s3 + $0x230] ss:$8 sps:$4 sm:$0xff]   ;;  %v8469_v15 = vld [vmem:[%s13550_s3 + $0x254] ss:$8 sps:$4 sm:$0xff]  }
 0x3f4   : > { %v4242_v41 = vsel %vm2834_vm6, %v4190_v29, 0 }
 0x3f5   : > { %v4174_v17 = vpop.permute.xlu1 %4173  ;;  %3880 = vmatpush2.bf16.msra.mxu1 %v3793_v53  ;;  %4274 = vmatpush2.bf16.msra.mxu0 %v4242_v41 }
 0x3f6   : > { %4275 = vmatprep.subr.bf16.mxu0 %v4174_v17  ;;  %v4172_v1 = vpop.permute.xlu0 %4171 }
 0x3f7   : > { %v4189_v63 = vsel %vm4179_vm7, %v4172_v1, %v4174_v17  ;;  %v8471_v17 = vld [vmem:[%s13550_s3 + $0x250] ss:$8 sps:$4 sm:$0xff]  }
 0x3f8   : > { %3183 = vmatmul.mubr.bf16.gmra.mxu1 %v8399_v57 }
 0x3f9   : > { %v3774_v0 = vpop.permute.xlu1 %3773  ;;  %4276 = vmatpush2.bf16.msra.mxu0 %v4189_v63  ;;  %7712 = vmatprep.mubr.msk.bf16.mxu1 %vm2803_vm5, %v8403_v52  ;;  %v8475_v52 = vld [vmem:[%s13550_s3 + $0x264] ss:$8 sps:$4 sm:$0xff]  }
 0x3fa   : > { %3881 = vmatprep.subr.bf16.mxu1 %v3774_v0  ;;  %v3772_v18 = vpop.permute.xlu0 %3771  ;;  %3578 = vmatmul.mubr.bf16.gmra.mxu0 %v8426_v5 }
 0x3fb   : > { %v3792_v20 = vsel %vm3783_vm8, %v3772_v18, %v3774_v0  ;;  %7859 = vmatprep.mubr.msk.bf16.mxu0 %vm2803_vm5, %v8432_v16  ;;  %v8477_v0 = vld [vmem:[%s13550_s3 + $0x260] ss:$8 sps:$4 sm:$0xff]   ;;  %v8481_v18 = vld [vmem:[%s13550_s3 + $0x274] ss:$8 sps:$4 sm:$0xff]  }
 0x3fc   : > { %3882 = vmatpush2.bf16.msra.mxu1 %v3792_v20 }
 0x3fd   : > { %v4170_v31 = vpop.permute.xlu1 %4169 }
 0x3fe   : > { %4277 = vmatprep.subr.bf16.mxu0 %v4170_v31  ;;  %v4168_v22 = vpop.permute.xlu0 %4167 }
 0x3ff   : > { %v4188_v43 = vsel %vm4179_vm7, %v4168_v22, %v4170_v31  ;;  %v8483_v22 = vld [vmem:[%s13550_s3 + $0x270] ss:$8 sps:$4 sm:$0xff]  }
 0x400   : > { %3193 = vmatmul.mubr.bf16.gmra.mxu1 %v8405_v23  ;;  %4278 = vmatpush2.bf16.msra.mxu0 %v4188_v43 }
 0x401   : > { %7713 = vmatprep.mubr.msk.bf16.mxu1 %vm2803_vm5, %v8409_v48 }
 0x403   : > { %4280 = vmatmul.mubr.bf16.vlgmr.msra.gmra.mxu0 %v8430_v21 }
 0x404   : > { %7860 = vmatprep.mubr.msk.bf16.mxu0 %vm2803_vm5, %v8436_v12 }
 0x408   : > { %3203 = vmatmul.mubr.bf16.gmra.mxu1 %v8411_v10 }
 0x409   : > { %7714 = vmatprep.mubr.msk.bf16.mxu1 %vm2803_vm5, %v8415_v47 }
 0x40b   : > { %4290 = vmatmul.mubr.bf16.gmra.mxu0 %v8438_v39 }
 0x40c   : > { %7861 = vmatprep.mubr.msk.bf16.mxu0 %vm2803_vm5, %v8442_v62 }
 0x410   : > { %3213 = vmatmul.mubr.bf16.gmra.mxu1 %v8417_v9 }
 0x411   : > { %7715 = vmatprep.mubr.msk.bf16.mxu1 %vm2803_vm5, %v8421_v44 }
 0x413   : > { %4300 = vmatmul.mubr.bf16.gmra.mxu0 %v8444_v38 }
 0x414   : > { %7862 = vmatprep.mubr.msk.bf16.mxu0 %vm2803_vm5, %v8448_v24 }
 0x418   : > { %3223 = vmatmul.mubr.bf16.gmra.mxu1 %v8423_v56 }
 0x419   : > { %7808 = vmatprep.mubr.msk.bf16.mxu1 %vm2803_vm5, %v8429_v14 }
 0x41b   : > { %4310 = vmatmul.mubr.bf16.gmra.mxu0 %v8450_v6 }
 0x41c   : > { %7863 = vmatprep.mubr.msk.bf16.mxu0 %vm2803_vm5, %v8454_v3 }
 0x420   : > { %3884 = vmatmul.mubr.bf16.vlgmr.msra.gmra.mxu1 %v8427_v35 }
 0x421   : > { %7809 = vmatprep.mubr.msk.bf16.mxu1 %vm2803_vm5, %v8433_v30 }
 0x423   : > { %4320 = vmatmul.mubr.bf16.gmra.mxu0 %v8456_v42 }
 0x424   : > { %7864 = vmatprep.mubr.msk.bf16.mxu0 %vm2803_vm5, %v8460_v13 }
 0x428   : > { %3894 = vmatmul.mubr.bf16.gmra.mxu1 %v8435_v34 }
 0x429   : > { %7810 = vmatprep.mubr.msk.bf16.mxu1 %vm2803_vm5, %v8439_v11 }
 0x42b   : > { %4330 = vmatmul.mubr.bf16.gmra.mxu0 %v8462_v49 }
 0x42c   : > { %7865 = vmatprep.mubr.msk.bf16.mxu0 %vm2803_vm5, %v8466_v19 }
 0x430   : > { %3904 = vmatmul.mubr.bf16.gmra.mxu1 %v8441_v59 }
 0x431   : > { %7811 = vmatprep.mubr.msk.bf16.mxu1 %vm2803_vm5, %v8445_v7 }
 0x433   : > { %4340 = vmatmul.mubr.bf16.gmra.mxu0 %v8468_v2 }
 0x434   : > { %7866 = vmatprep.mubr.msk.bf16.mxu0 %vm2803_vm5, %v8472_v4 }
 0x438   : > { %3914 = vmatmul.mubr.bf16.gmra.mxu1 %v8447_v37 }
 0x439   : > { %7812 = vmatprep.mubr.msk.bf16.mxu1 %vm2803_vm5, %v8451_v60 }
 0x43b   : > { %4350 = vmatmul.mubr.bf16.gmra.mxu0 %v8474_v32 }
 0x43c   : > { %7867 = vmatprep.mubr.msk.bf16.mxu0 %vm2803_vm5, %v8478_v27 }
 0x440   : > { %v10706_v36 = vpop.f32.mrf.mxu1  ;;  %3924 = vmatmul.mubr.bf16.gmra.mxu1 %v8453_v54 }
 0x441   : > { %7813 = vmatprep.mubr.msk.bf16.mxu1 %vm2803_vm5, %v8457_v40 }
 0x442   : > { %v10712_v61 = vpop.f32.mrf.mxu1 }
 0x443   : > { %4360 = vmatmul.mubr.bf16.gmra.mxu0 %v8480_v58 }
 0x444   : > { %v10714_v33 = vpop.f32.mrf.mxu1  ;;  %7868 = vmatprep.mubr.msk.bf16.mxu0 %vm2803_vm5, %v8484_v51 }
 0x446   : > { %v10723_v46 = vpop.f32.mrf.mxu1 }
 0x448   : > { %v10728_v28 = vpop.f32.mrf.mxu1  ;;  %3934 = vmatmul.mubr.bf16.gmra.mxu1 %v8459_v25 }
 0x449   : > { %7814 = vmatprep.mubr.msk.bf16.mxu1 %vm2803_vm5, %v8463_v55 }
 0x44a   : > { %v10731_v8 = vpop.f32.mrf.mxu1 }
 0x44b   : > { %4370 = vmatmul.mubr.bf16.gmra.mxu0 %v8486_v26 }
 0x44c   : > { %v10733_v45 = vpop.f32.mrf.mxu1 }
 0x44e   : > { %v10741_v29 = vpop.f32.mrf.mxu1 }
 0x450   : > { %v10743_v41 = vpop.f32.mrf.mxu1  ;;  %3944 = vmatmul.mubr.bf16.gmra.mxu1 %v8465_v50 }
 0x451   : > { %7815 = vmatprep.mubr.msk.bf16.mxu1 %vm2803_vm5, %v8469_v15 }
 0x452   : > { %v10746_v53 = vpop.f32.mrf.mxu1 }
 0x454   : > { %v10748_v57 = vpop.f32.mrf.mxu1 }
 0x456   : > { %v10756_v1 = vpop.f32.mrf.mxu1 }
 0x458   : > { %v10758_v5 = vpop.f32.mrf.mxu1  ;;  %3954 = vmatmul.mubr.bf16.gmra.mxu1 %v8471_v17 }
 0x459   : > { %7816 = vmatprep.mubr.msk.bf16.mxu1 %vm2803_vm5, %v8475_v52 }
 0x45a   : > { %v10761_v63 = vpop.f32.mrf.mxu1 }
 0x45c   : > { %v10763_v16 = vpop.f32.mrf.mxu1 }
 0x45e   : > { %v10771_v20 = vpop.f32.mrf.mxu1 }
 0x460   : > { %v10773_v23 = vpop.f32.mrf.mxu1  ;;  %3964 = vmatmul.mubr.bf16.gmra.mxu1 %v8477_v0 }
 0x461   : > { %7817 = vmatprep.mubr.msk.bf16.mxu1 %vm2803_vm5, %v8481_v18 }
 0x462   : > { %v10776_v31 = vpop.f32.mrf.mxu1 }
 0x463   : > { %13868 = vst [vmem:[#allocation6_spill] sm:$0xff] %v10776_v31 }
 0x464   : > { %v10778_v48 = vpop.f32.mrf.mxu1 }
 0x466   : > { %v10783_v43 = vpop.f32.mrf.mxu1 }
 0x467   : > { %13869 = vst [vmem:[#allocation29_spill] sm:$0xff] %v10783_v43 }
 0x468   : > { %v10785_v21 = vpop.f32.mrf.mxu1  ;;  %3974 = vmatmul.mubr.bf16.gmra.mxu1 %v8483_v22 }
 0x46a   : > { %v10787_v12 = vpop.f32.mrf.mxu1 }
 0x46b   : > { %13870 = vst [vmem:[#allocation7_spill] sm:$0xff] %v10787_v12 }
 0x46c   : > { %v10789_v10 = vpop.f32.mrf.mxu1 }
 0x46e   : > { %v10791_v47 = vpop.f32.mrf.mxu1 }
 0x46f   : > { %13871 = vst [vmem:[#allocation30_spill] sm:$0xff] %v10791_v47 }
 0x470   : > { %v10793_v39 = vpop.f32.mrf.mxu1 }
 0x471   : > { %v3489_v62 = vpop.f32.mrf.mxu0 }
 0x472   : > { %v10795_v9 = vpop.f32.mrf.mxu1 }
 0x473   : > { %13872 = vst [vmem:[#allocation8_spill] sm:$0xff] %v10795_v9  ;;  %v10797_v44 = vpop.f32.mrf.mxu0 }
 0x474   : > { %v10799_v38 = vpop.f32.mrf.mxu1 }
 0x475   : > { %v3493_v24 = vpop.f32.mrf.mxu0 }
 0x476   : > { %v10801_v56 = vpop.f32.mrf.mxu1 }
 0x477   : > { %13873 = vst [vmem:[#allocation31_spill] sm:$0xff] %v10801_v56  ;;  %v10803_v14 = vpop.f32.mrf.mxu0 }
 0x478   : > { %v10805_v6 = vpop.f32.mrf.mxu1 }
 0x479   : > { %v3499_v3 = vpop.f32.mrf.mxu0 }
 0x47a   : > { %v10807_v35 = vpop.f32.mrf.mxu1 }
 0x47b   : > { %13874 = vst [vmem:[#allocation10_spill] sm:$0xff] %v10807_v35  ;;  %v10809_v30 = vpop.f32.mrf.mxu0 }
 0x47c   : > { %v10811_v42 = vpop.f32.mrf.mxu1 }
 0x47d   : > { %v3503_v13 = vpop.f32.mrf.mxu0 }
 0x47e   : > { %v10813_v34 = vpop.f32.mrf.mxu1 }
 0x47f   : > { %13875 = vst [vmem:[#allocation27_spill] sm:$0xff] %v10813_v34  ;;  %v10815_v11 = vpop.f32.mrf.mxu0 }
 0x480   : > { %v10817_v49 = vpop.f32.mrf.mxu1 }
 0x481   : > { %v3509_v19 = vpop.f32.mrf.mxu0 }
 0x482   : > { %v10819_v59 = vpop.f32.mrf.mxu1 }
 0x483   : > { %13876 = vst [vmem:[#allocation5_spill] sm:$0xff] %v10819_v59  ;;  %v10821_v7 = vpop.f32.mrf.mxu0 }
 0x484   : > { %v10823_v2 = vpop.f32.mrf.mxu1 }
 0x485   : > { %v3513_v4 = vpop.f32.mrf.mxu0 }
 0x486   : > { %v10825_v37 = vpop.f32.mrf.mxu1 }
 0x487   : > { %13877 = vst [vmem:[#allocation35_spill] sm:$0xff] %v10825_v37  ;;  %v10827_v60 = vpop.f32.mrf.mxu0 }
 0x488   : > { %v10829_v32 = vpop.f32.mrf.mxu1 }
 0x489   : > { %v3519_v27 = vpop.f32.mrf.mxu0 }
 0x48a   : > { %v10831_v54 = vpop.f32.mrf.mxu1 }
 0x48b   : > { %13878 = vst [vmem:[#allocation14_spill] sm:$0xff] %v10831_v54  ;;  %v10833_v40 = vpop.f32.mrf.mxu0 }
 0x48c   : > { %v10835_v58 = vpop.f32.mrf.mxu1 }
 0x48d   : > { %v3523_v51 = vpop.f32.mrf.mxu0 }
 0x48e   : > { %v10837_v25 = vpop.f32.mrf.mxu1 }
 0x48f   : > { %13879 = vst [vmem:[#allocation26_spill] sm:$0xff] %v10837_v25  ;;  %v10839_v55 = vpop.f32.mrf.mxu0 }
 0x490   : > { %13880 = vst [vmem:[#allocation4_spill] sm:$0xff] %v10839_v55  ;;  %v3134_v26 = vpop.f32.mrf.mxu1 }
 0x491   : > { %v3135_v50 = vadd.f32 %v3134_v26, %v10706_v36 }
 0x492   : > { %v10842_v15 = vpop.f32.mrf.mxu1  ;;  %v3529_v17 = vpop.f32.mrf.mxu0 }
 0x493   : > { %v10844_v52 = vadd.f32 %v3489_v62, %v3135_v50 }
 0x494   : > { %v3138_v0 = vpop.f32.mrf.mxu1  ;;  %v10846_v18 = vpop.f32.mrf.mxu0 }
 0x495   : > { %13881 = vst [vmem:[#allocation49_spill] sm:$0xff] %v10846_v18  ;;  %v3139_v22 = vadd.f32 %v3138_v0, %v10714_v33 }
 0x496   : > { %v10849_v54 = vpop.f32.mrf.mxu1  ;;  %v3533_v37 = vpop.f32.mrf.mxu0 }
 0x497   : > { %v10851_v59 = vadd.f32 %v3493_v24, %v3139_v22 }
 0x498   : > { %v3144_v25 = vpop.f32.mrf.mxu1  ;;  %v10853_v34 = vpop.f32.mrf.mxu0 }
 0x499   : > { %13882 = vst [vmem:[#allocation45_spill] sm:$0xff] %v10853_v34  ;;  %v3145_v36 = vadd.f32 %v3144_v25, %v10728_v28 }
 0x49a   : > { %v10856_v26 = vpop.f32.mrf.mxu1  ;;  %v3539_v35 = vpop.f32.mrf.mxu0 }
 0x49b   : > { %v10858_v62 = vadd.f32 %v3499_v3, %v3145_v36 }
 0x49c   : > { %v3148_v50 = vpop.f32.mrf.mxu1  ;;  %v10860_v56 = vpop.f32.mrf.mxu0 }
 0x49d   : > { %13883 = vst [vmem:[#allocation50_spill] sm:$0xff] %v10860_v56  ;;  %v3149_v33 = vadd.f32 %v3148_v50, %v10733_v45 }
 0x49e   : > { %v10863_v0 = vpop.f32.mrf.mxu1  ;;  %v3543_v9 = vpop.f32.mrf.mxu0 }
 0x49f   : > { %v10865_v24 = vadd.f32 %v3503_v13, %v3149_v33 }
 0x4a0   : > { %v3154_v22 = vpop.f32.mrf.mxu1  ;;  %v10867_v47 = vpop.f32.mrf.mxu0 }
 0x4a1   : > { %13884 = vst [vmem:[#allocation25_spill] sm:$0xff] %v10867_v47  ;;  %v3155_v28 = vadd.f32 %v3154_v22, %v10743_v41 }
 0x4a2   : > { %v10870_v25 = vpop.f32.mrf.mxu1  ;;  %v3549_v12 = vpop.f32.mrf.mxu0 }
 0x4a3   : > { %v10872_v3 = vadd.f32 %v3509_v19, %v3155_v28 }
 0x4a4   : > { %v3158_v36 = vpop.f32.mrf.mxu1  ;;  %v10874_v34 = vpop.f32.mrf.mxu0 }
 0x4a5   : > { %13885 = vst [vmem:[#allocation3_spill] sm:$0xff] %v10874_v34  ;;  %v3159_v45 = vadd.f32 %v3158_v36, %v10748_v57 }
 0x4a6   : > { %v10877_v50 = vpop.f32.mrf.mxu1  ;;  %v3553_v56 = vpop.f32.mrf.mxu0 }
 0x4a7   : > { %v10879_v13 = vadd.f32 %v3513_v4, %v3159_v45 }
 0x4a8   : > { %v3164_v33 = vpop.f32.mrf.mxu1  ;;  %v10881_v43 = vpop.f32.mrf.mxu0 }
 0x4a9   : > { %13886 = vst [vmem:[#allocation48_spill] sm:$0xff] %v10881_v43  ;;  %v3165_v41 = vadd.f32 %v3164_v33, %v10758_v5 }
 0x4aa   : > { %v10884_v22 = vpop.f32.mrf.mxu1  ;;  %v3559_v47 = vpop.f32.mrf.mxu0 }
 0x4ab   : > { %v10886_v19 = vadd.f32 %v3519_v27, %v3165_v41 }
 0x4ac   : > { %v3168_v28 = vpop.f32.mrf.mxu1  ;;  %v10888_v18 = vpop.f32.mrf.mxu0 }
 0x4ad   : > { %13887 = vst [vmem:[#allocation40_spill] sm:$0xff] %v10888_v18  ;;  %v3169_v57 = vadd.f32 %v3168_v28, %v10763_v16 }
 0x4ae   : > { %v10891_v36 = vpop.f32.mrf.mxu1  ;;  %v3563_v34 = vpop.f32.mrf.mxu0 }
 0x4af   : > { %v10893_v4 = vadd.f32 %v3523_v51, %v3169_v57 }
 0x4b0   : > { %v3174_v45 = vpop.f32.mrf.mxu1  ;;  %v10895_v31 = vpop.f32.mrf.mxu0 }
 0x4b1   : > { %13888 = vst [vmem:[#allocation44_spill] sm:$0xff] %v10893_v4  ;;  %13889 = vst [vmem:[#allocation22_spill] sm:$0xff] %v10895_v31  ;;  %v3175_v5 = vadd.f32 %v3174_v45, %v10773_v23  ;;  %v10911_v31 = vpop.permute.xlu1 %4512 }
 0x4b2   : > { %v10898_v33 = vpop.f32.mrf.mxu1  ;;  %v3569_v43 = vpop.f32.mrf.mxu0  ;;  %13894 = vst [vmem:[#allocation9_spill] sm:$0xff] %v10911_v31 }
 0x4b3   : > { %v10900_v27 = vadd.f32 %v3529_v17, %v3175_v5 }
 0x4b4   : > { %v3178_v41 = vpop.f32.mrf.mxu1  ;;  %v10902_v55 = vpop.f32.mrf.mxu0 }
 0x4b5   : > { %13890 = vst [vmem:[#allocation34_spill] sm:$0xff] %v10900_v27  ;;  %13891 = vst [vmem:[#allocation13_spill] sm:$0xff] %v10902_v55  ;;  %v3179_v16 = vadd.f32 %v3178_v41, %v10778_v48  ;;  %v10920_v48 = vpop.permute.xlu0 %4517 }
 0x4b6   : > { %v10905_v28 = vpop.f32.mrf.mxu1  ;;  %v3573_v18 = vpop.f32.mrf.mxu0  ;;  %13898 = vst [vmem:[#allocation33_spill] sm:$0xff] %v10920_v48 }
 0x4b7   : > { %v10907_v51 = vadd.f32 %v3533_v37, %v3179_v16 }
 0x4b8   : > { %v3184_v57 = vpop.f32.mrf.mxu1  ;;  %v10909_v4 = vpop.f32.mrf.mxu0 }
 0x4b9   : > { %13892 = vst [vmem:[#allocation15_spill] sm:$0xff] %v10907_v51  ;;  %13893 = vst [vmem:[#allocation37_spill] sm:$0xff] %v10909_v4  ;;  %v3185_v23 = vadd.f32 %v3184_v57, %v10785_v21  ;;  %v10925_v4 = vpop.permute.xlu1 %4502  ;;  %v10936_v48 = vpop.permute.xlu0 %4507 }
 0x4ba   : > { %v10914_v45 = vpop.f32.mrf.mxu1  ;;  %v3579_v17 = vpop.f32.mrf.mxu0  ;;  %13900 = vst [vmem:[#allocation11_spill] sm:$0xff] %v10925_v4  ;;  %13905 = vst [vmem:[#allocation41_spill] sm:$0xff] %v10936_v48 }
 0x4bb   : > { %13895 = vst [vmem:[#allocation36_spill] sm:$0xff] %v10914_v45  ;;  %v10916_v5 = vadd.f32 %v3539_v35, %v3185_v23 }
 0x4bc   : > { %v3188_v55 = vpop.f32.mrf.mxu1  ;;  %v10918_v27 = vpop.f32.mrf.mxu0 }
 0x4bd   : > { %13896 = vst [vmem:[#allocation39_spill] sm:$0xff] %v10916_v5  ;;  %13897 = vst [vmem:[#allocation18_spill] sm:$0xff] %v10918_v27  ;;  %v3189_v37 = vadd.f32 %v3188_v55, %v10789_v10  ;;  %v10941_v4 = vpop.permute.xlu1 %4492 }
 0x4be   : > { %v10923_v41 = vpop.f32.mrf.mxu1  ;;  %v3583_v16 = vpop.f32.mrf.mxu0  ;;  %13906 = vst [vmem:[#allocation17_spill] sm:$0xff] %v10941_v4 }
 0x4bf   : > { %13899 = vst [vmem:[#allocation32_spill] sm:$0xff] %v10923_v41  ;;  %v10927_v31 = vadd.f32 %v3543_v9, %v3189_v37 }
 0x4c0   : > { %v3194_v21 = vpop.f32.mrf.mxu1  ;;  %v10929_v57 = vpop.f32.mrf.mxu0 }
 0x4c1   : > { %13901 = vst [vmem:[#allocation51_spill] sm:$0xff] %v10927_v31  ;;  %13902 = vst [vmem:[#allocation12_spill] sm:$0xff] %v10929_v57  ;;  %v3195_v35 = vadd.f32 %v3194_v21, %v10793_v39 }
 0x4c2   : > { %v10932_v23 = vpop.f32.mrf.mxu1 }
 0x4c3   : > { %13903 = vst [vmem:[#allocation38_spill] sm:$0xff] %v10932_v23  ;;  %v10934_v5 = vadd.f32 %v3549_v12, %v3195_v35  ;;  %v4281_v27 = vpop.f32.mrf.mxu0  ;;  %v10952_v35 = vpop.permute.xlu0 %4497 }
 0x4c4   : > { %v3198_v10 = vpop.f32.mrf.mxu1  ;;  %13909 = vst [vmem:[#allocation46_spill] sm:$0xff] %v10952_v35 }
 0x4c5   : > { %13904 = vst [vmem:[#allocation16_spill] sm:$0xff] %v10934_v5  ;;  %v3199_v55 = vadd.f32 %v3198_v10, %v10799_v38  ;;  %v10939_v41 = vpop.f32.mrf.mxu0  ;;  %v10960_v5 = vpop.permute.xlu1 %4482 }
 0x4c6   : > { %v10943_v9 = vpop.f32.mrf.mxu1  ;;  %13912 = vst [vmem:[#allocation19_spill] sm:$0xff] %v10960_v5 }
 0x4c7   : > { %13907 = vst [vmem:[#allocation43_spill] sm:$0xff] %v10943_v9  ;;  %v10945_v37 = vadd.f32 %v3553_v56, %v3199_v55  ;;  %v10947_v57 = vpop.f32.mrf.mxu0  ;;  %v10971_v35 = vpop.permute.xlu0 %4487 }
 0x4c8   : > { %v3204_v39 = vpop.f32.mrf.mxu1  ;;  %13915 = vst [vmem:[#allocation23_spill] sm:$0xff] %v10971_v35 }
 0x4c9   : > { %13908 = vst [vmem:[#allocation20_spill] sm:$0xff] %v10945_v37  ;;  %v3205_v12 = vadd.f32 %v3204_v39, %v10805_v6  ;;  %v10950_v21 = vpop.f32.mrf.mxu0 }
 0x4ca   : > { %v10954_v48 = vpop.f32.mrf.mxu1 }
 0x4cb   : > { %13910 = vst [vmem:[#allocation21_spill] sm:$0xff] %v10954_v48  ;;  %v10956_v38 = vadd.f32 %v3559_v47, %v3205_v12  ;;  %v10958_v10 = vpop.f32.mrf.mxu0 }
 0x4cc   : > { %v3208_v9 = vpop.f32.mrf.mxu1 }
 0x4cd   : > { %13911 = vst [vmem:[#allocation42_spill] sm:$0xff] %v10956_v38  ;;  %v3209_v56 = vadd.f32 %v3208_v9, %v10811_v42  ;;  %v10963_v55 = vpop.f32.mrf.mxu0  ;;  %v10976_v38 = vpop.permute.xlu1 %4472 }
 0x4ce   : > { %v10965_v37 = vpop.f32.mrf.mxu1 }
 0x4cf   : > { %13913 = vst [vmem:[#allocation47_spill] sm:$0xff] %v10965_v37  ;;  %v10967_v6 = vadd.f32 %v3563_v34, %v3209_v56  ;;  %v10969_v39 = vpop.f32.mrf.mxu0 }
 0x4d0   : > { %v3214_v48 = vpop.f32.mrf.mxu1 }
 0x4d1   : > { %13914 = vst [vmem:[#allocation28_spill] sm:$0xff] %v10967_v6  ;;  %v3215_v47 = vadd.f32 %v3214_v48, %v10817_v49  ;;  %v10974_v12 = vpop.f32.mrf.mxu0  ;;  %v10987_v6 = vpop.permute.xlu0 %4477 }
 0x4d2   : > { %v10978_v31 = vpop.f32.mrf.mxu1  ;;  %v10995_v23 = vpop.permute.xlu1 %4462 }
 0x4d3   : > { %13916 = vst [vmem:[#allocation24_spill] sm:$0xff] %v10978_v31  ;;  %v10980_v42 = vadd.f32 %v3569_v43, %v3215_v47  ;;  %v10982_v9 = vpop.f32.mrf.mxu0 }
 0x4d4   : > { %v3218_v37 = vpop.f32.mrf.mxu1 }
 0x4d5   : > { %13917 = vst [vmem:[#allocation52_spill] sm:$0xff] %v10980_v42  ;;  %v3219_v34 = vadd.f32 %v3218_v37, %v10823_v2  ;;  %v10985_v56 = vpop.f32.mrf.mxu0  ;;  %v11006_v35 = vpop.permute.xlu0 %4467 }
 0x4d6   : > { %v10989_v4 = vpop.f32.mrf.mxu1  ;;  %v4453_v51 = vpop.permute.xlu1 %4452 }
 0x4d7   : > { %13918 = vst [vmem:[#allocation53_spill] sm:$0xff] %v10989_v4  ;;  %v10991_v49 = vadd.f32 %v3573_v18, %v3219_v34  ;;  %v10993_v48 = vpop.f32.mrf.mxu0  ;;  %v3137_v18 = vadd.f32 %v10842_v15, %v10712_v61 }
 0x4d8   : > { %v3224_v31 = vpop.f32.mrf.mxu1 }
 0x4d9   : > { %13919 = vst [vmem:[#allocation54_spill] sm:$0xff] %v10991_v49  ;;  %v3225_v43 = vadd.f32 %v3224_v31, %v10829_v32  ;;  %v10998_v47 = vpop.f32.mrf.mxu0 }
 0x4da   : > { %v11000_v42 = vpop.f32.mrf.mxu1 }
 0x4db   : > { %13920 = vst [vmem:[#allocation55_spill] sm:$0xff] %v11000_v42  ;;  %v11002_v2 = vadd.f32 %v3579_v17, %v3225_v43  ;;  %v11004_v37 = vpop.f32.mrf.mxu0  ;;  %v3589_v43 = vadd.f32 %v10797_v44, %v3137_v18 }
 0x4dc   : > { %v3228_v4 = vpop.f32.mrf.mxu1 }
 0x4dd   : > { %13921 = vst [vmem:[#allocation56_spill] sm:$0xff] %v11002_v2  ;;  %v3229_v34 = vadd.f32 %v3228_v4, %v10835_v58  ;;  %v11011_v49 = vpop.f32.mrf.mxu0  ;;  %v3141_v2 = vadd.f32 %v10849_v54, %v10723_v46  ;;  %v11025_v58 = vpop.permute.xlu0 %4457 }
 0x4de   : > { %v11013_v31 = vpop.f32.mrf.mxu1 }
 0x4df   : > { %13922 = vst [vmem:[#allocation57_spill] sm:$0xff] %v11013_v31  ;;  %v11015_v32 = vadd.f32 %v3583_v16, %v3229_v34  ;;  %v11017_v42 = vpop.f32.mrf.mxu0  ;;  %v4443_v16 = vpop.permute.xlu1 %4442  ;;  %v3147_v34 = vadd.f32 %v10856_v26, %v10731_v8  ;;  %v3591_v44 = vadd.f32 %v10803_v14, %v3141_v2 }
 0x4e0   : > { %v3885_v17 = vpop.f32.mrf.mxu1 }
 0x4e1   : > { %13923 = vst [vmem:[#allocation58_spill] sm:$0xff] %v11015_v32  ;;  %v3984_v5 = vadd.f32 %v3885_v17, %v10844_v52  ;;  %v11023_v61 = vpop.f32.mrf.mxu0  ;;  %v4448_v26 = vpop.permute.xlu0 %4447  ;;  %v3593_v14 = vadd.f32 %v10809_v30, %v3147_v34 }
 0x4e2   : > { %v3887_v15 = vpop.f32.mrf.mxu1 }
 0x4e3   : > { %v4380_v4 = vadd.f32 %v4281_v27, %v3984_v5  ;;  %v3985_v45 = vadd.f32 %v3887_v15, %v3589_v43  ;;  %v11027_v31 = vpop.f32.mrf.mxu0 }
 0x4e4   : > { %v3889_v32 = vpop.f32.mrf.mxu1 }
 0x4e5   : > { %v11032_v18 = vadd.f32 %v4443_v16, %v4380_v4  ;;  %v4381_v46 = vadd.f32 %v10939_v41, %v3985_v45  ;;  %v3986_v54 = vadd.f32 %v3889_v32, %v10851_v59  ;;  %v11036_v52 = vpop.f32.mrf.mxu0  ;;  %v3151_v45 = vadd.f32 %v10863_v0, %v10741_v29 }
 0x4e6   : > { %v3891_v17 = vpop.f32.mrf.mxu1 }
 0x4e7   : > { %v4580_v27 = vmax.f32 %v11032_v18, 0.0  ;;  %v11039_v5 = vadd.f32 %v4443_v16, %v4381_v46  ;;  %v4382_v43 = vadd.f32 %v10947_v57, %v3986_v54  ;;  %v3987_v15 = vadd.f32 %v3891_v17, %v3591_v44  ;;  %v11042_v8 = vpop.f32.mrf.mxu0 }
 0x4e8   : > { %v3895_v41 = vpop.f32.mrf.mxu1  ;;  %v3157_v44 = vadd.f32 %v10870_v25, %v10746_v53 }
 0x4e9   : > { %v4581_v59 = vmax.f32 %v11039_v5, 0.0  ;;  %v11048_v2 = vadd.f32 %v4448_v26, %v4382_v43  ;;  %v4383_v32 = vadd.f32 %v10950_v21, %v3987_v15  ;;  %v3988_v4 = vadd.f32 %v3895_v41, %v10858_v62  ;;  %4660 = vrot.lane.b32.xlu0 %v4580_v27, %s8513_s29  ;;  %v11055_v57 = vpop.f32.mrf.mxu0 }
 0x4ea   : > { %v3897_v16 = vpop.f32.mrf.mxu1  ;;  %v3595_v62 = vadd.f32 %v10815_v11, %v3151_v45  ;;  %v3161_v45 = vadd.f32 %v10877_v50, %v10756_v1 }
 0x4eb   : > { %v4582_v30 = vmax.f32 %v11048_v2, 0.0  ;;  %v11058_v34 = vadd.f32 %v4448_v26, %v4383_v32  ;;  %v3989_v29 = vadd.f32 %v3897_v16, %v3593_v14  ;;  %v4384_v0 = vadd.f32 %v10958_v10, %v3988_v4  ;;  %4662 = vrot.lane.b32.xlu1 %v4581_v59, %s8513_s29  ;;  %v11064_v21 = vpop.f32.mrf.mxu0 }
 0x4ec   : > { %v3899_v46 = vpop.f32.mrf.mxu1 }
 0x4ed   : > { %v4583_v54 = vmax.f32 %v11058_v34, 0.0  ;;  %v11070_v17 = vadd.f32 %v4453_v51, %v4384_v0  ;;  %v3990_v43 = vadd.f32 %v3899_v46, %v10865_v24  ;;  %v4385_v10 = vadd.f32 %v10963_v55, %v3989_v29  ;;  %4664 = vrot.lane.b32.xlu0 %v4582_v30, %s8513_s29  ;;  %v11077_v15 = vpop.f32.mrf.mxu0 }
 0x4ee   : > { %v3901_v26 = vpop.f32.mrf.mxu1  ;;  %v3597_v55 = vadd.f32 %v10821_v7, %v3157_v44 }
 0x4ef   : > { %v13649_v11 = vmax.f32 %v11070_v17, 0.0  ;;  %v11080_v14 = vadd.f32 %v4453_v51, %v4385_v10  ;;  %v3991_v53 = vadd.f32 %v3901_v26, %v3595_v62  ;;  %v4386_v25 = vadd.f32 %v10969_v39, %v3990_v43  ;;  %4666 = vrot.lane.b32.xlu1 %v4583_v54, %s8513_s29  ;;  %v11086_v24 = vpop.f32.mrf.mxu0 }
 0x4f0   : > { %v3905_v41 = vpop.f32.mrf.mxu1  ;;  %v3167_v62 = vadd.f32 %v10884_v22, %v10761_v63 }
 0x4f1   : > { %v13650_v32 = vmax.f32 %v11080_v14, 0.0  ;;  %v11093_v51 = vadd.f32 %v11025_v58, %v4386_v25  ;;  %v3992_v4 = vadd.f32 %v3905_v41, %v10872_v3  ;;  %v4387_v39 = vadd.f32 %v10974_v12, %v3991_v53  ;;  %4668 = vrot.lane.b32.xlu0 %v13649_v11, %s8513_s29  ;;  %v11100_v16 = vpop.f32.mrf.mxu0 }
 0x4f2   : > { %v3907_v7 = vpop.f32.mrf.mxu1  ;;  %v3599_v12 = vadd.f32 %v10827_v60, %v3161_v45  ;;  %v13982_v2 = vmax.f32 %v11080_v14, 0.0 }
 0x4f3   : > { %v13645_v29 = vmax.f32 %v11093_v51, 0.0  ;;  %v11104_v1 = vadd.f32 %v11025_v58, %v4387_v39  ;;  %v3993_v50 = vadd.f32 %v3907_v7, %v3597_v55  ;;  %v4388_v0 = vadd.f32 %v10982_v9, %v3992_v4  ;;  %4670 = vrot.lane.b32.xlu1 %v13650_v32, %s8513_s29  ;;  %v11110_v3 = vpop.f32.mrf.mxu0  ;;  %v13925_v7 = vld [vmem:[#allocation6_spill] sm:$0xff]  ;;  %v13979_v32 = vld [vmem:[#allocation56_spill] sm:$0xff] }
 0x4f4   : > { %v3909_v44 = vpop.f32.mrf.mxu1 }
 0x4f5   : > { %v13646_v46 = vmax.f32 %v11104_v1, 0.0  ;;  %v11117_v58 = vadd.f32 %v10995_v23, %v4388_v0  ;;  %v3994_v43 = vadd.f32 %v3909_v44, %v10879_v13  ;;  %v4389_v9 = vadd.f32 %v10985_v56, %v3993_v50  ;;  %4672 = vrot.lane.b32.xlu0 %v13645_v29, %s8513_s29  ;;  %v11124_v26 = vpop.f32.mrf.mxu0 }
 0x4f6   : > { %v3911_v10 = vpop.f32.mrf.mxu1  ;;  %v3601_v13 = vadd.f32 %v10833_v40, %v3167_v62  ;;  %v3171_v56 = vadd.f32 %v10891_v36, %v10771_v20  ;;  %v3177_v50 = vadd.f32 %v10898_v33, %v13925_v7 }
 0x4f7   : > { %v13641_v60 = vmax.f32 %v11117_v58, 0.0  ;;  %v11128_v63 = vadd.f32 %v10995_v23, %v4389_v9  ;;  %v3995_v22 = vadd.f32 %v3911_v10, %v3599_v12  ;;  %v4390_v53 = vadd.f32 %v10993_v48, %v3994_v43  ;;  %4674 = vrot.lane.b32.xlu1 %v13646_v46, %s8513_s29  ;;  %v11146_v4 = vpop.f32.mrf.mxu0 }
 0x4f8   : > { %v3915_v25 = vpop.f32.mrf.mxu1 }
 0x4f9   : > { %v13642_v55 = vmax.f32 %v11128_v63, 0.0  ;;  %v11139_v45 = vadd.f32 %v11006_v35, %v4390_v53  ;;  %v3996_v23 = vadd.f32 %v3915_v25, %v10886_v19  ;;  %v4391_v41 = vadd.f32 %v10998_v47, %v3995_v22  ;;  %4676 = vrot.lane.b32.xlu0 %v13641_v60, %s8513_s29  ;;  %v13924_v19 = vld [vmem:[#allocation4_spill] sm:$0xff]  ;;  %v11168_v9 = vpop.f32.mrf.mxu0 }
 0x4fa   : > { %v3917_v48 = vpop.f32.mrf.mxu1  ;;  %v3603_v47 = vadd.f32 %v13924_v19, %v3171_v56  ;;  %v13928_v56 = vld [vmem:[#allocation29_spill] sm:$0xff] }
 0x4fb   : > { %v13635_v40 = vmax.f32 %v11139_v45, 0.0  ;;  %v11150_v20 = vadd.f32 %v11006_v35, %v4391_v41  ;;  %v3997_v36 = vadd.f32 %v3917_v48, %v3601_v13  ;;  %v4392_v39 = vadd.f32 %v11004_v37, %v3996_v23  ;;  %4678 = vrot.lane.b32.xlu1 %v13642_v55, %s8513_s29  ;;  %v13926_v35 = vld [vmem:[#allocation44_spill] sm:$0xff]  ;;  %v11190_v19 = vpop.f32.mrf.mxu0  ;;  %v13968_v55 = vld [vmem:[#allocation33_spill] sm:$0xff] }
 0x4fc   : > { %v3919_v0 = vpop.f32.mrf.mxu1  ;;  %v3181_v25 = vadd.f32 %v10905_v28, %v13928_v56 }
 0x4fd   : > { %v13638_v12 = vmax.f32 %v11150_v20, 0.0  ;;  %v11161_v62 = vadd.f32 %v10976_v38, %v4392_v39  ;;  %v3998_v44 = vadd.f32 %v3919_v0, %v13926_v35  ;;  %v4393_v43 = vadd.f32 %v11011_v49, %v3997_v36  ;;  %4680 = vrot.lane.b32.xlu0 %v13635_v40, %s8513_s29  ;;  %v13927_v49 = vld [vmem:[#allocation49_spill] sm:$0xff]  ;;  %v13931_v35 = vld [vmem:[#allocation7_spill] sm:$0xff] }
 0x4fe   : > { %v3921_v37 = vpop.f32.mrf.mxu1  ;;  %v3605_v13 = vadd.f32 %v13927_v49, %v3177_v50 }
 0x4ff   : > { %v13629_v10 = vmax.f32 %v11161_v62, 0.0  ;;  %v11172_v33 = vadd.f32 %v10976_v38, %v4393_v43  ;;  %v3999_v22 = vadd.f32 %v3921_v37, %v3603_v47  ;;  %v4394_v53 = vadd.f32 %v11017_v42, %v3998_v44  ;;  %4682 = vrot.lane.b32.xlu1 %v13638_v12, %s8513_s29  ;;  %v13929_v38 = vld [vmem:[#allocation34_spill] sm:$0xff]  ;;  %v13932_v44 = vld [vmem:[#allocation36_spill] sm:$0xff]  ;;  %v13963_v12 = vld [vmem:[#allocation9_spill] sm:$0xff] }
 0x500   : > { %v3925_v23 = vpop.f32.mrf.mxu1  ;;  %v3187_v43 = vadd.f32 %v13932_v44, %v13931_v35 }
 0x501   : > { %v13632_v41 = vmax.f32 %v11172_v33, 0.0  ;;  %v11183_v48 = vadd.f32 %v10987_v6, %v4394_v53  ;;  %v4000_v36 = vadd.f32 %v3925_v23, %v13929_v38  ;;  %v4395_v39 = vadd.f32 %v11023_v61, %v3999_v22  ;;  %4684 = vrot.lane.b32.xlu0 %v13629_v10, %s8513_s29  ;;  %v13930_v61 = vld [vmem:[#allocation45_spill] sm:$0xff]  ;;  %v13933_v53 = vld [vmem:[#allocation19_spill] sm:$0xff]  ;;  %v11212_v23 = vpop.f32.mrf.mxu0 }
 0x502   : > { %v3927_v42 = vpop.f32.mrf.mxu1  ;;  %v3607_v0 = vadd.f32 %v13930_v61, %v3181_v25 }
 0x503   : > { %v13625_v47 = vmax.f32 %v11183_v48, 0.0  ;;  %v11194_v28 = vadd.f32 %v10987_v6, %v4395_v39  ;;  %v4001_v7 = vadd.f32 %v3927_v42, %v3605_v13  ;;  %v4396_v50 = vadd.f32 %v11027_v31, %v4000_v36  ;;  %4686 = vrot.lane.b32.xlu1 %v13632_v41, %s8513_s29  ;;  %v13934_v6 = vld [vmem:[#allocation15_spill] sm:$0xff] }
 0x504   : > { %v3929_v37 = vpop.f32.mrf.mxu1 }
 0x505   : > { %v13626_v22 = vmax.f32 %v11194_v28, 0.0  ;;  %v11205_v49 = vadd.f32 %v13933_v53, %v4396_v50  ;;  %v4002_v56 = vadd.f32 %v3929_v37, %v13934_v6  ;;  %v4397_v13 = vadd.f32 %v11036_v52, %v4001_v7  ;;  %4688 = vrot.lane.b32.xlu0 %v13625_v47, %s8513_s29  ;;  %v13935_v52 = vld [vmem:[#allocation50_spill] sm:$0xff]  ;;  %v13937_v50 = vld [vmem:[#allocation32_spill] sm:$0xff]  ;;  %v13938_v37 = vld [vmem:[#allocation23_spill] sm:$0xff] }
 0x506   : > { %v3931_v31 = vpop.f32.mrf.mxu1  ;;  %v3609_v42 = vadd.f32 %v13935_v52, %v3187_v43  ;;  %v13936_v7 = vld [vmem:[#allocation30_spill] sm:$0xff]  ;;  %v13943_v47 = vld [vmem:[#allocation17_spill] sm:$0xff] }
 0x507   : > { %v13624_v25 = vmax.f32 %v11205_v49, 0.0  ;;  %v11216_v38 = vadd.f32 %v13933_v53, %v4397_v13  ;;  %v4003_v36 = vadd.f32 %v3931_v31, %v3607_v0  ;;  %v4398_v39 = vadd.f32 %v11042_v8, %v4002_v56  ;;  %4690 = vrot.lane.b32.xlu1 %v13626_v22, %s8513_s29  ;;  %v13939_v53 = vld [vmem:[#allocation39_spill] sm:$0xff]  ;;  %v11234_v56 = vpop.f32.mrf.mxu0 }
 0x508   : > { %v3191_v61 = vadd.f32 %v13937_v50, %v13936_v7  ;;  %v3935_v35 = vpop.f32.mrf.mxu1  ;;  %v13941_v7 = vld [vmem:[#allocation8_spill] sm:$0xff]  ;;  %v13942_v50 = vld [vmem:[#allocation38_spill] sm:$0xff] }
 0x509   : > { %v13628_v44 = vmax.f32 %v11216_v38, 0.0  ;;  %v11227_v6 = vadd.f32 %v13938_v37, %v4398_v39  ;;  %v4004_v13 = vadd.f32 %v3935_v35, %v13939_v53  ;;  %v4399_v0 = vadd.f32 %v11055_v57, %v4003_v36  ;;  %4692 = vrot.lane.b32.xlu0 %v13624_v25, %s8513_s29  ;;  %v13940_v57 = vld [vmem:[#allocation25_spill] sm:$0xff] }
 0x50a   : > { %v3937_v8 = vpop.f32.mrf.mxu1  ;;  %v3611_v36 = vadd.f32 %v13940_v57, %v3191_v61  ;;  %v3197_v35 = vadd.f32 %v13942_v50, %v13941_v7  ;;  %v13946_v7 = vld [vmem:[#allocation31_spill] sm:$0xff] }
 0x50b   : > { %v13627_v43 = vmax.f32 %v11227_v6, 0.0  ;;  %v11238_v31 = vadd.f32 %v13938_v37, %v4399_v0  ;;  %v4005_v52 = vadd.f32 %v3937_v8, %v3609_v42  ;;  %v4400_v39 = vadd.f32 %v11064_v21, %v4004_v13  ;;  %4694 = vrot.lane.b32.xlu1 %v13628_v44, %s8513_s29  ;;  %v13944_v37 = vld [vmem:[#allocation51_spill] sm:$0xff]  ;;  %v11256_v13 = vpop.f32.mrf.mxu0  ;;  %v13948_v44 = vld [vmem:[#allocation46_spill] sm:$0xff] }
 0x50c   : > { %v3939_v53 = vpop.f32.mrf.mxu1  ;;  %v13947_v50 = vld [vmem:[#allocation43_spill] sm:$0xff] }
 0x50d   : > { %v13630_v25 = vmax.f32 %v11238_v31, 0.0  ;;  %v11249_v22 = vadd.f32 %v13943_v47, %v4400_v39  ;;  %v4006_v0 = vadd.f32 %v3939_v53, %v13944_v37  ;;  %v4401_v42 = vadd.f32 %v11077_v15, %v4005_v52  ;;  %4696 = vrot.lane.b32.xlu0 %v13627_v43, %s8513_s29  ;;  %v13945_v15 = vld [vmem:[#allocation3_spill] sm:$0xff] }
 0x50e   : > { %v3941_v21 = vpop.f32.mrf.mxu1  ;;  %v3613_v52 = vadd.f32 %v13945_v15, %v3197_v35  ;;  %v3201_v53 = vadd.f32 %v13947_v50, %v13946_v7  ;;  %v13951_v7 = vld [vmem:[#allocation10_spill] sm:$0xff]  ;;  %v13952_v50 = vld [vmem:[#allocation21_spill] sm:$0xff] }
 0x50f   : > { %v13631_v61 = vmax.f32 %v11249_v22, 0.0  ;;  %v11260_v8 = vadd.f32 %v13943_v47, %v4401_v42  ;;  %v4007_v57 = vadd.f32 %v3941_v21, %v3611_v36  ;;  %v4402_v39 = vadd.f32 %v11086_v24, %v4006_v0  ;;  %4698 = vrot.lane.b32.xlu1 %v13630_v25, %s8513_s29  ;;  %v13949_v47 = vld [vmem:[#allocation16_spill] sm:$0xff]  ;;  %v11278_v0 = vpop.f32.mrf.mxu0 }
 0x510   : > { %v3945_v37 = vpop.f32.mrf.mxu1 }
 0x511   : > { %v13633_v43 = vmax.f32 %v11260_v8, 0.0  ;;  %v11271_v10 = vadd.f32 %v13948_v44, %v4402_v39  ;;  %v4008_v42 = vadd.f32 %v3945_v37, %v13949_v47  ;;  %v4403_v36 = vadd.f32 %v11100_v16, %v4007_v57  ;;  %4700 = vrot.lane.b32.xlu0 %v13631_v61, %s8513_s29  ;;  %v13950_v16 = vld [vmem:[#allocation48_spill] sm:$0xff]  ;;  %v13953_v61 = vld [vmem:[#allocation11_spill] sm:$0xff] }
 0x512   : > { %v3947_v24 = vpop.f32.mrf.mxu1  ;;  %v3615_v57 = vadd.f32 %v13950_v16, %v3201_v53  ;;  %v3207_v37 = vadd.f32 %v13952_v50, %v13951_v7  ;;  %v13957_v50 = vld [vmem:[#allocation47_spill] sm:$0xff] }
 0x513   : > { %v13634_v35 = vmax.f32 %v11271_v10, 0.0  ;;  %v11282_v21 = vadd.f32 %v13948_v44, %v4403_v36  ;;  %v4009_v15 = vadd.f32 %v3947_v24, %v3613_v52  ;;  %v4404_v39 = vadd.f32 %v11110_v3, %v4008_v42  ;;  %4702 = vrot.lane.b32.xlu1 %v13633_v43, %s8513_s29  ;;  %v13954_v44 = vld [vmem:[#allocation20_spill] sm:$0xff]  ;;  %v4363_v42 = vpop.f32.mrf.mxu0 }
 0x514   : > { %v3949_v47 = vpop.f32.mrf.mxu1 }
 0x515   : > { %v13636_v25 = vmax.f32 %v11282_v21, 0.0  ;;  %v11293_v41 = vadd.f32 %v13953_v61, %v4404_v39  ;;  %v4010_v36 = vadd.f32 %v3949_v47, %v13954_v44  ;;  %v4405_v52 = vadd.f32 %v11124_v26, %v4009_v15  ;;  %4704 = vrot.lane.b32.xlu0 %v13634_v35, %s8513_s29  ;;  %v13955_v39 = vld [vmem:[#allocation40_spill] sm:$0xff]  ;;  %v13956_v15 = vld [vmem:[#allocation27_spill] sm:$0xff]  ;;  %v13958_v35 = vld [vmem:[#allocation41_spill] sm:$0xff] }
 0x516   : > { %v3951_v3 = vpop.f32.mrf.mxu1  ;;  %v3617_v26 = vadd.f32 %v13955_v39, %v3207_v37  ;;  %v3211_v47 = vadd.f32 %v13957_v50, %v13956_v15  ;;  %v13962_v50 = vld [vmem:[#allocation24_spill] sm:$0xff] }
 0x517   : > { %v13637_v53 = vmax.f32 %v11293_v41, 0.0  ;;  %v11302_v24 = vadd.f32 %v13953_v61, %v4405_v52  ;;  %v4011_v16 = vadd.f32 %v3951_v3, %v3615_v57  ;;  %v4406_v7 = vadd.f32 %v11146_v4, %v4010_v36  ;;  %4706 = vrot.lane.b32.xlu1 %v13636_v25, %s8513_s29  ;;  %v13959_v61 = vld [vmem:[#allocation42_spill] sm:$0xff]  ;;  %v4365_v36 = vpop.f32.mrf.mxu0  ;;  %v11331_v25 = vpop.permute.xlu1 %4532 }
 0x518   : > { %v3955_v44 = vpop.f32.mrf.mxu1 }
 0x519   : > { %v13639_v43 = vmax.f32 %v11302_v24, 0.0  ;;  %v11313_v40 = vadd.f32 %v13958_v35, %v4406_v7  ;;  %v4012_v52 = vadd.f32 %v3955_v44, %v13959_v61  ;;  %v4407_v57 = vadd.f32 %v11168_v9, %v4011_v16  ;;  %4708 = vrot.lane.b32.xlu0 %v13637_v53, %s8513_s29  ;;  %v13960_v7 = vld [vmem:[#allocation22_spill] sm:$0xff]  ;;  %v13961_v16 = vld [vmem:[#allocation5_spill] sm:$0xff] }
 0x51a   : > { %v3957_v4 = vpop.f32.mrf.mxu1  ;;  %v3619_v9 = vadd.f32 %v13960_v7, %v3211_v47  ;;  %v3217_v44 = vadd.f32 %v13962_v50, %v13961_v16 }
 0x51b   : > { %v13640_v37 = vmax.f32 %v11313_v40, 0.0  ;;  %v11322_v3 = vadd.f32 %v13958_v35, %v4407_v57  ;;  %v4013_v39 = vadd.f32 %v3957_v4, %v3617_v26  ;;  %v4408_v15 = vadd.f32 %v11190_v19, %v4012_v52  ;;  %4710 = vrot.lane.b32.xlu1 %v13639_v43, %s8513_s29  ;;  %v13964_v26 = vld [vmem:[#allocation28_spill] sm:$0xff]  ;;  %v4367_v52 = vpop.f32.mrf.mxu0 }
 0x51c   : > { %v3959_v61 = vpop.f32.mrf.mxu1 }
 0x51d   : > { %v13643_v53 = vmax.f32 %v11322_v3, 0.0  ;;  %v11335_v35 = vadd.f32 %v13963_v12, %v4408_v15  ;;  %v4014_v57 = vadd.f32 %v3959_v61, %v13964_v26  ;;  %v4409_v19 = vadd.f32 %v11212_v23, %v4013_v39  ;;  %4712 = vrot.lane.b32.xlu0 %v13640_v37, %s8513_s29  ;;  %v13965_v15 = vld [vmem:[#allocation13_spill] sm:$0xff]  ;;  %v13966_v39 = vld [vmem:[#allocation35_spill] sm:$0xff]  ;;  %v11353_v37 = vpop.permute.xlu0 %4537 }
 0x51e   : > { %v3961_v47 = vpop.f32.mrf.mxu1  ;;  %v3621_v23 = vadd.f32 %v13965_v15, %v3217_v44  ;;  %v13967_v61 = vld [vmem:[#allocation53_spill] sm:$0xff] }
 0x51f   : > { %v13644_v4 = vmax.f32 %v11335_v35, 0.0  ;;  %v11344_v7 = vadd.f32 %v13963_v12, %v4409_v19  ;;  %v4015_v16 = vadd.f32 %v3961_v47, %v3619_v9  ;;  %v4410_v50 = vadd.f32 %v11234_v56, %v4014_v57  ;;  %4714 = vrot.lane.b32.xlu1 %v13643_v53, %s8513_s29  ;;  %v13969_v9 = vld [vmem:[#allocation52_spill] sm:$0xff]  ;;  %v4371_v57 = vpop.f32.mrf.mxu0 }
 0x520   : > { %v3221_v26 = vadd.f32 %v13967_v61, %v13966_v39  ;;  %v3965_v43 = vpop.f32.mrf.mxu1 }
 0x521   : > { %v13647_v60 = vmax.f32 %v11344_v7, 0.0  ;;  %v11357_v12 = vadd.f32 %v13968_v55, %v4410_v50  ;;  %v4016_v19 = vadd.f32 %v3965_v43, %v13969_v9  ;;  %v4411_v56 = vadd.f32 %v11256_v13, %v4015_v16  ;;  %4716 = vrot.lane.b32.xlu0 %v13644_v4, %s8513_s29  ;;  %v4523_v43 = vpop.permute.xlu1 %4522  ;;  %v13970_v13 = vld [vmem:[#allocation37_spill] sm:$0xff]  ;;  %v13971_v50 = vld [vmem:[#allocation14_spill] sm:$0xff]  ;;  %v13972_v9 = vld [vmem:[#allocation55_spill] sm:$0xff] }
 0x522   : > { %v3967_v44 = vpop.f32.mrf.mxu1  ;;  %v3623_v16 = vadd.f32 %v13970_v13, %v3221_v26  ;;  %v3227_v53 = vadd.f32 %v13972_v9, %v13971_v50  ;;  %v13976_v9 = vld [vmem:[#allocation18_spill] sm:$0xff] }
 0x523   : > { %v13648_v47 = vmax.f32 %v11357_v12, 0.0  ;;  %v11366_v15 = vadd.f32 %v13968_v55, %v4411_v56  ;;  %v4017_v39 = vadd.f32 %v3967_v44, %v3621_v23  ;;  %v4412_v61 = vadd.f32 %v11278_v0, %v4016_v19  ;;  %4718 = vrot.lane.b32.xlu1 %v13647_v60, %s8513_s29  ;;  %v13974_v55 = vld [vmem:[#allocation54_spill] sm:$0xff]  ;;  %v4373_v19 = vpop.f32.mrf.mxu0 }
 0x524   : > { %v3969_v4 = vpop.f32.mrf.mxu1 }
 0x525   : > { %v13659_v29 = vmax.f32 %v11366_v15, 0.0  ;;  %v11376_v46 = vadd.f32 %v4523_v43, %v4412_v61  ;;  %v4018_v56 = vadd.f32 %v3969_v4, %v13974_v55  ;;  %v4413_v23 = vadd.f32 %v4363_v42, %v4017_v39  ;;  %4720 = vrot.lane.b32.xlu0 %v13648_v47, %s8513_s29  ;;  %v4528_v61 = vpop.permute.xlu0 %4527  ;;  %v13977_v42 = vld [vmem:[#allocation26_spill] sm:$0xff]  ;;  %v13978_v39 = vld [vmem:[#allocation57_spill] sm:$0xff] }
 0x526   : > { %v3971_v0 = vpop.f32.mrf.mxu1  ;;  %v3625_v4 = vadd.f32 %v13976_v9, %v3227_v53  ;;  %v3231_v55 = vadd.f32 %v13978_v39, %v13977_v42 }
 0x527   : > { %13973 = vst [vmem:[#allocation4_spill] sm:$0xff] %v11376_v46  ;;  %v13651_v44 = vmax.f32 %v11376_v46, 0.0  ;;  %v11383_v26 = vadd.f32 %v4523_v43, %v4413_v23  ;;  %v4019_v13 = vadd.f32 %v3971_v0, %v3623_v16  ;;  %v4414_v50 = vadd.f32 %v4365_v36, %v4018_v56  ;;  %4722 = vrot.lane.b32.xlu1 %v13659_v29, %s8513_s29  ;;  %v4375_v16 = vpop.f32.mrf.mxu0 }
 0x528   : > { %v3975_v60 = vpop.f32.mrf.mxu1  ;;  %v13996_v46 = vmax.f32 %v11344_v7, 0.0  ;;  %v13999_v7 = vmax.f32 %v11322_v3, 0.0 }
 0x529   : > { %13975 = vst [vmem:[#allocation6_spill] sm:$0xff] %v11383_v26  ;;  %v13652_v47 = vmax.f32 %v11383_v26, 0.0  ;;  %v11392_v11 = vadd.f32 %v4528_v61, %v4414_v50  ;;  %v4020_v43 = vadd.f32 %v3975_v60, %v13979_v32  ;;  %v4415_v23 = vadd.f32 %v4367_v52, %v4019_v13  ;;  %4724 = vrot.lane.b32.xlu0 %v13651_v44, %s8513_s29  ;;  %v13980_v50 = vld [vmem:[#allocation12_spill] sm:$0xff]  ;;  %v13981_v13 = vld [vmem:[#allocation58_spill] sm:$0xff] }
 0x52a   : > { %v3977_v36 = vpop.f32.mrf.mxu1  ;;  %v3627_v42 = vadd.f32 %v13980_v50, %v3231_v55 }
 0x52b   : > { %v13653_v56 = vmax.f32 %v11392_v11, 0.0  ;;  %v11399_v53 = vadd.f32 %v4528_v61, %v4415_v23  ;;  %v4021_v0 = vadd.f32 %v3977_v36, %v3625_v4  ;;  %v4416_v9 = vadd.f32 %v4371_v57, %v4020_v43  ;;  %4726 = vrot.lane.b32.xlu1 %v13652_v47, %s8513_s29  ;;  %v4377_v61 = vpop.f32.mrf.mxu0 }
 0x52c   : > { %v3979_v32 = vpop.f32.mrf.mxu1 }
 0x52d   : > { %v13654_v60 = vmax.f32 %v11399_v53, 0.0  ;;  %v11407_v52 = vadd.f32 %v11331_v25, %v4416_v9  ;;  %v4022_v39 = vadd.f32 %v3979_v32, %v13981_v13  ;;  %v4417_v44 = vadd.f32 %v4373_v19, %v4021_v0  ;;  %4728 = vrot.lane.b32.xlu0 %v13653_v56, %s8513_s29 }
 0x52e   : > { %v3981_v57 = vpop.f32.mrf.mxu1 }
 0x52f   : > { %v13655_v4 = vmax.f32 %v11407_v52, 0.0  ;;  %v11415_v43 = vadd.f32 %v11331_v25, %v4417_v44  ;;  %v4023_v55 = vadd.f32 %v3981_v57, %v3627_v42  ;;  %v4418_v23 = vadd.f32 %v4375_v16, %v4022_v39  ;;  %4730 = vrot.lane.b32.xlu1 %v13654_v60, %s8513_s29 }
 0x531   : > { %v13656_v36 = vmax.f32 %v11415_v43, 0.0  ;;  %v11422_v19 = vadd.f32 %v11353_v37, %v4418_v23  ;;  %v4419_v0 = vadd.f32 %v4377_v61, %v4023_v55  ;;  %4732 = vrot.lane.b32.xlu0 %v13655_v4, %s8513_s29 }
 0x533   : > { %v13657_v9 = vmax.f32 %v11422_v19, 0.0  ;;  %v11429_v25 = vadd.f32 %v11353_v37, %v4419_v0  ;;  %4734 = vrot.lane.b32.xlu1 %v13656_v36, %s8513_s29 }
 0x535   : > { %v13658_v44 = vmax.f32 %v11429_v25, 0.0  ;;  %4736 = vrot.lane.b32.xlu0 %v13657_v9, %s8513_s29 }
 0x537   : > { %4738 = vrot.lane.b32.xlu1 %v13658_v44, %s8513_s29  ;;  %s8518_s29 = smov 116  }
 0x55b   : > { %v4661_v16 = vpop.permute.xlu0 %4660 }
 0x55d   : > { %v4663_v50 = vpop.permute.xlu1 %4662 }
 0x55e   : > { %v4741_v42 = vsel %vm1208_vm2, %v4661_v16, %v4663_v50  ;;  %v11444_v37 = vadd.f32 %v4663_v50, %v4581_v59 }
 0x55f   : > { %v11448_v32 = vadd.f32 %v4741_v42, %v4580_v27  ;;  %v4665_v13 = vpop.permute.xlu0 %4664 }
 0x560   : > { %4944 = vrot.lane.b32.xlu1 %v11444_v37, %s8515_s19 }
 0x561   : > { %v4667_v39 = vpop.permute.xlu1 %4666  ;;  %4942 = vrot.lane.b32.xlu0 %v11448_v32, %s8515_s19 }
 0x562   : > { %v4742_v61 = vsel %vm1208_vm2, %v4665_v13, %v4667_v39  ;;  %v11461_v18 = vadd.f32 %v4667_v39, %v4583_v54  ;;  %v13983_v54 = vmax.f32 %v11070_v17, 0.0  ;;  %v13984_v17 = vmax.f32 %v11104_v1, 0.0 }
 0x563   : > { %v4669_v57 = vpop.permute.xlu0 %4668  ;;  %v11465_v27 = vadd.f32 %v4742_v61, %v4582_v30  ;;  %v13985_v61 = vmax.f32 %v11093_v51, 0.0  ;;  %v13986_v51 = vmax.f32 %v11128_v63, 0.0 }
 0x564   : > { %5517 = vrot.lane.b32.xlu1 %v11444_v37, %s8517_s17 }
 0x565   : > { %v4671_v5 = vpop.permute.xlu1 %4670  ;;  %5515 = vrot.lane.b32.xlu0 %v11448_v32, %s8517_s17 }
 0x566   : > { %v4743_v0 = vsel %vm1208_vm2, %v4669_v57, %v4671_v5  ;;  %v11478_v30 = vadd.f32 %v4671_v5, %v13982_v2 }
 0x567   : > { %v4673_v59 = vpop.permute.xlu0 %4672  ;;  %v11482_v16 = vadd.f32 %v4743_v0, %v13983_v54 }
 0x568   : > { %4948 = vrot.lane.b32.xlu1 %v11461_v18, %s8515_s19 }
 0x569   : > { %v4675_v55 = vpop.permute.xlu1 %4674  ;;  %4946 = vrot.lane.b32.xlu0 %v11465_v27, %s8515_s19 }
 0x56a   : > { %v4744_v39 = vsel %vm1208_vm2, %v4673_v59, %v4675_v55  ;;  %v11495_v57 = vadd.f32 %v4675_v55, %v13984_v17 }
 0x56b   : > { %v4677_v23 = vpop.permute.xlu0 %4676  ;;  %v11499_v5 = vadd.f32 %v4744_v39, %v13985_v61  ;;  %v13987_v39 = vmax.f32 %v11117_v58, 0.0  ;;  %v13988_v58 = vmax.f32 %v11150_v20, 0.0 }
 0x56c   : > { %5521 = vrot.lane.b32.xlu1 %v11461_v18, %s8517_s17 }
 0x56d   : > { %v4679_v34 = vpop.permute.xlu1 %4678  ;;  %5519 = vrot.lane.b32.xlu0 %v11465_v27, %s8517_s17 }
 0x56e   : > { %v4745_v54 = vsel %vm1208_vm2, %v4677_v23, %v4679_v34  ;;  %v11512_v55 = vadd.f32 %v4679_v34, %v13986_v51 }
 0x56f   : > { %v4681_v50 = vpop.permute.xlu0 %4680  ;;  %v11516_v17 = vadd.f32 %v4745_v54, %v13987_v39  ;;  %v13989_v54 = vmax.f32 %v11139_v45, 0.0  ;;  %v13990_v45 = vmax.f32 %v11172_v33, 0.0 }
 0x570   : > { %4952 = vrot.lane.b32.xlu1 %v11478_v30, %s8515_s19 }
 0x571   : > { %v4683_v42 = vpop.permute.xlu1 %4682  ;;  %4950 = vrot.lane.b32.xlu0 %v11482_v16, %s8515_s19 }
 0x572   : > { %v4746_v56 = vsel %vm1208_vm2, %v4681_v50, %v4683_v42  ;;  %v11535_v34 = vadd.f32 %v4683_v42, %v13988_v58  ;;  %v13991_v42 = vmax.f32 %v11161_v62, 0.0  ;;  %v13992_v62 = vmax.f32 %v11194_v28, 0.0 }
 0x573   : > { %v4685_v13 = vpop.permute.xlu0 %4684  ;;  %v11539_v51 = vadd.f32 %v4746_v56, %v13989_v54  ;;  %v13994_v28 = vmax.f32 %v11366_v15, 0.0  ;;  %v13997_v15 = vmax.f32 %v11335_v35, 0.0  ;;  %v14000_v35 = vmax.f32 %v11205_v49, 0.0 }
 0x574   : > { %5525 = vrot.lane.b32.xlu1 %v11478_v30, %s8517_s17  ;;  %v14003_v49 = vmax.f32 %v11293_v41, 0.0 }
 0x575   : > { %v4687_v14 = vpop.permute.xlu1 %4686  ;;  %5523 = vrot.lane.b32.xlu0 %v11482_v16, %s8517_s17 }
 0x576   : > { %v4747_v4 = vsel %vm1208_vm2, %v4685_v13, %v4687_v14  ;;  %v11552_v56 = vadd.f32 %v4687_v14, %v13990_v45  ;;  %v13993_v14 = vmax.f32 %v11183_v48, 0.0  ;;  %v13995_v48 = vmax.f32 %v11357_v12, 0.0 }
 0x577   : > { %v4689_v0 = vpop.permute.xlu0 %4688  ;;  %v11556_v58 = vadd.f32 %v4747_v4, %v13991_v42 }
 0x578   : > { %4956 = vrot.lane.b32.xlu1 %v11495_v57, %s8515_s19 }
 0x579   : > { %v4691_v59 = vpop.permute.xlu1 %4690  ;;  %4954 = vrot.lane.b32.xlu0 %v11499_v5, %s8515_s19 }
 0x57a   : > { %v4748_v9 = vsel %vm1208_vm2, %v4689_v0, %v4691_v59  ;;  %v11569_v4 = vadd.f32 %v4691_v59, %v13992_v62 }
 0x57b   : > { %v4693_v2 = vpop.permute.xlu0 %4692  ;;  %v11573_v45 = vadd.f32 %v4748_v9, %v13993_v14 }
 0x57c   : > { %5529 = vrot.lane.b32.xlu1 %v11495_v57, %s8517_s17 }
 0x57d   : > { %v4695_v1 = vpop.permute.xlu1 %4694  ;;  %5527 = vrot.lane.b32.xlu0 %v11499_v5, %s8517_s17 }
 0x57e   : > { %v4749_v62 = vsel %vm1208_vm2, %v4693_v2, %v4695_v1 }
 0x57f   : > { %v11518_v61 = vpop.permute.xlu0 %4696 }
 0x580   : > { %4960 = vrot.lane.b32.xlu1 %v11512_v55, %s8515_s19 }
 0x581   : > { %v11522_v23 = vpop.permute.xlu1 %4698  ;;  %4958 = vrot.lane.b32.xlu0 %v11516_v17, %s8515_s19 }
 0x583   : > { %v4701_v47 = vpop.permute.xlu0 %4700 }
 0x584   : > { %5533 = vrot.lane.b32.xlu1 %v11512_v55, %s8517_s17 }
 0x585   : > { %v11529_v63 = vpop.permute.xlu1 %4702  ;;  %5531 = vrot.lane.b32.xlu0 %v11516_v17, %s8517_s17 }
 0x587   : > { %v4705_v39 = vpop.permute.xlu0 %4704 }
 0x588   : > { %4964 = vrot.lane.b32.xlu1 %v11535_v34, %s8515_s19 }
 0x589   : > { %v4707_v50 = vpop.permute.xlu1 %4706  ;;  %4962 = vrot.lane.b32.xlu0 %v11539_v51, %s8515_s19 }
 0x58b   : > { %v4709_v60 = vpop.permute.xlu0 %4708 }
 0x58c   : > { %5537 = vrot.lane.b32.xlu1 %v11535_v34, %s8517_s17 }
 0x58d   : > { %v4711_v20 = vpop.permute.xlu1 %4710  ;;  %5535 = vrot.lane.b32.xlu0 %v11539_v51, %s8517_s17 }
 0x58f   : > { %v4713_v54 = vpop.permute.xlu0 %4712 }
 0x590   : > { %4968 = vrot.lane.b32.xlu1 %v11552_v56, %s8515_s19 }
 0x591   : > { %v4715_v13 = vpop.permute.xlu1 %4714  ;;  %4966 = vrot.lane.b32.xlu0 %v11556_v58, %s8515_s19 }
 0x592   : > { %v4754_v14 = vsel %vm1208_vm2, %v4713_v54, %v4715_v13  ;;  %v11612_v2 = vadd.f32 %v4715_v13, %v13999_v7  ;;  %v14001_v54 = vmax.f32 %v11313_v40, 0.0  ;;  %v4751_v40 = vsel %vm1208_vm2, %v4701_v47, %v11529_v63 }
 0x593   : > { %v4717_v36 = vpop.permute.xlu0 %4716  ;;  %v14006_v47 = vmax.f32 %v11260_v8, 0.0  ;;  %v14008_v8 = vmax.f32 %v11238_v31, 0.0  ;;  %v14011_v7 = vmax.f32 %v11422_v19, 0.0 }
 0x594   : > { %5541 = vrot.lane.b32.xlu1 %v11552_v56, %s8517_s17 }
 0x595   : > { %v4719_v33 = vpop.permute.xlu1 %4718  ;;  %5539 = vrot.lane.b32.xlu0 %v11556_v58, %s8517_s17 }
 0x596   : > { %v4755_v44 = vsel %vm1208_vm2, %v4717_v36, %v4719_v33  ;;  %v11593_v26 = vadd.f32 %v4719_v33, %v13996_v46  ;;  %v4753_v46 = vsel %vm1208_vm2, %v4709_v60, %v4711_v20  ;;  %v11621_v33 = vadd.f32 %v4754_v14, %v14001_v54 }
 0x597   : > { %v4721_v42 = vpop.permute.xlu0 %4720  ;;  %v11600_v36 = vadd.f32 %v4755_v44, %v13997_v15  ;;  %v11617_v44 = vadd.f32 %v4749_v62, %v14000_v35  ;;  %v14002_v60 = vmax.f32 %v11302_v24, 0.0  ;;  %v11634_v3 = vadd.f32 %v4753_v46, %v14003_v49 }
 0x598   : > { %4972 = vrot.lane.b32.xlu1 %v11569_v4, %s8515_s19  ;;  %v14004_v24 = vmax.f32 %v11282_v21, 0.0  ;;  %v11659_v21 = vadd.f32 %v11529_v63, %v14006_v47  ;;  %v14009_v63 = vmax.f32 %v11227_v6, 0.0 }
 0x599   : > { %v4723_v0 = vpop.permute.xlu1 %4722  ;;  %4970 = vrot.lane.b32.xlu0 %v11573_v45, %s8515_s19 }
 0x59a   : > { %v4756_v29 = vsel %vm1208_vm2, %v4721_v42, %v4723_v0  ;;  %v11583_v59 = vadd.f32 %v4723_v0, %v13994_v28  ;;  %v4750_v42 = vsel %vm1208_vm2, %v11518_v61, %v11522_v23  ;;  %v11674_v61 = vadd.f32 %v11522_v23, %v14008_v8 }
 0x59b   : > { %v11587_v9 = vadd.f32 %v4756_v29, %v13995_v48  ;;  %v13998_v29 = vmax.f32 %v11216_v38, 0.0  ;;  %v4752_v38 = vsel %vm1208_vm2, %v4705_v39, %v4707_v50  ;;  %v11643_v39 = vadd.f32 %v4707_v50, %v14004_v24  ;;  %v4725_v0 = vpop.permute.xlu0 %4724 }
 0x59c   : > { %5329 = vmatprep.subr.mxu0 %v11583_v59  ;;  %5545 = vrot.lane.b32.xlu1 %v11569_v4, %s8517_s17  ;;  %v11679_v28 = vadd.f32 %v4750_v42, %v14009_v63  ;;  %v14015_v24 = vmax.f32 %v11392_v11, 0.0 }
 0x59d   : > { %5543 = vrot.lane.b32.xlu0 %v11573_v45, %s8517_s17  ;;  %5330 = vmatpush1.msra.mxu0 %v11587_v9  ;;  %v11607_v12 = vadd.f32 %v4695_v1, %v13998_v29  ;;  %v11627_v1 = vadd.f32 %v4711_v20, %v14002_v60  ;;  %v14005_v20 = vmax.f32 %v11271_v10, 0.0  ;;  %v11650_v41 = vpop.permute.xlu1 %4726  ;;  %v14007_v10 = vmax.f32 %v11249_v22, 0.0 }
 0x59e   : > { %5331 = vmatprep.subr.mxu0 %v11593_v26  ;;  %v14010_v29 = vmax.f32 %v11429_v25, 0.0  ;;  %v14013_v25 = vmax.f32 %v11407_v52, 0.0  ;;  %v4757_v19 = vsel %vm1208_vm2, %v4725_v0, %v11650_v41  ;;  %v14016_v52 = vld [vmem:[#allocation6_spill] sm:$0xff] }
 0x59f   : > { %5332 = vmatpush1.msra.mxu0 %v11600_v36  ;;  %v11648_v13 = vadd.f32 %v4752_v38, %v14005_v20  ;;  %v11666_v50 = vadd.f32 %v4751_v40, %v14007_v10  ;;  %v4729_v31 = vpop.permute.xlu0 %4728  ;;  %v14012_v38 = vmax.f32 %v11415_v43, 0.0  ;;  %v14014_v43 = vmax.f32 %v11399_v53, 0.0  ;;  %v14018_v53 = vld [vmem:[#allocation4_spill] sm:$0xff] }
 0x5a0   : > { %4976 = vrot.lane.b32.xlu1 %v11607_v12, %s8515_s19  ;;  %5333 = vmatprep.subr.mxu0 %v11612_v2  ;;  %v14017_v42 = vmax.f32 %v14016_v52, 0.0  ;;  %v14019_v10 = vmax.f32 %v14018_v53, 0.0 }
 0x5a1   : > { %4974 = vrot.lane.b32.xlu0 %v11617_v44, %s8515_s19  ;;  %5334 = vmatpush1.msra.mxu0 %v11621_v33  ;;  %v4731_v22 = vpop.permute.xlu1 %4730 }
 0x5a2   : > { %5335 = vmatprep.subr.mxu0 %v11627_v1  ;;  %v4758_v54 = vsel %vm1208_vm2, %v4729_v31, %v4731_v22  ;;  %v11751_v40 = vadd.f32 %v4731_v22, %v14014_v43  ;;  %v11762_v47 = vadd.f32 %v11650_v41, %v14017_v42  ;;  %v11769_v0 = vadd.f32 %v4757_v19, %v14019_v10 }
 0x5a3   : > { %5336 = vmatpush1.msra.mxu0 %v11634_v3  ;;  %v4733_v23 = vpop.permute.xlu0 %4732  ;;  %v11756_v20 = vadd.f32 %v4758_v54, %v14015_v24 }
 0x5a4   : > { %5549 = vrot.lane.b32.xlu1 %v11607_v12, %s8517_s17  ;;  %5337 = vmatprep.subr.mxu0 %v11643_v39 }
 0x5a5   : > { %5547 = vrot.lane.b32.xlu0 %v11617_v44, %s8517_s17  ;;  %5338 = vmatpush1.msra.mxu0 %v11648_v13  ;;  %v4735_v6 = vpop.permute.xlu1 %4734 }
 0x5a6   : > { %5339 = vmatprep.subr.mxu0 %v11659_v21  ;;  %v4759_v15 = vsel %vm1208_vm2, %v4733_v23, %v4735_v6  ;;  %v11735_v60 = vadd.f32 %v4735_v6, %v14012_v38 }
 0x5a7   : > { %5340 = vmatpush1.msra.mxu0 %v11666_v50  ;;  %v4737_v62 = vpop.permute.xlu0 %4736  ;;  %v11742_v49 = vadd.f32 %v4759_v15, %v14013_v25 }
 0x5a8   : > { %4980 = vrot.lane.b32.xlu1 %v11674_v61, %s8515_s19  ;;  %5341 = vmatprep.subr.mxu0 %v11674_v61 }
 0x5a9   : > { %4978 = vrot.lane.b32.xlu0 %v11679_v28, %s8515_s19  ;;  %5342 = vmatpush1.msra.mxu0 %v11679_v28  ;;  %v4739_v48 = vpop.permute.xlu1 %4738 }
 0x5aa   : > { %5343 = vmatprep.subr.mxu0 %v11607_v12  ;;  %v4760_v14 = vsel %vm1208_vm2, %v4737_v62, %v4739_v48  ;;  %v11724_v46 = vadd.f32 %v4739_v48, %v14010_v29  ;;  %v4842_v29 = vld [vmem:[%s13552_s5 + $0x8] sm:$0xff] }
 0x5ab   : > { %5344 = vmatpush1.msra.mxu0 %v11617_v44  ;;  %v11729_v35 = vadd.f32 %v4760_v14, %v14011_v7  ;;  %v4841_v7 = vld [vmem:[%s13552_s5] sm:$0xff]  ;;  %7914 = vmatprep.mubr.msk.f32.mxu0 %vm5083_vm9, %v4842_v29 }
 0x5ac   : > { %5553 = vrot.lane.b32.xlu1 %v11674_v61, %s8517_s17  ;;  %5345 = vmatprep.subr.mxu0 %v11569_v4 }
 0x5ad   : > { %5551 = vrot.lane.b32.xlu0 %v11679_v28, %s8517_s17  ;;  %5346 = vmatpush1.msra.mxu0 %v11573_v45 }
 0x5ae   : > { %5347 = vmatprep.subr.mxu0 %v11552_v56 }
 0x5af   : > { %5348 = vmatpush1.msra.mxu0 %v11556_v58 }
 0x5b0   : > { %4984 = vrot.lane.b32.xlu1 %v11659_v21, %s8515_s19  ;;  %5349 = vmatprep.subr.mxu0 %v11535_v34 }
 0x5b1   : > { %4982 = vrot.lane.b32.xlu0 %v11666_v50, %s8515_s19  ;;  %5350 = vmatpush1.msra.mxu0 %v11539_v51 }
 0x5b2   : > { %5351 = vmatprep.subr.mxu0 %v11512_v55 }
 0x5b3   : > { %5352 = vmatpush1.msra.mxu0 %v11516_v17 }
 0x5b4   : > { %5557 = vrot.lane.b32.xlu1 %v11659_v21, %s8517_s17  ;;  %5353 = vmatprep.subr.mxu0 %v11495_v57 }
 0x5b5   : > { %5555 = vrot.lane.b32.xlu0 %v11666_v50, %s8517_s17  ;;  %5354 = vmatpush1.msra.mxu0 %v11499_v5 }
 0x5b6   : > { %5355 = vmatprep.subr.mxu0 %v11478_v30 }
 0x5b7   : > { %5356 = vmatpush1.msra.mxu0 %v11482_v16 }
 0x5b8   : > { %4988 = vrot.lane.b32.xlu1 %v11643_v39, %s8515_s19  ;;  %5357 = vmatprep.subr.mxu0 %v11461_v18 }
 0x5b9   : > { %4986 = vrot.lane.b32.xlu0 %v11648_v13, %s8515_s19  ;;  %5358 = vmatpush1.msra.mxu0 %v11465_v27 }
 0x5ba   : > { %5359 = vmatprep.subr.mxu0 %v11444_v37 }
 0x5bb   : > { %5360 = vmatpush1.msra.mxu0 %v11448_v32 }
 0x5bc   : > { %5561 = vrot.lane.b32.xlu1 %v11643_v39, %s8517_s17  ;;  %5385 = vmatprep.subr.mxu0 %v11724_v46 }
 0x5bd   : > { %5559 = vrot.lane.b32.xlu0 %v11648_v13, %s8517_s17  ;;  %5386 = vmatpush2.msra.mxu0 %v11729_v35 }
 0x5be   : > { %5387 = vmatprep.subr.mxu0 %v11735_v60 }
 0x5bf   : > { %5388 = vmatpush2.msra.mxu0 %v11742_v49 }
 0x5c0   : > { %5963 = vrot.lane.b32.xlu1 %v11643_v39, %s8518_s29  ;;  %5389 = vmatprep.subr.mxu0 %v11751_v40 }
 0x5c1   : > { %5961 = vrot.lane.b32.xlu0 %v11648_v13, %s8518_s29  ;;  %5390 = vmatpush2.msra.mxu0 %v11756_v20 }
 0x5c2   : > { %5391 = vmatprep.subr.mxu0 %v11762_v47 }
 0x5c3   : > { %5392 = vmatpush2.msra.mxu0 %v11769_v0 }
 0x5c4   : > { %4992 = vrot.lane.b32.xlu1 %v11627_v1, %s8515_s19  ;;  %5394 = vmatmul.mubr.f32.vlgmr.msra.gmra.mxu0 %v4841_v7 }
 0x5c5   : > { %4990 = vrot.lane.b32.xlu0 %v11634_v3, %s8515_s19 }
 0x5c8   : > { %5565 = vrot.lane.b32.xlu1 %v11627_v1, %s8517_s17 }
 0x5c9   : > { %5563 = vrot.lane.b32.xlu0 %v11634_v3, %s8517_s17 }
 0x5cc   : > { %5967 = vrot.lane.b32.xlu1 %v11627_v1, %s8518_s29 }
 0x5cd   : > { %5965 = vrot.lane.b32.xlu0 %v11634_v3, %s8518_s29 }
 0x5d0   : > { %6369 = vrot.lane.b32.xlu1 %v11627_v1, %s8519_s13 }
 0x5d1   : > { %6367 = vrot.lane.b32.xlu0 %v11634_v3, %s8519_s13 }
 0x5d2   : > { %v11792_v11 = vpop.permute.xlu1 %4944 }
 0x5d3   : > { %v11794_v41 = vpop.permute.xlu0 %4942 }
 0x5d4   : > { %4996 = vrot.lane.b32.xlu1 %v11612_v2, %s8515_s19 }
 0x5d5   : > { %4994 = vrot.lane.b32.xlu0 %v11621_v33, %s8515_s19 }
 0x5d6   : > { %v11800_v8 = vpop.permute.xlu1 %5517 }
 0x5d7   : > { %14020 = vst [vmem:[#allocation44_spill] sm:$0xff] %v11800_v8  ;;  %v11802_v63 = vpop.permute.xlu0 %5515 }
 0x5d8   : > { %14021 = vst [vmem:[#allocation49_spill] sm:$0xff] %v11802_v63  ;;  %5569 = vrot.lane.b32.xlu1 %v11612_v2, %s8517_s17 }
 0x5d9   : > { %5567 = vrot.lane.b32.xlu0 %v11621_v33, %s8517_s17 }
 0x5da   : > { %v11808_v1 = vpop.permute.xlu1 %4948 }
 0x5db   : > { %v11810_v3 = vpop.permute.xlu0 %4946 }
 0x5dc   : > { %5971 = vrot.lane.b32.xlu1 %v11612_v2, %s8518_s29 }
 0x5dd   : > { %5969 = vrot.lane.b32.xlu0 %v11621_v33, %s8518_s29 }
 0x5de   : > { %v11816_v22 = vpop.permute.xlu1 %5521 }
 0x5df   : > { %14022 = vst [vmem:[#allocation29_spill] sm:$0xff] %v11816_v22  ;;  %v11818_v31 = vpop.permute.xlu0 %5519 }
 0x5e0   : > { %14023 = vst [vmem:[#allocation34_spill] sm:$0xff] %v11818_v31  ;;  %6373 = vrot.lane.b32.xlu1 %v11612_v2, %s8519_s13 }
 0x5e1   : > { %6371 = vrot.lane.b32.xlu0 %v11621_v33, %s8519_s13 }
 0x5e2   : > { %v11824_v6 = vpop.permute.xlu1 %4952 }
 0x5e3   : > { %v11826_v23 = vpop.permute.xlu0 %4950 }
 0x5e4   : > { %5000 = vrot.lane.b32.xlu1 %v11593_v26, %s8515_s19 }
 0x5e5   : > { %4998 = vrot.lane.b32.xlu0 %v11600_v36, %s8515_s19 }
 0x5e6   : > { %v11832_v48 = vpop.permute.xlu1 %5525 }
 0x5e7   : > { %14024 = vst [vmem:[#allocation45_spill] sm:$0xff] %v11832_v48  ;;  %v11834_v62 = vpop.permute.xlu0 %5523 }
 0x5e8   : > { %14025 = vst [vmem:[#allocation7_spill] sm:$0xff] %v11834_v62  ;;  %5573 = vrot.lane.b32.xlu1 %v11593_v26, %s8517_s17  ;;  %v7870_v62 = vld [vmem:[%s13552_s5 + $0xf8] sm:$0xff] }
 0x5e9   : > { %5571 = vrot.lane.b32.xlu0 %v11600_v36, %s8517_s17  ;;  %7899 = vmatprep.mubr.msk.f32.mxu1 %vm5083_vm9, %v7870_v62  ;;  %v4843_v62 = vld [vmem:[%s13552_s5 + $0x10] sm:$0xff] }
 0x5ea   : > { %v11840_v2 = vpop.permute.xlu1 %4956 }
 0x5eb   : > { %v11842_v33 = vpop.permute.xlu0 %4954 }
 0x5ec   : > { %5975 = vrot.lane.b32.xlu1 %v11593_v26, %s8518_s29 }
 0x5ed   : > { %5973 = vrot.lane.b32.xlu0 %v11600_v36, %s8518_s29 }
 0x5ee   : > { %v11848_v14 = vpop.permute.xlu1 %5529 }
 0x5ef   : > { %14026 = vst [vmem:[#allocation36_spill] sm:$0xff] %v11848_v14  ;;  %v11850_v15 = vpop.permute.xlu0 %5527  ;;  %v4844_v14 = vld [vmem:[%s13552_s5 + $0x18] sm:$0xff] }
 0x5f0   : > { %14027 = vst [vmem:[#allocation19_spill] sm:$0xff] %v11850_v15  ;;  %6377 = vrot.lane.b32.xlu1 %v11593_v26, %s8519_s13  ;;  %7915 = vmatprep.mubr.msk.f32.mxu0 %vm5083_vm9, %v4844_v14  ;;  %v4845_v14 = vld [vmem:[%s13552_s5 + $0x20] sm:$0xff] }
 0x5f1   : > { %6375 = vrot.lane.b32.xlu0 %v11600_v36, %s8519_s13  ;;  %5400 = vmatmul.mubr.f32.gmra.mxu0 %v4843_v62  ;;  %v4848_v62 = vld [vmem:[%s13552_s5 + $0x38] sm:$0xff] }
 0x5f2   : > { %v11863_v54 = vpop.permute.xlu1 %4960 }
 0x5f3   : > { %v11865_v38 = vpop.permute.xlu0 %4958 }
 0x5f4   : > { %5004 = vrot.lane.b32.xlu1 %v11583_v59, %s8515_s19 }
 0x5f5   : > { %5002 = vrot.lane.b32.xlu0 %v11587_v9, %s8515_s19 }
 0x5f6   : > { %v11871_v26 = vpop.permute.xlu1 %5533 }
 0x5f7   : > { %14028 = vst [vmem:[#allocation15_spill] sm:$0xff] %v11871_v26  ;;  %v11873_v25 = vpop.permute.xlu0 %5531 }
 0x5f8   : > { %14029 = vst [vmem:[#allocation50_spill] sm:$0xff] %v11873_v25  ;;  %5577 = vrot.lane.b32.xlu1 %v11583_v59, %s8517_s17 }
 0x5f9   : > { %5575 = vrot.lane.b32.xlu0 %v11587_v9, %s8517_s17 }
 0x5fa   : > { %v11879_v36 = vpop.permute.xlu1 %4964 }
 0x5fb   : > { %v11881_v19 = vpop.permute.xlu0 %4962 }
 0x5fc   : > { %5979 = vrot.lane.b32.xlu1 %v11583_v59, %s8518_s29 }
 0x5fd   : > { %5977 = vrot.lane.b32.xlu0 %v11587_v9, %s8518_s29 }
 0x5fe   : > { %v11887_v43 = vpop.permute.xlu1 %5537 }
 0x5ff   : > { %14030 = vst [vmem:[#allocation30_spill] sm:$0xff] %v11887_v43  ;;  %v11889_v24 = vpop.permute.xlu0 %5535 }
 0x600   : > { %14031 = vst [vmem:[#allocation32_spill] sm:$0xff] %v11889_v24  ;;  %6381 = vrot.lane.b32.xlu1 %v11583_v59, %s8519_s13  ;;  %v4846_v24 = vld [vmem:[%s13552_s5 + $0x28] sm:$0xff] }
 0x601   : > { %6379 = vrot.lane.b32.xlu0 %v11587_v9, %s8519_s13  ;;  %7916 = vmatprep.mubr.msk.f32.mxu0 %vm5083_vm9, %v4846_v24 }
 0x602   : > { %v11895_v52 = vpop.permute.xlu1 %4968  ;;  %5406 = vmatmul.mubr.f32.gmra.mxu0 %v4845_v14  ;;  %v4847_v14 = vld [vmem:[%s13552_s5 + $0x30] sm:$0xff] }
 0x603   : > { %v11897_v42 = vpop.permute.xlu0 %4966  ;;  %7917 = vmatprep.mubr.msk.f32.mxu0 %vm5083_vm9, %v4848_v62 }
 0x604   : > { %5008 = vrot.lane.b32.xlu1 %v11762_v47, %s8515_s19 }
 0x605   : > { %5006 = vrot.lane.b32.xlu0 %v11769_v0, %s8515_s19 }
 0x606   : > { %v11903_v53 = vpop.permute.xlu1 %5541  ;;  %5412 = vmatmul.mubr.f32.gmra.mxu0 %v4847_v14  ;;  %v4852_v14 = vld [vmem:[%s13552_s5 + $0x58] sm:$0xff] }
 0x607   : > { %14032 = vst [vmem:[#allocation23_spill] sm:$0xff] %v11903_v53  ;;  %v11905_v10 = vpop.permute.xlu0 %5539 }
 0x608   : > { %14033 = vst [vmem:[#allocation39_spill] sm:$0xff] %v11905_v10  ;;  %5581 = vrot.lane.b32.xlu1 %v11762_v47, %s8517_s17 }
 0x609   : > { %5579 = vrot.lane.b32.xlu0 %v11769_v0, %s8517_s17 }
 0x60a   : > { %v11911_v59 = vpop.permute.xlu1 %4972 }
 0x60b   : > { %v11913_v9 = vpop.permute.xlu0 %4970 }
 0x60c   : > { %5012 = vrot.lane.b32.xlu1 %v11751_v40, %s8515_s19 }
 0x60d   : > { %5010 = vrot.lane.b32.xlu0 %v11756_v20, %s8515_s19 }
 0x60e   : > { %v11919_v29 = vpop.permute.xlu1 %5545 }
 0x60f   : > { %14034 = vst [vmem:[#allocation25_spill] sm:$0xff] %v11919_v29  ;;  %v11921_v7 = vpop.permute.xlu0 %5543  ;;  %v4849_v29 = vld [vmem:[%s13552_s5 + $0x40] sm:$0xff] }
 0x610   : > { %14035 = vst [vmem:[#allocation8_spill] sm:$0xff] %v11921_v7  ;;  %5585 = vrot.lane.b32.xlu1 %v11751_v40, %s8517_s17  ;;  %v4850_v7 = vld [vmem:[%s13552_s5 + $0x48] sm:$0xff] }
 0x611   : > { %5583 = vrot.lane.b32.xlu0 %v11756_v20, %s8517_s17  ;;  %7918 = vmatprep.mubr.msk.f32.mxu0 %vm5083_vm9, %v4850_v7 }
 0x612   : > { %v11927_v63 = vpop.permute.xlu1 %4976  ;;  %5418 = vmatmul.mubr.f32.gmra.mxu0 %v4849_v29  ;;  %v4851_v29 = vld [vmem:[%s13552_s5 + $0x50] sm:$0xff] }
 0x613   : > { %v11929_v8 = vpop.permute.xlu0 %4974  ;;  %7919 = vmatprep.mubr.msk.f32.mxu0 %vm5083_vm9, %v4852_v14 }
 0x614   : > { %5016 = vrot.lane.b32.xlu1 %v11735_v60, %s8515_s19 }
 0x615   : > { %5014 = vrot.lane.b32.xlu0 %v11742_v49, %s8515_s19 }
 0x616   : > { %v11935_v31 = vpop.permute.xlu1 %5549  ;;  %5424 = vmatmul.mubr.f32.gmra.mxu0 %v4851_v29 }
 0x617   : > { %14036 = vst [vmem:[#allocation38_spill] sm:$0xff] %v11935_v31  ;;  %v11937_v22 = vpop.permute.xlu0 %5547  ;;  %v4854_v31 = vld [vmem:[%s13552_s5 + $0x68] sm:$0xff] }
 0x618   : > { %14037 = vst [vmem:[#allocation17_spill] sm:$0xff] %v11937_v22  ;;  %5589 = vrot.lane.b32.xlu1 %v11735_v60, %s8517_s17  ;;  %7920 = vmatprep.mubr.msk.f32.mxu0 %vm5083_vm9, %v4854_v31 }
 0x619   : > { %5587 = vrot.lane.b32.xlu0 %v11742_v49, %s8517_s17 }
 0x61a   : > { %v11947_v48 = vpop.permute.xlu1 %4980 }
 0x61b   : > { %v11949_v15 = vpop.permute.xlu0 %4978 }
 0x61c   : > { %5020 = vrot.lane.b32.xlu1 %v11724_v46, %s8515_s19 }
 0x61d   : > { %5018 = vrot.lane.b32.xlu0 %v11729_v35, %s8515_s19 }
 0x61e   : > { %v11958_v25 = vpop.permute.xlu1 %5553 }
 0x61f   : > { %14038 = vst [vmem:[#allocation51_spill] sm:$0xff] %v11958_v25  ;;  %v11964_v26 = vpop.permute.xlu0 %5551 }
 0x620   : > { %14039 = vst [vmem:[#allocation3_spill] sm:$0xff] %v11964_v26  ;;  %5593 = vrot.lane.b32.xlu1 %v11724_v46, %s8517_s17  ;;  %v4856_v26 = vld [vmem:[%s13552_s5 + $0x78] sm:$0xff] }
 0x621   : > { %5957 = vrot.lane.b32.xlu0 %v11666_v50, %s8518_s29 }
 0x622   : > { %v11973_v43 = vpop.permute.xlu1 %4984 }
 0x623   : > { %v11979_v10 = vpop.permute.xlu0 %4982 }
 0x624   : > { %5959 = vrot.lane.b32.xlu1 %v11659_v21, %s8518_s29 }
 0x625   : > { %6363 = vrot.lane.b32.xlu0 %v11648_v13, %s8519_s13 }
 0x626   : > { %v11988_v53 = vpop.permute.xlu1 %5557 }
 0x627   : > { %14040 = vst [vmem:[#allocation31_spill] sm:$0xff] %v11988_v53  ;;  %v11991_v24 = vpop.permute.xlu0 %5555 }
 0x628   : > { %14041 = vst [vmem:[#allocation43_spill] sm:$0xff] %v11991_v24  ;;  %6365 = vrot.lane.b32.xlu1 %v11643_v39, %s8519_s13  ;;  %v4860_v24 = vld [vmem:[%s13552_s5 + $0x98] sm:$0xff] }
 0x629   : > { %5953 = vrot.lane.b32.xlu0 %v11679_v28, %s8518_s29 }
 0x62a   : > { %v12000_v13 = vpop.permute.xlu1 %4988 }
 0x62b   : > { %v12005_v62 = vpop.permute.xlu0 %4986 }
 0x62c   : > { %5955 = vrot.lane.b32.xlu1 %v11674_v61, %s8518_s29 }
 0x62d   : > { %6359 = vrot.lane.b32.xlu0 %v11666_v50, %s8519_s13 }
 0x62e   : > { %v12015_v39 = vpop.permute.xlu1 %5561 }
 0x62f   : > { %14042 = vst [vmem:[#allocation46_spill] sm:$0xff] %v12015_v39  ;;  %v12020_v22 = vpop.permute.xlu0 %5559 }
 0x630   : > { %14043 = vst [vmem:[#allocation16_spill] sm:$0xff] %v12020_v22  ;;  %6361 = vrot.lane.b32.xlu1 %v11659_v21, %s8519_s13  ;;  %v4853_v21 = vld [vmem:[%s13552_s5 + $0x60] sm:$0xff]  ;;  %v4868_v22 = vld [vmem:[%s13552_s5 + $0xd8] sm:$0xff] }
 0x631   : > { %5949 = vrot.lane.b32.xlu0 %v11617_v44, %s8518_s29  ;;  %5430 = vmatmul.mubr.f32.gmra.mxu0 %v4853_v21 }
 0x632   : > { %v12030_v50 = vpop.permute.xlu1 %5963  ;;  %7921 = vmatprep.mubr.msk.f32.mxu0 %vm5083_vm9, %v4856_v26  ;;  %v4857_v26 = vld [vmem:[%s13552_s5 + $0x80] sm:$0xff] }
 0x633   : > { %v12032_v7 = vpop.permute.xlu0 %5961 }
 0x634   : > { %5951 = vrot.lane.b32.xlu1 %v11607_v12, %s8518_s29 }
 0x635   : > { %6355 = vrot.lane.b32.xlu0 %v11679_v28, %s8519_s13  ;;  %v4855_v28 = vld [vmem:[%s13552_s5 + $0x70] sm:$0xff] }
 0x636   : > { %v12045_v14 = vpop.permute.xlu1 %4992  ;;  %5436 = vmatmul.mubr.f32.gmra.mxu0 %v4855_v28 }
 0x637   : > { %v12047_v29 = vpop.permute.xlu0 %4990 }
 0x638   : > { %6357 = vrot.lane.b32.xlu1 %v11674_v61, %s8519_s13  ;;  %v4858_v61 = vld [vmem:[%s13552_s5 + $0x88] sm:$0xff] }
 0x639   : > { %5945 = vrot.lane.b32.xlu0 %v11573_v45, %s8518_s29  ;;  %7922 = vmatprep.mubr.msk.f32.mxu0 %vm5083_vm9, %v4858_v61 }
 0x63a   : > { %v12060_v31 = vpop.permute.xlu1 %5565  ;;  %5442 = vmatmul.mubr.f32.gmra.mxu0 %v4857_v26 }
 0x63b   : > { %14044 = vst [vmem:[#allocation48_spill] sm:$0xff] %v12060_v31  ;;  %v12062_v21 = vpop.permute.xlu0 %5563  ;;  %7923 = vmatprep.mubr.msk.f32.mxu0 %vm5083_vm9, %v4860_v24  ;;  %v4861_v24 = vld [vmem:[%s13552_s5 + $0xa0] sm:$0xff] }
 0x63c   : > { %14045 = vst [vmem:[#allocation10_spill] sm:$0xff] %v12062_v21  ;;  %5947 = vrot.lane.b32.xlu1 %v11569_v4, %s8518_s29 }
 0x63d   : > { %6351 = vrot.lane.b32.xlu0 %v11617_v44, %s8519_s13  ;;  %v4859_v44 = vld [vmem:[%s13552_s5 + $0x90] sm:$0xff] }
 0x63e   : > { %v12075_v25 = vpop.permute.xlu1 %5967  ;;  %5448 = vmatmul.mubr.f32.gmra.mxu0 %v4859_v44 }
 0x63f   : > { %v12077_v28 = vpop.permute.xlu0 %5965 }
 0x640   : > { %6353 = vrot.lane.b32.xlu1 %v11607_v12, %s8519_s13  ;;  %v4862_v12 = vld [vmem:[%s13552_s5 + $0xa8] sm:$0xff] }
 0x641   : > { %5941 = vrot.lane.b32.xlu0 %v11556_v58, %s8518_s29  ;;  %7924 = vmatprep.mubr.msk.f32.mxu0 %vm5083_vm9, %v4862_v12 }
 0x642   : > { %v12090_v61 = vpop.permute.xlu1 %6369  ;;  %5454 = vmatmul.mubr.f32.gmra.mxu0 %v4861_v24 }
 0x643   : > { %14046 = vst [vmem:[#allocation21_spill] sm:$0xff] %v12090_v61  ;;  %v12092_v26 = vpop.permute.xlu0 %6367 }
 0x644   : > { %14047 = vst [vmem:[#allocation11_spill] sm:$0xff] %v12092_v26  ;;  %5943 = vrot.lane.b32.xlu1 %v11552_v56, %s8518_s29  ;;  %v4864_v26 = vld [vmem:[%s13552_s5 + $0xb8] sm:$0xff] }
 0x645   : > { %6347 = vrot.lane.b32.xlu0 %v11573_v45, %s8519_s13  ;;  %7925 = vmatprep.mubr.msk.f32.mxu0 %vm5083_vm9, %v4864_v26  ;;  %v4863_v45 = vld [vmem:[%s13552_s5 + $0xb0] sm:$0xff]  ;;  %v4865_v26 = vld [vmem:[%s13552_s5 + $0xc0] sm:$0xff] }
 0x646   : > { %v4997_v61 = vpop.permute.xlu1 %4996  ;;  %5460 = vmatmul.mubr.f32.gmra.mxu0 %v4863_v45 }
 0x647   : > { %v4995_v44 = vpop.permute.xlu0 %4994 }
 0x648   : > { %6349 = vrot.lane.b32.xlu1 %v11569_v4, %s8519_s13  ;;  %v4866_v4 = vld [vmem:[%s13552_s5 + $0xc8] sm:$0xff] }
 0x649   : > { %5937 = vrot.lane.b32.xlu0 %v11539_v51, %s8518_s29  ;;  %7926 = vmatprep.mubr.msk.f32.mxu0 %vm5083_vm9, %v4866_v4 }
 0x64a   : > { %v12116_v12 = vpop.permute.xlu1 %5569  ;;  %5466 = vmatmul.mubr.f32.gmra.mxu0 %v4865_v26 }
 0x64b   : > { %v12118_v24 = vpop.permute.xlu0 %5567  ;;  %7927 = vmatprep.mubr.msk.f32.mxu0 %vm5083_vm9, %v4868_v22  ;;  %v4869_v22 = vld [vmem:[%s13552_s5 + $0xe0] sm:$0xff] }
 0x64c   : > { %14048 = vst [vmem:[#allocation20_spill] sm:$0xff] %v12118_v24  ;;  %5939 = vrot.lane.b32.xlu1 %v11535_v34, %s8518_s29 }
 0x64d   : > { %6343 = vrot.lane.b32.xlu0 %v11556_v58, %s8519_s13  ;;  %v4867_v58 = vld [vmem:[%s13552_s5 + $0xd0] sm:$0xff] }
 0x64e   : > { %v12131_v53 = vpop.permute.xlu1 %5971  ;;  %5472 = vmatmul.mubr.f32.gmra.mxu0 %v4867_v58 }
 0x64f   : > { %v12133_v45 = vpop.permute.xlu0 %5969 }
 0x650   : > { %6345 = vrot.lane.b32.xlu1 %v11552_v56, %s8519_s13  ;;  %v4870_v56 = vld [vmem:[%s13552_s5 + $0xe8] sm:$0xff] }
 0x651   : > { %5933 = vrot.lane.b32.xlu0 %v11516_v17, %s8518_s29  ;;  %7928 = vmatprep.mubr.msk.f32.mxu0 %vm5083_vm9, %v4870_v56 }
 0x652   : > { %v12146_v4 = vpop.permute.xlu1 %6373  ;;  %5478 = vmatmul.mubr.f32.gmra.mxu0 %v4869_v22 }
 0x653   : > { %14049 = vst [vmem:[#allocation40_spill] sm:$0xff] %v12146_v4  ;;  %v12148_v26 = vpop.permute.xlu0 %6371 }
 0x654   : > { %14050 = vst [vmem:[#allocation27_spill] sm:$0xff] %v12148_v26  ;;  %5935 = vrot.lane.b32.xlu1 %v11512_v55, %s8518_s29 }
 0x655   : > { %6339 = vrot.lane.b32.xlu0 %v11539_v51, %s8519_s13 }
 0x656   : > { %v5001_v4 = vpop.permute.xlu1 %5000 }
 0x657   : > { %v4999_v58 = vpop.permute.xlu0 %4998 }
 0x658   : > { %6341 = vrot.lane.b32.xlu1 %v11535_v34, %s8519_s13 }
 0x659   : > { %5591 = vrot.lane.b32.xlu0 %v11729_v35, %s8517_s17 }
 0x65a   : > { %v12165_v26 = vpop.permute.xlu1 %5573 }
 0x65b   : > { %v12167_v39 = vpop.permute.xlu0 %5571 }
 0x65c   : > { %5931 = vrot.lane.b32.xlu1 %v11495_v57, %s8518_s29 }
 0x65d   : > { %5929 = vrot.lane.b32.xlu0 %v11499_v5, %s8518_s29 }
 0x65e   : > { %v5976_v51 = vpop.permute.xlu1 %5975 }
 0x65f   : > { %v5974_v56 = vpop.permute.xlu0 %5973 }
 0x660   : > { %6337 = vrot.lane.b32.xlu1 %v11512_v55, %s8519_s13  ;;  %v5037_v55 = vsel %vm1876_vm4, %v4999_v58, %v5001_v4  ;;  %v7871_v58 = vld [vmem:[%s13552_s5 + $0x100] sm:$0xff] }
 0x661   : > { %6335 = vrot.lane.b32.xlu0 %v11516_v17, %s8519_s13 }
 0x662   : > { %v12177_v34 = vpop.permute.xlu1 %6377 }
 0x663   : > { %14051 = vst [vmem:[#allocation47_spill] sm:$0xff] %v12177_v34  ;;  %v12179_v22 = vpop.permute.xlu0 %6375  ;;  %v5036_v34 = vsel %vm1876_vm4, %v4995_v44, %v4997_v61 }
 0x664   : > { %14052 = vst [vmem:[#allocation41_spill] sm:$0xff] %v12179_v22  ;;  %5927 = vrot.lane.b32.xlu1 %v11478_v30, %s8518_s29 }
 0x665   : > { %5925 = vrot.lane.b32.xlu0 %v11482_v16, %s8518_s29 }
 0x666   : > { %v5005_v21 = vpop.permute.xlu1 %5004 }
 0x667   : > { %5129 = vmatprep.subr.mxu1 %v5005_v21  ;;  %v5003_v31 = vpop.permute.xlu0 %5002 }
 0x668   : > { %v5038_v24 = vsel %vm1876_vm4, %v5003_v31, %v5005_v21  ;;  %6333 = vrot.lane.b32.xlu1 %v11495_v57, %s8519_s13  ;;  %v5035_v57 = vsel %vm1876_vm4, %v12047_v29, %v12045_v14  ;;  %v5034_v21 = vsel %vm1876_vm4, %v12005_v62, %v12000_v13  ;;  %v6012_v62 = vsel %vm5997_vm10, %v5974_v56, %v5976_v51  ;;  %v7874_v56 = vld [vmem:[%s13552_s5 + $0x118] sm:$0xff] }
 0x669   : > { %6331 = vrot.lane.b32.xlu0 %v11499_v5, %s8519_s13  ;;  %5130 = vmatpush1.msra.mxu1 %v5038_v24 }
 0x66a   : > { %v12191_v17 = vpop.permute.xlu1 %5577  ;;  %5131 = vmatprep.subr.mxu1 %v5001_v4 }
 0x66b   : > { %5132 = vmatpush1.msra.mxu1 %v5037_v55  ;;  %v12193_v22 = vpop.permute.xlu0 %5575  ;;  %v14054_v55 = vld [vmem:[#allocation48_spill] sm:$0xff] }
 0x66c   : > { %5923 = vrot.lane.b32.xlu1 %v11461_v18, %s8518_s29  ;;  %5133 = vmatprep.subr.mxu1 %v4997_v61 }
 0x66d   : > { %5921 = vrot.lane.b32.xlu0 %v11465_v27, %s8518_s29  ;;  %5134 = vmatpush1.msra.mxu1 %v5036_v34  ;;  %v14053_v34 = vld [vmem:[#allocation20_spill] sm:$0xff] }
 0x66e   : > { %v5980_v5 = vpop.permute.xlu1 %5979  ;;  %5135 = vmatprep.subr.mxu1 %v12045_v14  ;;  %v5033_v14 = vsel %vm1876_vm4, %v11979_v10, %v11973_v43 }
 0x66f   : > { %5136 = vmatpush1.msra.mxu1 %v5035_v57  ;;  %6103 = vmatprep.subr.mxu0 %v5980_v5  ;;  %v5978_v31 = vpop.permute.xlu0 %5977 }
 0x670   : > { %v6013_v61 = vsel %vm5997_vm10, %v5978_v31, %v5980_v5  ;;  %6329 = vrot.lane.b32.xlu1 %v11478_v30, %s8519_s13  ;;  %5137 = vmatprep.subr.mxu1 %v12000_v13  ;;  %v5031_v13 = vsel %vm1876_vm4, %v11929_v8, %v11927_v63  ;;  %v5030_v8 = vsel %vm1876_vm4, %v11913_v9, %v11911_v59  ;;  %v6733_v5 = vld [vmem:[%s13553_s6 + $0x70] sm:$0xff]  ;;  %v14056_v31 = vld [vmem:[#allocation46_spill] sm:$0xff] }
 0x671   : > { %6327 = vrot.lane.b32.xlu0 %v11482_v16, %s8519_s13  ;;  %5138 = vmatpush1.msra.mxu1 %v5034_v21  ;;  %v5032_v16 = vsel %vm1876_vm4, %v11949_v15, %v11947_v48  ;;  %v6010_v15 = vsel %vm5997_vm10, %v12077_v28, %v12075_v25 }
 0x672   : > { %6104 = vmatpush1.msra.mxu0 %v6013_v61  ;;  %v12216_v29 = vpop.permute.xlu1 %6381  ;;  %5139 = vmatprep.subr.mxu1 %v11973_v43  ;;  %v6011_v43 = vsel %vm5997_vm10, %v12133_v45, %v12131_v53  ;;  %v5611_v45 = vsel %vm4179_vm7, %v12193_v22, %v12191_v17  ;;  %v6730_v61 = vld [vmem:[%s13553_s6 + $0x58] sm:$0xff] }
 0x673   : > { %6105 = vmatprep.subr.mxu0 %v5976_v51  ;;  %5140 = vmatpush1.msra.mxu1 %v5033_v14  ;;  %v12220_v30 = vpop.permute.xlu0 %6379  ;;  %v5610_v51 = vsel %vm4179_vm7, %v12167_v39, %v12165_v26  ;;  %v5609_v39 = vsel %vm4179_vm7, %v14053_v34, %v12116_v12  ;;  %v14057_v14 = vld [vmem:[#allocation16_spill] sm:$0xff] }
 0x674   : > { %6106 = vmatpush1.msra.mxu0 %v6012_v62  ;;  %5919 = vrot.lane.b32.xlu1 %v11444_v37, %s8518_s29  ;;  %v5607_v62 = vsel %vm4179_vm7, %v14057_v14, %v14056_v31  ;;  %v14069_v34 = vld [vmem:[#allocation32_spill] sm:$0xff] }
 0x675   : > { %5141 = vmatprep.subr.mxu1 %v11947_v48  ;;  %6107 = vmatprep.subr.mxu0 %v12131_v53  ;;  %v6009_v53 = vsel %vm5997_vm10, %v12032_v7, %v12030_v50 }
 0x676   : > { %5917 = vrot.lane.b32.xlu0 %v11448_v32, %s8518_s29  ;;  %5142 = vmatpush1.msra.mxu1 %v5032_v16  ;;  %v12234_v10 = vpop.permute.xlu1 %5008 }
 0x677   : > { %6108 = vmatpush1.msra.mxu0 %v6011_v43  ;;  %5143 = vmatprep.subr.mxu1 %v11927_v63  ;;  %v12240_v48 = vpop.permute.xlu0 %5006 }
 0x678   : > { %6109 = vmatprep.subr.mxu0 %v12075_v25  ;;  %5144 = vmatpush1.msra.mxu1 %v5031_v13  ;;  %v5039_v7 = vsel %vm1876_vm4, %v12240_v48, %v12234_v10  ;;  %v14058_v13 = vld [vmem:[#allocation31_spill] sm:$0xff] }
 0x679   : > { %6110 = vmatpush1.msra.mxu0 %v6010_v15  ;;  %6325 = vrot.lane.b32.xlu1 %v11461_v18, %s8519_s13  ;;  %v5029_v18 = vsel %vm1876_vm4, %v11897_v42, %v11895_v52  ;;  %v14059_v48 = vld [vmem:[#allocation43_spill] sm:$0xff] }
 0x67a   : > { %5145 = vmatprep.subr.mxu1 %v11911_v59  ;;  %6111 = vmatprep.subr.mxu0 %v12030_v50  ;;  %v12253_v63 = vpop.permute.xlu1 %5581  ;;  %v5028_v59 = vsel %vm1876_vm4, %v11881_v19, %v11879_v36  ;;  %v5606_v15 = vsel %vm4179_vm7, %v14059_v48, %v14058_v13  ;;  %v14075_v48 = vld [vmem:[#allocation7_spill] sm:$0xff] }
 0x67b   : > { %6323 = vrot.lane.b32.xlu0 %v11465_v27, %s8519_s13  ;;  %5146 = vmatpush1.msra.mxu1 %v5030_v8  ;;  %v12260_v25 = vpop.permute.xlu0 %5579  ;;  %v6731_v8 = vld [vmem:[%s13553_s6 + $0x60] sm:$0xff] }
 0x67c   : > { %6112 = vmatpush1.msra.mxu0 %v6009_v53  ;;  %5147 = vmatprep.subr.mxu1 %v11895_v52  ;;  %v5027_v52 = vsel %vm1876_vm4, %v11865_v38, %v11863_v54 }
 0x67d   : > { %5148 = vmatpush1.msra.mxu1 %v5029_v18  ;;  %5995 = vrot.lane.b32.xlu1 %v11724_v46, %s8518_s29  ;;  %v7878_v18 = vld [vmem:[%s13552_s5 + $0x138] sm:$0xff] }
 0x67e   : > { %5149 = vmatprep.subr.mxu1 %v11879_v36  ;;  %v5013_v27 = vpop.permute.xlu1 %5012  ;;  %v5026_v36 = vsel %vm1876_vm4, %v11842_v33, %v11840_v2 }
 0x67f   : > { %6319 = vrot.lane.b32.xlu0 %v11448_v32, %s8519_s13  ;;  %5150 = vmatpush1.msra.mxu1 %v5028_v59  ;;  %v5011_v9 = vpop.permute.xlu0 %5010  ;;  %v14060_v59 = vld [vmem:[#allocation51_spill] sm:$0xff] }
 0x680   : > { %5151 = vmatprep.subr.mxu1 %v11863_v54  ;;  %v5025_v54 = vsel %vm1876_vm4, %v11826_v23, %v11824_v6  ;;  %v5040_v50 = vsel %vm1876_vm4, %v5011_v9, %v5013_v27 }
 0x681   : > { %5152 = vmatpush1.msra.mxu1 %v5027_v52  ;;  %6321 = vrot.lane.b32.xlu1 %v11444_v37, %s8519_s13  ;;  %v5024_v37 = vsel %vm1876_vm4, %v11810_v3, %v11808_v1 }
 0x682   : > { %5153 = vmatprep.subr.mxu1 %v11840_v2  ;;  %v12284_v19 = vpop.permute.xlu1 %5585 }
 0x683   : > { %5989 = vrot.lane.b32.xlu0 %v11742_v49, %s8518_s29  ;;  %5154 = vmatpush1.msra.mxu1 %v5026_v36  ;;  %v12288_v32 = vpop.permute.xlu0 %5583  ;;  %v6728_v36 = vld [vmem:[%s13553_s6 + $0x48] sm:$0xff] }
 0x684   : > { %5155 = vmatprep.subr.mxu1 %v11824_v6  ;;  %v5023_v6 = vsel %vm1876_vm4, %v11794_v41, %v11792_v11  ;;  %v7975_v41 = vld [vmem:[%s13552_s5 + $0x2d8] sm:$0xff] }
 0x685   : > { %5156 = vmatpush1.msra.mxu1 %v5025_v54  ;;  %5991 = vrot.lane.b32.xlu1 %v11735_v60, %s8518_s29  ;;  %v7877_v54 = vld [vmem:[%s13552_s5 + $0x130] sm:$0xff] }
 0x686   : > { %5157 = vmatprep.subr.mxu1 %v11808_v1  ;;  %v5017_v2 = vpop.permute.xlu1 %5016  ;;  %8004 = vmatprep.mubr.msk.f32.mxu0 %vm5083_vm9, %v7975_v41 }
 0x687   : > { %5985 = vrot.lane.b32.xlu0 %v11756_v20, %s8518_s29  ;;  %5158 = vmatpush1.msra.mxu1 %v5024_v37  ;;  %v5015_v33 = vpop.permute.xlu0 %5014  ;;  %v14062_v37 = vld [vmem:[#allocation38_spill] sm:$0xff] }
 0x688   : > { %5159 = vmatprep.subr.mxu1 %v11792_v11 }
 0x689   : > { %5160 = vmatpush1.msra.mxu1 %v5023_v6  ;;  %6397 = vrot.lane.b32.xlu1 %v11724_v46, %s8519_s13 }
 0x68a   : > { %v12308_v23 = vpop.permute.xlu1 %5589 }
 0x68b   : > { %6391 = vrot.lane.b32.xlu0 %v11742_v49, %s8519_s13  ;;  %v12312_v1 = vpop.permute.xlu0 %5587  ;;  %v5041_v49 = vsel %vm1876_vm4, %v5015_v33, %v5017_v2 }
 0x68d   : > { %5987 = vrot.lane.b32.xlu1 %v11751_v40, %s8518_s29 }
 0x68e   : > { %v5021_v3 = vpop.permute.xlu1 %5020 }
 0x68f   : > { %5981 = vrot.lane.b32.xlu0 %v11769_v0, %s8518_s29  ;;  %5185 = vmatprep.subr.mxu1 %v5021_v3  ;;  %v5019_v46 = vpop.permute.xlu0 %5018 }
 0x690   : > { %v5042_v11 = vsel %vm1876_vm4, %v5019_v46, %v5021_v3  ;;  %v6729_v3 = vld [vmem:[%s13553_s6 + $0x50] sm:$0xff]  ;;  %v7880_v46 = vld [vmem:[%s13552_s5 + $0x148] sm:$0xff] }
 0x691   : > { %6393 = vrot.lane.b32.xlu1 %v11735_v60, %s8519_s13  ;;  %5186 = vmatpush2.msra.mxu1 %v5042_v11  ;;  %v7869_v60 = vld [vmem:[%s13552_s5 + $0xf0] sm:$0xff] }
 0x692   : > { %v12326_v38 = vpop.permute.xlu1 %5593  ;;  %5187 = vmatprep.subr.mxu1 %v5017_v2  ;;  %v14063_v2 = vld [vmem:[#allocation17_spill] sm:$0xff] }
 0x693   : > { %5993 = vrot.lane.b32.xlu0 %v11729_v35, %s8518_s29  ;;  %5188 = vmatpush2.msra.mxu1 %v5041_v49  ;;  %v5958_v42 = vpop.permute.xlu0 %5957  ;;  %v5604_v33 = vsel %vm4179_vm7, %v14063_v2, %v14062_v37  ;;  %v14064_v49 = vld [vmem:[#allocation25_spill] sm:$0xff]  ;;  %v14078_v2 = vld [vmem:[#allocation44_spill] sm:$0xff] }
 0x694   : > { %5189 = vmatprep.subr.mxu1 %v5013_v27  ;;  %v14061_v27 = vld [vmem:[#allocation3_spill] sm:$0xff] }
 0x695   : > { %5983 = vrot.lane.b32.xlu1 %v11762_v47, %s8518_s29  ;;  %5190 = vmatpush2.msra.mxu1 %v5040_v50  ;;  %v5605_v9 = vsel %vm4179_vm7, %v14061_v27, %v14060_v59  ;;  %v14077_v27 = vld [vmem:[#allocation34_spill] sm:$0xff]  ;;  %s494_s29 = scalar_lea.vmem %s13559_s12, %s8097_s20 }
 0x696   : > { %v5960_v28 = vpop.permute.xlu1 %5959  ;;  %5191 = vmatprep.subr.mxu1 %v12234_v10  ;;  %v7875_v10 = vld [vmem:[%s13552_s5 + $0x120] sm:$0xff] }
 0x697   : > { %6395 = vrot.lane.b32.xlu0 %v11729_v35, %s8519_s13  ;;  %v6008_v44 = vsel %vm5997_vm10, %v5958_v42, %v5960_v28  ;;  %5192 = vmatpush2.msra.mxu1 %v5039_v7  ;;  %v12343_v24 = vpop.permute.xlu0 %6363  ;;  %v7872_v35 = vld [vmem:[%s13552_s5 + $0x108] sm:$0xff]  ;;  %v7879_v7 = vld [vmem:[%s13552_s5 + $0x140] sm:$0xff] }
 0x698   : > { %6113 = vmatprep.subr.mxu0 %v5960_v28  ;;  %5194 = vmatmul.mubr.f32.vlgmr.msra.gmra.mxu1 %v7869_v60  ;;  %v14065_v42 = vld [vmem:[#allocation8_spill] sm:$0xff]  ;;  %v6726_v60 = vld [vmem:[%s13553_s6 + $0x38] sm:$0xff]  ;;  %v14066_v28 = vld [vmem:[#allocation23_spill] sm:$0xff] }
 0x699   : > { %6389 = vrot.lane.b32.xlu1 %v11751_v40, %s8519_s13  ;;  %5701 = vmatprep.subr.mxu1 %v12191_v17  ;;  %v14055_v17 = vld [vmem:[#allocation10_spill] sm:$0xff]  ;;  %v5603_v50 = vsel %vm4179_vm7, %v14065_v42, %v14064_v49  ;;  %v7035_v42 = vld [vmem:[%s13556_s9 + $0x50] sm:$0xf] }
 0x69a   : > { %6114 = vmatpush1.msra.mxu0 %v6008_v44  ;;  %5702 = vmatpush1.msra.mxu1 %v5611_v45  ;;  %v12354_v4 = vpop.permute.xlu1 %6365  ;;  %v14067_v44 = vld [vmem:[#allocation39_spill] sm:$0xff] }
 0x69b   : > { %6387 = vrot.lane.b32.xlu0 %v11756_v20, %s8519_s13  ;;  %5703 = vmatprep.subr.mxu1 %v12165_v26  ;;  %v5954_v40 = vpop.permute.xlu0 %5953  ;;  %v6732_v26 = vld [vmem:[%s13553_s6 + $0x68] sm:$0xff]  ;;  %v5602_v45 = vsel %vm4179_vm7, %v14067_v44, %v14066_v28 }
 0x69c   : > { %7900 = vmatprep.mubr.msk.f32.mxu1 %vm5083_vm9, %v7872_v35  ;;  %5704 = vmatpush1.msra.mxu1 %v5610_v51  ;;  %v6727_v35 = vld [vmem:[%s13553_s6 + $0x40] sm:$0xff]  ;;  %v7882_v51 = vld [vmem:[%s13552_s5 + $0x158] sm:$0xff] }
 0x69d   : > { %6385 = vrot.lane.b32.xlu1 %v11762_v47, %s8519_s13  ;;  %5200 = vmatmul.mubr.f32.gmra.mxu1 %v7871_v58  ;;  %v7873_v47 = vld [vmem:[%s13552_s5 + $0x110] sm:$0xff] }
 0x69e   : > { %5705 = vmatprep.subr.mxu1 %v12116_v12  ;;  %v5956_v20 = vpop.permute.xlu1 %5955  ;;  %7901 = vmatprep.mubr.msk.f32.mxu1 %vm5083_vm9, %v7874_v56  ;;  %v5608_v12 = vsel %vm4179_vm7, %v14055_v17, %v14054_v55  ;;  %v14068_v56 = vld [vmem:[#allocation30_spill] sm:$0xff] }
 0x69f   : > { %6383 = vrot.lane.b32.xlu0 %v11769_v0, %s8519_s13  ;;  %5706 = vmatpush1.msra.mxu1 %v5609_v39  ;;  %v6360_v22 = vpop.permute.xlu0 %6359  ;;  %v6007_v57 = vsel %vm5997_vm10, %v5954_v40, %v5956_v20  ;;  %v7876_v0 = vld [vmem:[%s13552_s5 + $0x128] sm:$0xff]  ;;  %v5601_v39 = vsel %vm4179_vm7, %v14069_v34, %v14068_v56 }
 0x6a0   : > { %5707 = vmatprep.subr.mxu1 %v14054_v55  ;;  %6115 = vmatprep.subr.mxu0 %v5956_v20  ;;  %v6724_v20 = vld [vmem:[%s13553_s6 + $0x28] sm:$0xff] }
 0x6a1   : > { %5708 = vmatpush1.msra.mxu1 %v5608_v12  ;;  %6801 = vperm.xlu1 %8263, %v6732_v26   ;;  %v7881_v26 = vld [vmem:[%s13552_s5 + $0x150] sm:$0xff] }
 0x6a2   : > { %5206 = vmatmul.mubr.f32.gmra.mxu1 %v7873_v47  ;;  %5709 = vmatprep.subr.mxu1 %v14056_v31  ;;  %v12396_v21 = vpop.permute.xlu1 %6361  ;;  %v14071_v47 = vld [vmem:[#allocation50_spill] sm:$0xff]  ;;  %v14072_v31 = vld [vmem:[#allocation36_spill] sm:$0xff] }
 0x6a3   : > { %6116 = vmatpush1.msra.mxu0 %v6007_v57  ;;  %6806 = vperm.xlu0 %8262, %v6733_v5   ;;  %v12406_v16 = vsel %vm6399_vm11, %v6360_v22, %v12396_v21  ;;  %v5950_v43 = vpop.permute.xlu0 %5949  ;;  %v14070_v22 = vld [vmem:[#allocation15_spill] sm:$0xff]  ;;  %v6725_v57 = vld [vmem:[%s13553_s6 + $0x30] sm:$0xff] }
 0x6a4   : > { %5710 = vmatpush1.msra.mxu1 %v5607_v62  ;;  %7902 = vmatprep.mubr.msk.f32.mxu1 %vm5083_vm9, %v7876_v0  ;;  %v5600_v55 = vsel %vm4179_vm7, %v14071_v47, %v14070_v22  ;;  %v7884_v0 = vld [vmem:[%s13552_s5 + $0x168] sm:$0xff]  ;;  %v6722_v62 = vld [vmem:[%s13553_s6 + $0x18] sm:$0xff] }
 0x6a5   : > { %5711 = vmatprep.subr.mxu1 %v14058_v13  ;;  %6791 = vperm.xlu1 %8263, %v6730_v61   ;;  %v14073_v61 = vld [vmem:[#allocation19_spill] sm:$0xff]  ;;  %v14074_v13 = vld [vmem:[#allocation45_spill] sm:$0xff] }
 0x6a6   : > { %5712 = vmatpush1.msra.mxu1 %v5606_v15  ;;  %v5952_v53 = vpop.permute.xlu1 %5951  ;;  %v5599_v14 = vsel %vm4179_vm7, %v14073_v61, %v14072_v31  ;;  %v5598_v15 = vsel %vm4179_vm7, %v14075_v48, %v14074_v13  ;;  %v7896_v61 = vld [vmem:[%s13552_s5 + $0x1c8] sm:$0xff] }
 0x6a7   : > { %5212 = vmatmul.mubr.f32.gmra.mxu1 %v7875_v10  ;;  %5713 = vmatprep.subr.mxu1 %v14060_v59  ;;  %v12426_v52 = vpop.permute.xlu0 %6355  ;;  %v6006_v6 = vsel %vm5997_vm10, %v5950_v43, %v5952_v53  ;;  %v7883_v43 = vld [vmem:[%s13552_s5 + $0x160] sm:$0xff]  ;;  %v14076_v59 = vld [vmem:[#allocation29_spill] sm:$0xff] }
 0x6a8   : > { %6796 = vperm.xlu0 %8262, %v6731_v8   ;;  %5714 = vmatpush1.msra.mxu1 %v5605_v9  ;;  %v6723_v8 = vld [vmem:[%s13553_s6 + $0x20] sm:$0xff]  ;;  %v5597_v9 = vsel %vm4179_vm7, %v14077_v27, %v14076_v59  ;;  %v7897_v27 = vld [vmem:[%s13552_s5 + $0x1d0] sm:$0xff] }
 0x6a9   : > { %5715 = vmatprep.subr.mxu1 %v14062_v37  ;;  %7903 = vmatprep.mubr.msk.f32.mxu1 %vm5083_vm9, %v7878_v18  ;;  %v7886_v18 = vld [vmem:[%s13552_s5 + $0x178] sm:$0xff] }
 0x6aa   : > { %5716 = vmatpush1.msra.mxu1 %v5604_v33  ;;  %6117 = vmatprep.subr.mxu0 %v5952_v53  ;;  %v12443_v41 = vpop.permute.xlu1 %6357  ;;  %v14079_v33 = vld [vmem:[#allocation49_spill] sm:$0xff] }
 0x6ab   : > { %6781 = vperm.xlu1 %8263, %v6728_v36   ;;  %5218 = vmatmul.mubr.f32.gmra.mxu1 %v7877_v54  ;;  %v5946_v11 = vpop.permute.xlu0 %5945  ;;  %v6720_v36 = vld [vmem:[%s13553_s6 + $0x8] sm:$0xff]  ;;  %v7885_v54 = vld [vmem:[%s13552_s5 + $0x170] sm:$0xff] }
 0x6ac   : > { %5717 = vmatprep.subr.mxu1 %v14064_v49  ;;  %6118 = vmatpush1.msra.mxu0 %v6006_v6  ;;  %v5596_v6 = vsel %vm4179_vm7, %v14079_v33, %v14078_v2  ;;  %v7888_v49 = vld [vmem:[%s13552_s5 + $0x188] sm:$0xff]  ;;  %v7929_v33 = vld [vmem:[%s13552_s5 + $0x1e0] sm:$0xff] }
 0x6ad   : > { %6786 = vperm.xlu0 %8262, %v6729_v3   ;;  %5718 = vmatpush1.msra.mxu1 %v5603_v50  ;;  %v7887_v50 = vld [vmem:[%s13552_s5 + $0x180] sm:$0xff] }
 0x6ae   : > { %5719 = vmatprep.subr.mxu1 %v14066_v28  ;;  %7904 = vmatprep.mubr.msk.f32.mxu1 %vm5083_vm9, %v7880_v46  ;;  %v5948_v58 = vpop.permute.xlu1 %5947  ;;  %v7890_v28 = vld [vmem:[%s13552_s5 + $0x198] sm:$0xff] }
 0x6af   : > { %5720 = vmatpush1.msra.mxu1 %v5602_v45  ;;  %6771 = vperm.xlu1 %8263, %v6726_v60   ;;  %v12469_v40 = vpop.permute.xlu0 %6351  ;;  %v6005_v17 = vsel %vm5997_vm10, %v5946_v11, %v5948_v58  ;;  %v6721_v11 = vld [vmem:[%s13553_s6 + $0x10] sm:$0xff]  ;;  %v6719_v45 = vld [vmem:[%s13553_s6] sm:$0xff] }
 0x6b0   : > { %5224 = vmatmul.mubr.f32.gmra.mxu1 %v7879_v7  ;;  %5721 = vmatprep.subr.mxu1 %v14068_v56  ;;  %v7892_v56 = vld [vmem:[%s13552_s5 + $0x1a8] sm:$0xff] }
 0x6b1   : > { %6776 = vperm.xlu0 %8262, %v6727_v35   ;;  %5722 = vmatpush1.msra.mxu1 %v5601_v39  ;;  %v7033_v35 = vld [vmem:[%s13556_s9 + $0x40] sm:$0xff]  ;;  %v7034_v39 = vld [vmem:[%s13556_s9 + $0x48] sm:$0xff] }
 0x6b2   : > { %5723 = vmatprep.subr.mxu1 %v14070_v22  ;;  %7905 = vmatprep.mubr.msk.f32.mxu1 %vm5083_vm9, %v7882_v51  ;;  %v12487_v12 = vpop.permute.xlu1 %6353 }
 0x6b3   : > { %5724 = vmatpush1.msra.mxu1 %v5600_v55  ;;  %6119 = vmatprep.subr.mxu0 %v5948_v58  ;;  %v5942_v5 = vpop.permute.xlu0 %5941  ;;  %v7889_v58 = vld [vmem:[%s13552_s5 + $0x190] sm:$0xff]  ;;  %v7894_v55 = vld [vmem:[%s13552_s5 + $0x1b8] sm:$0xff] }
 0x6b4   : > { %6761 = vperm.xlu1 %8263, %v6724_v20   ;;  %5230 = vmatmul.mubr.f32.gmra.mxu1 %v7881_v26  ;;  %v7031_v20 = vld [vmem:[%s13556_s9 + $0x30] sm:$0xff]  ;;  %v7891_v26 = vld [vmem:[%s13552_s5 + $0x1a0] sm:$0xff] }
 0x6b5   : > { %5725 = vmatprep.subr.mxu1 %v14072_v31  ;;  %6120 = vmatpush1.msra.mxu0 %v6005_v17 }
 0x6b6   : > { %6766 = vperm.xlu0 %8262, %v6725_v57   ;;  %5726 = vmatpush1.msra.mxu1 %v5599_v14  ;;  %v5944_v10 = vpop.permute.xlu1 %5943  ;;  %v7032_v57 = vld [vmem:[%s13556_s9 + $0x38] sm:$0xff] }
 0x6b7   : > { %5727 = vmatprep.subr.mxu1 %v14074_v13  ;;  %7906 = vmatprep.mubr.msk.f32.mxu1 %vm5083_vm9, %v7884_v0  ;;  %v12513_v53 = vpop.permute.xlu0 %6347  ;;  %v6004_v3 = vsel %vm5997_vm10, %v5942_v5, %v5944_v10  ;;  %v7029_v5 = vld [vmem:[%s13556_s9 + $0x20] sm:$0xff]  ;;  %v7893_v0 = vld [vmem:[%s13552_s5 + $0x1b0] sm:$0xff] }
 0x6b8   : > { %5728 = vmatpush1.msra.mxu1 %v5598_v15  ;;  %6751 = vperm.xlu1 %8263, %v6722_v62   ;;  %v7030_v62 = vld [vmem:[%s13556_s9 + $0x28] sm:$0xff]  ;;  %v7895_v13 = vld [vmem:[%s13552_s5 + $0x1c0] sm:$0xff]  ;;  %v5614_v15 = vsel %vm4179_vm7, %v12312_v1, %v12308_v23  ;;  %v5613_v1 = vsel %vm4179_vm7, %v12288_v32, %v12284_v19 }
 0x6b9   : > { %5236 = vmatmul.mubr.f32.gmra.mxu1 %v7883_v43  ;;  %5729 = vmatprep.subr.mxu1 %v14076_v59  ;;  %v7930_v32 = vld [vmem:[%s13552_s5 + $0x1e8] sm:$0xff] }
 0x6ba   : > { %6756 = vperm.xlu0 %8262, %v6723_v8   ;;  %5730 = vmatpush1.msra.mxu1 %v5597_v9  ;;  %v12528_v37 = vpop.permute.xlu1 %6349 }
 0x6bb   : > { %5731 = vmatprep.subr.mxu1 %v14078_v2  ;;  %7907 = vmatprep.mubr.msk.f32.mxu1 %vm5083_vm9, %v7886_v18  ;;  %v5938_v46 = vpop.permute.xlu0 %5937  ;;  %v7028_v18 = vld [vmem:[%s13556_s9 + $0x18] sm:$0xff]  ;;  %v7258_v2 = vld [vmem:[%s13558_s11 + $0x8] sm:$0x3] }
 0x6bc   : > { %5732 = vmatpush1.msra.mxu1 %v5596_v6  ;;  %6121 = vmatprep.subr.mxu0 %v5944_v10  ;;  %v7027_v10 = vld [vmem:[%s13556_s9 + $0x10] sm:$0xff] }
 0x6bd   : > { %6741 = vperm.xlu1 %8263, %v6720_v36   ;;  %5242 = vmatmul.mubr.f32.gmra.mxu1 %v7885_v54  ;;  %v7026_v54 = vld [vmem:[%s13556_s9 + $0x8] sm:$0xff] }
 0x6be   : > { %5757 = vmatprep.subr.mxu1 %v12326_v38  ;;  %6122 = vmatpush1.msra.mxu0 %v6004_v3  ;;  %v5940_v60 = vpop.permute.xlu1 %5939  ;;  %v7257_v3 = vld [vmem:[%s13558_s11] sm:$0xff] }
 0x6bf   : > { %6746 = vperm.xlu0 %8262, %v6721_v11   ;;  %7908 = vmatprep.mubr.msk.f32.mxu1 %vm5083_vm9, %v7888_v49  ;;  %v6003_v7 = vsel %vm5997_vm10, %v5938_v46, %v5940_v60  ;;  %v12554_v44 = vpop.permute.xlu0 %6343  ;;  %v6415_v46 = vsel %vm6399_vm11, %v12220_v30, %v12216_v29  ;;  %v7931_v49 = vld [vmem:[%s13552_s5 + $0x1f0] sm:$0xff] }
 0x6c0   : > { %6123 = vmatprep.subr.mxu0 %v5940_v60  ;;  %v14081_v60 = vld [vmem:[#allocation41_spill] sm:$0xff] }
 0x6c1   : > { %7088 = vperm.xlu1 %8263, %v7035_v42   ;;  %5248 = vmatmul.mubr.f32.gmra.mxu1 %v7887_v50  ;;  %v14080_v50 = vld [vmem:[#allocation47_spill] sm:$0xff] }
 0x6c2   : > { %7909 = vmatprep.mubr.msk.f32.mxu1 %vm5083_vm9, %v7890_v28  ;;  %6124 = vmatpush1.msra.mxu0 %v6003_v7  ;;  %v12566_v51 = vpop.permute.xlu1 %6345  ;;  %v6414_v7 = vsel %vm6399_vm11, %v14081_v60, %v14080_v50  ;;  %v14082_v28 = vld [vmem:[#allocation40_spill] sm:$0xff]  ;;  %v7953_v60 = vld [vmem:[%s13552_s5 + $0x2a0] sm:$0xff] }
 0x6c3   : > { %6736 = vperm.xlu0 %8262, %v6719_v45   ;;  %v5934_v34 = vpop.permute.xlu0 %5933  ;;  %v14083_v45 = vld [vmem:[#allocation27_spill] sm:$0xff] }
 0x6c5   : > { %7078 = vperm.xlu1 %8263, %v7033_v35   ;;  %5254 = vmatmul.mubr.f32.gmra.mxu1 %v7889_v58  ;;  %v6413_v35 = vsel %vm6399_vm11, %v14083_v45, %v14082_v28  ;;  %v7933_v58 = vld [vmem:[%s13552_s5 + $0x200] sm:$0xff] }
 0x6c6   : > { %7910 = vmatprep.mubr.msk.f32.mxu1 %vm5083_vm9, %v7892_v56  ;;  %v5936_v22 = vpop.permute.xlu1 %5935 }
 0x6c7   : > { %7083 = vperm.xlu0 %8262, %v7034_v39   ;;  %v6002_v47 = vsel %vm5997_vm10, %v5934_v34, %v5936_v22  ;;  %6125 = vmatprep.subr.mxu0 %v5936_v22  ;;  %v12585_v17 = vpop.permute.xlu0 %6339  ;;  %v14084_v34 = vld [vmem:[#allocation21_spill] sm:$0xff]  ;;  %v14085_v39 = vld [vmem:[#allocation11_spill] sm:$0xff] }
 0x6c8   : > { %6126 = vmatpush1.msra.mxu0 %v6002_v47 }
 0x6c9   : > { %7068 = vperm.xlu1 %8263, %v7031_v20   ;;  %5260 = vmatmul.mubr.f32.gmra.mxu1 %v7891_v26  ;;  %v6412_v20 = vsel %vm6399_vm11, %v14085_v39, %v14084_v34  ;;  %v7936_v26 = vld [vmem:[%s13552_s5 + $0x218] sm:$0xff] }
 0x6ca   : > { %7911 = vmatprep.mubr.msk.f32.mxu1 %vm5083_vm9, %v7894_v55  ;;  %v12597_v31 = vpop.permute.xlu1 %6341  ;;  %v6411_v55 = vsel %vm6399_vm11, %v12343_v24, %v12354_v4  ;;  %v6409_v24 = vsel %vm6399_vm11, %v12426_v52, %v12443_v41 }
 0x6cb   : > { %7073 = vperm.xlu0 %8262, %v7032_v57   ;;  %v5592_v14 = vpop.permute.xlu0 %5591  ;;  %v7935_v57 = vld [vmem:[%s13552_s5 + $0x210] sm:$0xff] }
 0x6cc   : > { %v5615_v43 = vsel %vm4179_vm7, %v5592_v14, %v12326_v38  ;;  %v7898_v38 = vld [vmem:[%s13552_s5 + $0x1d8] sm:$0xff]  ;;  %v6408_v14 = vsel %vm6399_vm11, %v12469_v40, %v12487_v12  ;;  %v7939_v40 = vld [vmem:[%s13552_s5 + $0x230] sm:$0xff] }
 0x6cd   : > { %7058 = vperm.xlu1 %8263, %v7029_v5   ;;  %5266 = vmatmul.mubr.f32.gmra.mxu1 %v7893_v0  ;;  %v7938_v0 = vld [vmem:[%s13552_s5 + $0x228] sm:$0xff] }
 0x6ce   : > { %7912 = vmatprep.mubr.msk.f32.mxu1 %vm5083_vm9, %v7896_v61  ;;  %5758 = vmatpush2.msra.mxu1 %v5615_v43  ;;  %v5932_v48 = vpop.permute.xlu1 %5931  ;;  %v6405_v43 = vsel %vm6399_vm11, %v12585_v17, %v12597_v31  ;;  %v7944_v17 = vld [vmem:[%s13552_s5 + $0x258] sm:$0xff] }
 0x6cf   : > { %7063 = vperm.xlu0 %8262, %v7030_v62   ;;  %5759 = vmatprep.subr.mxu1 %v12308_v23  ;;  %v5930_v8 = vpop.permute.xlu0 %5929  ;;  %v7025_v23 = vld [vmem:[%s13556_s9] sm:$0xff] }
 0x6d0   : > { %5760 = vmatpush2.msra.mxu1 %v5614_v15  ;;  %6127 = vmatprep.subr.mxu0 %v5932_v48  ;;  %v6001_v59 = vsel %vm5997_vm10, %v5930_v8, %v5932_v48  ;;  %v7943_v15 = vld [vmem:[%s13552_s5 + $0x250] sm:$0xff] }
 0x6d1   : > { %7048 = vperm.xlu1 %8263, %v7027_v10   ;;  %5272 = vmatmul.mubr.f32.gmra.mxu1 %v7895_v13 }
 0x6d2   : > { %7913 = vmatprep.mubr.msk.f32.mxu1 %vm5083_vm9, %v7898_v38  ;;  %5761 = vmatprep.subr.mxu1 %v12284_v19  ;;  %v12636_v9 = vpop.permute.xlu1 %6337  ;;  %v5612_v19 = vsel %vm4179_vm7, %v12260_v25, %v12253_v63 }
 0x6d3   : > { %7053 = vperm.xlu0 %8262, %v7028_v18   ;;  %5762 = vmatpush2.msra.mxu1 %v5613_v1  ;;  %v12641_v36 = vpop.permute.xlu0 %6335  ;;  %v7946_v18 = vld [vmem:[%s13552_s5 + $0x268] sm:$0xff] }
 0x6d4   : > { %6128 = vmatpush1.msra.mxu0 %v6001_v59  ;;  %5763 = vmatprep.subr.mxu1 %v12253_v63  ;;  %v7932_v63 = vld [vmem:[%s13552_s5 + $0x1f8] sm:$0xff] }
 0x6d5   : > { %7038 = vperm.xlu1 %8263, %v7025_v23   ;;  %5278 = vmatmul.mubr.f32.gmra.mxu1 %v7897_v27  ;;  %v7945_v27 = vld [vmem:[%s13552_s5 + $0x260] sm:$0xff] }
 0x6d6   : > { %5764 = vmatpush2.msra.mxu1 %v5612_v19  ;;  %7959 = vmatprep.mubr.msk.f32.mxu1 %vm5083_vm9, %v7930_v32  ;;  %v5928_v6 = vpop.permute.xlu1 %5927  ;;  %v7948_v32 = vld [vmem:[%s13552_s5 + $0x278] sm:$0xff] }
 0x6d7   : > { %7043 = vperm.xlu0 %8262, %v7026_v54   ;;  %6505 = vmatprep.subr.mxu1 %v12216_v29  ;;  %v5926_v25 = vpop.permute.xlu0 %5925  ;;  %v7934_v29 = vld [vmem:[%s13552_s5 + $0x208] sm:$0xff]  ;;  %v7947_v54 = vld [vmem:[%s13552_s5 + $0x270] sm:$0xff] }
 0x6d8   : > { %6129 = vmatprep.subr.mxu0 %v5928_v6  ;;  %v6000_v11 = vsel %vm5997_vm10, %v5926_v25, %v5928_v6  ;;  %v7949_v6 = vld [vmem:[%s13552_s5 + $0x280] sm:$0xff]  ;;  %v7952_v25 = vld [vmem:[%s13552_s5 + $0x298] sm:$0xff] }
 0x6d9   : > { %7266 = vperm.xlu1 %8263, %v7258_v2   ;;  %5766 = vmatmul.mubr.f32.vlgmr.msra.gmra.mxu1 %v7929_v33  ;;  %v7950_v2 = vld [vmem:[%s13552_s5 + $0x288] sm:$0xff] }
 0x6da   : > { %6506 = vmatpush1.msra.mxu1 %v6415_v46  ;;  %7960 = vmatprep.mubr.msk.f32.mxu1 %vm5083_vm9, %v7932_v63  ;;  %v12672_v42 = vpop.permute.xlu1 %6333  ;;  %v7951_v46 = vld [vmem:[%s13552_s5 + $0x290] sm:$0xff] }
 0x6db   : > { %7261 = vperm.xlu0 %8262, %v7257_v3   ;;  %6507 = vmatprep.subr.mxu1 %v14080_v50  ;;  %v12681_v30 = vpop.permute.xlu0 %6331 }
 0x6dc   : > { %6508 = vmatpush1.msra.mxu1 %v6414_v7  ;;  %6130 = vmatpush1.msra.mxu0 %v6000_v11 }
 0x6dd   : > { %5772 = vmatmul.mubr.f32.gmra.mxu1 %v7931_v49  ;;  %6509 = vmatprep.subr.mxu1 %v14082_v28  ;;  %v7954_v49 = vld [vmem:[%s13552_s5 + $0x2a8] sm:$0xff] }
 0x6de   : > { %6510 = vmatpush1.msra.mxu1 %v6413_v35  ;;  %7961 = vmatprep.mubr.msk.f32.mxu1 %vm5083_vm9, %v7934_v29  ;;  %v5924_v56 = vpop.permute.xlu1 %5923  ;;  %v7956_v29 = vld [vmem:[%s13552_s5 + $0x2b8] sm:$0xff] }
 0x6df   : > { %6511 = vmatprep.subr.mxu1 %v14084_v34  ;;  %6131 = vmatprep.subr.mxu0 %v5924_v56  ;;  %v5922_v22 = vpop.permute.xlu0 %5921  ;;  %v7958_v34 = vld [vmem:[%s13552_s5 + $0x2c8] sm:$0xff] }
 0x6e0   : > { %6512 = vmatpush1.msra.mxu1 %v6412_v20  ;;  %v5999_v47 = vsel %vm5997_vm10, %v5922_v22, %v5924_v56  ;;  %v7974_v20 = vld [vmem:[%s13552_s5 + $0x2d0] sm:$0xff] }
 0x6e1   : > { %5778 = vmatmul.mubr.f32.gmra.mxu1 %v7933_v58  ;;  %6513 = vmatprep.subr.mxu1 %v12354_v4  ;;  %v7937_v4 = vld [vmem:[%s13552_s5 + $0x220] sm:$0xff]  ;;  %v7955_v58 = vld [vmem:[%s13552_s5 + $0x2b0] sm:$0xff] }
 0x6e2   : > { %6514 = vmatpush1.msra.mxu1 %v6411_v55  ;;  %7962 = vmatprep.mubr.msk.f32.mxu1 %vm5083_vm9, %v7936_v26  ;;  %v6330_v5 = vpop.permute.xlu1 %6329 }
 0x6e3   : > { %6515 = vmatprep.subr.mxu1 %v12396_v21  ;;  %6132 = vmatpush1.msra.mxu0 %v5999_v47  ;;  %v6328_v61 = vpop.permute.xlu0 %6327  ;;  %v7977_v47 = vld [vmem:[%s13552_s5 + $0x2e8] sm:$0xff] }
 0x6e4   : > { %6516 = vmatpush1.msra.mxu1 %v12406_v16  ;;  %v7940_v16 = vld [vmem:[%s13552_s5 + $0x238] sm:$0xff]  ;;  %v6402_v38 = vsel %vm6399_vm11, %v6328_v61, %v6330_v5  ;;  %v7976_v61 = vld [vmem:[%s13552_s5 + $0x2e0] sm:$0xff] }
 0x6e5   : > { %5784 = vmatmul.mubr.f32.gmra.mxu1 %v7935_v57  ;;  %6517 = vmatprep.subr.mxu1 %v12443_v41  ;;  %v6407_v41 = vsel %vm6399_vm11, %v12513_v53, %v12528_v37  ;;  %v7957_v57 = vld [vmem:[%s13552_s5 + $0x2c0] sm:$0xff] }
 0x6e6   : > { %6518 = vmatpush1.msra.mxu1 %v6409_v24  ;;  %7963 = vmatprep.mubr.msk.f32.mxu1 %vm5083_vm9, %v7938_v0  ;;  %v5920_v21 = vpop.permute.xlu1 %5919  ;;  %v8020_v0 = vld [vmem:[%s13552_s5 + $0x3c8] sm:$0xff] }
 0x6e7   : > { %6519 = vmatprep.subr.mxu1 %v12487_v12  ;;  %6133 = vmatprep.subr.mxu0 %v5920_v21  ;;  %v6406_v12 = vsel %vm6399_vm11, %v12554_v44, %v12566_v51  ;;  %v7941_v44 = vld [vmem:[%s13552_s5 + $0x240] sm:$0xff] }
 0x6e8   : > { %6520 = vmatpush1.msra.mxu1 %v6408_v14  ;;  %v5918_v52 = vpop.permute.xlu0 %5917  ;;  %v8019_v14 = vld [vmem:[%s13552_s5 + $0x3c0] sm:$0xff] }
 0x6e9   : > { %5790 = vmatmul.mubr.f32.gmra.mxu1 %v7937_v4  ;;  %6521 = vmatprep.subr.mxu1 %v12528_v37  ;;  %v5998_v62 = vsel %vm5997_vm10, %v5918_v52, %v5920_v21  ;;  %v7942_v37 = vld [vmem:[%s13552_s5 + $0x248] sm:$0xff]  ;;  %v7979_v4 = vld [vmem:[%s13552_s5 + $0x2f8] sm:$0xff]  ;;  %v7978_v52 = vld [vmem:[%s13552_s5 + $0x2f0] sm:$0xff] }
 0x6ea   : > { %6522 = vmatpush1.msra.mxu1 %v6407_v41  ;;  %7964 = vmatprep.mubr.msk.f32.mxu1 %vm5083_vm9, %v7940_v16  ;;  %v8022_v16 = vld [vmem:[%s13552_s5 + $0x3d8] sm:$0xff]  ;;  %v7981_v41 = vld [vmem:[%s13552_s5 + $0x308] sm:$0xff] }
 0x6eb   : > { %6523 = vmatprep.subr.mxu1 %v12566_v51  ;;  %6134 = vmatpush1.msra.mxu0 %v5998_v62  ;;  %v6326_v53 = vpop.permute.xlu1 %6325  ;;  %v6404_v51 = vsel %vm6399_vm11, %v12641_v36, %v12636_v9  ;;  %v8021_v62 = vld [vmem:[%s13552_s5 + $0x3d0] sm:$0xff] }
 0x6ec   : > { %6524 = vmatpush1.msra.mxu1 %v6406_v12  ;;  %v7980_v12 = vld [vmem:[%s13552_s5 + $0x300] sm:$0xff] }
 0x6ed   : > { %5796 = vmatmul.mubr.f32.gmra.mxu1 %v7939_v40  ;;  %6525 = vmatprep.subr.mxu1 %v12597_v31  ;;  %v6324_v10 = vpop.permute.xlu0 %6323  ;;  %v6403_v31 = vsel %vm6399_vm11, %v12681_v30, %v12672_v42  ;;  %v8024_v40 = vld [vmem:[%s13552_s5 + $0x3e8] sm:$0xff] }
 0x6ee   : > { %6526 = vmatpush1.msra.mxu1 %v6405_v43  ;;  %7965 = vmatprep.mubr.msk.f32.mxu1 %vm5083_vm9, %v7942_v37  ;;  %v6401_v59 = vsel %vm6399_vm11, %v6324_v10, %v6326_v53  ;;  %v8023_v37 = vld [vmem:[%s13552_s5 + $0x3e0] sm:$0xff]  ;;  %v8026_v43 = vld [vmem:[%s13552_s5 + $0x3f8] sm:$0xff]  ;;  %v7982_v10 = vld [vmem:[%s13552_s5 + $0x310] sm:$0xff] }
 0x6ef   : > { %6527 = vmatprep.subr.mxu1 %v12636_v9  ;;  %v5996_v13 = vpop.permute.xlu1 %5995 }
 0x6f0   : > { %6528 = vmatpush1.msra.mxu1 %v6404_v51  ;;  %6159 = vmatprep.subr.mxu0 %v5996_v13  ;;  %v8025_v51 = vld [vmem:[%s13552_s5 + $0x3f0] sm:$0xff] }
 0x6f1   : > { %5802 = vmatmul.mubr.f32.gmra.mxu1 %v7941_v44  ;;  %6529 = vmatprep.subr.mxu1 %v12672_v42  ;;  %v6320_v48 = vpop.permute.xlu0 %6319  ;;  %v7985_v44 = vld [vmem:[%s13552_s5 + $0x328] sm:$0xff] }
 0x6f2   : > { %6530 = vmatpush1.msra.mxu1 %v6403_v31  ;;  %7966 = vmatprep.mubr.msk.f32.mxu1 %vm5083_vm9, %v7944_v17  ;;  %v7984_v17 = vld [vmem:[%s13552_s5 + $0x320] sm:$0xff]  ;;  %v7987_v31 = vld [vmem:[%s13552_s5 + $0x338] sm:$0xff] }
 0x6f3   : > { %6531 = vmatprep.subr.mxu1 %v6330_v5  ;;  %v6322_v8 = vpop.permute.xlu1 %6321 }
 0x6f4   : > { %6532 = vmatpush1.msra.mxu1 %v6402_v38  ;;  %v6400_v1 = vsel %vm6399_vm11, %v6320_v48, %v6322_v8  ;;  %v8027_v48 = vld [vmem:[%s13552_s5 + $0x400] sm:$0xff]  ;;  %v7986_v38 = vld [vmem:[%s13552_s5 + $0x330] sm:$0xff] }
 0x6f5   : > { %5808 = vmatmul.mubr.f32.gmra.mxu1 %v7943_v15  ;;  %6533 = vmatprep.subr.mxu1 %v6326_v53  ;;  %v5990_v23 = vpop.permute.xlu0 %5989  ;;  %v7983_v53 = vld [vmem:[%s13552_s5 + $0x318] sm:$0xff] }
 0x6f6   : > { %6534 = vmatpush1.msra.mxu1 %v6401_v59  ;;  %7967 = vmatprep.mubr.msk.f32.mxu1 %vm5083_vm9, %v7946_v18  ;;  %v8030_v15 = vld [vmem:[%s13552_s5 + $0x418] sm:$0xff]  ;;  %v7989_v59 = vld [vmem:[%s13552_s5 + $0x348] sm:$0xff] }
 0x6f7   : > { %6535 = vmatprep.subr.mxu1 %v6322_v8  ;;  %v5992_v9 = vpop.permute.xlu1 %5991  ;;  %v13678_v8 = vmov 0.0   ;;  %v6705_v18 = vld [vmem:[%s13554_s7 + $0x78] sm:$0xff] }
 0x6f8   : > { %6536 = vmatpush1.msra.mxu1 %v6400_v1  ;;  %v6016_v30 = vsel %vm5997_vm10, %v5990_v23, %v5992_v9  ;;  %v8029_v1 = vld [vmem:[%s13552_s5 + $0x410] sm:$0xff] }
 0x6f9   : > { %5814 = vmatmul.mubr.f32.gmra.mxu1 %v7945_v27  ;;  %v5986_v36 = vpop.permute.xlu0 %5985  ;;  %v6704_v23 = vld [vmem:[%s13554_s7 + $0x70] sm:$0xff]  ;;  %v8032_v27 = vld [vmem:[%s13552_s5 + $0x428] sm:$0xff] }
 0x6fa   : > { %7968 = vmatprep.mubr.msk.f32.mxu1 %vm5083_vm9, %v7948_v32  ;;  %v6703_v32 = vld [vmem:[%s13554_s7 + $0x68] sm:$0xff] }
 0x6fb   : > { %v6398_v19 = vpop.permute.xlu1 %6397 }
 0x6fc   : > { %6561 = vmatprep.subr.mxu1 %v6398_v19 }
 0x6fd   : > { %5820 = vmatmul.mubr.f32.gmra.mxu1 %v7947_v54  ;;  %v6392_v33 = vpop.permute.xlu0 %6391  ;;  %v8031_v54 = vld [vmem:[%s13552_s5 + $0x420] sm:$0xff] }
 0x6fe   : > { %7969 = vmatprep.mubr.msk.f32.mxu1 %vm5083_vm9, %v7950_v2  ;;  %v8034_v2 = vld [vmem:[%s13552_s5 + $0x438] sm:$0xff] }
 0x6ff   : > { %v5988_v63 = vpop.permute.xlu1 %5987 }
 0x700   : > { %v6015_v45 = vsel %vm5997_vm10, %v5986_v36, %v5988_v63  ;;  %v7991_v36 = vld [vmem:[%s13552_s5 + $0x358] sm:$0xff] }
 0x701   : > { %5826 = vmatmul.mubr.f32.gmra.mxu1 %v7949_v6  ;;  %v5982_v3 = vpop.permute.xlu0 %5981  ;;  %v6701_v6 = vld [vmem:[%s13554_s7 + $0x58] sm:$0xff] }
 0x702   : > { %7970 = vmatprep.mubr.msk.f32.mxu1 %vm5083_vm9, %v7952_v25  ;;  %v8033_v25 = vld [vmem:[%s13552_s5 + $0x430] sm:$0xff] }
 0x703   : > { %v6394_v11 = vpop.permute.xlu1 %6393 }
 0x704   : > { %v6418_v26 = vsel %vm6399_vm11, %v6392_v33, %v6394_v11  ;;  %v7990_v33 = vld [vmem:[%s13552_s5 + $0x350] sm:$0xff] }
 0x705   : > { %5832 = vmatmul.mubr.f32.gmra.mxu1 %v7951_v46  ;;  %v5994_v42 = vpop.permute.xlu0 %5993  ;;  %v8036_v46 = vld [vmem:[%s13552_s5 + $0x448] sm:$0xff] }
 0x706   : > { %7971 = vmatprep.mubr.msk.f32.mxu1 %vm5083_vm9, %v7954_v49  ;;  %v6017_v50 = vsel %vm5997_vm10, %v5994_v42, %v5996_v13  ;;  %v8028_v13 = vld [vmem:[%s13552_s5 + $0x408] sm:$0xff]  ;;  %v7995_v42 = vld [vmem:[%s13552_s5 + $0x378] sm:$0xff] }
 0x707   : > { %6160 = vmatpush2.msra.mxu0 %v6017_v50  ;;  %v5984_v7 = vpop.permute.xlu1 %5983  ;;  %v6699_v49 = vld [vmem:[%s13554_s7 + $0x48] sm:$0xff]  ;;  %v8035_v50 = vld [vmem:[%s13552_s5 + $0x440] sm:$0xff] }
 0x708   : > { %6161 = vmatprep.subr.mxu0 %v5992_v9  ;;  %v6014_v39 = vsel %vm5997_vm10, %v5982_v3, %v5984_v7  ;;  %v7988_v9 = vld [vmem:[%s13552_s5 + $0x340] sm:$0xff]  ;;  %v6700_v3 = vld [vmem:[%s13554_s7 + $0x50] sm:$0xff] }
 0x709   : > { %5838 = vmatmul.mubr.f32.gmra.mxu1 %v7953_v60  ;;  %6162 = vmatpush2.msra.mxu0 %v6016_v30  ;;  %v6396_v28 = vpop.permute.xlu0 %6395  ;;  %v6698_v60 = vld [vmem:[%s13554_s7 + $0x40] sm:$0xff]  ;;  %v6697_v30 = vld [vmem:[%s13554_s7 + $0x38] sm:$0xff] }
 0x70a   : > { %7972 = vmatprep.mubr.msk.f32.mxu1 %vm5083_vm9, %v7956_v29  ;;  %v6419_v35 = vsel %vm6399_vm11, %v6396_v28, %v6398_v19  ;;  %6163 = vmatprep.subr.mxu0 %v5988_v63  ;;  %v6702_v19 = vld [vmem:[%s13554_s7 + $0x60] sm:$0xff]  ;;  %v7993_v63 = vld [vmem:[%s13552_s5 + $0x368] sm:$0xff]  ;;  %v7994_v29 = vld [vmem:[%s13552_s5 + $0x370] sm:$0xff] }
 0x70b   : > { %6164 = vmatpush2.msra.mxu0 %v6015_v45  ;;  %6562 = vmatpush2.msra.mxu1 %v6419_v35  ;;  %v6390_v56 = vpop.permute.xlu1 %6389  ;;  %v7997_v28 = vld [vmem:[%s13552_s5 + $0x388] sm:$0xff]  ;;  %v8037_v45 = vld [vmem:[%s13552_s5 + $0x450] sm:$0xff] }
 0x70c   : > { %6165 = vmatprep.subr.mxu0 %v5984_v7  ;;  %6563 = vmatprep.subr.mxu1 %v6394_v11  ;;  %v7992_v11 = vld [vmem:[%s13552_s5 + $0x360] sm:$0xff]  ;;  %v8038_v7 = vld [vmem:[%s13552_s5 + $0x458] sm:$0xff]  ;;  %v6696_v35 = vld [vmem:[%s13554_s7 + $0x30] sm:$0xff] }
 0x70d   : > { %5844 = vmatmul.mubr.f32.gmra.mxu1 %v7955_v58  ;;  %6166 = vmatpush2.msra.mxu0 %v6014_v39  ;;  %v6388_v22 = vpop.permute.xlu0 %6387  ;;  %v8040_v58 = vld [vmem:[%s13552_s5 + $0x468] sm:$0xff]  ;;  %v7999_v39 = vld [vmem:[%s13552_s5 + $0x398] sm:$0xff] }
 0x70e   : > { %7973 = vmatprep.mubr.msk.f32.mxu1 %vm5083_vm9, %v7958_v34  ;;  %6564 = vmatpush2.msra.mxu1 %v6418_v26  ;;  %v6417_v55 = vsel %vm6399_vm11, %v6388_v22, %v6390_v56  ;;  %v6695_v34 = vld [vmem:[%s13554_s7 + $0x28] sm:$0xff]  ;;  %v6694_v26 = vld [vmem:[%s13554_s7 + $0x20] sm:$0xff]  ;;  %v8042_v22 = vld [vmem:[%s13552_s5 + $0x478] sm:$0xff] }
 0x70f   : > { %6168 = vmatmul.mubr.f32.vlgmr.msra.gmra.mxu0 %v7974_v20  ;;  %6565 = vmatprep.subr.mxu1 %v6390_v56  ;;  %v6386_v5 = vpop.permute.xlu1 %6385  ;;  %v7996_v56 = vld [vmem:[%s13552_s5 + $0x380] sm:$0xff] }
 0x710   : > { %6566 = vmatpush2.msra.mxu1 %v6417_v55  ;;  %8005 = vmatprep.mubr.msk.f32.mxu0 %vm5083_vm9, %v7977_v47  ;;  %v8039_v20 = vld [vmem:[%s13552_s5 + $0x460] sm:$0xff]  ;;  %v7998_v47 = vld [vmem:[%s13552_s5 + $0x390] sm:$0xff]  ;;  %v6693_v55 = vld [vmem:[%s13554_s7 + $0x18] sm:$0xff] }
 0x711   : > { %5850 = vmatmul.mubr.f32.gmra.mxu1 %v7957_v57  ;;  %6567 = vmatprep.subr.mxu1 %v6386_v5  ;;  %v6384_v24 = vpop.permute.xlu0 %6383  ;;  %v8001_v57 = vld [vmem:[%s13552_s5 + $0x3a8] sm:$0xff] }
 0x712   : > { %v6416_v21 = vsel %vm6399_vm11, %v6384_v24, %v6386_v5  ;;  %8049 = vmatprep.mubr.msk.f32.mxu1 %vm5083_vm9, %v8020_v0  ;;  %6859 = vmatprep.subr.mxu0 %v13678_v8  ;;  %v8041_v5 = vld [vmem:[%s13552_s5 + $0x470] sm:$0xff]  ;;  %v8000_v24 = vld [vmem:[%s13552_s5 + $0x3a0] sm:$0xff] }
 0x713   : > { %6174 = vmatmul.mubr.f32.gmra.mxu0 %v7976_v61  ;;  %6568 = vmatpush2.msra.mxu1 %v6416_v21  ;;  %v6692_v0 = vld [vmem:[%s13554_s7 + $0x10] sm:$0xff]  ;;  %v8044_v61 = vld [vmem:[%s13552_s5 + $0x488] sm:$0xff]  ;;  %v8003_v21 = vld [vmem:[%s13552_s5 + $0x3b8] sm:$0xff] }
 0x714   : > { %8006 = vmatprep.mubr.msk.f32.mxu0 %vm5083_vm9, %v7979_v4  ;;  %6860 = vmatpush1.msra.mxu0 %v6705_v18  ;;  %v6691_v4 = vld [vmem:[%s13554_s7 + $0x8] sm:$0xff]  ;;  %v13142_v18 = vpop.f32.mrf.mxu0 }
 0x715   : > { %6570 = vmatmul.mubr.f32.vlgmr.msra.gmra.mxu1 %v8019_v14  ;;  %6861 = vmatprep.subr.mxu0 %v13678_v8  ;;  %v8043_v14 = vld [vmem:[%s13552_s5 + $0x480] sm:$0xff] }
 0x716   : > { %8050 = vmatprep.mubr.msk.f32.mxu1 %vm5083_vm9, %v8022_v16  ;;  %8137 = vmatprep.subr.mxu1 %v13678_v8  ;;  %v6690_v16 = vld [vmem:[%s13554_s7] sm:$0xff] }
 0x717   : > { %6180 = vmatmul.mubr.f32.gmra.mxu0 %v7978_v52  ;;  %v8046_v52 = vld [vmem:[%s13552_s5 + $0x498] sm:$0xff] }
 0x718   : > { %8007 = vmatprep.mubr.msk.f32.mxu0 %vm5083_vm9, %v7981_v41  ;;  %6862 = vmatpush1.msra.mxu0 %v6704_v23  ;;  %v8002_v41 = vld [vmem:[%s13552_s5 + $0x3b0] sm:$0xff]  ;;  %v6706_v23 = vld [vmem:[%s13554_s7 + $0x80] sm:$0xff] }
 0x719   : > { %6576 = vmatmul.mubr.f32.gmra.mxu1 %v8021_v62  ;;  %6863 = vmatprep.subr.mxu0 %v13678_v8  ;;  %v6718_v62 = vld [vmem:[%s13554_s7 + $0xe0] sm:$0x1] }
 0x71a   : > { %8051 = vmatprep.mubr.msk.f32.mxu1 %vm5083_vm9, %v8024_v40  ;;  %6864 = vmatpush1.msra.mxu0 %v6703_v32  ;;  %v8045_v40 = vld [vmem:[%s13552_s5 + $0x490] sm:$0xff] }
 0x71b   : > { %6186 = vmatmul.mubr.f32.gmra.mxu0 %v7980_v12  ;;  %6865 = vmatprep.subr.mxu0 %v13678_v8  ;;  %v6717_v12 = vld [vmem:[%s13554_s7 + $0xd8] sm:$0xff] }
 0x71c   : > { %8008 = vmatprep.mubr.msk.f32.mxu0 %vm5083_vm9, %v7983_v53  ;;  %6866 = vmatpush1.msra.mxu0 %v6702_v19  ;;  %v8048_v53 = vld [vmem:[%s13552_s5 + $0x4a8] sm:$0xff] }
 0x71d   : > { %6582 = vmatmul.mubr.f32.gmra.mxu1 %v8023_v37  ;;  %6867 = vmatprep.subr.mxu0 %v13678_v8  ;;  %v6716_v37 = vld [vmem:[%s13554_s7 + $0xd0] sm:$0xff] }
 0x71e   : > { %8052 = vmatprep.mubr.msk.f32.mxu1 %vm5083_vm9, %v8026_v43  ;;  %6868 = vmatpush1.msra.mxu0 %v6701_v6  ;;  %v8047_v43 = vld [vmem:[%s13552_s5 + $0x4a0] sm:$0xff] }
 0x71f   : > { %6192 = vmatmul.mubr.f32.gmra.mxu0 %v7982_v10  ;;  %6869 = vmatprep.subr.mxu0 %v13678_v8  ;;  %v6715_v10 = vld [vmem:[%s13554_s7 + $0xc8] sm:$0xff] }
 0x720   : > { %8009 = vmatprep.mubr.msk.f32.mxu0 %vm5083_vm9, %v7985_v44  ;;  %6870 = vmatpush1.msra.mxu0 %v6700_v3  ;;  %v6714_v44 = vld [vmem:[%s13554_s7 + $0xc0] sm:$0xff] }
 0x721   : > { %6588 = vmatmul.mubr.f32.gmra.mxu1 %v8025_v51  ;;  %6871 = vmatprep.subr.mxu0 %v13678_v8  ;;  %v6713_v51 = vld [vmem:[%s13554_s7 + $0xb8] sm:$0xff] }
 0x722   : > { %8053 = vmatprep.mubr.msk.f32.mxu1 %vm5083_vm9, %v8028_v13  ;;  %6872 = vmatpush1.msra.mxu0 %v6699_v49  ;;  %v6712_v13 = vld [vmem:[%s13554_s7 + $0xb0] sm:$0xff] }
 0x723   : > { %6198 = vmatmul.mubr.f32.gmra.mxu0 %v7984_v17  ;;  %6873 = vmatprep.subr.mxu0 %v13678_v8  ;;  %v6711_v17 = vld [vmem:[%s13554_s7 + $0xa8] sm:$0xff] }
 0x724   : > { %8010 = vmatprep.mubr.msk.f32.mxu0 %vm5083_vm9, %v7987_v31  ;;  %6874 = vmatpush1.msra.mxu0 %v6698_v60  ;;  %v6710_v31 = vld [vmem:[%s13554_s7 + $0xa0] sm:$0xff] }
 0x725   : > { %6594 = vmatmul.mubr.f32.gmra.mxu1 %v8027_v48  ;;  %6875 = vmatprep.subr.mxu0 %v13678_v8  ;;  %v6709_v48 = vld [vmem:[%s13554_s7 + $0x98] sm:$0xff] }
 0x726   : > { %8054 = vmatprep.mubr.msk.f32.mxu1 %vm5083_vm9, %v8030_v15  ;;  %6876 = vmatpush1.msra.mxu0 %v6697_v30  ;;  %v6708_v15 = vld [vmem:[%s13554_s7 + $0x90] sm:$0xff] }
 0x727   : > { %6204 = vmatmul.mubr.f32.gmra.mxu0 %v7986_v38  ;;  %6877 = vmatprep.subr.mxu0 %v13678_v8 }
 0x728   : > { %8011 = vmatprep.mubr.msk.f32.mxu0 %vm5083_vm9, %v7989_v59  ;;  %6878 = vmatpush1.msra.mxu0 %v6696_v35  ;;  %v6707_v59 = vld [vmem:[%s13554_s7 + $0x88] sm:$0xff] }
 0x729   : > { %6600 = vmatmul.mubr.f32.gmra.mxu1 %v8029_v1  ;;  %6879 = vmatprep.subr.mxu0 %v13678_v8 }
 0x72a   : > { %8055 = vmatprep.mubr.msk.f32.mxu1 %vm5083_vm9, %v8032_v27  ;;  %6880 = vmatpush1.msra.mxu0 %v6695_v34 }
 0x72b   : > { %6210 = vmatmul.mubr.f32.gmra.mxu0 %v7988_v9  ;;  %6881 = vmatprep.subr.mxu0 %v13678_v8  ;;  %v13156_v9 = vpop.f32.mrf.mxu0 }
 0x72c   : > { %8012 = vmatprep.mubr.msk.f32.mxu0 %vm5083_vm9, %v7991_v36  ;;  %6882 = vmatpush1.msra.mxu0 %v6694_v26 }
 0x72d   : > { %6606 = vmatmul.mubr.f32.gmra.mxu1 %v8031_v54  ;;  %6883 = vmatprep.subr.mxu0 %v13678_v8  ;;  %v13161_v36 = vpop.f32.mrf.mxu0 }
 0x72e   : > { %8056 = vmatprep.mubr.msk.f32.mxu1 %vm5083_vm9, %v8034_v2  ;;  %6884 = vmatpush1.msra.mxu0 %v6693_v55 }
 0x72f   : > { %6216 = vmatmul.mubr.f32.gmra.mxu0 %v7990_v33  ;;  %6885 = vmatprep.subr.mxu0 %v13678_v8  ;;  %v13167_v2 = vpop.f32.mrf.mxu0 }
 0x730   : > { %8013 = vmatprep.mubr.msk.f32.mxu0 %vm5083_vm9, %v7993_v63  ;;  %6886 = vmatpush1.msra.mxu0 %v6692_v0 }
 0x731   : > { %6612 = vmatmul.mubr.f32.gmra.mxu1 %v8033_v25  ;;  %6887 = vmatprep.subr.mxu0 %v13678_v8  ;;  %v13171_v6 = vpop.f32.mrf.mxu0 }
 0x732   : > { %8057 = vmatprep.mubr.msk.f32.mxu1 %vm5083_vm9, %v8036_v46  ;;  %6888 = vmatpush1.msra.mxu0 %v6691_v4 }
 0x733   : > { %6222 = vmatmul.mubr.f32.gmra.mxu0 %v7992_v11  ;;  %6889 = vmatprep.subr.mxu0 %v13678_v8  ;;  %v13177_v3 = vpop.f32.mrf.mxu0 }
 0x734   : > { %8014 = vmatprep.mubr.msk.f32.mxu0 %vm5083_vm9, %v7995_v42  ;;  %6890 = vmatpush1.msra.mxu0 %v6690_v16 }
 0x735   : > { %6618 = vmatmul.mubr.f32.gmra.mxu1 %v8035_v50  ;;  %6897 = vmatprep.subr.mxu0 %v13678_v8  ;;  %v13183_v49 = vpop.f32.mrf.mxu0 }
 0x736   : > { %8058 = vmatprep.mubr.msk.f32.mxu1 %vm5083_vm9, %v8038_v7  ;;  %8064 = vmatpush2.msk.msra.mxu0 %vm6855_vm12, %v6718_v62 }
 0x737   : > { %6228 = vmatmul.mubr.f32.gmra.mxu0 %v7994_v29  ;;  %6899 = vmatprep.subr.mxu0 %v13678_v8  ;;  %v13189_v60 = vpop.f32.mrf.mxu0 }
 0x738   : > { %8015 = vmatprep.mubr.msk.f32.mxu0 %vm5083_vm9, %v7997_v28  ;;  %6900 = vmatpush2.msra.mxu0 %v6717_v12 }
 0x739   : > { %6624 = vmatmul.mubr.f32.gmra.mxu1 %v8037_v45  ;;  %6901 = vmatprep.subr.mxu0 %v13678_v8  ;;  %v13193_v29 = vpop.f32.mrf.mxu0 }
 0x73a   : > { %8059 = vmatprep.mubr.msk.f32.mxu1 %vm5083_vm9, %v8040_v58  ;;  %6902 = vmatpush2.msra.mxu0 %v6716_v37 }
 0x73b   : > { %6234 = vmatmul.mubr.f32.gmra.mxu0 %v7996_v56  ;;  %6903 = vmatprep.subr.mxu0 %v13678_v8  ;;  %v13199_v45 = vpop.f32.mrf.mxu0 }
 0x73c   : > { %8016 = vmatprep.mubr.msk.f32.mxu0 %vm5083_vm9, %v7999_v39  ;;  %6904 = vmatpush2.msra.mxu0 %v6715_v10 }
 0x73d   : > { %6630 = vmatmul.mubr.f32.gmra.mxu1 %v8039_v20  ;;  %6905 = vmatprep.subr.mxu0 %v13678_v8  ;;  %v13205_v56 = vpop.f32.mrf.mxu0 }
 0x73e   : > { %8060 = vmatprep.mubr.msk.f32.mxu1 %vm5083_vm9, %v8042_v22  ;;  %6906 = vmatpush2.msra.mxu0 %v6714_v44 }
 0x73f   : > { %6240 = vmatmul.mubr.f32.gmra.mxu0 %v7998_v47  ;;  %6907 = vmatprep.subr.mxu0 %v13678_v8  ;;  %v13211_v20 = vpop.f32.mrf.mxu0 }
 0x740   : > { %8017 = vmatprep.mubr.msk.f32.mxu0 %vm5083_vm9, %v8001_v57  ;;  %6908 = vmatpush2.msra.mxu0 %v6713_v51 }
 0x741   : > { %6636 = vmatmul.mubr.f32.gmra.mxu1 %v8041_v5  ;;  %6909 = vmatprep.subr.mxu0 %v13678_v8  ;;  %v13217_v47 = vpop.f32.mrf.mxu0 }
 0x742   : > { %8061 = vmatprep.mubr.msk.f32.mxu1 %vm5083_vm9, %v8044_v61  ;;  %6910 = vmatpush2.msra.mxu0 %v6712_v13 }
 0x743   : > { %6246 = vmatmul.mubr.f32.gmra.mxu0 %v8000_v24  ;;  %6911 = vmatprep.subr.mxu0 %v13678_v8  ;;  %v13223_v5 = vpop.f32.mrf.mxu0 }
 0x744   : > { %8018 = vmatprep.mubr.msk.f32.mxu0 %vm5083_vm9, %v8003_v21  ;;  %6912 = vmatpush2.msra.mxu0 %v6711_v17 }
 0x745   : > { %6642 = vmatmul.mubr.f32.gmra.mxu1 %v8043_v14  ;;  %6913 = vmatprep.subr.mxu0 %v13678_v8  ;;  %v13229_v24 = vpop.f32.mrf.mxu0 }
 0x746   : > { %8062 = vmatprep.mubr.msk.f32.mxu1 %vm5083_vm9, %v8046_v52  ;;  %6914 = vmatpush2.msra.mxu0 %v6710_v31 }
 0x747   : > { %6252 = vmatmul.mubr.f32.gmra.mxu0 %v8002_v41  ;;  %6915 = vmatprep.subr.mxu0 %v13678_v8  ;;  %v13235_v14 = vpop.f32.mrf.mxu0 }
 0x748   : > { %6916 = vmatpush2.msra.mxu0 %v6709_v48 }
 0x749   : > { %6648 = vmatmul.mubr.f32.gmra.mxu1 %v8045_v40  ;;  %6917 = vmatprep.subr.mxu0 %v13678_v8  ;;  %v13241_v41 = vpop.f32.mrf.mxu0 }
 0x74a   : > { %8063 = vmatprep.mubr.msk.f32.mxu1 %vm5083_vm9, %v8048_v53  ;;  %6918 = vmatpush2.msra.mxu0 %v6708_v15  ;;  %14100 = vst [vmem:[#allocation54_spill] sm:$0xff] %v13241_v41 }
 0x74b   : > { %6919 = vmatprep.subr.mxu0 %v13678_v8  ;;  %v13243_v12 = vpop.f32.mrf.mxu0 }
 0x74c   : > { %6920 = vmatpush2.msra.mxu0 %v6707_v59  ;;  %14101 = vst [vmem:[#allocation18_spill] sm:$0xff] %v13243_v12 }
 0x74d   : > { %6654 = vmatmul.mubr.f32.gmra.mxu1 %v8047_v43  ;;  %6921 = vmatprep.subr.mxu0 %v13678_v8  ;;  %v13245_v43 = vpop.f32.mrf.mxu0 }
 0x74e   : > { %6922 = vmatpush2.msra.mxu0 %v6706_v23  ;;  %14102 = vst [vmem:[#allocation26_spill] sm:$0xff] %v13245_v43 }
 0x74f   : > { %v13251_v51 = vpop.f32.mrf.mxu0 }
 0x750   : > { %14103 = vst [vmem:[#allocation57_spill] sm:$0xff] %v13251_v51 }
 0x751   : > { %v13257_v31 = vpop.f32.mrf.mxu0 }
 0x752   : > { %14104 = vst [vmem:[#allocation56_spill] sm:$0xff] %v13257_v31 }
 0x753   : > { %v13263_v59 = vpop.f32.mrf.mxu0 }
 0x754   : > { %14105 = vst [vmem:[#allocation12_spill] sm:$0xff] %v13263_v59 }
 0x758   : > { %v13140_v38 = vpop.f32.mrf.mxu1 }
 0x75a   : > { %v13148_v1 = vpop.f32.mrf.mxu1 }
 0x75d   : > { %v13154_v27 = vpop.f32.mrf.mxu1 }
 0x75f   : > { %v13159_v32 = vpop.f32.mrf.mxu1 }
 0x762   : > { %v13163_v54 = vpop.f32.mrf.mxu1 }
 0x764   : > { %v13165_v19 = vpop.f32.mrf.mxu1 }
 0x767   : > { %v13169_v33 = vpop.f32.mrf.mxu1 }
 0x769   : > { %v13173_v63 = vpop.f32.mrf.mxu1 }
 0x76b   : > { %v13175_v25 = vpop.f32.mrf.mxu1 }
 0x76d   : > { %v13179_v46 = vpop.f32.mrf.mxu1 }
 0x770   : > { %v13181_v11 = vpop.f32.mrf.mxu1 }
 0x772   : > { %v13185_v42 = vpop.f32.mrf.mxu1 }
 0x774   : > { %v13187_v50 = vpop.f32.mrf.mxu1 }
 0x776   : > { %v13191_v7 = vpop.f32.mrf.mxu1 }
 0x779   : > { %v13195_v30 = vpop.f32.mrf.mxu1 }
 0x77b   : > { %v13197_v28 = vpop.f32.mrf.mxu1 }
 0x77d   : > { %v13201_v35 = vpop.f32.mrf.mxu1 }
 0x77e   : > { %14086 = vst [vmem:[#allocation42_spill] sm:$0xff] %v13201_v35 }
 0x77f   : > { %v13203_v58 = vpop.f32.mrf.mxu1 }
 0x780   : > { %14087 = vst [vmem:[#allocation22_spill] sm:$0xff] %v13203_v58 }
 0x781   : > { %v13207_v34 = vpop.f32.mrf.mxu1 }
 0x782   : > { %14088 = vst [vmem:[#allocation5_spill] sm:$0xff] %v13207_v34 }
 0x783   : > { %v13209_v39 = vpop.f32.mrf.mxu1 }
 0x784   : > { %14089 = vst [vmem:[#allocation24_spill] sm:$0xff] %v13209_v39 }
 0x785   : > { %v13213_v26 = vpop.f32.mrf.mxu1 }
 0x786   : > { %14090 = vst [vmem:[#allocation9_spill] sm:$0xff] %v13213_v26 }
 0x787   : > { %v13215_v22 = vpop.f32.mrf.mxu1 }
 0x788   : > { %14091 = vst [vmem:[#allocation28_spill] sm:$0xff] %v13215_v22 }
 0x789   : > { %v13219_v55 = vpop.f32.mrf.mxu1 }
 0x78a   : > { %14092 = vst [vmem:[#allocation13_spill] sm:$0xff] %v13219_v55 }
 0x78b   : > { %v13221_v57 = vpop.f32.mrf.mxu1 }
 0x78c   : > { %14093 = vst [vmem:[#allocation35_spill] sm:$0xff] %v13221_v57 }
 0x78d   : > { %v13225_v0 = vpop.f32.mrf.mxu1 }
 0x78e   : > { %14094 = vst [vmem:[#allocation53_spill] sm:$0xff] %v13225_v0 }
 0x78f   : > { %v13227_v61 = vpop.f32.mrf.mxu1 }
 0x790   : > { %14095 = vst [vmem:[#allocation33_spill] sm:$0xff] %v13227_v61 }
 0x791   : > { %v13231_v4 = vpop.f32.mrf.mxu1 }
 0x792   : > { %14096 = vst [vmem:[#allocation52_spill] sm:$0xff] %v13231_v4 }
 0x793   : > { %v13233_v21 = vpop.f32.mrf.mxu1 }
 0x794   : > { %14097 = vst [vmem:[#allocation37_spill] sm:$0xff] %v13233_v21 }
 0x795   : > { %v13237_v16 = vpop.f32.mrf.mxu1 }
 0x796   : > { %14098 = vst [vmem:[#allocation14_spill] sm:$0xff] %v13237_v16  ;;  %v13269_v16 = vpop.f32.mrf.mxu0 }
 0x797   : > { %v13239_v52 = vpop.f32.mrf.mxu1  ;;  %14106 = vst [vmem:[#allocation58_spill] sm:$0xff] %v13269_v16 }
 0x798   : > { %14099 = vst [vmem:[#allocation55_spill] sm:$0xff] %v13239_v52  ;;  %v13275_v21 = vpop.f32.mrf.mxu0 }
 0x799   : > { %v5767_v62 = vpop.f32.mrf.mxu1  ;;  %14107 = vst [vmem:[#allocation6_spill] sm:$0xff] %v13275_v21 }
 0x79a   : > { %v13281_v55 = vpop.f32.mrf.mxu0 }
 0x79b   : > { %v5769_v40 = vpop.f32.mrf.mxu1  ;;  %14108 = vst [vmem:[#allocation4_spill] sm:$0xff] %v13281_v55 }
 0x79c   : > { %v13287_v26 = vpop.f32.mrf.mxu0 }
 0x79d   : > { %v5773_v53 = vpop.f32.mrf.mxu1  ;;  %14111 = vst [vmem:[#allocation10_spill] sm:$0xff] %v13287_v26 }
 0x79e   : > { %v13293_v22 = vpop.f32.mrf.mxu0 }
 0x79f   : > { %v5775_v37 = vpop.f32.mrf.mxu1  ;;  %14114 = vst [vmem:[#allocation31_spill] sm:$0xff] %v13293_v22 }
 0x7a0   : > { %v13299_v34 = vpop.f32.mrf.mxu0 }
 0x7a1   : > { %v13247_v10 = vpop.f32.mrf.mxu1  ;;  %14117 = vst [vmem:[#allocation3_spill] sm:$0xff] %v13299_v34 }
 0x7a2   : > { %v13305_v39 = vpop.f32.mrf.mxu0 }
 0x7a3   : > { %v13249_v44 = vpop.f32.mrf.mxu1  ;;  %14120 = vst [vmem:[#allocation25_spill] sm:$0xff] %v13305_v39  ;;  %v5396_v39 = vadd.f32 %v13142_v18, %v13140_v38 }
 0x7a5   : > { %v13253_v13 = vpop.f32.mrf.mxu1 }
 0x7a7   : > { %v13255_v17 = vpop.f32.mrf.mxu1 }
 0x7a9   : > { %v13259_v48 = vpop.f32.mrf.mxu1 }
 0x7ab   : > { %v13261_v15 = vpop.f32.mrf.mxu1 }
 0x7ad   : > { %v13265_v23 = vpop.f32.mrf.mxu1 }
 0x7af   : > { %v13267_v8 = vpop.f32.mrf.mxu1 }
 0x7b1   : > { %v13271_v52 = vpop.f32.mrf.mxu1 }
 0x7b3   : > { %v13273_v4 = vpop.f32.mrf.mxu1 }
 0x7b5   : > { %v13277_v0 = vpop.f32.mrf.mxu1 }
 0x7b7   : > { %v13279_v61 = vpop.f32.mrf.mxu1 }
 0x7b9   : > { %v13283_v57 = vpop.f32.mrf.mxu1 }
 0x7ba   : > { %14109 = vst [vmem:[#allocation20_spill] sm:$0xff] %v13283_v57 }
 0x7bb   : > { %v13285_v31 = vpop.f32.mrf.mxu1 }
 0x7bc   : > { %14110 = vst [vmem:[#allocation48_spill] sm:$0xff] %v13285_v31  ;;  %v5856_v31 = vadd.f32 %v5767_v62, %v5396_v39  ;;  %v5410_v39 = vadd.f32 %v13177_v3, %v13165_v19  ;;  %v5416_v19 = vadd.f32 %v13189_v60, %v13173_v63  ;;  %v5422_v63 = vadd.f32 %v13199_v45, %v13179_v46 }
 0x7bd   : > { %v13289_v59 = vpop.f32.mrf.mxu1  ;;  %v5428_v46 = vadd.f32 %v13211_v20, %v13185_v42  ;;  %v5434_v42 = vadd.f32 %v13223_v5, %v13191_v7  ;;  %v5440_v7 = vadd.f32 %v13235_v14, %v13197_v28  ;;  %v14129_v28 = vld [vmem:[#allocation18_spill] sm:$0xff] }
 0x7be   : > { %14112 = vst [vmem:[#allocation46_spill] sm:$0xff] %v13289_v59  ;;  %v13311_v59 = vpop.f32.mrf.mxu0 }
 0x7bf   : > { %v13291_v16 = vpop.f32.mrf.mxu1  ;;  %14123 = vst [vmem:[#allocation39_spill] sm:$0xff] %v13311_v59 }
 0x7c0   : > { %14113 = vst [vmem:[#allocation16_spill] sm:$0xff] %v13291_v16 }
 0x7c1   : > { %v13295_v43 = vpop.f32.mrf.mxu1 }
 0x7c2   : > { %14115 = vst [vmem:[#allocation43_spill] sm:$0xff] %v13295_v43 }
 0x7c3   : > { %v13297_v21 = vpop.f32.mrf.mxu1 }
 0x7c4   : > { %14116 = vst [vmem:[#allocation51_spill] sm:$0xff] %v13297_v21 }
 0x7c5   : > { %v13301_v51 = vpop.f32.mrf.mxu1 }
 0x7c6   : > { %14118 = vst [vmem:[#allocation38_spill] sm:$0xff] %v13301_v51  ;;  %v5398_v51 = vadd.f32 %v13156_v9, %v13148_v1 }
 0x7c7   : > { %v13303_v55 = vpop.f32.mrf.mxu1 }
 0x7c8   : > { %14119 = vst [vmem:[#allocation17_spill] sm:$0xff] %v13303_v55 }
 0x7c9   : > { %v13307_v57 = vpop.f32.mrf.mxu1 }
 0x7ca   : > { %14121 = vst [vmem:[#allocation8_spill] sm:$0xff] %v13307_v57 }
 0x7cb   : > { %v13309_v26 = vpop.f32.mrf.mxu1 }
 0x7cc   : > { %14122 = vst [vmem:[#allocation23_spill] sm:$0xff] %v13309_v26  ;;  %v5857_v26 = vadd.f32 %v5769_v40, %v5398_v51  ;;  %v5865_v51 = vadd.f32 %v13261_v15, %v5422_v63  ;;  %v5867_v15 = vadd.f32 %v13267_v8, %v5428_v46  ;;  %v5869_v8 = vadd.f32 %v13273_v4, %v5434_v42  ;;  %v14138_v46 = vld [vmem:[#allocation16_spill] sm:$0xff]  ;;  %v14142_v42 = vld [vmem:[#allocation9_spill] sm:$0xff] }
 0x7cd   : > { %v13313_v16 = vpop.f32.mrf.mxu1  ;;  %v5871_v4 = vadd.f32 %v13279_v61, %v5440_v7  ;;  %v14132_v61 = vld [vmem:[#allocation48_spill] sm:$0xff] }
 0x7ce   : > { %14124 = vst [vmem:[#allocation30_spill] sm:$0xff] %v13313_v16  ;;  %v5404_v16 = vadd.f32 %v13167_v2, %v13159_v32  ;;  %v5408_v32 = vadd.f32 %v13171_v6, %v13163_v54  ;;  %v5414_v54 = vadd.f32 %v13183_v49, %v13169_v33  ;;  %v5420_v33 = vadd.f32 %v13193_v29, %v13175_v25 }
 0x7cf   : > { %v13315_v22 = vpop.f32.mrf.mxu1  ;;  %v6169_v43 = vpop.f32.mrf.mxu0  ;;  %v5426_v25 = vadd.f32 %v13205_v56, %v13181_v11  ;;  %v5432_v11 = vadd.f32 %v13217_v47, %v13187_v50  ;;  %v5438_v50 = vadd.f32 %v13229_v24, %v13195_v30  ;;  %v14131_v30 = vld [vmem:[#allocation54_spill] sm:$0xff] }
 0x7d0   : > { %14125 = vst [vmem:[#allocation32_spill] sm:$0xff] %v13315_v22  ;;  %v6258_v35 = vadd.f32 %v6169_v43, %v5856_v31  ;;  %v5859_v9 = vadd.f32 %v5775_v37, %v5404_v16  ;;  %v5862_v37 = vadd.f32 %v13253_v13, %v5414_v54  ;;  %v5864_v13 = vadd.f32 %v13259_v48, %v5420_v33  ;;  %v14128_v54 = vld [vmem:[#allocation22_spill] sm:$0xff]  ;;  %v14134_v33 = vld [vmem:[#allocation24_spill] sm:$0xff] }
 0x7d1   : > { %v13317_v21 = vpop.f32.mrf.mxu1  ;;  %v6171_v34 = vpop.f32.mrf.mxu0  ;;  %v5866_v48 = vadd.f32 %v13265_v23, %v5426_v25  ;;  %v5868_v23 = vadd.f32 %v13271_v52, %v5432_v11  ;;  %v5870_v52 = vadd.f32 %v13277_v0, %v5438_v50  ;;  %v5446_v14 = vadd.f32 %v14129_v28, %v14128_v54  ;;  %v14133_v0 = vld [vmem:[#allocation20_spill] sm:$0xff]  ;;  %v14146_v50 = vld [vmem:[#allocation35_spill] sm:$0xff]  ;;  %v14150_v54 = vld [vmem:[#allocation17_spill] sm:$0xff] }
 0x7d2   : > { %14126 = vst [vmem:[#allocation15_spill] sm:$0xff] %v13317_v21  ;;  %v6259_v22 = vadd.f32 %v6171_v34, %v5857_v26  ;;  %v5402_v21 = vadd.f32 %v13161_v36, %v13154_v27  ;;  %v5861_v34 = vadd.f32 %v13249_v44, %v5410_v39 }
 0x7d3   : > { %v13323_v55 = vpop.f32.mrf.mxu1  ;;  %v6175_v57 = vpop.f32.mrf.mxu0 }
 0x7d4   : > { %14127 = vst [vmem:[#allocation50_spill] sm:$0xff] %v13323_v55  ;;  %v5858_v18 = vadd.f32 %v5773_v53, %v5402_v21 }
 0x7d5   : > { %v6177_v59 = vpop.f32.mrf.mxu0  ;;  %v6571_v41 = vpop.f32.mrf.mxu1 }
 0x7d6   : > { %v6660_v55 = vadd.f32 %v6571_v41, %v6258_v35  ;;  %v6261_v62 = vadd.f32 %v6177_v59, %v5859_v9  ;;  %v6260_v27 = vadd.f32 %v6175_v57, %v5858_v18  ;;  %v5860_v35 = vadd.f32 %v13247_v10, %v5408_v32 }
 0x7d7   : > { %v6181_v12 = vpop.f32.mrf.mxu0  ;;  %v6573_v1 = vpop.f32.mrf.mxu1  ;;  %v5863_v41 = vadd.f32 %v13255_v17, %v5416_v19 }
 0x7d8   : > { %v6661_v38 = vadd.f32 %v6573_v1, %v6259_v22  ;;  %v6262_v6 = vadd.f32 %v6181_v12, %v5860_v35 }
 0x7d9   : > { %v6183_v58 = vpop.f32.mrf.mxu0  ;;  %v6577_v40 = vpop.f32.mrf.mxu1 }
 0x7da   : > { %8065 = vmatprep.mubr.msk.f32.mxu0 %vm6809_vm13, %v6661_v38  ;;  %v6662_v22 = vadd.f32 %v6577_v40, %v6260_v27  ;;  %v6263_v3 = vadd.f32 %v6183_v58, %v5861_v34 }
 0x7db   : > { %v6187_v36 = vpop.f32.mrf.mxu0  ;;  %v6579_v2 = vpop.f32.mrf.mxu1  ;;  %6924 = vmatmul.mubr.f32.vlgmr.msra.gmra.mxu0 %v6660_v55 }
 0x7dc   : > { %v6663_v26 = vadd.f32 %v6579_v2, %v6261_v62  ;;  %v6264_v49 = vadd.f32 %v6187_v36, %v5862_v37  ;;  %v5873_v37 = vadd.f32 %v14132_v61, %v5446_v14 }
 0x7dd   : > { %v6189_v21 = vpop.f32.mrf.mxu0  ;;  %v6583_v16 = vpop.f32.mrf.mxu1 }
 0x7de   : > { %8066 = vmatprep.mubr.msk.f32.mxu0 %vm6809_vm13, %v6663_v26  ;;  %v6664_v43 = vadd.f32 %v6583_v16, %v6262_v6  ;;  %v6265_v60 = vadd.f32 %v6189_v21, %v5863_v41 }
 0x7df   : > { %v6193_v57 = vpop.f32.mrf.mxu0  ;;  %v6585_v55 = vpop.f32.mrf.mxu1  ;;  %6929 = vmatmul.mubr.f32.gmra.mxu0 %v6662_v22 }
 0x7e0   : > { %v6665_v53 = vadd.f32 %v6585_v55, %v6263_v3  ;;  %v6266_v29 = vadd.f32 %v6193_v57, %v5864_v13  ;;  %v14130_v57 = vld [vmem:[#allocation42_spill] sm:$0xff] }
 0x7e1   : > { %v6195_v10 = vpop.f32.mrf.mxu0  ;;  %v6589_v44 = vpop.f32.mrf.mxu1  ;;  %v5444_v24 = vadd.f32 %v14131_v30, %v14130_v57 }
 0x7e2   : > { %8067 = vmatprep.mubr.msk.f32.mxu0 %vm6809_vm13, %v6665_v53  ;;  %v6666_v31 = vadd.f32 %v6589_v44, %v6264_v49  ;;  %v6267_v45 = vadd.f32 %v6195_v10, %v5865_v51  ;;  %v14135_v49 = vld [vmem:[#allocation57_spill] sm:$0xff] }
 0x7e3   : > { %v6199_v58 = vpop.f32.mrf.mxu0  ;;  %v6591_v12 = vpop.f32.mrf.mxu1  ;;  %6934 = vmatmul.mubr.f32.gmra.mxu0 %v6664_v43  ;;  %v5872_v10 = vadd.f32 %v14133_v0, %v5444_v24  ;;  %v14136_v51 = vld [vmem:[#allocation5_spill] sm:$0xff]  ;;  %v14155_v0 = vld [vmem:[#allocation4_spill] sm:$0xff] }
 0x7e4   : > { %v6667_v17 = vadd.f32 %v6591_v12, %v6265_v60  ;;  %v6268_v56 = vadd.f32 %v6199_v58, %v5866_v48  ;;  %v5452_v58 = vadd.f32 %v14135_v49, %v14134_v33  ;;  %v14140_v48 = vld [vmem:[#allocation28_spill] sm:$0xff]  ;;  %v14156_v33 = vld [vmem:[#allocation23_spill] sm:$0xff] }
 0x7e5   : > { %v6201_v59 = vpop.f32.mrf.mxu0  ;;  %v6595_v1 = vpop.f32.mrf.mxu1 }
 0x7e6   : > { %8068 = vmatprep.mubr.msk.f32.mxu0 %vm6809_vm13, %v6667_v17  ;;  %v6668_v40 = vadd.f32 %v6595_v1, %v6266_v29  ;;  %v6269_v20 = vadd.f32 %v6201_v59, %v5867_v15  ;;  %v14137_v17 = vld [vmem:[#allocation26_spill] sm:$0xff] }
 0x7e7   : > { %v6205_v9 = vpop.f32.mrf.mxu0  ;;  %v6597_v38 = vpop.f32.mrf.mxu1  ;;  %6939 = vmatmul.mubr.f32.gmra.mxu0 %v6666_v31  ;;  %v5450_v13 = vadd.f32 %v14137_v17, %v14136_v51  ;;  %v14139_v29 = vld [vmem:[#allocation46_spill] sm:$0xff] }
 0x7e8   : > { %v6669_v18 = vadd.f32 %v6597_v38, %v6267_v45  ;;  %v6270_v47 = vadd.f32 %v6205_v9, %v5868_v23  ;;  %v5875_v45 = vadd.f32 %v14138_v46, %v5452_v58 }
 0x7e9   : > { %v6207_v39 = vpop.f32.mrf.mxu0  ;;  %v6601_v62 = vpop.f32.mrf.mxu1  ;;  %v5874_v9 = vadd.f32 %v14139_v29, %v5450_v13  ;;  %v14161_v29 = vld [vmem:[#allocation31_spill] sm:$0xff] }
 0x7ea   : > { %8069 = vmatprep.mubr.msk.f32.mxu0 %vm6809_vm13, %v6669_v18  ;;  %v6670_v2 = vadd.f32 %v6601_v62, %v6268_v56  ;;  %v6271_v5 = vadd.f32 %v6207_v39, %v5869_v8  ;;  %v14144_v8 = vld [vmem:[#allocation51_spill] sm:$0xff] }
 0x7eb   : > { %v6211_v32 = vpop.f32.mrf.mxu0  ;;  %v6603_v27 = vpop.f32.mrf.mxu1  ;;  %6944 = vmatmul.mubr.f32.gmra.mxu0 %v6668_v40  ;;  %v14141_v40 = vld [vmem:[#allocation12_spill] sm:$0xff] }
 0x7ec   : > { %v6671_v36 = vadd.f32 %v6603_v27, %v6269_v20  ;;  %v6272_v55 = vadd.f32 %v6211_v32, %v5870_v52  ;;  %v5458_v39 = vadd.f32 %v14141_v40, %v14140_v48  ;;  %v14143_v20 = vld [vmem:[#allocation56_spill] sm:$0xff] }
 0x7ed   : > { %v6213_v34 = vpop.f32.mrf.mxu0  ;;  %v6607_v26 = vpop.f32.mrf.mxu1  ;;  %v5456_v11 = vadd.f32 %v14143_v20, %v14142_v42  ;;  %v14162_v48 = vld [vmem:[#allocation32_spill] sm:$0xff] }
 0x7ee   : > { %8070 = vmatprep.mubr.msk.f32.mxu0 %vm6809_vm13, %v6671_v36  ;;  %v6672_v16 = vadd.f32 %v6607_v26, %v6270_v47  ;;  %v6273_v6 = vadd.f32 %v6213_v34, %v5871_v4  ;;  %v5877_v36 = vadd.f32 %v14144_v8, %v5458_v39  ;;  %v14147_v47 = vld [vmem:[#allocation6_spill] sm:$0xff]  ;;  %v14148_v4 = vld [vmem:[#allocation13_spill] sm:$0xff] }
 0x7ef   : > { %v6217_v35 = vpop.f32.mrf.mxu0  ;;  %v6609_v22 = vpop.f32.mrf.mxu1  ;;  %6949 = vmatmul.mubr.f32.gmra.mxu0 %v6670_v2  ;;  %v14145_v2 = vld [vmem:[#allocation43_spill] sm:$0xff] }
 0x7f0   : > { %v6673_v21 = vadd.f32 %v6609_v22, %v6271_v5  ;;  %v6274_v31 = vadd.f32 %v6217_v35, %v5872_v10  ;;  %v5876_v34 = vadd.f32 %v14145_v2, %v5456_v11  ;;  %v5464_v35 = vadd.f32 %v14147_v47, %v14146_v50 }
 0x7f1   : > { %v6219_v19 = vpop.f32.mrf.mxu0  ;;  %v6613_v3 = vpop.f32.mrf.mxu1 }
 0x7f2   : > { %8071 = vmatprep.mubr.msk.f32.mxu0 %vm6809_vm13, %v6673_v21  ;;  %v6674_v44 = vadd.f32 %v6613_v3, %v6272_v55  ;;  %v6275_v12 = vadd.f32 %v6219_v19, %v5873_v37  ;;  %v14149_v21 = vld [vmem:[#allocation58_spill] sm:$0xff]  ;;  %v5879_v28 = vadd.f32 %v14150_v54, %v5464_v35  ;;  %v14169_v35 = vld [vmem:[#allocation15_spill] sm:$0xff] }
 0x7f3   : > { %v6223_v41 = vpop.f32.mrf.mxu0  ;;  %v6615_v53 = vpop.f32.mrf.mxu1  ;;  %6954 = vmatmul.mubr.f32.gmra.mxu0 %v6672_v16  ;;  %v5462_v52 = vadd.f32 %v14149_v21, %v14148_v4 }
 0x7f4   : > { %v6675_v43 = vadd.f32 %v6615_v53, %v6273_v6  ;;  %v6276_v56 = vadd.f32 %v6223_v41, %v5874_v9  ;;  %v14151_v6 = vld [vmem:[#allocation38_spill] sm:$0xff]  ;;  %v14152_v41 = vld [vmem:[#allocation33_spill] sm:$0xff] }
 0x7f5   : > { %v6225_v63 = vpop.f32.mrf.mxu0  ;;  %v6619_v60 = vpop.f32.mrf.mxu1  ;;  %v5878_v57 = vadd.f32 %v14151_v6, %v5462_v52  ;;  %v14153_v53 = vld [vmem:[#allocation10_spill] sm:$0xff] }
 0x7f6   : > { %8072 = vmatprep.mubr.msk.f32.mxu0 %vm6809_vm13, %v6675_v43  ;;  %v6676_v38 = vadd.f32 %v6619_v60, %v6274_v31  ;;  %v6277_v62 = vadd.f32 %v6225_v63, %v5875_v45  ;;  %v5470_v61 = vadd.f32 %v14153_v53, %v14152_v41  ;;  %v14154_v43 = vld [vmem:[#allocation53_spill] sm:$0xff] }
 0x7f7   : > { %v6229_v59 = vpop.f32.mrf.mxu0  ;;  %v6621_v1 = vpop.f32.mrf.mxu1  ;;  %6959 = vmatmul.mubr.f32.gmra.mxu0 %v6674_v44  ;;  %v5468_v10 = vadd.f32 %v14155_v0, %v14154_v43 }
 0x7f8   : > { %v6677_v25 = vadd.f32 %v6621_v1, %v6275_v12  ;;  %v6278_v16 = vadd.f32 %v6229_v59, %v5876_v34  ;;  %v5881_v49 = vadd.f32 %v14156_v33, %v5470_v61  ;;  %v14157_v12 = vld [vmem:[#allocation8_spill] sm:$0xff]  ;;  %v14158_v59 = vld [vmem:[#allocation37_spill] sm:$0xff]  ;;  %v14159_v1 = vld [vmem:[#allocation3_spill] sm:$0xff] }
 0x7f9   : > { %v6231_v15 = vpop.f32.mrf.mxu0  ;;  %v6625_v18 = vpop.f32.mrf.mxu1  ;;  %v5880_v51 = vadd.f32 %v14157_v12, %v5468_v10  ;;  %v5476_v46 = vadd.f32 %v14159_v1, %v14158_v59 }
 0x7fa   : > { %8073 = vmatprep.mubr.msk.f32.mxu0 %vm6809_vm13, %v6677_v25  ;;  %v6678_v26 = vadd.f32 %v6625_v18, %v6276_v56  ;;  %v6279_v22 = vadd.f32 %v6231_v15, %v5877_v36  ;;  %v14160_v25 = vld [vmem:[#allocation52_spill] sm:$0xff]  ;;  %v14164_v56 = vld [vmem:[#allocation55_spill] sm:$0xff]  ;;  %v14166_v36 = vld [vmem:[#allocation14_spill] sm:$0xff] }
 0x7fb   : > { %v6235_v32 = vpop.f32.mrf.mxu0  ;;  %v6627_v27 = vpop.f32.mrf.mxu1  ;;  %6964 = vmatmul.mubr.f32.gmra.mxu0 %v6676_v38  ;;  %v5474_v9 = vadd.f32 %v14161_v29, %v14160_v25  ;;  %v5883_v40 = vadd.f32 %v14162_v48, %v5476_v46 }
 0x7fc   : > { %v6679_v23 = vadd.f32 %v6627_v27, %v6277_v62  ;;  %v6280_v44 = vadd.f32 %v6235_v32, %v5878_v57  ;;  %v14163_v62 = vld [vmem:[#allocation30_spill] sm:$0xff]  ;;  %v14165_v32 = vld [vmem:[#allocation39_spill] sm:$0xff] }
 0x7fd   : > { %v6237_v7 = vpop.f32.mrf.mxu0  ;;  %v6631_v5 = vpop.f32.mrf.mxu1  ;;  %v5882_v42 = vadd.f32 %v14163_v62, %v5474_v9  ;;  %v5482_v27 = vadd.f32 %v14165_v32, %v14164_v56 }
 0x7fe   : > { %8074 = vmatprep.mubr.msk.f32.mxu0 %vm6809_vm13, %v6679_v23  ;;  %v6680_v30 = vadd.f32 %v6631_v5, %v6278_v16  ;;  %v6281_v37 = vadd.f32 %v6237_v7, %v5879_v28  ;;  %v14167_v23 = vld [vmem:[#allocation25_spill] sm:$0xff]  ;;  %v14168_v5 = vld [vmem:[#allocation50_spill] sm:$0xff]  ;;  %v14170_v28 = vmov 0.0  }
 0x7ff   : > { %v6241_v19 = vpop.f32.mrf.mxu0  ;;  %v6633_v3 = vpop.f32.mrf.mxu1  ;;  %6969 = vmatmul.mubr.f32.gmra.mxu0 %v6678_v26  ;;  %v5480_v2 = vadd.f32 %v14167_v23, %v14166_v36  ;;  %v5885_v50 = vadd.f32 %v14168_v5, %v5482_v27  ;;  %8167 = vmatprep.mubr.msk.f32.mxu1 %vm8521_vm14, %v14170_v28 }
 0x800   : > { %v6681_v14 = vadd.f32 %v6633_v3, %v6279_v22  ;;  %v6282_v38 = vadd.f32 %v6241_v19, %v5880_v51  ;;  %v6807_v51 = vpop.permute.xlu0 %6806 }
 0x801   : > { %v6243_v24 = vpop.f32.mrf.mxu0  ;;  %v6637_v55 = vpop.f32.mrf.mxu1  ;;  %v5884_v22 = vadd.f32 %v14169_v35, %v5480_v2 }
 0x802   : > { %8075 = vmatprep.mubr.msk.f32.mxu0 %vm6809_vm13, %v6681_v14  ;;  %v6682_v17 = vadd.f32 %v6637_v55, %v6280_v44  ;;  %v6283_v45 = vadd.f32 %v6243_v24, %v5881_v49 }
 0x803   : > { %v6247_v63 = vpop.f32.mrf.mxu0  ;;  %v6639_v60 = vpop.f32.mrf.mxu1  ;;  %6974 = vmatmul.mubr.f32.gmra.mxu0 %v6680_v30 }
 0x804   : > { %v6683_v58 = vadd.f32 %v6639_v60, %v6281_v37  ;;  %v6284_v34 = vadd.f32 %v6247_v63, %v5882_v42  ;;  %v6797_v1 = vpop.permute.xlu0 %6796 }
 0x805   : > { %v6249_v13 = vpop.f32.mrf.mxu0  ;;  %v6643_v31 = vpop.f32.mrf.mxu1 }
 0x806   : > { %8076 = vmatprep.mubr.msk.f32.mxu0 %vm6809_vm13, %v6683_v58  ;;  %v6684_v20 = vadd.f32 %v6643_v31, %v6282_v38  ;;  %v6285_v8 = vadd.f32 %v6249_v13, %v5883_v40  ;;  %v6802_v31 = vpop.permute.xlu1 %6801 }
 0x807   : > { %v6253_v15 = vpop.f32.mrf.mxu0  ;;  %v6645_v18 = vpop.f32.mrf.mxu1  ;;  %6979 = vmatmul.mubr.f32.gmra.mxu0 %v6682_v17 }
 0x808   : > { %v6685_v39 = vadd.f32 %v6645_v18, %v6283_v45  ;;  %v6286_v16 = vadd.f32 %v6253_v15, %v5884_v22  ;;  %v6787_v9 = vpop.permute.xlu0 %6786 }
 0x809   : > { %v6649_v11 = vpop.f32.mrf.mxu1  ;;  %v6255_v26 = vpop.f32.mrf.mxu0 }
 0x80a   : > { %8077 = vmatprep.mubr.msk.f32.mxu0 %vm6809_vm13, %v6685_v39  ;;  %v6686_v4 = vadd.f32 %v6649_v11, %v6284_v34  ;;  %v6287_v52 = vadd.f32 %v6255_v26, %v5885_v50  ;;  %v6792_v25 = vpop.permute.xlu1 %6791 }
 0x80b   : > { %v6651_v7 = vpop.f32.mrf.mxu1  ;;  %6984 = vmatmul.mubr.f32.gmra.mxu0 %v6684_v20 }
 0x80c   : > { %v6687_v47 = vadd.f32 %v6651_v7, %v6285_v8  ;;  %v6777_v62 = vpop.permute.xlu0 %6776 }
 0x80d   : > { %v6655_v21 = vpop.f32.mrf.mxu1 }
 0x80e   : > { %8078 = vmatprep.mubr.msk.f32.mxu0 %vm6809_vm13, %v6687_v47  ;;  %v6688_v54 = vadd.f32 %v6655_v21, %v6286_v16  ;;  %v6782_v18 = vpop.permute.xlu1 %6781 }
 0x80f   : > { %v6657_v19 = vpop.f32.mrf.mxu1  ;;  %6989 = vmatmul.mubr.f32.gmra.mxu0 %v6686_v4 }
 0x810   : > { %v6689_v3 = vadd.f32 %v6657_v19, %v6287_v52  ;;  %v6767_v23 = vpop.permute.xlu0 %6766 }
 0x812   : > { %8079 = vmatprep.mubr.msk.f32.mxu0 %vm6809_vm13, %v6689_v3  ;;  %v6772_v27 = vpop.permute.xlu1 %6771 }
 0x813   : > { %6994 = vmatmul.mubr.f32.gmra.mxu0 %v6688_v54 }
 0x814   : > { %v6757_v35 = vpop.permute.xlu0 %6756 }
 0x816   : > { %v6762_v5 = vpop.permute.xlu1 %6761 }
 0x818   : > { %v6747_v54 = vpop.permute.xlu0 %6746 }
 0x81a   : > { %v6752_v16 = vpop.permute.xlu1 %6751 }
 0x89b   : > { %v13424_v14 = vpop.f32.mrf.mxu0 }
 0x89d   : > { %v6927_v6 = vpop.f32.mrf.mxu0 }
 0x89f   : > { %v13426_v57 = vpop.f32.mrf.mxu0 }
 0x8a1   : > { %v6932_v30 = vpop.f32.mrf.mxu0 }
 0x8a3   : > { %v13428_v24 = vpop.f32.mrf.mxu0 }
 0x8a5   : > { %v6937_v55 = vpop.f32.mrf.mxu0 }
 0x8a6   : > { %v6936_v55 = vadd.f32 %v13428_v24, %v6747_v54 }
 0x8a7   : > { %v13430_v41 = vpop.f32.mrf.mxu0 }
 0x8a8   : > { %v6941_v6 = vadd.f32 %v13430_v41, %v6752_v16 }
 0x8a9   : > { %v6942_v53 = vpop.f32.mrf.mxu0 }
 0x8ab   : > { %v13432_v61 = vpop.f32.mrf.mxu0 }
 0x8ac   : > { %v6946_v19 = vadd.f32 %v13432_v61, %v6757_v35 }
 0x8ad   : > { %v6947_v37 = vpop.f32.mrf.mxu0 }
 0x8ae   : > { %v7003_v53 = vmax.f32 %v6946_v19, 0.0  ;;  %v6742_v37 = vpop.permute.xlu1 %6741 }
 0x8af   : > { %v6950_v43 = vpop.f32.mrf.mxu0  ;;  %v6931_v61 = vadd.f32 %v13426_v57, %v6742_v37  ;;  %v7014_v57 = vld [vmem:[%s13555_s8] sm:$0xff] }
 0x8b0   : > { %v6951_v21 = vadd.f32 %v6950_v43, %v6762_v5  ;;  %v7002_v43 = vmax.f32 %v6941_v6, 0.0 }
 0x8b1   : > { %v6952_v0 = vpop.f32.mrf.mxu0 }
 0x8b2   : > { %v7004_v30 = vmax.f32 %v6951_v21, 0.0  ;;  %v6737_v0 = vpop.permute.xlu0 %6736 }
 0x8b3   : > { %v6955_v10 = vpop.f32.mrf.mxu0  ;;  %v6926_v41 = vadd.f32 %v13424_v14, %v6737_v0  ;;  %v7015_v14 = vld [vmem:[%s13555_s8 + $0x8] sm:$0xff] }
 0x8b4   : > { %v6956_v22 = vadd.f32 %v6955_v10, %v6767_v23  ;;  %v7001_v10 = vmax.f32 %v6936_v55, 0.0 }
 0x8b5   : > { %v6957_v44 = vpop.f32.mrf.mxu0  ;;  %v6999_v24 = vmax.f32 %v6926_v41, 0.0 }
 0x8b6   : > { %v7005_v3 = vmax.f32 %v6956_v22, 0.0  ;;  %v7000_v44 = vmax.f32 %v6931_v61, 0.0 }
 0x8b7   : > { %v6960_v63 = vpop.f32.mrf.mxu0 }
 0x8b8   : > { %v6961_v50 = vadd.f32 %v6960_v63, %v6772_v27  ;;  %v7016_v63 = vld [vmem:[%s13555_s8 + $0x10] sm:$0xff] }
 0x8b9   : > { %v6962_v60 = vpop.f32.mrf.mxu0 }
 0x8ba   : > { %v7006_v52 = vmax.f32 %v6961_v50, 0.0  ;;  %v7017_v60 = vld [vmem:[%s13555_s8 + $0x18] sm:$0xff] }
 0x8bb   : > { %v6965_v33 = vpop.f32.mrf.mxu0 }
 0x8bc   : > { %v6966_v26 = vadd.f32 %v6965_v33, %v6777_v62  ;;  %v7018_v33 = vld [vmem:[%s13555_s8 + $0x20] sm:$0xff]  ;;  %v7089_v62 = vpop.permute.xlu1 %7088 }
 0x8bd   : > { %v6967_v49 = vpop.f32.mrf.mxu0 }
 0x8be   : > { %v7007_v4 = vmax.f32 %v6966_v26, 0.0  ;;  %v7019_v49 = vld [vmem:[%s13555_s8 + $0x28] sm:$0xff] }
 0x8bf   : > { %v6970_v58 = vpop.f32.mrf.mxu0 }
 0x8c0   : > { %v6971_v2 = vadd.f32 %v6970_v58, %v6782_v18  ;;  %v7020_v58 = vld [vmem:[%s13555_s8 + $0x30] sm:$0xff] }
 0x8c1   : > { %v6972_v12 = vpop.f32.mrf.mxu0 }
 0x8c2   : > { %v7008_v47 = vmax.f32 %v6971_v2, 0.0  ;;  %v7021_v12 = vld [vmem:[%s13555_s8 + $0x38] sm:$0xff] }
 0x8c3   : > { %v6975_v17 = vpop.f32.mrf.mxu0 }
 0x8c4   : > { %v6976_v8 = vadd.f32 %v6975_v17, %v6787_v9  ;;  %v7023_v17 = vld [vmem:[%s13555_s8 + $0x48] sm:$0xff] }
 0x8c5   : > { %v6977_v13 = vpop.f32.mrf.mxu0 }
 0x8c6   : > { %v7009_v7 = vmax.f32 %v6976_v8, 0.0  ;;  %v7024_v13 = vld [vmem:[%s13555_s8 + $0x50] sm:$0xf] }
 0x8c7   : > { %v6980_v59 = vpop.f32.mrf.mxu0 }
 0x8c8   : > { %v6981_v56 = vadd.f32 %v6980_v59, %v6792_v25 }
 0x8c9   : > { %v6982_v46 = vpop.f32.mrf.mxu0 }
 0x8ca   : > { %v7010_v34 = vmax.f32 %v6981_v56, 0.0 }
 0x8cb   : > { %v6985_v45 = vpop.f32.mrf.mxu0 }
 0x8cc   : > { %v6986_v20 = vadd.f32 %v6985_v45, %v6797_v1 }
 0x8cd   : > { %v6987_v29 = vpop.f32.mrf.mxu0 }
 0x8ce   : > { %v7011_v36 = vmax.f32 %v6986_v20, 0.0 }
 0x8cf   : > { %v6990_v38 = vpop.f32.mrf.mxu0 }
 0x8d0   : > { %v6991_v40 = vadd.f32 %v6990_v38, %v6802_v31  ;;  %v7255_v31 = vld [vmem:[%s13557_s10] sm:$0xff] }
 0x8d1   : > { %v6992_v15 = vpop.f32.mrf.mxu0  ;;  %8222 = vmatprep.mubr.msk.f32.mxu0 %vm7269_vm15, %v7255_v31 }
 0x8d2   : > { %v7012_v32 = vmax.f32 %v6991_v40, 0.0 }
 0x8d3   : > { %v6995_v48 = vpop.f32.mrf.mxu0 }
 0x8d4   : > { %v6996_v39 = vadd.f32 %v6995_v48, %v6807_v51  ;;  %v7022_v51 = vld [vmem:[%s13555_s8 + $0x40] sm:$0xff] }
 0x8d5   : > { %v6997_v42 = vpop.f32.mrf.mxu0 }
 0x8d6   : > { %v7013_v11 = vmax.f32 %v6996_v39, 0.0 }
 0x8d8   : > { %8138 = vmatpush3.msra.mxu1 %v7013_v11  ;;  %v7084_v11 = vpop.permute.xlu0 %7083 }
 0x8d9   : > { %8139 = vmatprep.subr.mxu1 %v14170_v28 }
 0x8da   : > { %8140 = vmatpush3.msra.mxu1 %v7012_v32  ;;  %v7079_v32 = vpop.permute.xlu1 %7078 }
 0x8db   : > { %8141 = vmatprep.subr.mxu1 %v14170_v28 }
 0x8dc   : > { %8142 = vmatpush3.msra.mxu1 %v7011_v36  ;;  %v7074_v36 = vpop.permute.xlu0 %7073 }
 0x8dd   : > { %8143 = vmatprep.subr.mxu1 %v14170_v28 }
 0x8de   : > { %8144 = vmatpush3.msra.mxu1 %v7010_v34  ;;  %v7069_v2 = vpop.permute.xlu1 %7068 }
 0x8df   : > { %8145 = vmatprep.subr.mxu1 %v14170_v28 }
 0x8e0   : > { %8146 = vmatpush3.msra.mxu1 %v7009_v7  ;;  %v7064_v35 = vpop.permute.xlu0 %7063 }
 0x8e1   : > { %8147 = vmatprep.subr.mxu1 %v14170_v28 }
 0x8e2   : > { %8148 = vmatpush3.msra.mxu1 %v7008_v47  ;;  %v7059_v21 = vpop.permute.xlu1 %7058 }
 0x8e3   : > { %8149 = vmatprep.subr.mxu1 %v14170_v28 }
 0x8e4   : > { %8150 = vmatpush3.msra.mxu1 %v7007_v4  ;;  %v7054_v54 = vpop.permute.xlu0 %7053 }
 0x8e5   : > { %8151 = vmatprep.subr.mxu1 %v14170_v28 }
 0x8e6   : > { %8152 = vmatpush3.msra.mxu1 %v7006_v52  ;;  %v7049_v55 = vpop.permute.xlu1 %7048 }
 0x8e7   : > { %8153 = vmatprep.subr.mxu1 %v14170_v28 }
 0x8e8   : > { %8154 = vmatpush3.msra.mxu1 %v7005_v3  ;;  %v7044_v0 = vpop.permute.xlu0 %7043 }
 0x8e9   : > { %8155 = vmatprep.subr.mxu1 %v14170_v28 }
 0x8ea   : > { %8156 = vmatpush3.msra.mxu1 %v7004_v30 }
 0x8eb   : > { %8157 = vmatprep.subr.mxu1 %v14170_v28 }
 0x8ec   : > { %8158 = vmatpush3.msra.mxu1 %v7003_v53 }
 0x8ed   : > { %8159 = vmatprep.subr.mxu1 %v14170_v28 }
 0x8ee   : > { %8160 = vmatpush3.msra.mxu1 %v7002_v43 }
 0x8ef   : > { %8161 = vmatprep.subr.mxu1 %v14170_v28 }
 0x8f0   : > { %8162 = vmatpush3.msra.mxu1 %v7001_v10 }
 0x8f1   : > { %8163 = vmatprep.subr.mxu1 %v14170_v28 }
 0x8f2   : > { %8164 = vmatpush3.msra.mxu1 %v7000_v44  ;;  %v7039_v44 = vpop.permute.xlu1 %7038 }
 0x8f3   : > { %8165 = vmatprep.subr.mxu1 %v14170_v28 }
 0x8f4   : > { %8166 = vmatpush3.msra.mxu1 %v6999_v24 }
 0x8f5   : > { %8168 = vmatmul.mubr.msk.f32.vlgmr.msra.gmra.mxu1 %vm4179_vm7, %v7014_v57 }
 0x8f6   : > { %8170 = vmatprep.mubr.msk.f32.mxu1 %vm8521_vm14, %v14170_v28 }
 0x8f9   : > { %8171 = vmatmul.mubr.msk.f32.gmra.mxu1 %vm4179_vm7, %v7015_v14 }
 0x8fa   : > { %8173 = vmatprep.mubr.msk.f32.mxu1 %vm8521_vm14, %v14170_v28 }
 0x8fd   : > { %8174 = vmatmul.mubr.msk.f32.gmra.mxu1 %vm4179_vm7, %v7016_v63 }
 0x8fe   : > { %8176 = vmatprep.mubr.msk.f32.mxu1 %vm8521_vm14, %v14170_v28 }
 0x901   : > { %8177 = vmatmul.mubr.msk.f32.gmra.mxu1 %vm4179_vm7, %v7017_v60  ;;  %v7256_v60 = vld [vmem:[%s13557_s10 + $0x8] sm:$0x3] }
 0x902   : > { %8179 = vmatprep.mubr.msk.f32.mxu1 %vm8521_vm14, %v14170_v28 }
 0x905   : > { %8180 = vmatmul.mubr.msk.f32.gmra.mxu1 %vm4179_vm7, %v7018_v33  ;;  %v7267_v33 = vpop.permute.xlu1 %7266 }
 0x906   : > { %8182 = vmatprep.mubr.msk.f32.mxu1 %vm8521_vm14, %v14170_v28 }
 0x909   : > { %8183 = vmatmul.mubr.msk.f32.gmra.mxu1 %vm4179_vm7, %v7019_v49 }
 0x90a   : > { %8185 = vmatprep.mubr.msk.f32.mxu1 %vm8521_vm14, %v14170_v28 }
 0x90d   : > { %8186 = vmatmul.mubr.msk.f32.gmra.mxu1 %vm4179_vm7, %v7020_v58 }
 0x90e   : > { %8188 = vmatprep.mubr.msk.f32.mxu1 %vm8521_vm14, %v14170_v28 }
 0x911   : > { %8189 = vmatmul.mubr.msk.f32.gmra.mxu1 %vm4179_vm7, %v7021_v12  ;;  %v7262_v12 = vpop.permute.xlu0 %7261 }
 0x912   : > { %8191 = vmatprep.mubr.msk.f32.mxu1 %vm8521_vm14, %v14170_v28 }
 0x915   : > { %8192 = vmatmul.mubr.msk.f32.gmra.mxu1 %vm4179_vm7, %v7022_v51 }
 0x916   : > { %8194 = vmatprep.mubr.msk.f32.mxu1 %vm8521_vm14, %v14170_v28 }
 0x919   : > { %8195 = vmatmul.mubr.msk.f32.gmra.mxu1 %vm4179_vm7, %v7023_v17 }
 0x91a   : > { %8197 = vmatprep.mubr.msk.f32.mxu1 %vm8521_vm14, %v14170_v28 }
 0x91d   : > { %8198 = vmatmul.mubr.msk.f32.gmra.mxu1 %vm4179_vm7, %v7024_v13 }
 0x9b5   : > { %v13521_v59 = vpop.f32.mrf.mxu1 }
 0x9b6   : > { %v7191_v24 = vadd.f32 %v13521_v59, %v7039_v44 }
 0x9b7   : > { %v8169_v1 = vpop.f32.mrf.mxu1 }
 0x9b8   : > { %v7244_v63 = vmax.f32 %v7191_v24, 0.0 }
 0x9b9   : > { %v7195_v46 = vpop.f32.mrf.mxu1 }
 0x9ba   : > { %v7196_v41 = vadd.f32 %v7195_v46, %v7044_v0 }
 0x9bb   : > { %v8172_v45 = vpop.f32.mrf.mxu1 }
 0x9bc   : > { %v7245_v14 = vmax.f32 %v7196_v41, 0.0 }
 0x9bd   : > { %v7200_v25 = vpop.f32.mrf.mxu1 }
 0x9be   : > { %v7201_v61 = vadd.f32 %v7200_v25, %v7049_v55 }
 0x9bf   : > { %v8175_v28 = vpop.f32.mrf.mxu1 }
 0x9c0   : > { %v7246_v57 = vmax.f32 %v7201_v61, 0.0 }
 0x9c1   : > { %v7205_v29 = vpop.f32.mrf.mxu1 }
 0x9c2   : > { %v7206_v53 = vadd.f32 %v7205_v29, %v7054_v54 }
 0x9c3   : > { %v8178_v9 = vpop.f32.mrf.mxu1 }
 0x9c4   : > { %v7247_v10 = vmax.f32 %v7206_v53, 0.0 }
 0x9c5   : > { %v7210_v38 = vpop.f32.mrf.mxu1 }
 0x9c6   : > { %v7211_v6 = vadd.f32 %v7210_v38, %v7059_v21 }
 0x9c7   : > { %v8181_v15 = vpop.f32.mrf.mxu1 }
 0x9c8   : > { %v7248_v43 = vmax.f32 %v7211_v6, 0.0 }
 0x9c9   : > { %v7215_v18 = vpop.f32.mrf.mxu1 }
 0x9ca   : > { %v7216_v19 = vadd.f32 %v7215_v18, %v7064_v35 }
 0x9cb   : > { %v8184_v48 = vpop.f32.mrf.mxu1 }
 0x9cc   : > { %v7249_v37 = vmax.f32 %v7216_v19, 0.0 }
 0x9cd   : > { %v7220_v40 = vpop.f32.mrf.mxu1 }
 0x9ce   : > { %v7221_v52 = vadd.f32 %v7220_v40, %v7069_v2 }
 0x9cf   : > { %v8187_v39 = vpop.f32.mrf.mxu1 }
 0x9d0   : > { %v7250_v30 = vmax.f32 %v7221_v52, 0.0 }
 0x9d1   : > { %v7225_v42 = vpop.f32.mrf.mxu1 }
 0x9d2   : > { %v7226_v22 = vadd.f32 %v7225_v42, %v7074_v36 }
 0x9d3   : > { %v8190_v20 = vpop.f32.mrf.mxu1 }
 0x9d4   : > { %v7251_v3 = vmax.f32 %v7226_v22, 0.0 }
 0x9d5   : > { %v7230_v56 = vpop.f32.mrf.mxu1 }
 0x9d6   : > { %v7231_v50 = vadd.f32 %v7230_v56, %v7079_v32 }
 0x9d7   : > { %v8193_v27 = vpop.f32.mrf.mxu1 }
 0x9d8   : > { %v7252_v16 = vmax.f32 %v7231_v50, 0.0 }
 0x9d9   : > { %v7235_v8 = vpop.f32.mrf.mxu1 }
 0x9da   : > { %v7236_v26 = vadd.f32 %v7235_v8, %v7084_v11 }
 0x9db   : > { %v8196_v23 = vpop.f32.mrf.mxu1 }
 0x9dc   : > { %v7253_v4 = vmax.f32 %v7236_v26, 0.0 }
 0x9dd   : > { %v7240_v34 = vpop.f32.mrf.mxu1 }
 0x9de   : > { %v7241_v7 = vadd.f32 %v7240_v34, %v7089_v62 }
 0x9df   : > { %v8199_v5 = vpop.f32.mrf.mxu1 }
 0x9e0   : > { %v7254_v47 = vmax.f32 %v7241_v7, 0.0 }
 0x9e2   : > { %8200 = vmatprep.subr.msk.mxu0 %vm2834_vm6, %v7254_v47 }
 0x9e3   : > { %8201 = vmatpush3.msk.msra.mxu0 %vm2834_vm6, %v7254_v47 }
 0x9e4   : > { %8202 = vmatprep.subr.mxu0 %v7253_v4 }
 0x9e5   : > { %8203 = vmatpush3.msra.mxu0 %v7253_v4 }
 0x9e6   : > { %8204 = vmatprep.subr.mxu0 %v7252_v16 }
 0x9e7   : > { %8205 = vmatpush3.msra.mxu0 %v7252_v16 }
 0x9e8   : > { %8206 = vmatprep.subr.mxu0 %v7251_v3 }
 0x9e9   : > { %8207 = vmatpush3.msra.mxu0 %v7251_v3 }
 0x9ea   : > { %8208 = vmatprep.subr.mxu0 %v7250_v30 }
 0x9eb   : > { %8209 = vmatpush3.msra.mxu0 %v7250_v30 }
 0x9ec   : > { %8210 = vmatprep.subr.mxu0 %v7249_v37 }
 0x9ed   : > { %8211 = vmatpush3.msra.mxu0 %v7249_v37 }
 0x9ee   : > { %8212 = vmatprep.subr.mxu0 %v7248_v43 }
 0x9ef   : > { %8213 = vmatpush3.msra.mxu0 %v7248_v43 }
 0x9f0   : > { %8214 = vmatprep.subr.mxu0 %v7247_v10 }
 0x9f1   : > { %8215 = vmatpush3.msra.mxu0 %v7247_v10 }
 0x9f2   : > { %8216 = vmatprep.subr.mxu0 %v7246_v57 }
 0x9f3   : > { %8217 = vmatpush3.msra.mxu0 %v7246_v57 }
 0x9f4   : > { %8218 = vmatprep.subr.mxu0 %v7245_v14 }
 0x9f5   : > { %8219 = vmatpush3.msra.mxu0 %v7245_v14 }
 0x9f6   : > { %8220 = vmatprep.subr.mxu0 %v7244_v63 }
 0x9f7   : > { %8221 = vmatpush3.msra.mxu0 %v7244_v63 }
 0x9f8   : > { %8223 = vmatmul.mubr.msk.f32.vlgmr.msra.gmra.mxu0 %vm7269_vm15, %v7256_v60 }
 0xab8   : > { %v8224_v49 = vpop.f32.mrf.mxu0 }
 0xab9   : > { %v7351_v58 = vadd.f32 %v8224_v49, %v7267_v33 }
 0xaba   : > { %v7345_v51 = vpop.f32.mrf.mxu0 }
 0xabb   : > { %7357 = vst.msk [vmem:[%s494_s29 + $0x8] sm:$0x3] %vm7356_vm0, %v7351_v58  ;;  %v7346_v17 = vadd.f32 %v7345_v51, %v7262_v12 }
 0xabd   : > { %7355 = vst.msk [vmem:[%s494_s29] sm:$0xff] %vm7354_vm1, %v7346_v17 }
 0xabe PF: > { %p19_p9 = scmp.ge.s32.totalorder %s8604_s25, 4   ;;  %s14171_s21 = smov %s8505_s22 }
 0xabf   : > { %s14172_s22 = smov %s8613_s28  ;;  %s14173_s23 = smov %s8604_s25 }
 0xac0   :  { %21 = sbr.rel (!%p19_p9) target bundleno = 2 (0x2), region = 153 }

</bundles_post_ra>
